<compile_context>
chip_gen: v6e
topology: v6e:2x2x1
jax: 0.10.0
libtpu: 0.0.40
codegen_flags: <defaults>
</compile_context>

<pallas_src>
import functools
import jax
import jax.numpy as jnp
from jax.experimental import pallas as pl
from jax.experimental.pallas import tpu as pltpu


# ----------------------------------------------------------------------------
# Tiling helpers
# ----------------------------------------------------------------------------
def _round_up(x, m):
    return (x + m - 1) // m * m


def _pick_div(dim, prefs):
    for t in prefs:
        if dim % t == 0:
            return t
    return None


def _tile_rows(M, prefs=(256, 128, 64, 32, 16, 8)):
    """Return (padded_M, tile_m): prefer a divisor (no padding copy), else pad."""
    t = _pick_div(M, prefs)
    if t is not None:
        return M, t
    if M > 256:
        return _round_up(M, 256), 256
    Mp = _round_up(M, 8)
    return Mp, Mp


def _tile_cols(N):
    t = _pick_div(N, (256, 128))
    return t if t is not None else N   # full-dim block is legal for any N


def _tile_k(K):
    t = _pick_div(K, (512, 256, 128))
    return t if t is not None else K   # full-K block (fits VMEM for resnet18 sizes)


# ----------------------------------------------------------------------------
# Pallas kernels
# ----------------------------------------------------------------------------
def _gemm_affine_kernel(x_ref, w_ref, s_ref, b_ref, *rest, relu, has_res, has_scale):
    """Tiled (tm,tk)@(tk,tn) with K-reduction accumulator and fused epilogue:
       o = [relu]( acc * scale + bias [+ residual] )   (epilogue math in fp32)."""
    if has_res:
        r_ref, o_ref, acc_ref = rest
    else:
        o_ref, acc_ref = rest

    @pl.when(pl.program_id(2) == 0)
    def _():
        acc_ref[...] = jnp.zeros_like(acc_ref)

    acc_ref[...] += jnp.dot(x_ref[...], w_ref[...],
                            preferred_element_type=jnp.float32)

    @pl.when(pl.program_id(2) == pl.num_programs(2) - 1)
    def _():
        y = acc_ref[...]
        if has_scale:
            y = y * s_ref[...]
        y = y + b_ref[...]
        if has_res:
            y = y + r_ref[...].astype(jnp.float32)
        if relu:
            y = jnp.maximum(y, 0.0)
        o_ref[...] = y.astype(o_ref.dtype)


def gemm_affine(x, w, scale, bias, *, relu=False, residual=None,
                has_scale=True, out_dtype=jnp.bfloat16):
    """(M,K)@(K,N) * scale + bias [+ residual] [+ relu] as a tiled Pallas GEMM."""
    M, K = x.shape
    Kw, N = w.shape
    assert K == Kw
    Mp, tm = _tile_rows(M)
    tn = _tile_cols(N)
    tk = _tile_k(K)

    x = x.astype(jnp.bfloat16)
    if Mp != M:
        x = jnp.pad(x, ((0, Mp - M), (0, 0)))
    res = None
    if residual is not None:
        res = residual.astype(jnp.bfloat16)
        if Mp != M:
            res = jnp.pad(res, ((0, Mp - M), (0, 0)))

    grid = (Mp // tm, N // tn, K // tk)
    in_specs = [
        pl.BlockSpec((tm, tk), lambda i, j, k: (i, k)),
        pl.BlockSpec((tk, tn), lambda i, j, k: (k, j)),
        pl.BlockSpec((1, tn), lambda i, j, k: (0, j)),
        pl.BlockSpec((1, tn), lambda i, j, k: (0, j)),
    ]
    args = [x, w, scale, bias]
    if res is not None:
        in_specs.append(pl.BlockSpec((tm, tn), lambda i, j, k: (i, j)))
        args.append(res)

    out = pl.pallas_call(
        functools.partial(_gemm_affine_kernel, relu=relu,
                          has_res=res is not None, has_scale=has_scale),
        out_shape=jax.ShapeDtypeStruct((Mp, N), out_dtype),
        grid=grid,
        in_specs=in_specs,
        out_specs=pl.BlockSpec((tm, tn), lambda i, j, k: (i, j)),
        scratch_shapes=[pltpu.VMEM((tm, tn), jnp.float32)],
        compiler_params=pltpu.CompilerParams(
            dimension_semantics=("parallel", "parallel", "arbitrary"),
            vmem_limit_bytes=48 * 1024 * 1024,
        ),
    )(*args)
    if Mp != M:
        out = out[:M]
    return out


def _add_kernel(a_ref, b_ref, o_ref, *, relu):
    y = a_ref[...].astype(jnp.float32) + b_ref[...].astype(jnp.float32)
    if relu:
        y = jnp.maximum(y, 0.0)
    o_ref[...] = y.astype(o_ref.dtype)


def fused_add(a, b, relu=False):
    """Tiled elementwise a+b (+relu) over lane-dense (rows, C) blocks."""
    assert a.shape == b.shape
    shape = a.shape
    C = shape[-1]
    a2 = a.reshape(-1, C)
    b2 = b.reshape(-1, C)
    M = a2.shape[0]
    Mp, tm = _tile_rows(M, prefs=(1024, 512, 256, 128, 64, 32, 16, 8))
    if Mp != M:
        a2 = jnp.pad(a2, ((0, Mp - M), (0, 0)))
        b2 = jnp.pad(b2, ((0, Mp - M), (0, 0)))
    out = pl.pallas_call(
        functools.partial(_add_kernel, relu=relu),
        out_shape=jax.ShapeDtypeStruct((Mp, C), a.dtype),
        grid=(Mp // tm,),
        in_specs=[pl.BlockSpec((tm, C), lambda i: (i, 0)),
                  pl.BlockSpec((tm, C), lambda i: (i, 0))],
        out_specs=pl.BlockSpec((tm, C), lambda i: (i, 0)),
        compiler_params=pltpu.CompilerParams(
            dimension_semantics=("parallel",)),
    )(a2, b2)
    if Mp != M:
        out = out[:M]
    return out.reshape(shape)


# ----------------------------------------------------------------------------
# Conv building blocks (im2col glue in JAX, GEMM in Pallas)
# ----------------------------------------------------------------------------
def _im2col(x, k, stride, padding):
    """NHWC -> (N*Ho*Wo, k*k*C) patches; taps concatenated along the channel axis
       (matches the (kh,kw,cin,cout) weight packing), no layout-crossing reshape."""
    N, H, W, C = x.shape
    if padding > 0:
        x = jnp.pad(x, ((0, 0), (padding, padding), (padding, padding), (0, 0)))
    Ho = (H + 2 * padding - k) // stride + 1
    Wo = (W + 2 * padding - k) // stride + 1
    if k == 1:
        p = x[:, :(Ho - 1) * stride + 1:stride, :(Wo - 1) * stride + 1:stride, :]
        return p.reshape(N * Ho * Wo, C), (N, Ho, Wo)
    cols = []
    for i in range(k):
        for j in range(k):
            cols.append(x[:, i:i + (Ho - 1) * stride + 1:stride,
                           j:j + (Wo - 1) * stride + 1:stride, :])
    patches = jnp.concatenate(cols, axis=-1)          # (N, Ho, Wo, k*k*C)
    return patches.reshape(N * Ho * Wo, k * k * C), (N, Ho, Wo)


def conv_block(x, packed, *, ksize, stride, padding, relu,
               residual=None, has_scale=True, out_dtype=jnp.bfloat16):
    """conv2d (pre-packed GEMM weight) + folded BN / bias + optional fused
       residual add + optional ReLU, all in one Pallas GEMM."""
    Cout = packed["w"].shape[1]
    patches, (N, Ho, Wo) = _im2col(x, ksize, stride, padding)
    res2 = residual.reshape(-1, Cout) if residual is not None else None
    y = gemm_affine(patches, packed["w"], packed["s"], packed["b"],
                    relu=relu, residual=res2, has_scale=has_scale,
                    out_dtype=out_dtype)
    return y.reshape(N, Ho, Wo, Cout)


def maxpool3x3s2(x):
    # TODO(synk): maxpool kept in plain JAX (reduce_window); minor vs conv GEMMs.
    return jax.lax.reduce_window(
        x, jnp.array(-jnp.inf, dtype=x.dtype), jax.lax.max,
        (1, 3, 3, 1), (1, 2, 2, 1), [(0, 0), (1, 1), (1, 1), (0, 0)])


def basic_block_fwd(p, x, stride):
    if "ds" in p:
        identity = conv_block(x, p["ds"], ksize=1, stride=stride, padding=0,
                              relu=False)
    else:
        identity = x
    out = conv_block(x, p["conv1"], ksize=3, stride=stride, padding=1, relu=True)
    # conv2 + BN + residual add + ReLU fused into a single GEMM epilogue
    out = conv_block(out, p["conv2"], ksize=3, stride=1, padding=1, relu=True,
                     residual=identity)
    return out


def run_layer(blocks, strides, x, pool=False):
    if pool:
        x = maxpool3x3s2(x)
    for p, s in zip(blocks, strides):
        x = basic_block_fwd(p, x, s)
    return x


def fuse_block(x, d):
    # TODO(synk): Fuse_Block source not provided; mmf_att=None default modeled as
    # additive fusion l = x + d, depth feature passed through unchanged.
    return fused_add(x, d), d


# ----------------------------------------------------------------------------
# Parameter construction (deterministic, synthetic) + GEMM-ready packing
# ----------------------------------------------------------------------------
def init_params(key, n_classes=21):
    counter = [0]

    def nk():
        counter[0] += 1
        return jax.random.fold_in(key, counter[0])

    def conv_w(cout, cin, k):
        fan_in = cin * k * k
        return jax.random.normal(nk(), (cout, cin, k, k), jnp.float32) * (2.0 / fan_in) ** 0.5

    def bn_p(c):
        return {
            "gamma": 1.0 + 0.1 * jax.random.normal(nk(), (c,), jnp.float32),
            "beta": 0.1 * jax.random.normal(nk(), (c,), jnp.float32),
            "mean": 0.1 * jax.random.normal(nk(), (c,), jnp.float32),
            "var": 1.0 + 0.1 * jnp.abs(jax.random.normal(nk(), (c,), jnp.float32)),
        }

    def pack_conv_bn(w_oihw, bn, eps=1e-5):
        cout, cin, kh, kw = w_oihw.shape
        wmat = jnp.transpose(w_oihw, (2, 3, 1, 0)).reshape(kh * kw * cin, cout)
        scale = bn["gamma"] / jnp.sqrt(bn["var"] + eps)
        bias = bn["beta"] - bn["mean"] * scale
        return {"w": wmat.astype(jnp.bfloat16),
                "s": scale.reshape(1, cout).astype(jnp.float32),
                "b": bias.reshape(1, cout).astype(jnp.float32)}

    def pack_conv_bias(w_oihw, b):
        cout, cin, kh, kw = w_oihw.shape
        wmat = jnp.transpose(w_oihw, (2, 3, 1, 0)).reshape(kh * kw * cin, cout)
        return {"w": wmat.astype(jnp.bfloat16),
                "s": jnp.ones((1, cout), jnp.float32),
                "b": b.reshape(1, cout).astype(jnp.float32)}

    def basic_block(cin, cout, stride):
        p = {"conv1": pack_conv_bn(conv_w(cout, cin, 3), bn_p(cout)),
             "conv2": pack_conv_bn(conv_w(cout, cout, 3), bn_p(cout))}
        if stride != 1 or cin != cout:
            p["ds"] = pack_conv_bn(conv_w(cout, cin, 1), bn_p(cout))
        return p

    bn1 = bn_p(64)
    params = {
        # layer0 / d_layer0 share (deepcopy'd) bn1 -> same folded affine.
        "conv1": pack_conv_bn(conv_w(64, 3, 7), bn1),
        # init_dep(): d_conv1 copied from the pretrained green channel in the
        # original; here initialized deterministically (no .pth load).
        "d_conv1": pack_conv_bn(conv_w(64, 1, 7), bn1),
        # d_layer1..4 = deepcopy(layer1..4) -> identical values, so shared params.
        "layer1": [basic_block(64, 64, 1), basic_block(64, 64, 1)],
        "layer2": [basic_block(64, 128, 2), basic_block(128, 128, 1)],
        "layer3": [basic_block(128, 256, 2), basic_block(256, 256, 1)],
        "layer4": [basic_block(256, 512, 2), basic_block(512, 512, 1)],
        # Simplified decoder (see TODO in forward)
        "dec3": pack_conv_bias(conv_w(256, 512, 1),
                               0.1 * jax.random.normal(nk(), (256,), jnp.float32)),
        "dec2": pack_conv_bias(conv_w(128, 256, 1),
                               0.1 * jax.random.normal(nk(), (128,), jnp.float32)),
        "dec1": pack_conv_bias(conv_w(64, 128, 1),
                               0.1 * jax.random.normal(nk(), (64,), jnp.float32)),
        "cls": pack_conv_bias(conv_w(n_classes, 64, 1),
                              0.1 * jax.random.normal(nk(), (n_classes,), jnp.float32)),
    }
    return params


# ----------------------------------------------------------------------------
# Forward pass
# ----------------------------------------------------------------------------
def rfunet_forward(params, x_nchw, d_nchw, n_classes=21):
    h, w = x_nchw.shape[2], x_nchw.shape[3]
    x = jnp.transpose(x_nchw, (0, 2, 3, 1)).astype(jnp.bfloat16)  # NHWC, bf16 features
    d = jnp.transpose(d_nchw, (0, 2, 3, 1)).astype(jnp.bfloat16)

    # layer0 / d_layer0 : conv7x7 s2 + BN + ReLU (different conv weights per branch)
    d0 = conv_block(d, params["d_conv1"], ksize=7, stride=2, padding=3, relu=True)
    x0 = conv_block(x, params["conv1"], ksize=7, stride=2, padding=3, relu=True)
    l0, d0 = fuse_block(x0, d0)

    # d_layer1..4 share weights with layer1..4, so both branches are batched
    # through the same GEMMs (concat along the batch/row dimension).
    def dual_layer(blocks, strides, l, dd, pool=False):
        both = jnp.concatenate([l, dd], axis=0)
        both = run_layer(blocks, strides, both, pool=pool)
        l_out, d_out = jnp.split(both, 2, axis=0)
        return fuse_block(l_out, d_out)

    l1, d1 = dual_layer(params["layer1"], (1, 1), l0, d0, pool=True)
    l2, d2 = dual_layer(params["layer2"], (2, 1), l1, d1)
    l3, d3 = dual_layer(params["layer3"], (2, 1), l2, d2)
    l4, _ = dual_layer(params["layer4"], (2, 1), l3, d3)
    # ctr defaults to None -> no APNB context block.

    # TODO(synk): Decoder class ('irb' blocks, aux heads, mrfs/dan options) is not
    # in the provided source; implemented as a UNet-style top-down decoder with
    # 1x1 projections (Pallas GEMM, residual add + ReLU fused in the epilogue)
    # and bilinear upsampling.
    def up_to(t, hw):
        out = jax.image.resize(t.astype(jnp.float32),
                               (t.shape[0], hw[0], hw[1], t.shape[-1]), "bilinear")
        return out.astype(jnp.bfloat16)

    u3 = conv_block(up_to(l4, l3.shape[1:3]), params["dec3"], ksize=1, stride=1,
                    padding=0, relu=True, residual=l3, has_scale=False)
    u2 = conv_block(up_to(u3, l2.shape[1:3]), params["dec2"], ksize=1, stride=1,
                    padding=0, relu=True, residual=l2, has_scale=False)
    u1 = conv_block(up_to(u2, l1.shape[1:3]), params["dec1"], ksize=1, stride=1,
                    padding=0, relu=True, residual=l1, has_scale=False)
    logits = conv_block(u1, params["cls"], ksize=1, stride=1, padding=0,
                        relu=False, has_scale=False, out_dtype=jnp.float32)
    logits = jax.image.resize(logits, (logits.shape[0], h, w, n_classes), "bilinear")
    return jnp.transpose(logits, (0, 3, 1, 2))  # back to NCHW


# ----------------------------------------------------------------------------
if __name__ == "__main__":
    n_classes = 21
    key = jax.random.PRNGKey(0)
    params = init_params(key, n_classes=n_classes)

    kx, kd = jax.random.split(jax.random.fold_in(key, 999))
    x = jax.random.normal(kx, (2, 3, 16, 16), jnp.float32)    # RGB  (NCHW)
    dep = jax.random.normal(kd, (2, 1, 16, 16), jnp.float32)  # Depth (NCHW)

    fwd = jax.jit(functools.partial(rfunet_forward, n_classes=n_classes))
    out = jax.block_until_ready(fwd(params, x, dep))
    assert out.shape == (2, n_classes, 16, 16), out.shape
    assert bool(jnp.all(jnp.isfinite(out)))
    print("KERNEL_OK")
</pallas_src>

<mosaic_0001>
module attributes {stable_mosaic.version = 11 : i64} {
  func.func @_gemm_affine_kernel(%arg0: i32, %arg1: i32, %arg2: i32, %arg3: memref<128x147xbf16, #tpu.memory_space<vmem>>, %arg4: memref<147x64xbf16, #tpu.memory_space<vmem>>, %arg5: memref<1x64xf32, #tpu.memory_space<vmem>>, %arg6: memref<1x64xf32, #tpu.memory_space<vmem>>, %arg7: memref<128x64xbf16, #tpu.memory_space<vmem>>, %arg8: memref<128x64xf32, #tpu.memory_space<vmem>>) attributes {dimension_semantics = [#tpu.dimension_semantics<parallel>, #tpu.dimension_semantics<parallel>, #tpu.dimension_semantics<arbitrary>], iteration_bounds = array<i64: 1, 1, 1>, scalar_prefetch = 0 : i64, scratch_operands = 1 : i64, tpu.core_type = #tpu.core_type<tc>, window_params = [{transform_indices = @transform_0, window_bounds = array<i64: 128, 147>}, {transform_indices = @transform_1, window_bounds = array<i64: 147, 64>}, {transform_indices = @transform_2, window_bounds = array<i64: 1, 64>}, {transform_indices = @transform_3, window_bounds = array<i64: 1, 64>}, {transform_indices = @transform_4, window_bounds = array<i64: 128, 64>}]} {
    %c0_i32 = arith.constant 0 : i32
    %0 = arith.cmpi eq, %arg2, %c0_i32 : i32
    %1 = arith.extui %0 : i1 to i32
    %c0_i32_0 = arith.constant 0 : i32
    %2 = arith.cmpi ne, %1, %c0_i32_0 : i32
    scf.if %2 {
      %cst_10 = arith.constant 0.000000e+00 : f32
      %12 = vector.broadcast %cst_10 : f32 to vector<128x64xf32>
      %c0_11 = arith.constant 0 : index
      %c0_12 = arith.constant 0 : index
      %13 = vector.load %arg8[%c0_11, %c0_12] : memref<128x64xf32, #tpu.memory_space<vmem>>, vector<128x64xf32>
      tpu.vector_store %arg8[%c0_11, %c0_12], %12 {strides = array<i32>} : memref<128x64xf32, #tpu.memory_space<vmem>>, vector<128x64xf32>,
    } else {
    }
    %c0 = arith.constant 0 : index
    %c0_1 = arith.constant 0 : index
    %3 = vector.load %arg8[%c0, %c0_1] : memref<128x64xf32, #tpu.memory_space<vmem>>, vector<128x64xf32>
    %c0_2 = arith.constant 0 : index
    %c0_3 = arith.constant 0 : index
    %4 = vector.load %arg3[%c0_2, %c0_3] : memref<128x147xbf16, #tpu.memory_space<vmem>>, vector<128x147xbf16>
    %c0_4 = arith.constant 0 : index
    %c0_5 = arith.constant 0 : index
    %5 = vector.load %arg4[%c0_4, %c0_5] : memref<147x64xbf16, #tpu.memory_space<vmem>>, vector<147x64xbf16>
    %cst = arith.constant dense<0.000000e+00> : vector<128x64xf32>
    %6 = tpu.matmul %4, %5, %cst {dimension_numbers = #tpu.dot_dimension_numbers<[1], [0], [0], [1], [0, 0, 1, 1], [], []>} : vector<128x147xbf16>, vector<147x64xbf16>, vector<128x64xf32> -> vector<128x64xf32>
    %7 = arith.addf %3, %6 : vector<128x64xf32>
    %c0_6 = arith.constant 0 : index
    %c0_7 = arith.constant 0 : index
    %8 = vector.load %arg8[%c0_6, %c0_7] : memref<128x64xf32, #tpu.memory_space<vmem>>, vector<128x64xf32>
    tpu.vector_store %arg8[%c0_6, %c0_7], %7 {strides = array<i32>} : memref<128x64xf32, #tpu.memory_space<vmem>>, vector<128x64xf32>,
    %c0_i32_8 = arith.constant 0 : i32
    %9 = arith.cmpi eq, %arg2, %c0_i32_8 : i32
    %10 = arith.extui %9 : i1 to i32
    %c0_i32_9 = arith.constant 0 : i32
    %11 = arith.cmpi ne, %10, %c0_i32_9 : i32
    scf.if %11 {
      %c0_10 = arith.constant 0 : index
      %c0_11 = arith.constant 0 : index
      %12 = vector.load %arg8[%c0_10, %c0_11] : memref<128x64xf32, #tpu.memory_space<vmem>>, vector<128x64xf32>
      %c0_12 = arith.constant 0 : index
      %c0_13 = arith.constant 0 : index
      %13 = vector.load %arg5[%c0_12, %c0_13] : memref<1x64xf32, #tpu.memory_space<vmem>>, vector<1x64xf32>
      %14 = vector.broadcast %13 : vector<1x64xf32> to vector<128x64xf32>
      %15 = arith.mulf %12, %14 : vector<128x64xf32>
      %c0_14 = arith.constant 0 : index
      %c0_15 = arith.constant 0 : index
      %16 = vector.load %arg6[%c0_14, %c0_15] : memref<1x64xf32, #tpu.memory_space<vmem>>, vector<1x64xf32>
      %17 = vector.broadcast %16 : vector<1x64xf32> to vector<128x64xf32>
      %18 = arith.addf %15, %17 : vector<128x64xf32>
      %cst_16 = arith.constant 0.000000e+00 : f32
      %19 = vector.broadcast %cst_16 : f32 to vector<128x64xf32>
      %20 = arith.maximumf %18, %19 : vector<128x64xf32>
      %21 = arith.truncf %20 : vector<128x64xf32> to vector<128x64xbf16>
      %c0_17 = arith.constant 0 : index
      %c0_18 = arith.constant 0 : index
      %22 = vector.load %arg7[%c0_17, %c0_18] : memref<128x64xbf16, #tpu.memory_space<vmem>>, vector<128x64xbf16>
      tpu.vector_store %arg7[%c0_17, %c0_18], %21 {strides = array<i32>} : memref<128x64xbf16, #tpu.memory_space<vmem>>, vector<128x64xbf16>,
    } else {
    }
    return
  }
  func.func @transform_0(%arg0: i32, %arg1: i32, %arg2: i32) -> (i32, i32) {
    %c0_i32 = arith.constant 0 : i32
    return %arg0, %arg2 : i32, i32
  }
  func.func @transform_1(%arg0: i32, %arg1: i32, %arg2: i32) -> (i32, i32) {
    %c0_i32 = arith.constant 0 : i32
    return %arg2, %arg1 : i32, i32
  }
  func.func @transform_2(%arg0: i32, %arg1: i32, %arg2: i32) -> (i32, i32) {
    %c0_i32 = arith.constant 0 : i32
    %c0_i32_0 = arith.constant 0 : i32
    return %c0_i32, %arg1 : i32, i32
  }
  func.func @transform_3(%arg0: i32, %arg1: i32, %arg2: i32) -> (i32, i32) {
    %c0_i32 = arith.constant 0 : i32
    %c0_i32_0 = arith.constant 0 : i32
    return %c0_i32, %arg1 : i32, i32
  }
  func.func @transform_4(%arg0: i32, %arg1: i32, %arg2: i32) -> (i32, i32) {
    %c0_i32 = arith.constant 0 : i32
    return %arg0, %arg1 : i32, i32
  }
}

module attributes {stable_mosaic.version = 11 : i64} {
  func.func @_add_kernel(%arg0: i32, %arg1: memref<128x64xbf16, #tpu.memory_space<vmem>>, %arg2: memref<128x64xbf16, #tpu.memory_space<vmem>>, %arg3: memref<128x64xbf16, #tpu.memory_space<vmem>>) attributes {dimension_semantics = [#tpu.dimension_semantics<parallel>], iteration_bounds = array<i64: 1>, scalar_prefetch = 0 : i64, scratch_operands = 0 : i64, tpu.core_type = #tpu.core_type<tc>, window_params = [{transform_indices = @transform_0, window_bounds = array<i64: 128, 64>}, {transform_indices = @transform_1, window_bounds = array<i64: 128, 64>}, {transform_indices = @transform_2, window_bounds = array<i64: 128, 64>}]} {
    %c0 = arith.constant 0 : index
    %c0_0 = arith.constant 0 : index
    %0 = vector.load %arg1[%c0, %c0_0] : memref<128x64xbf16, #tpu.memory_space<vmem>>, vector<128x64xbf16>
    %1 = arith.extf %0 : vector<128x64xbf16> to vector<128x64xf32>
    %c0_1 = arith.constant 0 : index
    %c0_2 = arith.constant 0 : index
    %2 = vector.load %arg2[%c0_1, %c0_2] : memref<128x64xbf16, #tpu.memory_space<vmem>>, vector<128x64xbf16>
    %3 = arith.extf %2 : vector<128x64xbf16> to vector<128x64xf32>
    %4 = arith.addf %1, %3 : vector<128x64xf32>
    %5 = arith.truncf %4 : vector<128x64xf32> to vector<128x64xbf16>
    %c0_3 = arith.constant 0 : index
    %c0_4 = arith.constant 0 : index
    %6 = vector.load %arg3[%c0_3, %c0_4] : memref<128x64xbf16, #tpu.memory_space<vmem>>, vector<128x64xbf16>
    tpu.vector_store %arg3[%c0_3, %c0_4], %5 {strides = array<i32>} : memref<128x64xbf16, #tpu.memory_space<vmem>>, vector<128x64xbf16>,
    return
  }
  func.func @transform_0(%arg0: i32) -> (i32, i32) {
    %c0_i32 = arith.constant 0 : i32
    %c0_i32_0 = arith.constant 0 : i32
    return %arg0, %c0_i32 : i32, i32
  }
  func.func @transform_1(%arg0: i32) -> (i32, i32) {
    %c0_i32 = arith.constant 0 : i32
    %c0_i32_0 = arith.constant 0 : i32
    return %arg0, %c0_i32 : i32, i32
  }
  func.func @transform_2(%arg0: i32) -> (i32, i32) {
    %c0_i32 = arith.constant 0 : i32
    %c0_i32_0 = arith.constant 0 : i32
    return %arg0, %c0_i32 : i32, i32
  }
}

module attributes {stable_mosaic.version = 11 : i64} {
  func.func @_gemm_affine_kernel(%arg0: i32, %arg1: i32, %arg2: i32, %arg3: memref<128x49xbf16, #tpu.memory_space<vmem>>, %arg4: memref<49x64xbf16, #tpu.memory_space<vmem>>, %arg5: memref<1x64xf32, #tpu.memory_space<vmem>>, %arg6: memref<1x64xf32, #tpu.memory_space<vmem>>, %arg7: memref<128x64xbf16, #tpu.memory_space<vmem>>, %arg8: memref<128x64xf32, #tpu.memory_space<vmem>>) attributes {dimension_semantics = [#tpu.dimension_semantics<parallel>, #tpu.dimension_semantics<parallel>, #tpu.dimension_semantics<arbitrary>], iteration_bounds = array<i64: 1, 1, 1>, scalar_prefetch = 0 : i64, scratch_operands = 1 : i64, tpu.core_type = #tpu.core_type<tc>, window_params = [{transform_indices = @transform_0, window_bounds = array<i64: 128, 49>}, {transform_indices = @transform_1, window_bounds = array<i64: 49, 64>}, {transform_indices = @transform_2, window_bounds = array<i64: 1, 64>}, {transform_indices = @transform_3, window_bounds = array<i64: 1, 64>}, {transform_indices = @transform_4, window_bounds = array<i64: 128, 64>}]} {
    %c0_i32 = arith.constant 0 : i32
    %0 = arith.cmpi eq, %arg2, %c0_i32 : i32
    %1 = arith.extui %0 : i1 to i32
    %c0_i32_0 = arith.constant 0 : i32
    %2 = arith.cmpi ne, %1, %c0_i32_0 : i32
    scf.if %2 {
      %cst_10 = arith.constant 0.000000e+00 : f32
      %12 = vector.broadcast %cst_10 : f32 to vector<128x64xf32>
      %c0_11 = arith.constant 0 : index
      %c0_12 = arith.constant 0 : index
      %13 = vector.load %arg8[%c0_11, %c0_12] : memref<128x64xf32, #tpu.memory_space<vmem>>, vector<128x64xf32>
      tpu.vector_store %arg8[%c0_11, %c0_12], %12 {strides = array<i32>} : memref<128x64xf32, #tpu.memory_space<vmem>>, vector<128x64xf32>,
    } else {
    }
    %c0 = arith.constant 0 : index
    %c0_1 = arith.constant 0 : index
    %3 = vector.load %arg8[%c0, %c0_1] : memref<128x64xf32, #tpu.memory_space<vmem>>, vector<128x64xf32>
    %c0_2 = arith.constant 0 : index
    %c0_3 = arith.constant 0 : index
    %4 = vector.load %arg3[%c0_2, %c0_3] : memref<128x49xbf16, #tpu.memory_space<vmem>>, vector<128x49xbf16>
    %c0_4 = arith.constant 0 : index
    %c0_5 = arith.constant 0 : index
    %5 = vector.load %arg4[%c0_4, %c0_5] : memref<49x64xbf16, #tpu.memory_space<vmem>>, vector<49x64xbf16>
    %cst = arith.constant dense<0.000000e+00> : vector<128x64xf32>
    %6 = tpu.matmul %4, %5, %cst {dimension_numbers = #tpu.dot_dimension_numbers<[1], [0], [0], [1], [0, 0, 1, 1], [], []>} : vector<128x49xbf16>, vector<49x64xbf16>, vector<128x64xf32> -> vector<128x64xf32>
    %7 = arith.addf %3, %6 : vector<128x64xf32>
    %c0_6 = arith.constant 0 : index
    %c0_7 = arith.constant 0 : index
    %8 = vector.load %arg8[%c0_6, %c0_7] : memref<128x64xf32, #tpu.memory_space<vmem>>, vector<128x64xf32>
    tpu.vector_store %arg8[%c0_6, %c0_7], %7 {strides = array<i32>} : memref<128x64xf32, #tpu.memory_space<vmem>>, vector<128x64xf32>,
    %c0_i32_8 = arith.constant 0 : i32
    %9 = arith.cmpi eq, %arg2, %c0_i32_8 : i32
    %10 = arith.extui %9 : i1 to i32
    %c0_i32_9 = arith.constant 0 : i32
    %11 = arith.cmpi ne, %10, %c0_i32_9 : i32
    scf.if %11 {
      %c0_10 = arith.constant 0 : index
      %c0_11 = arith.constant 0 : index
      %12 = vector.load %arg8[%c0_10, %c0_11] : memref<128x64xf32, #tpu.memory_space<vmem>>, vector<128x64xf32>
      %c0_12 = arith.constant 0 : index
      %c0_13 = arith.constant 0 : index
      %13 = vector.load %arg5[%c0_12, %c0_13] : memref<1x64xf32, #tpu.memory_space<vmem>>, vector<1x64xf32>
      %14 = vector.broadcast %13 : vector<1x64xf32> to vector<128x64xf32>
      %15 = arith.mulf %12, %14 : vector<128x64xf32>
      %c0_14 = arith.constant 0 : index
      %c0_15 = arith.constant 0 : index
      %16 = vector.load %arg6[%c0_14, %c0_15] : memref<1x64xf32, #tpu.memory_space<vmem>>, vector<1x64xf32>
      %17 = vector.broadcast %16 : vector<1x64xf32> to vector<128x64xf32>
      %18 = arith.addf %15, %17 : vector<128x64xf32>
      %cst_16 = arith.constant 0.000000e+00 : f32
      %19 = vector.broadcast %cst_16 : f32 to vector<128x64xf32>
      %20 = arith.maximumf %18, %19 : vector<128x64xf32>
      %21 = arith.truncf %20 : vector<128x64xf32> to vector<128x64xbf16>
      %c0_17 = arith.constant 0 : index
      %c0_18 = arith.constant 0 : index
      %22 = vector.load %arg7[%c0_17, %c0_18] : memref<128x64xbf16, #tpu.memory_space<vmem>>, vector<128x64xbf16>
      tpu.vector_store %arg7[%c0_17, %c0_18], %21 {strides = array<i32>} : memref<128x64xbf16, #tpu.memory_space<vmem>>, vector<128x64xbf16>,
    } else {
    }
    return
  }
  func.func @transform_0(%arg0: i32, %arg1: i32, %arg2: i32) -> (i32, i32) {
    %c0_i32 = arith.constant 0 : i32
    return %arg0, %arg2 : i32, i32
  }
  func.func @transform_1(%arg0: i32, %arg1: i32, %arg2: i32) -> (i32, i32) {
    %c0_i32 = arith.constant 0 : i32
    return %arg2, %arg1 : i32, i32
  }
  func.func @transform_2(%arg0: i32, %arg1: i32, %arg2: i32) -> (i32, i32) {
    %c0_i32 = arith.constant 0 : i32
    %c0_i32_0 = arith.constant 0 : i32
    return %c0_i32, %arg1 : i32, i32
  }
  func.func @transform_3(%arg0: i32, %arg1: i32, %arg2: i32) -> (i32, i32) {
    %c0_i32 = arith.constant 0 : i32
    %c0_i32_0 = arith.constant 0 : i32
    return %c0_i32, %arg1 : i32, i32
  }
  func.func @transform_4(%arg0: i32, %arg1: i32, %arg2: i32) -> (i32, i32) {
    %c0_i32 = arith.constant 0 : i32
    return %arg0, %arg1 : i32, i32
  }
}

module attributes {stable_mosaic.version = 11 : i64} {
  func.func @_gemm_affine_kernel(%arg0: i32, %arg1: i32, %arg2: i32, %arg3: memref<64x576xbf16, #tpu.memory_space<vmem>>, %arg4: memref<576x64xbf16, #tpu.memory_space<vmem>>, %arg5: memref<1x64xf32, #tpu.memory_space<vmem>>, %arg6: memref<1x64xf32, #tpu.memory_space<vmem>>, %arg7: memref<64x64xbf16, #tpu.memory_space<vmem>>, %arg8: memref<64x64xf32, #tpu.memory_space<vmem>>) attributes {dimension_semantics = [#tpu.dimension_semantics<parallel>, #tpu.dimension_semantics<parallel>, #tpu.dimension_semantics<arbitrary>], iteration_bounds = array<i64: 1, 1, 1>, scalar_prefetch = 0 : i64, scratch_operands = 1 : i64, tpu.core_type = #tpu.core_type<tc>, window_params = [{transform_indices = @transform_0, window_bounds = array<i64: 64, 576>}, {transform_indices = @transform_1, window_bounds = array<i64: 576, 64>}, {transform_indices = @transform_2, window_bounds = array<i64: 1, 64>}, {transform_indices = @transform_3, window_bounds = array<i64: 1, 64>}, {transform_indices = @transform_4, window_bounds = array<i64: 64, 64>}]} {
    %c0_i32 = arith.constant 0 : i32
    %0 = arith.cmpi eq, %arg2, %c0_i32 : i32
    %1 = arith.extui %0 : i1 to i32
    %c0_i32_0 = arith.constant 0 : i32
    %2 = arith.cmpi ne, %1, %c0_i32_0 : i32
    scf.if %2 {
      %cst_10 = arith.constant 0.000000e+00 : f32
      %12 = vector.broadcast %cst_10 : f32 to vector<64x64xf32>
      %c0_11 = arith.constant 0 : index
      %c0_12 = arith.constant 0 : index
      %13 = vector.load %arg8[%c0_11, %c0_12] : memref<64x64xf32, #tpu.memory_space<vmem>>, vector<64x64xf32>
      tpu.vector_store %arg8[%c0_11, %c0_12], %12 {strides = array<i32>} : memref<64x64xf32, #tpu.memory_space<vmem>>, vector<64x64xf32>,
    } else {
    }
    %c0 = arith.constant 0 : index
    %c0_1 = arith.constant 0 : index
    %3 = vector.load %arg8[%c0, %c0_1] : memref<64x64xf32, #tpu.memory_space<vmem>>, vector<64x64xf32>
    %c0_2 = arith.constant 0 : index
    %c0_3 = arith.constant 0 : index
    %4 = vector.load %arg3[%c0_2, %c0_3] : memref<64x576xbf16, #tpu.memory_space<vmem>>, vector<64x576xbf16>
    %c0_4 = arith.constant 0 : index
    %c0_5 = arith.constant 0 : index
    %5 = vector.load %arg4[%c0_4, %c0_5] : memref<576x64xbf16, #tpu.memory_space<vmem>>, vector<576x64xbf16>
    %cst = arith.constant dense<0.000000e+00> : vector<64x64xf32>
    %6 = tpu.matmul %4, %5, %cst {dimension_numbers = #tpu.dot_dimension_numbers<[1], [0], [0], [1], [0, 0, 1, 1], [], []>} : vector<64x576xbf16>, vector<576x64xbf16>, vector<64x64xf32> -> vector<64x64xf32>
    %7 = arith.addf %3, %6 : vector<64x64xf32>
    %c0_6 = arith.constant 0 : index
    %c0_7 = arith.constant 0 : index
    %8 = vector.load %arg8[%c0_6, %c0_7] : memref<64x64xf32, #tpu.memory_space<vmem>>, vector<64x64xf32>
    tpu.vector_store %arg8[%c0_6, %c0_7], %7 {strides = array<i32>} : memref<64x64xf32, #tpu.memory_space<vmem>>, vector<64x64xf32>,
    %c0_i32_8 = arith.constant 0 : i32
    %9 = arith.cmpi eq, %arg2, %c0_i32_8 : i32
    %10 = arith.extui %9 : i1 to i32
    %c0_i32_9 = arith.constant 0 : i32
    %11 = arith.cmpi ne, %10, %c0_i32_9 : i32
    scf.if %11 {
      %c0_10 = arith.constant 0 : index
      %c0_11 = arith.constant 0 : index
      %12 = vector.load %arg8[%c0_10, %c0_11] : memref<64x64xf32, #tpu.memory_space<vmem>>, vector<64x64xf32>
      %c0_12 = arith.constant 0 : index
      %c0_13 = arith.constant 0 : index
      %13 = vector.load %arg5[%c0_12, %c0_13] : memref<1x64xf32, #tpu.memory_space<vmem>>, vector<1x64xf32>
      %14 = vector.broadcast %13 : vector<1x64xf32> to vector<64x64xf32>
      %15 = arith.mulf %12, %14 : vector<64x64xf32>
      %c0_14 = arith.constant 0 : index
      %c0_15 = arith.constant 0 : index
      %16 = vector.load %arg6[%c0_14, %c0_15] : memref<1x64xf32, #tpu.memory_space<vmem>>, vector<1x64xf32>
      %17 = vector.broadcast %16 : vector<1x64xf32> to vector<64x64xf32>
      %18 = arith.addf %15, %17 : vector<64x64xf32>
      %cst_16 = arith.constant 0.000000e+00 : f32
      %19 = vector.broadcast %cst_16 : f32 to vector<64x64xf32>
      %20 = arith.maximumf %18, %19 : vector<64x64xf32>
      %21 = arith.truncf %20 : vector<64x64xf32> to vector<64x64xbf16>
      %c0_17 = arith.constant 0 : index
      %c0_18 = arith.constant 0 : index
      %22 = vector.load %arg7[%c0_17, %c0_18] : memref<64x64xbf16, #tpu.memory_space<vmem>>, vector<64x64xbf16>
      tpu.vector_store %arg7[%c0_17, %c0_18], %21 {strides = array<i32>} : memref<64x64xbf16, #tpu.memory_space<vmem>>, vector<64x64xbf16>,
    } else {
    }
    return
  }
  func.func @transform_0(%arg0: i32, %arg1: i32, %arg2: i32) -> (i32, i32) {
    %c0_i32 = arith.constant 0 : i32
    return %arg0, %arg2 : i32, i32
  }
  func.func @transform_1(%arg0: i32, %arg1: i32, %arg2: i32) -> (i32, i32) {
    %c0_i32 = arith.constant 0 : i32
    return %arg2, %arg1 : i32, i32
  }
  func.func @transform_2(%arg0: i32, %arg1: i32, %arg2: i32) -> (i32, i32) {
    %c0_i32 = arith.constant 0 : i32
    %c0_i32_0 = arith.constant 0 : i32
    return %c0_i32, %arg1 : i32, i32
  }
  func.func @transform_3(%arg0: i32, %arg1: i32, %arg2: i32) -> (i32, i32) {
    %c0_i32 = arith.constant 0 : i32
    %c0_i32_0 = arith.constant 0 : i32
    return %c0_i32, %arg1 : i32, i32
  }
  func.func @transform_4(%arg0: i32, %arg1: i32, %arg2: i32) -> (i32, i32) {
    %c0_i32 = arith.constant 0 : i32
    return %arg0, %arg1 : i32, i32
  }
}

module attributes {stable_mosaic.version = 11 : i64} {
  func.func @_gemm_affine_kernel(%arg0: i32, %arg1: i32, %arg2: i32, %arg3: memref<64x576xbf16, #tpu.memory_space<vmem>>, %arg4: memref<576x64xbf16, #tpu.memory_space<vmem>>, %arg5: memref<1x64xf32, #tpu.memory_space<vmem>>, %arg6: memref<1x64xf32, #tpu.memory_space<vmem>>, %arg7: memref<64x64xbf16, #tpu.memory_space<vmem>>, %arg8: memref<64x64xbf16, #tpu.memory_space<vmem>>, %arg9: memref<64x64xf32, #tpu.memory_space<vmem>>) attributes {dimension_semantics = [#tpu.dimension_semantics<parallel>, #tpu.dimension_semantics<parallel>, #tpu.dimension_semantics<arbitrary>], iteration_bounds = array<i64: 1, 1, 1>, scalar_prefetch = 0 : i64, scratch_operands = 1 : i64, tpu.core_type = #tpu.core_type<tc>, window_params = [{transform_indices = @transform_0, window_bounds = array<i64: 64, 576>}, {transform_indices = @transform_1, window_bounds = array<i64: 576, 64>}, {transform_indices = @transform_2, window_bounds = array<i64: 1, 64>}, {transform_indices = @transform_3, window_bounds = array<i64: 1, 64>}, {transform_indices = @transform_4, window_bounds = array<i64: 64, 64>}, {transform_indices = @transform_5, window_bounds = array<i64: 64, 64>}]} {
    %c0_i32 = arith.constant 0 : i32
    %0 = arith.cmpi eq, %arg2, %c0_i32 : i32
    %1 = arith.extui %0 : i1 to i32
    %c0_i32_0 = arith.constant 0 : i32
    %2 = arith.cmpi ne, %1, %c0_i32_0 : i32
    scf.if %2 {
      %cst_10 = arith.constant 0.000000e+00 : f32
      %12 = vector.broadcast %cst_10 : f32 to vector<64x64xf32>
      %c0_11 = arith.constant 0 : index
      %c0_12 = arith.constant 0 : index
      %13 = vector.load %arg9[%c0_11, %c0_12] : memref<64x64xf32, #tpu.memory_space<vmem>>, vector<64x64xf32>
      tpu.vector_store %arg9[%c0_11, %c0_12], %12 {strides = array<i32>} : memref<64x64xf32, #tpu.memory_space<vmem>>, vector<64x64xf32>,
    } else {
    }
    %c0 = arith.constant 0 : index
    %c0_1 = arith.constant 0 : index
    %3 = vector.load %arg9[%c0, %c0_1] : memref<64x64xf32, #tpu.memory_space<vmem>>, vector<64x64xf32>
    %c0_2 = arith.constant 0 : index
    %c0_3 = arith.constant 0 : index
    %4 = vector.load %arg3[%c0_2, %c0_3] : memref<64x576xbf16, #tpu.memory_space<vmem>>, vector<64x576xbf16>
    %c0_4 = arith.constant 0 : index
    %c0_5 = arith.constant 0 : index
    %5 = vector.load %arg4[%c0_4, %c0_5] : memref<576x64xbf16, #tpu.memory_space<vmem>>, vector<576x64xbf16>
    %cst = arith.constant dense<0.000000e+00> : vector<64x64xf32>
    %6 = tpu.matmul %4, %5, %cst {dimension_numbers = #tpu.dot_dimension_numbers<[1], [0], [0], [1], [0, 0, 1, 1], [], []>} : vector<64x576xbf16>, vector<576x64xbf16>, vector<64x64xf32> -> vector<64x64xf32>
    %7 = arith.addf %3, %6 : vector<64x64xf32>
    %c0_6 = arith.constant 0 : index
    %c0_7 = arith.constant 0 : index
    %8 = vector.load %arg9[%c0_6, %c0_7] : memref<64x64xf32, #tpu.memory_space<vmem>>, vector<64x64xf32>
    tpu.vector_store %arg9[%c0_6, %c0_7], %7 {strides = array<i32>} : memref<64x64xf32, #tpu.memory_space<vmem>>, vector<64x64xf32>,
    %c0_i32_8 = arith.constant 0 : i32
    %9 = arith.cmpi eq, %arg2, %c0_i32_8 : i32
    %10 = arith.extui %9 : i1 to i32
    %c0_i32_9 = arith.constant 0 : i32
    %11 = arith.cmpi ne, %10, %c0_i32_9 : i32
    scf.if %11 {
      %c0_10 = arith.constant 0 : index
      %c0_11 = arith.constant 0 : index
      %12 = vector.load %arg9[%c0_10, %c0_11] : memref<64x64xf32, #tpu.memory_space<vmem>>, vector<64x64xf32>
      %c0_12 = arith.constant 0 : index
      %c0_13 = arith.constant 0 : index
      %13 = vector.load %arg5[%c0_12, %c0_13] : memref<1x64xf32, #tpu.memory_space<vmem>>, vector<1x64xf32>
      %14 = vector.broadcast %13 : vector<1x64xf32> to vector<64x64xf32>
      %15 = arith.mulf %12, %14 : vector<64x64xf32>
      %c0_14 = arith.constant 0 : index
      %c0_15 = arith.constant 0 : index
      %16 = vector.load %arg6[%c0_14, %c0_15] : memref<1x64xf32, #tpu.memory_space<vmem>>, vector<1x64xf32>
      %17 = vector.broadcast %16 : vector<1x64xf32> to vector<64x64xf32>
      %18 = arith.addf %15, %17 : vector<64x64xf32>
      %c0_16 = arith.constant 0 : index
      %c0_17 = arith.constant 0 : index
      %19 = vector.load %arg7[%c0_16, %c0_17] : memref<64x64xbf16, #tpu.memory_space<vmem>>, vector<64x64xbf16>
      %20 = arith.extf %19 : vector<64x64xbf16> to vector<64x64xf32>
      %21 = arith.addf %18, %20 : vector<64x64xf32>
      %cst_18 = arith.constant 0.000000e+00 : f32
      %22 = vector.broadcast %cst_18 : f32 to vector<64x64xf32>
      %23 = arith.maximumf %21, %22 : vector<64x64xf32>
      %24 = arith.truncf %23 : vector<64x64xf32> to vector<64x64xbf16>
      %c0_19 = arith.constant 0 : index
      %c0_20 = arith.constant 0 : index
      %25 = vector.load %arg8[%c0_19, %c0_20] : memref<64x64xbf16, #tpu.memory_space<vmem>>, vector<64x64xbf16>
      tpu.vector_store %arg8[%c0_19, %c0_20], %24 {strides = array<i32>} : memref<64x64xbf16, #tpu.memory_space<vmem>>, vector<64x64xbf16>,
    } else {
    }
    return
  }
  func.func @transform_0(%arg0: i32, %arg1: i32, %arg2: i32) -> (i32, i32) {
    %c0_i32 = arith.constant 0 : i32
    return %arg0, %arg2 : i32, i32
  }
  func.func @transform_1(%arg0: i32, %arg1: i32, %arg2: i32) -> (i32, i32) {
    %c0_i32 = arith.constant 0 : i32
    return %arg2, %arg1 : i32, i32
  }
  func.func @transform_2(%arg0: i32, %arg1: i32, %arg2: i32) -> (i32, i32) {
    %c0_i32 = arith.constant 0 : i32
    %c0_i32_0 = arith.constant 0 : i32
    return %c0_i32, %arg1 : i32, i32
  }
  func.func @transform_3(%arg0: i32, %arg1: i32, %arg2: i32) -> (i32, i32) {
    %c0_i32 = arith.constant 0 : i32
    %c0_i32_0 = arith.constant 0 : i32
    return %c0_i32, %arg1 : i32, i32
  }
  func.func @transform_4(%arg0: i32, %arg1: i32, %arg2: i32) -> (i32, i32) {
    %c0_i32 = arith.constant 0 : i32
    return %arg0, %arg1 : i32, i32
  }
  func.func @transform_5(%arg0: i32, %arg1: i32, %arg2: i32) -> (i32, i32) {
    %c0_i32 = arith.constant 0 : i32
    return %arg0, %arg1 : i32, i32
  }
}

module attributes {stable_mosaic.version = 11 : i64} {
  func.func @_add_kernel(%arg0: i32, %arg1: memref<32x64xbf16, #tpu.memory_space<vmem>>, %arg2: memref<32x64xbf16, #tpu.memory_space<vmem>>, %arg3: memref<32x64xbf16, #tpu.memory_space<vmem>>) attributes {dimension_semantics = [#tpu.dimension_semantics<parallel>], iteration_bounds = array<i64: 1>, scalar_prefetch = 0 : i64, scratch_operands = 0 : i64, tpu.core_type = #tpu.core_type<tc>, window_params = [{transform_indices = @transform_0, window_bounds = array<i64: 32, 64>}, {transform_indices = @transform_1, window_bounds = array<i64: 32, 64>}, {transform_indices = @transform_2, window_bounds = array<i64: 32, 64>}]} {
    %c0 = arith.constant 0 : index
    %c0_0 = arith.constant 0 : index
    %0 = vector.load %arg1[%c0, %c0_0] : memref<32x64xbf16, #tpu.memory_space<vmem>>, vector<32x64xbf16>
    %1 = arith.extf %0 : vector<32x64xbf16> to vector<32x64xf32>
    %c0_1 = arith.constant 0 : index
    %c0_2 = arith.constant 0 : index
    %2 = vector.load %arg2[%c0_1, %c0_2] : memref<32x64xbf16, #tpu.memory_space<vmem>>, vector<32x64xbf16>
    %3 = arith.extf %2 : vector<32x64xbf16> to vector<32x64xf32>
    %4 = arith.addf %1, %3 : vector<32x64xf32>
    %5 = arith.truncf %4 : vector<32x64xf32> to vector<32x64xbf16>
    %c0_3 = arith.constant 0 : index
    %c0_4 = arith.constant 0 : index
    %6 = vector.load %arg3[%c0_3, %c0_4] : memref<32x64xbf16, #tpu.memory_space<vmem>>, vector<32x64xbf16>
    tpu.vector_store %arg3[%c0_3, %c0_4], %5 {strides = array<i32>} : memref<32x64xbf16, #tpu.memory_space<vmem>>, vector<32x64xbf16>,
    return
  }
  func.func @transform_0(%arg0: i32) -> (i32, i32) {
    %c0_i32 = arith.constant 0 : i32
    %c0_i32_0 = arith.constant 0 : i32
    return %arg0, %c0_i32 : i32, i32
  }
  func.func @transform_1(%arg0: i32) -> (i32, i32) {
    %c0_i32 = arith.constant 0 : i32
    %c0_i32_0 = arith.constant 0 : i32
    return %arg0, %c0_i32 : i32, i32
  }
  func.func @transform_2(%arg0: i32) -> (i32, i32) {
    %c0_i32 = arith.constant 0 : i32
    %c0_i32_0 = arith.constant 0 : i32
    return %arg0, %c0_i32 : i32, i32
  }
}

module attributes {stable_mosaic.version = 11 : i64} {
  func.func @_gemm_affine_kernel(%arg0: i32, %arg1: i32, %arg2: i32, %arg3: memref<16x576xbf16, #tpu.memory_space<vmem>>, %arg4: memref<576x128xbf16, #tpu.memory_space<vmem>>, %arg5: memref<1x128xf32, #tpu.memory_space<vmem>>, %arg6: memref<1x128xf32, #tpu.memory_space<vmem>>, %arg7: memref<16x128xbf16, #tpu.memory_space<vmem>>, %arg8: memref<16x128xf32, #tpu.memory_space<vmem>>) attributes {dimension_semantics = [#tpu.dimension_semantics<parallel>, #tpu.dimension_semantics<parallel>, #tpu.dimension_semantics<arbitrary>], iteration_bounds = array<i64: 1, 1, 1>, scalar_prefetch = 0 : i64, scratch_operands = 1 : i64, tpu.core_type = #tpu.core_type<tc>, window_params = [{transform_indices = @transform_0, window_bounds = array<i64: 16, 576>}, {transform_indices = @transform_1, window_bounds = array<i64: 576, 128>}, {transform_indices = @transform_2, window_bounds = array<i64: 1, 128>}, {transform_indices = @transform_3, window_bounds = array<i64: 1, 128>}, {transform_indices = @transform_4, window_bounds = array<i64: 16, 128>}]} {
    %c0_i32 = arith.constant 0 : i32
    %0 = arith.cmpi eq, %arg2, %c0_i32 : i32
    %1 = arith.extui %0 : i1 to i32
    %c0_i32_0 = arith.constant 0 : i32
    %2 = arith.cmpi ne, %1, %c0_i32_0 : i32
    scf.if %2 {
      %cst_10 = arith.constant 0.000000e+00 : f32
      %12 = vector.broadcast %cst_10 : f32 to vector<16x128xf32>
      %c0_11 = arith.constant 0 : index
      %c0_12 = arith.constant 0 : index
      %13 = vector.load %arg8[%c0_11, %c0_12] : memref<16x128xf32, #tpu.memory_space<vmem>>, vector<16x128xf32>
      tpu.vector_store %arg8[%c0_11, %c0_12], %12 {strides = array<i32>} : memref<16x128xf32, #tpu.memory_space<vmem>>, vector<16x128xf32>,
    } else {
    }
    %c0 = arith.constant 0 : index
    %c0_1 = arith.constant 0 : index
    %3 = vector.load %arg8[%c0, %c0_1] : memref<16x128xf32, #tpu.memory_space<vmem>>, vector<16x128xf32>
    %c0_2 = arith.constant 0 : index
    %c0_3 = arith.constant 0 : index
    %4 = vector.load %arg3[%c0_2, %c0_3] : memref<16x576xbf16, #tpu.memory_space<vmem>>, vector<16x576xbf16>
    %c0_4 = arith.constant 0 : index
    %c0_5 = arith.constant 0 : index
    %5 = vector.load %arg4[%c0_4, %c0_5] : memref<576x128xbf16, #tpu.memory_space<vmem>>, vector<576x128xbf16>
    %cst = arith.constant dense<0.000000e+00> : vector<16x128xf32>
    %6 = tpu.matmul %4, %5, %cst {dimension_numbers = #tpu.dot_dimension_numbers<[1], [0], [0], [1], [0, 0, 1, 1], [], []>} : vector<16x576xbf16>, vector<576x128xbf16>, vector<16x128xf32> -> vector<16x128xf32>
    %7 = arith.addf %3, %6 : vector<16x128xf32>
    %c0_6 = arith.constant 0 : index
    %c0_7 = arith.constant 0 : index
    %8 = vector.load %arg8[%c0_6, %c0_7] : memref<16x128xf32, #tpu.memory_space<vmem>>, vector<16x128xf32>
    tpu.vector_store %arg8[%c0_6, %c0_7], %7 {strides = array<i32>} : memref<16x128xf32, #tpu.memory_space<vmem>>, vector<16x128xf32>,
    %c0_i32_8 = arith.constant 0 : i32
    %9 = arith.cmpi eq, %arg2, %c0_i32_8 : i32
    %10 = arith.extui %9 : i1 to i32
    %c0_i32_9 = arith.constant 0 : i32
    %11 = arith.cmpi ne, %10, %c0_i32_9 : i32
    scf.if %11 {
      %c0_10 = arith.constant 0 : index
      %c0_11 = arith.constant 0 : index
      %12 = vector.load %arg8[%c0_10, %c0_11] : memref<16x128xf32, #tpu.memory_space<vmem>>, vector<16x128xf32>
      %c0_12 = arith.constant 0 : index
      %c0_13 = arith.constant 0 : index
      %13 = vector.load %arg5[%c0_12, %c0_13] : memref<1x128xf32, #tpu.memory_space<vmem>>, vector<1x128xf32>
      %14 = vector.broadcast %13 : vector<1x128xf32> to vector<16x128xf32>
      %15 = arith.mulf %12, %14 : vector<16x128xf32>
      %c0_14 = arith.constant 0 : index
      %c0_15 = arith.constant 0 : index
      %16 = vector.load %arg6[%c0_14, %c0_15] : memref<1x128xf32, #tpu.memory_space<vmem>>, vector<1x128xf32>
      %17 = vector.broadcast %16 : vector<1x128xf32> to vector<16x128xf32>
      %18 = arith.addf %15, %17 : vector<16x128xf32>
      %cst_16 = arith.constant 0.000000e+00 : f32
      %19 = vector.broadcast %cst_16 : f32 to vector<16x128xf32>
      %20 = arith.maximumf %18, %19 : vector<16x128xf32>
      %21 = arith.truncf %20 : vector<16x128xf32> to vector<16x128xbf16>
      %c0_17 = arith.constant 0 : index
      %c0_18 = arith.constant 0 : index
      %22 = vector.load %arg7[%c0_17, %c0_18] : memref<16x128xbf16, #tpu.memory_space<vmem>>, vector<16x128xbf16>
      tpu.vector_store %arg7[%c0_17, %c0_18], %21 {strides = array<i32>} : memref<16x128xbf16, #tpu.memory_space<vmem>>, vector<16x128xbf16>,
    } else {
    }
    return
  }
  func.func @transform_0(%arg0: i32, %arg1: i32, %arg2: i32) -> (i32, i32) {
    %c0_i32 = arith.constant 0 : i32
    return %arg0, %arg2 : i32, i32
  }
  func.func @transform_1(%arg0: i32, %arg1: i32, %arg2: i32) -> (i32, i32) {
    %c0_i32 = arith.constant 0 : i32
    return %arg2, %arg1 : i32, i32
  }
  func.func @transform_2(%arg0: i32, %arg1: i32, %arg2: i32) -> (i32, i32) {
    %c0_i32 = arith.constant 0 : i32
    %c0_i32_0 = arith.constant 0 : i32
    return %c0_i32, %arg1 : i32, i32
  }
  func.func @transform_3(%arg0: i32, %arg1: i32, %arg2: i32) -> (i32, i32) {
    %c0_i32 = arith.constant 0 : i32
    %c0_i32_0 = arith.constant 0 : i32
    return %c0_i32, %arg1 : i32, i32
  }
  func.func @transform_4(%arg0: i32, %arg1: i32, %arg2: i32) -> (i32, i32) {
    %c0_i32 = arith.constant 0 : i32
    return %arg0, %arg1 : i32, i32
  }
}

module attributes {stable_mosaic.version = 11 : i64} {
  func.func @_gemm_affine_kernel(%arg0: i32, %arg1: i32, %arg2: i32, %arg3: memref<16x64xbf16, #tpu.memory_space<vmem>>, %arg4: memref<64x128xbf16, #tpu.memory_space<vmem>>, %arg5: memref<1x128xf32, #tpu.memory_space<vmem>>, %arg6: memref<1x128xf32, #tpu.memory_space<vmem>>, %arg7: memref<16x128xbf16, #tpu.memory_space<vmem>>, %arg8: memref<16x128xf32, #tpu.memory_space<vmem>>) attributes {dimension_semantics = [#tpu.dimension_semantics<parallel>, #tpu.dimension_semantics<parallel>, #tpu.dimension_semantics<arbitrary>], iteration_bounds = array<i64: 1, 1, 1>, scalar_prefetch = 0 : i64, scratch_operands = 1 : i64, tpu.core_type = #tpu.core_type<tc>, window_params = [{transform_indices = @transform_0, window_bounds = array<i64: 16, 64>}, {transform_indices = @transform_1, window_bounds = array<i64: 64, 128>}, {transform_indices = @transform_2, window_bounds = array<i64: 1, 128>}, {transform_indices = @transform_3, window_bounds = array<i64: 1, 128>}, {transform_indices = @transform_4, window_bounds = array<i64: 16, 128>}]} {
    %c0_i32 = arith.constant 0 : i32
    %0 = arith.cmpi eq, %arg2, %c0_i32 : i32
    %1 = arith.extui %0 : i1 to i32
    %c0_i32_0 = arith.constant 0 : i32
    %2 = arith.cmpi ne, %1, %c0_i32_0 : i32
    scf.if %2 {
      %cst_10 = arith.constant 0.000000e+00 : f32
      %12 = vector.broadcast %cst_10 : f32 to vector<16x128xf32>
      %c0_11 = arith.constant 0 : index
      %c0_12 = arith.constant 0 : index
      %13 = vector.load %arg8[%c0_11, %c0_12] : memref<16x128xf32, #tpu.memory_space<vmem>>, vector<16x128xf32>
      tpu.vector_store %arg8[%c0_11, %c0_12], %12 {strides = array<i32>} : memref<16x128xf32, #tpu.memory_space<vmem>>, vector<16x128xf32>,
    } else {
    }
    %c0 = arith.constant 0 : index
    %c0_1 = arith.constant 0 : index
    %3 = vector.load %arg8[%c0, %c0_1] : memref<16x128xf32, #tpu.memory_space<vmem>>, vector<16x128xf32>
    %c0_2 = arith.constant 0 : index
    %c0_3 = arith.constant 0 : index
    %4 = vector.load %arg3[%c0_2, %c0_3] : memref<16x64xbf16, #tpu.memory_space<vmem>>, vector<16x64xbf16>
    %c0_4 = arith.constant 0 : index
    %c0_5 = arith.constant 0 : index
    %5 = vector.load %arg4[%c0_4, %c0_5] : memref<64x128xbf16, #tpu.memory_space<vmem>>, vector<64x128xbf16>
    %cst = arith.constant dense<0.000000e+00> : vector<16x128xf32>
    %6 = tpu.matmul %4, %5, %cst {dimension_numbers = #tpu.dot_dimension_numbers<[1], [0], [0], [1], [0, 0, 1, 1], [], []>} : vector<16x64xbf16>, vector<64x128xbf16>, vector<16x128xf32> -> vector<16x128xf32>
    %7 = arith.addf %3, %6 : vector<16x128xf32>
    %c0_6 = arith.constant 0 : index
    %c0_7 = arith.constant 0 : index
    %8 = vector.load %arg8[%c0_6, %c0_7] : memref<16x128xf32, #tpu.memory_space<vmem>>, vector<16x128xf32>
    tpu.vector_store %arg8[%c0_6, %c0_7], %7 {strides = array<i32>} : memref<16x128xf32, #tpu.memory_space<vmem>>, vector<16x128xf32>,
    %c0_i32_8 = arith.constant 0 : i32
    %9 = arith.cmpi eq, %arg2, %c0_i32_8 : i32
    %10 = arith.extui %9 : i1 to i32
    %c0_i32_9 = arith.constant 0 : i32
    %11 = arith.cmpi ne, %10, %c0_i32_9 : i32
    scf.if %11 {
      %c0_10 = arith.constant 0 : index
      %c0_11 = arith.constant 0 : index
      %12 = vector.load %arg8[%c0_10, %c0_11] : memref<16x128xf32, #tpu.memory_space<vmem>>, vector<16x128xf32>
      %c0_12 = arith.constant 0 : index
      %c0_13 = arith.constant 0 : index
      %13 = vector.load %arg5[%c0_12, %c0_13] : memref<1x128xf32, #tpu.memory_space<vmem>>, vector<1x128xf32>
      %14 = vector.broadcast %13 : vector<1x128xf32> to vector<16x128xf32>
      %15 = arith.mulf %12, %14 : vector<16x128xf32>
      %c0_14 = arith.constant 0 : index
      %c0_15 = arith.constant 0 : index
      %16 = vector.load %arg6[%c0_14, %c0_15] : memref<1x128xf32, #tpu.memory_space<vmem>>, vector<1x128xf32>
      %17 = vector.broadcast %16 : vector<1x128xf32> to vector<16x128xf32>
      %18 = arith.addf %15, %17 : vector<16x128xf32>
      %19 = arith.truncf %18 : vector<16x128xf32> to vector<16x128xbf16>
      %c0_16 = arith.constant 0 : index
      %c0_17 = arith.constant 0 : index
      %20 = vector.load %arg7[%c0_16, %c0_17] : memref<16x128xbf16, #tpu.memory_space<vmem>>, vector<16x128xbf16>
      tpu.vector_store %arg7[%c0_16, %c0_17], %19 {strides = array<i32>} : memref<16x128xbf16, #tpu.memory_space<vmem>>, vector<16x128xbf16>,
    } else {
    }
    return
  }
  func.func @transform_0(%arg0: i32, %arg1: i32, %arg2: i32) -> (i32, i32) {
    %c0_i32 = arith.constant 0 : i32
    return %arg0, %arg2 : i32, i32
  }
  func.func @transform_1(%arg0: i32, %arg1: i32, %arg2: i32) -> (i32, i32) {
    %c0_i32 = arith.constant 0 : i32
    return %arg2, %arg1 : i32, i32
  }
  func.func @transform_2(%arg0: i32, %arg1: i32, %arg2: i32) -> (i32, i32) {
    %c0_i32 = arith.constant 0 : i32
    %c0_i32_0 = arith.constant 0 : i32
    return %c0_i32, %arg1 : i32, i32
  }
  func.func @transform_3(%arg0: i32, %arg1: i32, %arg2: i32) -> (i32, i32) {
    %c0_i32 = arith.constant 0 : i32
    %c0_i32_0 = arith.constant 0 : i32
    return %c0_i32, %arg1 : i32, i32
  }
  func.func @transform_4(%arg0: i32, %arg1: i32, %arg2: i32) -> (i32, i32) {
    %c0_i32 = arith.constant 0 : i32
    return %arg0, %arg1 : i32, i32
  }
}

module attributes {stable_mosaic.version = 11 : i64} {
  func.func @_gemm_affine_kernel(%arg0: i32, %arg1: i32, %arg2: i32, %arg3: memref<16x128xbf16, #tpu.memory_space<vmem>>, %arg4: memref<128x128xbf16, #tpu.memory_space<vmem>>, %arg5: memref<1x128xf32, #tpu.memory_space<vmem>>, %arg6: memref<1x128xf32, #tpu.memory_space<vmem>>, %arg7: memref<16x128xbf16, #tpu.memory_space<vmem>>, %arg8: memref<16x128xf32, #tpu.memory_space<vmem>>) attributes {dimension_semantics = [#tpu.dimension_semantics<parallel>, #tpu.dimension_semantics<parallel>, #tpu.dimension_semantics<arbitrary>], iteration_bounds = array<i64: 1, 1, 9>, scalar_prefetch = 0 : i64, scratch_operands = 1 : i64, tpu.core_type = #tpu.core_type<tc>, window_params = [{transform_indices = @transform_0, window_bounds = array<i64: 16, 128>}, {transform_indices = @transform_1, window_bounds = array<i64: 128, 128>}, {transform_indices = @transform_2, window_bounds = array<i64: 1, 128>}, {transform_indices = @transform_3, window_bounds = array<i64: 1, 128>}, {transform_indices = @transform_4, window_bounds = array<i64: 16, 128>}]} {
    %c0_i32 = arith.constant 0 : i32
    %0 = arith.cmpi eq, %arg2, %c0_i32 : i32
    %1 = arith.extui %0 : i1 to i32
    %c0_i32_0 = arith.constant 0 : i32
    %2 = arith.cmpi ne, %1, %c0_i32_0 : i32
    scf.if %2 {
      %cst_9 = arith.constant 0.000000e+00 : f32
      %12 = vector.broadcast %cst_9 : f32 to vector<16x128xf32>
      %c0_10 = arith.constant 0 : index
      %c0_11 = arith.constant 0 : index
      %13 = vector.load %arg8[%c0_10, %c0_11] : memref<16x128xf32, #tpu.memory_space<vmem>>, vector<16x128xf32>
      tpu.vector_store %arg8[%c0_10, %c0_11], %12 {strides = array<i32>} : memref<16x128xf32, #tpu.memory_space<vmem>>, vector<16x128xf32>,
    } else {
    }
    %c0 = arith.constant 0 : index
    %c0_1 = arith.constant 0 : index
    %3 = vector.load %arg8[%c0, %c0_1] : memref<16x128xf32, #tpu.memory_space<vmem>>, vector<16x128xf32>
    %c0_2 = arith.constant 0 : index
    %c0_3 = arith.constant 0 : index
    %4 = vector.load %arg3[%c0_2, %c0_3] : memref<16x128xbf16, #tpu.memory_space<vmem>>, vector<16x128xbf16>
    %c0_4 = arith.constant 0 : index
    %c0_5 = arith.constant 0 : index
    %5 = vector.load %arg4[%c0_4, %c0_5] : memref<128x128xbf16, #tpu.memory_space<vmem>>, vector<128x128xbf16>
    %cst = arith.constant dense<0.000000e+00> : vector<16x128xf32>
    %6 = tpu.matmul %4, %5, %cst {dimension_numbers = #tpu.dot_dimension_numbers<[1], [0], [0], [1], [0, 0, 1, 1], [], []>} : vector<16x128xbf16>, vector<128x128xbf16>, vector<16x128xf32> -> vector<16x128xf32>
    %7 = arith.addf %3, %6 : vector<16x128xf32>
    %c0_6 = arith.constant 0 : index
    %c0_7 = arith.constant 0 : index
    %8 = vector.load %arg8[%c0_6, %c0_7] : memref<16x128xf32, #tpu.memory_space<vmem>>, vector<16x128xf32>
    tpu.vector_store %arg8[%c0_6, %c0_7], %7 {strides = array<i32>} : memref<16x128xf32, #tpu.memory_space<vmem>>, vector<16x128xf32>,
    %c8_i32 = arith.constant 8 : i32
    %9 = arith.cmpi eq, %arg2, %c8_i32 : i32
    %10 = arith.extui %9 : i1 to i32
    %c0_i32_8 = arith.constant 0 : i32
    %11 = arith.cmpi ne, %10, %c0_i32_8 : i32
    scf.if %11 {
      %c0_9 = arith.constant 0 : index
      %c0_10 = arith.constant 0 : index
      %12 = vector.load %arg8[%c0_9, %c0_10] : memref<16x128xf32, #tpu.memory_space<vmem>>, vector<16x128xf32>
      %c0_11 = arith.constant 0 : index
      %c0_12 = arith.constant 0 : index
      %13 = vector.load %arg5[%c0_11, %c0_12] : memref<1x128xf32, #tpu.memory_space<vmem>>, vector<1x128xf32>
      %14 = vector.broadcast %13 : vector<1x128xf32> to vector<16x128xf32>
      %15 = arith.mulf %12, %14 : vector<16x128xf32>
      %c0_13 = arith.constant 0 : index
      %c0_14 = arith.constant 0 : index
      %16 = vector.load %arg6[%c0_13, %c0_14] : memref<1x128xf32, #tpu.memory_space<vmem>>, vector<1x128xf32>
      %17 = vector.broadcast %16 : vector<1x128xf32> to vector<16x128xf32>
      %18 = arith.addf %15, %17 : vector<16x128xf32>
      %cst_15 = arith.constant 0.000000e+00 : f32
      %19 = vector.broadcast %cst_15 : f32 to vector<16x128xf32>
      %20 = arith.maximumf %18, %19 : vector<16x128xf32>
      %21 = arith.truncf %20 : vector<16x128xf32> to vector<16x128xbf16>
      %c0_16 = arith.constant 0 : index
      %c0_17 = arith.constant 0 : index
      %22 = vector.load %arg7[%c0_16, %c0_17] : memref<16x128xbf16, #tpu.memory_space<vmem>>, vector<16x128xbf16>
      tpu.vector_store %arg7[%c0_16, %c0_17], %21 {strides = array<i32>} : memref<16x128xbf16, #tpu.memory_space<vmem>>, vector<16x128xbf16>,
    } else {
    }
    return
  }
  func.func @transform_0(%arg0: i32, %arg1: i32, %arg2: i32) -> (i32, i32) {
    %c0_i32 = arith.constant 0 : i32
    return %arg0, %arg2 : i32, i32
  }
  func.func @transform_1(%arg0: i32, %arg1: i32, %arg2: i32) -> (i32, i32) {
    %c0_i32 = arith.constant 0 : i32
    return %arg2, %arg1 : i32, i32
  }
  func.func @transform_2(%arg0: i32, %arg1: i32, %arg2: i32) -> (i32, i32) {
    %c0_i32 = arith.constant 0 : i32
    %c0_i32_0 = arith.constant 0 : i32
    return %c0_i32, %arg1 : i32, i32
  }
  func.func @transform_3(%arg0: i32, %arg1: i32, %arg2: i32) -> (i32, i32) {
    %c0_i32 = arith.constant 0 : i32
    %c0_i32_0 = arith.constant 0 : i32
    return %c0_i32, %arg1 : i32, i32
  }
  func.func @transform_4(%arg0: i32, %arg1: i32, %arg2: i32) -> (i32, i32) {
    %c0_i32 = arith.constant 0 : i32
    return %arg0, %arg1 : i32, i32
  }
}

module attributes {stable_mosaic.version = 11 : i64} {
  func.func @_gemm_affine_kernel(%arg0: i32, %arg1: i32, %arg2: i32, %arg3: memref<16x128xbf16, #tpu.memory_space<vmem>>, %arg4: memref<128x128xbf16, #tpu.memory_space<vmem>>, %arg5: memref<1x128xf32, #tpu.memory_space<vmem>>, %arg6: memref<1x128xf32, #tpu.memory_space<vmem>>, %arg7: memref<16x128xbf16, #tpu.memory_space<vmem>>, %arg8: memref<16x128xbf16, #tpu.memory_space<vmem>>, %arg9: memref<16x128xf32, #tpu.memory_space<vmem>>) attributes {dimension_semantics = [#tpu.dimension_semantics<parallel>, #tpu.dimension_semantics<parallel>, #tpu.dimension_semantics<arbitrary>], iteration_bounds = array<i64: 1, 1, 9>, scalar_prefetch = 0 : i64, scratch_operands = 1 : i64, tpu.core_type = #tpu.core_type<tc>, window_params = [{transform_indices = @transform_0, window_bounds = array<i64: 16, 128>}, {transform_indices = @transform_1, window_bounds = array<i64: 128, 128>}, {transform_indices = @transform_2, window_bounds = array<i64: 1, 128>}, {transform_indices = @transform_3, window_bounds = array<i64: 1, 128>}, {transform_indices = @transform_4, window_bounds = array<i64: 16, 128>}, {transform_indices = @transform_5, window_bounds = array<i64: 16, 128>}]} {
    %c0_i32 = arith.constant 0 : i32
    %0 = arith.cmpi eq, %arg2, %c0_i32 : i32
    %1 = arith.extui %0 : i1 to i32
    %c0_i32_0 = arith.constant 0 : i32
    %2 = arith.cmpi ne, %1, %c0_i32_0 : i32
    scf.if %2 {
      %cst_9 = arith.constant 0.000000e+00 : f32
      %12 = vector.broadcast %cst_9 : f32 to vector<16x128xf32>
      %c0_10 = arith.constant 0 : index
      %c0_11 = arith.constant 0 : index
      %13 = vector.load %arg9[%c0_10, %c0_11] : memref<16x128xf32, #tpu.memory_space<vmem>>, vector<16x128xf32>
      tpu.vector_store %arg9[%c0_10, %c0_11], %12 {strides = array<i32>} : memref<16x128xf32, #tpu.memory_space<vmem>>, vector<16x128xf32>,
    } else {
    }
    %c0 = arith.constant 0 : index
    %c0_1 = arith.constant 0 : index
    %3 = vector.load %arg9[%c0, %c0_1] : memref<16x128xf32, #tpu.memory_space<vmem>>, vector<16x128xf32>
    %c0_2 = arith.constant 0 : index
    %c0_3 = arith.constant 0 : index
    %4 = vector.load %arg3[%c0_2, %c0_3] : memref<16x128xbf16, #tpu.memory_space<vmem>>, vector<16x128xbf16>
    %c0_4 = arith.constant 0 : index
    %c0_5 = arith.constant 0 : index
    %5 = vector.load %arg4[%c0_4, %c0_5] : memref<128x128xbf16, #tpu.memory_space<vmem>>, vector<128x128xbf16>
    %cst = arith.constant dense<0.000000e+00> : vector<16x128xf32>
    %6 = tpu.matmul %4, %5, %cst {dimension_numbers = #tpu.dot_dimension_numbers<[1], [0], [0], [1], [0, 0, 1, 1], [], []>} : vector<16x128xbf16>, vector<128x128xbf16>, vector<16x128xf32> -> vector<16x128xf32>
    %7 = arith.addf %3, %6 : vector<16x128xf32>
    %c0_6 = arith.constant 0 : index
    %c0_7 = arith.constant 0 : index
    %8 = vector.load %arg9[%c0_6, %c0_7] : memref<16x128xf32, #tpu.memory_space<vmem>>, vector<16x128xf32>
    tpu.vector_store %arg9[%c0_6, %c0_7], %7 {strides = array<i32>} : memref<16x128xf32, #tpu.memory_space<vmem>>, vector<16x128xf32>,
    %c8_i32 = arith.constant 8 : i32
    %9 = arith.cmpi eq, %arg2, %c8_i32 : i32
    %10 = arith.extui %9 : i1 to i32
    %c0_i32_8 = arith.constant 0 : i32
    %11 = arith.cmpi ne, %10, %c0_i32_8 : i32
    scf.if %11 {
      %c0_9 = arith.constant 0 : index
      %c0_10 = arith.constant 0 : index
      %12 = vector.load %arg9[%c0_9, %c0_10] : memref<16x128xf32, #tpu.memory_space<vmem>>, vector<16x128xf32>
      %c0_11 = arith.constant 0 : index
      %c0_12 = arith.constant 0 : index
      %13 = vector.load %arg5[%c0_11, %c0_12] : memref<1x128xf32, #tpu.memory_space<vmem>>, vector<1x128xf32>
      %14 = vector.broadcast %13 : vector<1x128xf32> to vector<16x128xf32>
      %15 = arith.mulf %12, %14 : vector<16x128xf32>
      %c0_13 = arith.constant 0 : index
      %c0_14 = arith.constant 0 : index
      %16 = vector.load %arg6[%c0_13, %c0_14] : memref<1x128xf32, #tpu.memory_space<vmem>>, vector<1x128xf32>
      %17 = vector.broadcast %16 : vector<1x128xf32> to vector<16x128xf32>
      %18 = arith.addf %15, %17 : vector<16x128xf32>
      %c0_15 = arith.constant 0 : index
      %c0_16 = arith.constant 0 : index
      %19 = vector.load %arg7[%c0_15, %c0_16] : memref<16x128xbf16, #tpu.memory_space<vmem>>, vector<16x128xbf16>
      %20 = arith.extf %19 : vector<16x128xbf16> to vector<16x128xf32>
      %21 = arith.addf %18, %20 : vector<16x128xf32>
      %cst_17 = arith.constant 0.000000e+00 : f32
      %22 = vector.broadcast %cst_17 : f32 to vector<16x128xf32>
      %23 = arith.maximumf %21, %22 : vector<16x128xf32>
      %24 = arith.truncf %23 : vector<16x128xf32> to vector<16x128xbf16>
      %c0_18 = arith.constant 0 : index
      %c0_19 = arith.constant 0 : index
      %25 = vector.load %arg8[%c0_18, %c0_19] : memref<16x128xbf16, #tpu.memory_space<vmem>>, vector<16x128xbf16>
      tpu.vector_store %arg8[%c0_18, %c0_19], %24 {strides = array<i32>} : memref<16x128xbf16, #tpu.memory_space<vmem>>, vector<16x128xbf16>,
    } else {
    }
    return
  }
  func.func @transform_0(%arg0: i32, %arg1: i32, %arg2: i32) -> (i32, i32) {
    %c0_i32 = arith.constant 0 : i32
    return %arg0, %arg2 : i32, i32
  }
  func.func @transform_1(%arg0: i32, %arg1: i32, %arg2: i32) -> (i32, i32) {
    %c0_i32 = arith.constant 0 : i32
    return %arg2, %arg1 : i32, i32
  }
  func.func @transform_2(%arg0: i32, %arg1: i32, %arg2: i32) -> (i32, i32) {
    %c0_i32 = arith.constant 0 : i32
    %c0_i32_0 = arith.constant 0 : i32
    return %c0_i32, %arg1 : i32, i32
  }
  func.func @transform_3(%arg0: i32, %arg1: i32, %arg2: i32) -> (i32, i32) {
    %c0_i32 = arith.constant 0 : i32
    %c0_i32_0 = arith.constant 0 : i32
    return %c0_i32, %arg1 : i32, i32
  }
  func.func @transform_4(%arg0: i32, %arg1: i32, %arg2: i32) -> (i32, i32) {
    %c0_i32 = arith.constant 0 : i32
    return %arg0, %arg1 : i32, i32
  }
  func.func @transform_5(%arg0: i32, %arg1: i32, %arg2: i32) -> (i32, i32) {
    %c0_i32 = arith.constant 0 : i32
    return %arg0, %arg1 : i32, i32
  }
}

module attributes {stable_mosaic.version = 11 : i64} {
  func.func @_add_kernel(%arg0: i32, %arg1: memref<8x128xbf16, #tpu.memory_space<vmem>>, %arg2: memref<8x128xbf16, #tpu.memory_space<vmem>>, %arg3: memref<8x128xbf16, #tpu.memory_space<vmem>>) attributes {dimension_semantics = [#tpu.dimension_semantics<parallel>], iteration_bounds = array<i64: 1>, scalar_prefetch = 0 : i64, scratch_operands = 0 : i64, tpu.core_type = #tpu.core_type<tc>, window_params = [{transform_indices = @transform_0, window_bounds = array<i64: 8, 128>}, {transform_indices = @transform_1, window_bounds = array<i64: 8, 128>}, {transform_indices = @transform_2, window_bounds = array<i64: 8, 128>}]} {
    %c0 = arith.constant 0 : index
    %c0_0 = arith.constant 0 : index
    %0 = vector.load %arg1[%c0, %c0_0] : memref<8x128xbf16, #tpu.memory_space<vmem>>, vector<8x128xbf16>
    %1 = arith.extf %0 : vector<8x128xbf16> to vector<8x128xf32>
    %c0_1 = arith.constant 0 : index
    %c0_2 = arith.constant 0 : index
    %2 = vector.load %arg2[%c0_1, %c0_2] : memref<8x128xbf16, #tpu.memory_space<vmem>>, vector<8x128xbf16>
    %3 = arith.extf %2 : vector<8x128xbf16> to vector<8x128xf32>
    %4 = arith.addf %1, %3 : vector<8x128xf32>
    %5 = arith.truncf %4 : vector<8x128xf32> to vector<8x128xbf16>
    %c0_3 = arith.constant 0 : index
    %c0_4 = arith.constant 0 : index
    %6 = vector.load %arg3[%c0_3, %c0_4] : memref<8x128xbf16, #tpu.memory_space<vmem>>, vector<8x128xbf16>
    tpu.vector_store %arg3[%c0_3, %c0_4], %5 {strides = array<i32>} : memref<8x128xbf16, #tpu.memory_space<vmem>>, vector<8x128xbf16>,
    return
  }
  func.func @transform_0(%arg0: i32) -> (i32, i32) {
    %c0_i32 = arith.constant 0 : i32
    %c0_i32_0 = arith.constant 0 : i32
    return %arg0, %c0_i32 : i32, i32
  }
  func.func @transform_1(%arg0: i32) -> (i32, i32) {
    %c0_i32 = arith.constant 0 : i32
    %c0_i32_0 = arith.constant 0 : i32
    return %arg0, %c0_i32 : i32, i32
  }
  func.func @transform_2(%arg0: i32) -> (i32, i32) {
    %c0_i32 = arith.constant 0 : i32
    %c0_i32_0 = arith.constant 0 : i32
    return %arg0, %c0_i32 : i32, i32
  }
}

module attributes {stable_mosaic.version = 11 : i64} {
  func.func @_gemm_affine_kernel(%arg0: i32, %arg1: i32, %arg2: i32, %arg3: memref<8x128xbf16, #tpu.memory_space<vmem>>, %arg4: memref<128x256xbf16, #tpu.memory_space<vmem>>, %arg5: memref<1x256xf32, #tpu.memory_space<vmem>>, %arg6: memref<1x256xf32, #tpu.memory_space<vmem>>, %arg7: memref<8x256xbf16, #tpu.memory_space<vmem>>, %arg8: memref<8x256xf32, #tpu.memory_space<vmem>>) attributes {dimension_semantics = [#tpu.dimension_semantics<parallel>, #tpu.dimension_semantics<parallel>, #tpu.dimension_semantics<arbitrary>], iteration_bounds = array<i64: 1, 1, 9>, scalar_prefetch = 0 : i64, scratch_operands = 1 : i64, tpu.core_type = #tpu.core_type<tc>, window_params = [{transform_indices = @transform_0, window_bounds = array<i64: 8, 128>}, {transform_indices = @transform_1, window_bounds = array<i64: 128, 256>}, {transform_indices = @transform_2, window_bounds = array<i64: 1, 256>}, {transform_indices = @transform_3, window_bounds = array<i64: 1, 256>}, {transform_indices = @transform_4, window_bounds = array<i64: 8, 256>}]} {
    %c0_i32 = arith.constant 0 : i32
    %0 = arith.cmpi eq, %arg2, %c0_i32 : i32
    %1 = arith.extui %0 : i1 to i32
    %c0_i32_0 = arith.constant 0 : i32
    %2 = arith.cmpi ne, %1, %c0_i32_0 : i32
    scf.if %2 {
      %cst_9 = arith.constant 0.000000e+00 : f32
      %12 = vector.broadcast %cst_9 : f32 to vector<8x256xf32>
      %c0_10 = arith.constant 0 : index
      %c0_11 = arith.constant 0 : index
      %13 = vector.load %arg8[%c0_10, %c0_11] : memref<8x256xf32, #tpu.memory_space<vmem>>, vector<8x256xf32>
      tpu.vector_store %arg8[%c0_10, %c0_11], %12 {strides = array<i32>} : memref<8x256xf32, #tpu.memory_space<vmem>>, vector<8x256xf32>,
    } else {
    }
    %c0 = arith.constant 0 : index
    %c0_1 = arith.constant 0 : index
    %3 = vector.load %arg8[%c0, %c0_1] : memref<8x256xf32, #tpu.memory_space<vmem>>, vector<8x256xf32>
    %c0_2 = arith.constant 0 : index
    %c0_3 = arith.constant 0 : index
    %4 = vector.load %arg3[%c0_2, %c0_3] : memref<8x128xbf16, #tpu.memory_space<vmem>>, vector<8x128xbf16>
    %c0_4 = arith.constant 0 : index
    %c0_5 = arith.constant 0 : index
    %5 = vector.load %arg4[%c0_4, %c0_5] : memref<128x256xbf16, #tpu.memory_space<vmem>>, vector<128x256xbf16>
    %cst = arith.constant dense<0.000000e+00> : vector<8x256xf32>
    %6 = tpu.matmul %4, %5, %cst {dimension_numbers = #tpu.dot_dimension_numbers<[1], [0], [0], [1], [0, 0, 1, 1], [], []>} : vector<8x128xbf16>, vector<128x256xbf16>, vector<8x256xf32> -> vector<8x256xf32>
    %7 = arith.addf %3, %6 : vector<8x256xf32>
    %c0_6 = arith.constant 0 : index
    %c0_7 = arith.constant 0 : index
    %8 = vector.load %arg8[%c0_6, %c0_7] : memref<8x256xf32, #tpu.memory_space<vmem>>, vector<8x256xf32>
    tpu.vector_store %arg8[%c0_6, %c0_7], %7 {strides = array<i32>} : memref<8x256xf32, #tpu.memory_space<vmem>>, vector<8x256xf32>,
    %c8_i32 = arith.constant 8 : i32
    %9 = arith.cmpi eq, %arg2, %c8_i32 : i32
    %10 = arith.extui %9 : i1 to i32
    %c0_i32_8 = arith.constant 0 : i32
    %11 = arith.cmpi ne, %10, %c0_i32_8 : i32
    scf.if %11 {
      %c0_9 = arith.constant 0 : index
      %c0_10 = arith.constant 0 : index
      %12 = vector.load %arg8[%c0_9, %c0_10] : memref<8x256xf32, #tpu.memory_space<vmem>>, vector<8x256xf32>
      %c0_11 = arith.constant 0 : index
      %c0_12 = arith.constant 0 : index
      %13 = vector.load %arg5[%c0_11, %c0_12] : memref<1x256xf32, #tpu.memory_space<vmem>>, vector<1x256xf32>
      %14 = vector.broadcast %13 : vector<1x256xf32> to vector<8x256xf32>
      %15 = arith.mulf %12, %14 : vector<8x256xf32>
      %c0_13 = arith.constant 0 : index
      %c0_14 = arith.constant 0 : index
      %16 = vector.load %arg6[%c0_13, %c0_14] : memref<1x256xf32, #tpu.memory_space<vmem>>, vector<1x256xf32>
      %17 = vector.broadcast %16 : vector<1x256xf32> to vector<8x256xf32>
      %18 = arith.addf %15, %17 : vector<8x256xf32>
      %cst_15 = arith.constant 0.000000e+00 : f32
      %19 = vector.broadcast %cst_15 : f32 to vector<8x256xf32>
      %20 = arith.maximumf %18, %19 : vector<8x256xf32>
      %21 = arith.truncf %20 : vector<8x256xf32> to vector<8x256xbf16>
      %c0_16 = arith.constant 0 : index
      %c0_17 = arith.constant 0 : index
      %22 = vector.load %arg7[%c0_16, %c0_17] : memref<8x256xbf16, #tpu.memory_space<vmem>>, vector<8x256xbf16>
      tpu.vector_store %arg7[%c0_16, %c0_17], %21 {strides = array<i32>} : memref<8x256xbf16, #tpu.memory_space<vmem>>, vector<8x256xbf16>,
    } else {
    }
    return
  }
  func.func @transform_0(%arg0: i32, %arg1: i32, %arg2: i32) -> (i32, i32) {
    %c0_i32 = arith.constant 0 : i32
    return %arg0, %arg2 : i32, i32
  }
  func.func @transform_1(%arg0: i32, %arg1: i32, %arg2: i32) -> (i32, i32) {
    %c0_i32 = arith.constant 0 : i32
    return %arg2, %arg1 : i32, i32
  }
  func.func @transform_2(%arg0: i32, %arg1: i32, %arg2: i32) -> (i32, i32) {
    %c0_i32 = arith.constant 0 : i32
    %c0_i32_0 = arith.constant 0 : i32
    return %c0_i32, %arg1 : i32, i32
  }
  func.func @transform_3(%arg0: i32, %arg1: i32, %arg2: i32) -> (i32, i32) {
    %c0_i32 = arith.constant 0 : i32
    %c0_i32_0 = arith.constant 0 : i32
    return %c0_i32, %arg1 : i32, i32
  }
  func.func @transform_4(%arg0: i32, %arg1: i32, %arg2: i32) -> (i32, i32) {
    %c0_i32 = arith.constant 0 : i32
    return %arg0, %arg1 : i32, i32
  }
}

module attributes {stable_mosaic.version = 11 : i64} {
  func.func @_gemm_affine_kernel(%arg0: i32, %arg1: i32, %arg2: i32, %arg3: memref<8x128xbf16, #tpu.memory_space<vmem>>, %arg4: memref<128x256xbf16, #tpu.memory_space<vmem>>, %arg5: memref<1x256xf32, #tpu.memory_space<vmem>>, %arg6: memref<1x256xf32, #tpu.memory_space<vmem>>, %arg7: memref<8x256xbf16, #tpu.memory_space<vmem>>, %arg8: memref<8x256xf32, #tpu.memory_space<vmem>>) attributes {dimension_semantics = [#tpu.dimension_semantics<parallel>, #tpu.dimension_semantics<parallel>, #tpu.dimension_semantics<arbitrary>], iteration_bounds = array<i64: 1, 1, 1>, scalar_prefetch = 0 : i64, scratch_operands = 1 : i64, tpu.core_type = #tpu.core_type<tc>, window_params = [{transform_indices = @transform_0, window_bounds = array<i64: 8, 128>}, {transform_indices = @transform_1, window_bounds = array<i64: 128, 256>}, {transform_indices = @transform_2, window_bounds = array<i64: 1, 256>}, {transform_indices = @transform_3, window_bounds = array<i64: 1, 256>}, {transform_indices = @transform_4, window_bounds = array<i64: 8, 256>}]} {
    %c0_i32 = arith.constant 0 : i32
    %0 = arith.cmpi eq, %arg2, %c0_i32 : i32
    %1 = arith.extui %0 : i1 to i32
    %c0_i32_0 = arith.constant 0 : i32
    %2 = arith.cmpi ne, %1, %c0_i32_0 : i32
    scf.if %2 {
      %cst_10 = arith.constant 0.000000e+00 : f32
      %12 = vector.broadcast %cst_10 : f32 to vector<8x256xf32>
      %c0_11 = arith.constant 0 : index
      %c0_12 = arith.constant 0 : index
      %13 = vector.load %arg8[%c0_11, %c0_12] : memref<8x256xf32, #tpu.memory_space<vmem>>, vector<8x256xf32>
      tpu.vector_store %arg8[%c0_11, %c0_12], %12 {strides = array<i32>} : memref<8x256xf32, #tpu.memory_space<vmem>>, vector<8x256xf32>,
    } else {
    }
    %c0 = arith.constant 0 : index
    %c0_1 = arith.constant 0 : index
    %3 = vector.load %arg8[%c0, %c0_1] : memref<8x256xf32, #tpu.memory_space<vmem>>, vector<8x256xf32>
    %c0_2 = arith.constant 0 : index
    %c0_3 = arith.constant 0 : index
    %4 = vector.load %arg3[%c0_2, %c0_3] : memref<8x128xbf16, #tpu.memory_space<vmem>>, vector<8x128xbf16>
    %c0_4 = arith.constant 0 : index
    %c0_5 = arith.constant 0 : index
    %5 = vector.load %arg4[%c0_4, %c0_5] : memref<128x256xbf16, #tpu.memory_space<vmem>>, vector<128x256xbf16>
    %cst = arith.constant dense<0.000000e+00> : vector<8x256xf32>
    %6 = tpu.matmul %4, %5, %cst {dimension_numbers = #tpu.dot_dimension_numbers<[1], [0], [0], [1], [0, 0, 1, 1], [], []>} : vector<8x128xbf16>, vector<128x256xbf16>, vector<8x256xf32> -> vector<8x256xf32>
    %7 = arith.addf %3, %6 : vector<8x256xf32>
    %c0_6 = arith.constant 0 : index
    %c0_7 = arith.constant 0 : index
    %8 = vector.load %arg8[%c0_6, %c0_7] : memref<8x256xf32, #tpu.memory_space<vmem>>, vector<8x256xf32>
    tpu.vector_store %arg8[%c0_6, %c0_7], %7 {strides = array<i32>} : memref<8x256xf32, #tpu.memory_space<vmem>>, vector<8x256xf32>,
    %c0_i32_8 = arith.constant 0 : i32
    %9 = arith.cmpi eq, %arg2, %c0_i32_8 : i32
    %10 = arith.extui %9 : i1 to i32
    %c0_i32_9 = arith.constant 0 : i32
    %11 = arith.cmpi ne, %10, %c0_i32_9 : i32
    scf.if %11 {
      %c0_10 = arith.constant 0 : index
      %c0_11 = arith.constant 0 : index
      %12 = vector.load %arg8[%c0_10, %c0_11] : memref<8x256xf32, #tpu.memory_space<vmem>>, vector<8x256xf32>
      %c0_12 = arith.constant 0 : index
      %c0_13 = arith.constant 0 : index
      %13 = vector.load %arg5[%c0_12, %c0_13] : memref<1x256xf32, #tpu.memory_space<vmem>>, vector<1x256xf32>
      %14 = vector.broadcast %13 : vector<1x256xf32> to vector<8x256xf32>
      %15 = arith.mulf %12, %14 : vector<8x256xf32>
      %c0_14 = arith.constant 0 : index
      %c0_15 = arith.constant 0 : index
      %16 = vector.load %arg6[%c0_14, %c0_15] : memref<1x256xf32, #tpu.memory_space<vmem>>, vector<1x256xf32>
      %17 = vector.broadcast %16 : vector<1x256xf32> to vector<8x256xf32>
      %18 = arith.addf %15, %17 : vector<8x256xf32>
      %19 = arith.truncf %18 : vector<8x256xf32> to vector<8x256xbf16>
      %c0_16 = arith.constant 0 : index
      %c0_17 = arith.constant 0 : index
      %20 = vector.load %arg7[%c0_16, %c0_17] : memref<8x256xbf16, #tpu.memory_space<vmem>>, vector<8x256xbf16>
      tpu.vector_store %arg7[%c0_16, %c0_17], %19 {strides = array<i32>} : memref<8x256xbf16, #tpu.memory_space<vmem>>, vector<8x256xbf16>,
    } else {
    }
    return
  }
  func.func @transform_0(%arg0: i32, %arg1: i32, %arg2: i32) -> (i32, i32) {
    %c0_i32 = arith.constant 0 : i32
    return %arg0, %arg2 : i32, i32
  }
  func.func @transform_1(%arg0: i32, %arg1: i32, %arg2: i32) -> (i32, i32) {
    %c0_i32 = arith.constant 0 : i32
    return %arg2, %arg1 : i32, i32
  }
  func.func @transform_2(%arg0: i32, %arg1: i32, %arg2: i32) -> (i32, i32) {
    %c0_i32 = arith.constant 0 : i32
    %c0_i32_0 = arith.constant 0 : i32
    return %c0_i32, %arg1 : i32, i32
  }
  func.func @transform_3(%arg0: i32, %arg1: i32, %arg2: i32) -> (i32, i32) {
    %c0_i32 = arith.constant 0 : i32
    %c0_i32_0 = arith.constant 0 : i32
    return %c0_i32, %arg1 : i32, i32
  }
  func.func @transform_4(%arg0: i32, %arg1: i32, %arg2: i32) -> (i32, i32) {
    %c0_i32 = arith.constant 0 : i32
    return %arg0, %arg1 : i32, i32
  }
}

module attributes {stable_mosaic.version = 11 : i64} {
  func.func @_gemm_affine_kernel(%arg0: i32, %arg1: i32, %arg2: i32, %arg3: memref<8x256xbf16, #tpu.memory_space<vmem>>, %arg4: memref<256x256xbf16, #tpu.memory_space<vmem>>, %arg5: memref<1x256xf32, #tpu.memory_space<vmem>>, %arg6: memref<1x256xf32, #tpu.memory_space<vmem>>, %arg7: memref<8x256xbf16, #tpu.memory_space<vmem>>, %arg8: memref<8x256xbf16, #tpu.memory_space<vmem>>, %arg9: memref<8x256xf32, #tpu.memory_space<vmem>>) attributes {dimension_semantics = [#tpu.dimension_semantics<parallel>, #tpu.dimension_semantics<parallel>, #tpu.dimension_semantics<arbitrary>], iteration_bounds = array<i64: 1, 1, 9>, scalar_prefetch = 0 : i64, scratch_operands = 1 : i64, tpu.core_type = #tpu.core_type<tc>, window_params = [{transform_indices = @transform_0, window_bounds = array<i64: 8, 256>}, {transform_indices = @transform_1, window_bounds = array<i64: 256, 256>}, {transform_indices = @transform_2, window_bounds = array<i64: 1, 256>}, {transform_indices = @transform_3, window_bounds = array<i64: 1, 256>}, {transform_indices = @transform_4, window_bounds = array<i64: 8, 256>}, {transform_indices = @transform_5, window_bounds = array<i64: 8, 256>}]} {
    %c0_i32 = arith.constant 0 : i32
    %0 = arith.cmpi eq, %arg2, %c0_i32 : i32
    %1 = arith.extui %0 : i1 to i32
    %c0_i32_0 = arith.constant 0 : i32
    %2 = arith.cmpi ne, %1, %c0_i32_0 : i32
    scf.if %2 {
      %cst_9 = arith.constant 0.000000e+00 : f32
      %12 = vector.broadcast %cst_9 : f32 to vector<8x256xf32>
      %c0_10 = arith.constant 0 : index
      %c0_11 = arith.constant 0 : index
      %13 = vector.load %arg9[%c0_10, %c0_11] : memref<8x256xf32, #tpu.memory_space<vmem>>, vector<8x256xf32>
      tpu.vector_store %arg9[%c0_10, %c0_11], %12 {strides = array<i32>} : memref<8x256xf32, #tpu.memory_space<vmem>>, vector<8x256xf32>,
    } else {
    }
    %c0 = arith.constant 0 : index
    %c0_1 = arith.constant 0 : index
    %3 = vector.load %arg9[%c0, %c0_1] : memref<8x256xf32, #tpu.memory_space<vmem>>, vector<8x256xf32>
    %c0_2 = arith.constant 0 : index
    %c0_3 = arith.constant 0 : index
    %4 = vector.load %arg3[%c0_2, %c0_3] : memref<8x256xbf16, #tpu.memory_space<vmem>>, vector<8x256xbf16>
    %c0_4 = arith.constant 0 : index
    %c0_5 = arith.constant 0 : index
    %5 = vector.load %arg4[%c0_4, %c0_5] : memref<256x256xbf16, #tpu.memory_space<vmem>>, vector<256x256xbf16>
    %cst = arith.constant dense<0.000000e+00> : vector<8x256xf32>
    %6 = tpu.matmul %4, %5, %cst {dimension_numbers = #tpu.dot_dimension_numbers<[1], [0], [0], [1], [0, 0, 1, 1], [], []>} : vector<8x256xbf16>, vector<256x256xbf16>, vector<8x256xf32> -> vector<8x256xf32>
    %7 = arith.addf %3, %6 : vector<8x256xf32>
    %c0_6 = arith.constant 0 : index
    %c0_7 = arith.constant 0 : index
    %8 = vector.load %arg9[%c0_6, %c0_7] : memref<8x256xf32, #tpu.memory_space<vmem>>, vector<8x256xf32>
    tpu.vector_store %arg9[%c0_6, %c0_7], %7 {strides = array<i32>} : memref<8x256xf32, #tpu.memory_space<vmem>>, vector<8x256xf32>,
    %c8_i32 = arith.constant 8 : i32
    %9 = arith.cmpi eq, %arg2, %c8_i32 : i32
    %10 = arith.extui %9 : i1 to i32
    %c0_i32_8 = arith.constant 0 : i32
    %11 = arith.cmpi ne, %10, %c0_i32_8 : i32
    scf.if %11 {
      %c0_9 = arith.constant 0 : index
      %c0_10 = arith.constant 0 : index
      %12 = vector.load %arg9[%c0_9, %c0_10] : memref<8x256xf32, #tpu.memory_space<vmem>>, vector<8x256xf32>
      %c0_11 = arith.constant 0 : index
      %c0_12 = arith.constant 0 : index
      %13 = vector.load %arg5[%c0_11, %c0_12] : memref<1x256xf32, #tpu.memory_space<vmem>>, vector<1x256xf32>
      %14 = vector.broadcast %13 : vector<1x256xf32> to vector<8x256xf32>
      %15 = arith.mulf %12, %14 : vector<8x256xf32>
      %c0_13 = arith.constant 0 : index
      %c0_14 = arith.constant 0 : index
      %16 = vector.load %arg6[%c0_13, %c0_14] : memref<1x256xf32, #tpu.memory_space<vmem>>, vector<1x256xf32>
      %17 = vector.broadcast %16 : vector<1x256xf32> to vector<8x256xf32>
      %18 = arith.addf %15, %17 : vector<8x256xf32>
      %c0_15 = arith.constant 0 : index
      %c0_16 = arith.constant 0 : index
      %19 = vector.load %arg7[%c0_15, %c0_16] : memref<8x256xbf16, #tpu.memory_space<vmem>>, vector<8x256xbf16>
      %20 = arith.extf %19 : vector<8x256xbf16> to vector<8x256xf32>
      %21 = arith.addf %18, %20 : vector<8x256xf32>
      %cst_17 = arith.constant 0.000000e+00 : f32
      %22 = vector.broadcast %cst_17 : f32 to vector<8x256xf32>
      %23 = arith.maximumf %21, %22 : vector<8x256xf32>
      %24 = arith.truncf %23 : vector<8x256xf32> to vector<8x256xbf16>
      %c0_18 = arith.constant 0 : index
      %c0_19 = arith.constant 0 : index
      %25 = vector.load %arg8[%c0_18, %c0_19] : memref<8x256xbf16, #tpu.memory_space<vmem>>, vector<8x256xbf16>
      tpu.vector_store %arg8[%c0_18, %c0_19], %24 {strides = array<i32>} : memref<8x256xbf16, #tpu.memory_space<vmem>>, vector<8x256xbf16>,
    } else {
    }
    return
  }
  func.func @transform_0(%arg0: i32, %arg1: i32, %arg2: i32) -> (i32, i32) {
    %c0_i32 = arith.constant 0 : i32
    return %arg0, %arg2 : i32, i32
  }
  func.func @transform_1(%arg0: i32, %arg1: i32, %arg2: i32) -> (i32, i32) {
    %c0_i32 = arith.constant 0 : i32
    return %arg2, %arg1 : i32, i32
  }
  func.func @transform_2(%arg0: i32, %arg1: i32, %arg2: i32) -> (i32, i32) {
    %c0_i32 = arith.constant 0 : i32
    %c0_i32_0 = arith.constant 0 : i32
    return %c0_i32, %arg1 : i32, i32
  }
  func.func @transform_3(%arg0: i32, %arg1: i32, %arg2: i32) -> (i32, i32) {
    %c0_i32 = arith.constant 0 : i32
    %c0_i32_0 = arith.constant 0 : i32
    return %c0_i32, %arg1 : i32, i32
  }
  func.func @transform_4(%arg0: i32, %arg1: i32, %arg2: i32) -> (i32, i32) {
    %c0_i32 = arith.constant 0 : i32
    return %arg0, %arg1 : i32, i32
  }
  func.func @transform_5(%arg0: i32, %arg1: i32, %arg2: i32) -> (i32, i32) {
    %c0_i32 = arith.constant 0 : i32
    return %arg0, %arg1 : i32, i32
  }
}

module attributes {stable_mosaic.version = 11 : i64} {
  func.func @_gemm_affine_kernel(%arg0: i32, %arg1: i32, %arg2: i32, %arg3: memref<8x256xbf16, #tpu.memory_space<vmem>>, %arg4: memref<256x256xbf16, #tpu.memory_space<vmem>>, %arg5: memref<1x256xf32, #tpu.memory_space<vmem>>, %arg6: memref<1x256xf32, #tpu.memory_space<vmem>>, %arg7: memref<8x256xbf16, #tpu.memory_space<vmem>>, %arg8: memref<8x256xf32, #tpu.memory_space<vmem>>) attributes {dimension_semantics = [#tpu.dimension_semantics<parallel>, #tpu.dimension_semantics<parallel>, #tpu.dimension_semantics<arbitrary>], iteration_bounds = array<i64: 1, 1, 9>, scalar_prefetch = 0 : i64, scratch_operands = 1 : i64, tpu.core_type = #tpu.core_type<tc>, window_params = [{transform_indices = @transform_0, window_bounds = array<i64: 8, 256>}, {transform_indices = @transform_1, window_bounds = array<i64: 256, 256>}, {transform_indices = @transform_2, window_bounds = array<i64: 1, 256>}, {transform_indices = @transform_3, window_bounds = array<i64: 1, 256>}, {transform_indices = @transform_4, window_bounds = array<i64: 8, 256>}]} {
    %c0_i32 = arith.constant 0 : i32
    %0 = arith.cmpi eq, %arg2, %c0_i32 : i32
    %1 = arith.extui %0 : i1 to i32
    %c0_i32_0 = arith.constant 0 : i32
    %2 = arith.cmpi ne, %1, %c0_i32_0 : i32
    scf.if %2 {
      %cst_9 = arith.constant 0.000000e+00 : f32
      %12 = vector.broadcast %cst_9 : f32 to vector<8x256xf32>
      %c0_10 = arith.constant 0 : index
      %c0_11 = arith.constant 0 : index
      %13 = vector.load %arg8[%c0_10, %c0_11] : memref<8x256xf32, #tpu.memory_space<vmem>>, vector<8x256xf32>
      tpu.vector_store %arg8[%c0_10, %c0_11], %12 {strides = array<i32>} : memref<8x256xf32, #tpu.memory_space<vmem>>, vector<8x256xf32>,
    } else {
    }
    %c0 = arith.constant 0 : index
    %c0_1 = arith.constant 0 : index
    %3 = vector.load %arg8[%c0, %c0_1] : memref<8x256xf32, #tpu.memory_space<vmem>>, vector<8x256xf32>
    %c0_2 = arith.constant 0 : index
    %c0_3 = arith.constant 0 : index
    %4 = vector.load %arg3[%c0_2, %c0_3] : memref<8x256xbf16, #tpu.memory_space<vmem>>, vector<8x256xbf16>
    %c0_4 = arith.constant 0 : index
    %c0_5 = arith.constant 0 : index
    %5 = vector.load %arg4[%c0_4, %c0_5] : memref<256x256xbf16, #tpu.memory_space<vmem>>, vector<256x256xbf16>
    %cst = arith.constant dense<0.000000e+00> : vector<8x256xf32>
    %6 = tpu.matmul %4, %5, %cst {dimension_numbers = #tpu.dot_dimension_numbers<[1], [0], [0], [1], [0, 0, 1, 1], [], []>} : vector<8x256xbf16>, vector<256x256xbf16>, vector<8x256xf32> -> vector<8x256xf32>
    %7 = arith.addf %3, %6 : vector<8x256xf32>
    %c0_6 = arith.constant 0 : index
    %c0_7 = arith.constant 0 : index
    %8 = vector.load %arg8[%c0_6, %c0_7] : memref<8x256xf32, #tpu.memory_space<vmem>>, vector<8x256xf32>
    tpu.vector_store %arg8[%c0_6, %c0_7], %7 {strides = array<i32>} : memref<8x256xf32, #tpu.memory_space<vmem>>, vector<8x256xf32>,
    %c8_i32 = arith.constant 8 : i32
    %9 = arith.cmpi eq, %arg2, %c8_i32 : i32
    %10 = arith.extui %9 : i1 to i32
    %c0_i32_8 = arith.constant 0 : i32
    %11 = arith.cmpi ne, %10, %c0_i32_8 : i32
    scf.if %11 {
      %c0_9 = arith.constant 0 : index
      %c0_10 = arith.constant 0 : index
      %12 = vector.load %arg8[%c0_9, %c0_10] : memref<8x256xf32, #tpu.memory_space<vmem>>, vector<8x256xf32>
      %c0_11 = arith.constant 0 : index
      %c0_12 = arith.constant 0 : index
      %13 = vector.load %arg5[%c0_11, %c0_12] : memref<1x256xf32, #tpu.memory_space<vmem>>, vector<1x256xf32>
      %14 = vector.broadcast %13 : vector<1x256xf32> to vector<8x256xf32>
      %15 = arith.mulf %12, %14 : vector<8x256xf32>
      %c0_13 = arith.constant 0 : index
      %c0_14 = arith.constant 0 : index
      %16 = vector.load %arg6[%c0_13, %c0_14] : memref<1x256xf32, #tpu.memory_space<vmem>>, vector<1x256xf32>
      %17 = vector.broadcast %16 : vector<1x256xf32> to vector<8x256xf32>
      %18 = arith.addf %15, %17 : vector<8x256xf32>
      %cst_15 = arith.constant 0.000000e+00 : f32
      %19 = vector.broadcast %cst_15 : f32 to vector<8x256xf32>
      %20 = arith.maximumf %18, %19 : vector<8x256xf32>
      %21 = arith.truncf %20 : vector<8x256xf32> to vector<8x256xbf16>
      %c0_16 = arith.constant 0 : index
      %c0_17 = arith.constant 0 : index
      %22 = vector.load %arg7[%c0_16, %c0_17] : memref<8x256xbf16, #tpu.memory_space<vmem>>, vector<8x256xbf16>
      tpu.vector_store %arg7[%c0_16, %c0_17], %21 {strides = array<i32>} : memref<8x256xbf16, #tpu.memory_space<vmem>>, vector<8x256xbf16>,
    } else {
    }
    return
  }
  func.func @transform_0(%arg0: i32, %arg1: i32, %arg2: i32) -> (i32, i32) {
    %c0_i32 = arith.constant 0 : i32
    return %arg0, %arg2 : i32, i32
  }
  func.func @transform_1(%arg0: i32, %arg1: i32, %arg2: i32) -> (i32, i32) {
    %c0_i32 = arith.constant 0 : i32
    return %arg2, %arg1 : i32, i32
  }
  func.func @transform_2(%arg0: i32, %arg1: i32, %arg2: i32) -> (i32, i32) {
    %c0_i32 = arith.constant 0 : i32
    %c0_i32_0 = arith.constant 0 : i32
    return %c0_i32, %arg1 : i32, i32
  }
  func.func @transform_3(%arg0: i32, %arg1: i32, %arg2: i32) -> (i32, i32) {
    %c0_i32 = arith.constant 0 : i32
    %c0_i32_0 = arith.constant 0 : i32
    return %c0_i32, %arg1 : i32, i32
  }
  func.func @transform_4(%arg0: i32, %arg1: i32, %arg2: i32) -> (i32, i32) {
    %c0_i32 = arith.constant 0 : i32
    return %arg0, %arg1 : i32, i32
  }
}

module attributes {stable_mosaic.version = 11 : i64} {
  func.func @_add_kernel(%arg0: i32, %arg1: memref<8x256xbf16, #tpu.memory_space<vmem>>, %arg2: memref<8x256xbf16, #tpu.memory_space<vmem>>, %arg3: memref<8x256xbf16, #tpu.memory_space<vmem>>) attributes {dimension_semantics = [#tpu.dimension_semantics<parallel>], iteration_bounds = array<i64: 1>, scalar_prefetch = 0 : i64, scratch_operands = 0 : i64, tpu.core_type = #tpu.core_type<tc>, window_params = [{transform_indices = @transform_0, window_bounds = array<i64: 8, 256>}, {transform_indices = @transform_1, window_bounds = array<i64: 8, 256>}, {transform_indices = @transform_2, window_bounds = array<i64: 8, 256>}]} {
    %c0 = arith.constant 0 : index
    %c0_0 = arith.constant 0 : index
    %0 = vector.load %arg1[%c0, %c0_0] : memref<8x256xbf16, #tpu.memory_space<vmem>>, vector<8x256xbf16>
    %1 = arith.extf %0 : vector<8x256xbf16> to vector<8x256xf32>
    %c0_1 = arith.constant 0 : index
    %c0_2 = arith.constant 0 : index
    %2 = vector.load %arg2[%c0_1, %c0_2] : memref<8x256xbf16, #tpu.memory_space<vmem>>, vector<8x256xbf16>
    %3 = arith.extf %2 : vector<8x256xbf16> to vector<8x256xf32>
    %4 = arith.addf %1, %3 : vector<8x256xf32>
    %5 = arith.truncf %4 : vector<8x256xf32> to vector<8x256xbf16>
    %c0_3 = arith.constant 0 : index
    %c0_4 = arith.constant 0 : index
    %6 = vector.load %arg3[%c0_3, %c0_4] : memref<8x256xbf16, #tpu.memory_space<vmem>>, vector<8x256xbf16>
    tpu.vector_store %arg3[%c0_3, %c0_4], %5 {strides = array<i32>} : memref<8x256xbf16, #tpu.memory_space<vmem>>, vector<8x256xbf16>,
    return
  }
  func.func @transform_0(%arg0: i32) -> (i32, i32) {
    %c0_i32 = arith.constant 0 : i32
    %c0_i32_0 = arith.constant 0 : i32
    return %arg0, %c0_i32 : i32, i32
  }
  func.func @transform_1(%arg0: i32) -> (i32, i32) {
    %c0_i32 = arith.constant 0 : i32
    %c0_i32_0 = arith.constant 0 : i32
    return %arg0, %c0_i32 : i32, i32
  }
  func.func @transform_2(%arg0: i32) -> (i32, i32) {
    %c0_i32 = arith.constant 0 : i32
    %c0_i32_0 = arith.constant 0 : i32
    return %arg0, %c0_i32 : i32, i32
  }
}

module attributes {stable_mosaic.version = 11 : i64} {
  func.func @_gemm_affine_kernel(%arg0: i32, %arg1: i32, %arg2: i32, %arg3: memref<8x256xbf16, #tpu.memory_space<vmem>>, %arg4: memref<256x256xbf16, #tpu.memory_space<vmem>>, %arg5: memref<1x256xf32, #tpu.memory_space<vmem>>, %arg6: memref<1x256xf32, #tpu.memory_space<vmem>>, %arg7: memref<8x256xbf16, #tpu.memory_space<vmem>>, %arg8: memref<8x256xf32, #tpu.memory_space<vmem>>) attributes {dimension_semantics = [#tpu.dimension_semantics<parallel>, #tpu.dimension_semantics<parallel>, #tpu.dimension_semantics<arbitrary>], iteration_bounds = array<i64: 1, 2, 9>, scalar_prefetch = 0 : i64, scratch_operands = 1 : i64, tpu.core_type = #tpu.core_type<tc>, window_params = [{transform_indices = @transform_0, window_bounds = array<i64: 8, 256>}, {transform_indices = @transform_1, window_bounds = array<i64: 256, 256>}, {transform_indices = @transform_2, window_bounds = array<i64: 1, 256>}, {transform_indices = @transform_3, window_bounds = array<i64: 1, 256>}, {transform_indices = @transform_4, window_bounds = array<i64: 8, 256>}]} {
    %c0_i32 = arith.constant 0 : i32
    %0 = arith.cmpi eq, %arg2, %c0_i32 : i32
    %1 = arith.extui %0 : i1 to i32
    %c0_i32_0 = arith.constant 0 : i32
    %2 = arith.cmpi ne, %1, %c0_i32_0 : i32
    scf.if %2 {
      %cst_9 = arith.constant 0.000000e+00 : f32
      %12 = vector.broadcast %cst_9 : f32 to vector<8x256xf32>
      %c0_10 = arith.constant 0 : index
      %c0_11 = arith.constant 0 : index
      %13 = vector.load %arg8[%c0_10, %c0_11] : memref<8x256xf32, #tpu.memory_space<vmem>>, vector<8x256xf32>
      tpu.vector_store %arg8[%c0_10, %c0_11], %12 {strides = array<i32>} : memref<8x256xf32, #tpu.memory_space<vmem>>, vector<8x256xf32>,
    } else {
    }
    %c0 = arith.constant 0 : index
    %c0_1 = arith.constant 0 : index
    %3 = vector.load %arg8[%c0, %c0_1] : memref<8x256xf32, #tpu.memory_space<vmem>>, vector<8x256xf32>
    %c0_2 = arith.constant 0 : index
    %c0_3 = arith.constant 0 : index
    %4 = vector.load %arg3[%c0_2, %c0_3] : memref<8x256xbf16, #tpu.memory_space<vmem>>, vector<8x256xbf16>
    %c0_4 = arith.constant 0 : index
    %c0_5 = arith.constant 0 : index
    %5 = vector.load %arg4[%c0_4, %c0_5] : memref<256x256xbf16, #tpu.memory_space<vmem>>, vector<256x256xbf16>
    %cst = arith.constant dense<0.000000e+00> : vector<8x256xf32>
    %6 = tpu.matmul %4, %5, %cst {dimension_numbers = #tpu.dot_dimension_numbers<[1], [0], [0], [1], [0, 0, 1, 1], [], []>} : vector<8x256xbf16>, vector<256x256xbf16>, vector<8x256xf32> -> vector<8x256xf32>
    %7 = arith.addf %3, %6 : vector<8x256xf32>
    %c0_6 = arith.constant 0 : index
    %c0_7 = arith.constant 0 : index
    %8 = vector.load %arg8[%c0_6, %c0_7] : memref<8x256xf32, #tpu.memory_space<vmem>>, vector<8x256xf32>
    tpu.vector_store %arg8[%c0_6, %c0_7], %7 {strides = array<i32>} : memref<8x256xf32, #tpu.memory_space<vmem>>, vector<8x256xf32>,
    %c8_i32 = arith.constant 8 : i32
    %9 = arith.cmpi eq, %arg2, %c8_i32 : i32
    %10 = arith.extui %9 : i1 to i32
    %c0_i32_8 = arith.constant 0 : i32
    %11 = arith.cmpi ne, %10, %c0_i32_8 : i32
    scf.if %11 {
      %c0_9 = arith.constant 0 : index
      %c0_10 = arith.constant 0 : index
      %12 = vector.load %arg8[%c0_9, %c0_10] : memref<8x256xf32, #tpu.memory_space<vmem>>, vector<8x256xf32>
      %c0_11 = arith.constant 0 : index
      %c0_12 = arith.constant 0 : index
      %13 = vector.load %arg5[%c0_11, %c0_12] : memref<1x256xf32, #tpu.memory_space<vmem>>, vector<1x256xf32>
      %14 = vector.broadcast %13 : vector<1x256xf32> to vector<8x256xf32>
      %15 = arith.mulf %12, %14 : vector<8x256xf32>
      %c0_13 = arith.constant 0 : index
      %c0_14 = arith.constant 0 : index
      %16 = vector.load %arg6[%c0_13, %c0_14] : memref<1x256xf32, #tpu.memory_space<vmem>>, vector<1x256xf32>
      %17 = vector.broadcast %16 : vector<1x256xf32> to vector<8x256xf32>
      %18 = arith.addf %15, %17 : vector<8x256xf32>
      %cst_15 = arith.constant 0.000000e+00 : f32
      %19 = vector.broadcast %cst_15 : f32 to vector<8x256xf32>
      %20 = arith.maximumf %18, %19 : vector<8x256xf32>
      %21 = arith.truncf %20 : vector<8x256xf32> to vector<8x256xbf16>
      %c0_16 = arith.constant 0 : index
      %c0_17 = arith.constant 0 : index
      %22 = vector.load %arg7[%c0_16, %c0_17] : memref<8x256xbf16, #tpu.memory_space<vmem>>, vector<8x256xbf16>
      tpu.vector_store %arg7[%c0_16, %c0_17], %21 {strides = array<i32>} : memref<8x256xbf16, #tpu.memory_space<vmem>>, vector<8x256xbf16>,
    } else {
    }
    return
  }
  func.func @transform_0(%arg0: i32, %arg1: i32, %arg2: i32) -> (i32, i32) {
    %c0_i32 = arith.constant 0 : i32
    return %arg0, %arg2 : i32, i32
  }
  func.func @transform_1(%arg0: i32, %arg1: i32, %arg2: i32) -> (i32, i32) {
    %c0_i32 = arith.constant 0 : i32
    return %arg2, %arg1 : i32, i32
  }
  func.func @transform_2(%arg0: i32, %arg1: i32, %arg2: i32) -> (i32, i32) {
    %c0_i32 = arith.constant 0 : i32
    %c0_i32_0 = arith.constant 0 : i32
    return %c0_i32, %arg1 : i32, i32
  }
  func.func @transform_3(%arg0: i32, %arg1: i32, %arg2: i32) -> (i32, i32) {
    %c0_i32 = arith.constant 0 : i32
    %c0_i32_0 = arith.constant 0 : i32
    return %c0_i32, %arg1 : i32, i32
  }
  func.func @transform_4(%arg0: i32, %arg1: i32, %arg2: i32) -> (i32, i32) {
    %c0_i32 = arith.constant 0 : i32
    return %arg0, %arg1 : i32, i32
  }
}

module attributes {stable_mosaic.version = 11 : i64} {
  func.func @_gemm_affine_kernel(%arg0: i32, %arg1: i32, %arg2: i32, %arg3: memref<8x256xbf16, #tpu.memory_space<vmem>>, %arg4: memref<256x256xbf16, #tpu.memory_space<vmem>>, %arg5: memref<1x256xf32, #tpu.memory_space<vmem>>, %arg6: memref<1x256xf32, #tpu.memory_space<vmem>>, %arg7: memref<8x256xbf16, #tpu.memory_space<vmem>>, %arg8: memref<8x256xf32, #tpu.memory_space<vmem>>) attributes {dimension_semantics = [#tpu.dimension_semantics<parallel>, #tpu.dimension_semantics<parallel>, #tpu.dimension_semantics<arbitrary>], iteration_bounds = array<i64: 1, 2, 1>, scalar_prefetch = 0 : i64, scratch_operands = 1 : i64, tpu.core_type = #tpu.core_type<tc>, window_params = [{transform_indices = @transform_0, window_bounds = array<i64: 8, 256>}, {transform_indices = @transform_1, window_bounds = array<i64: 256, 256>}, {transform_indices = @transform_2, window_bounds = array<i64: 1, 256>}, {transform_indices = @transform_3, window_bounds = array<i64: 1, 256>}, {transform_indices = @transform_4, window_bounds = array<i64: 8, 256>}]} {
    %c0_i32 = arith.constant 0 : i32
    %0 = arith.cmpi eq, %arg2, %c0_i32 : i32
    %1 = arith.extui %0 : i1 to i32
    %c0_i32_0 = arith.constant 0 : i32
    %2 = arith.cmpi ne, %1, %c0_i32_0 : i32
    scf.if %2 {
      %cst_10 = arith.constant 0.000000e+00 : f32
      %12 = vector.broadcast %cst_10 : f32 to vector<8x256xf32>
      %c0_11 = arith.constant 0 : index
      %c0_12 = arith.constant 0 : index
      %13 = vector.load %arg8[%c0_11, %c0_12] : memref<8x256xf32, #tpu.memory_space<vmem>>, vector<8x256xf32>
      tpu.vector_store %arg8[%c0_11, %c0_12], %12 {strides = array<i32>} : memref<8x256xf32, #tpu.memory_space<vmem>>, vector<8x256xf32>,
    } else {
    }
    %c0 = arith.constant 0 : index
    %c0_1 = arith.constant 0 : index
    %3 = vector.load %arg8[%c0, %c0_1] : memref<8x256xf32, #tpu.memory_space<vmem>>, vector<8x256xf32>
    %c0_2 = arith.constant 0 : index
    %c0_3 = arith.constant 0 : index
    %4 = vector.load %arg3[%c0_2, %c0_3] : memref<8x256xbf16, #tpu.memory_space<vmem>>, vector<8x256xbf16>
    %c0_4 = arith.constant 0 : index
    %c0_5 = arith.constant 0 : index
    %5 = vector.load %arg4[%c0_4, %c0_5] : memref<256x256xbf16, #tpu.memory_space<vmem>>, vector<256x256xbf16>
    %cst = arith.constant dense<0.000000e+00> : vector<8x256xf32>
    %6 = tpu.matmul %4, %5, %cst {dimension_numbers = #tpu.dot_dimension_numbers<[1], [0], [0], [1], [0, 0, 1, 1], [], []>} : vector<8x256xbf16>, vector<256x256xbf16>, vector<8x256xf32> -> vector<8x256xf32>
    %7 = arith.addf %3, %6 : vector<8x256xf32>
    %c0_6 = arith.constant 0 : index
    %c0_7 = arith.constant 0 : index
    %8 = vector.load %arg8[%c0_6, %c0_7] : memref<8x256xf32, #tpu.memory_space<vmem>>, vector<8x256xf32>
    tpu.vector_store %arg8[%c0_6, %c0_7], %7 {strides = array<i32>} : memref<8x256xf32, #tpu.memory_space<vmem>>, vector<8x256xf32>,
    %c0_i32_8 = arith.constant 0 : i32
    %9 = arith.cmpi eq, %arg2, %c0_i32_8 : i32
    %10 = arith.extui %9 : i1 to i32
    %c0_i32_9 = arith.constant 0 : i32
    %11 = arith.cmpi ne, %10, %c0_i32_9 : i32
    scf.if %11 {
      %c0_10 = arith.constant 0 : index
      %c0_11 = arith.constant 0 : index
      %12 = vector.load %arg8[%c0_10, %c0_11] : memref<8x256xf32, #tpu.memory_space<vmem>>, vector<8x256xf32>
      %c0_12 = arith.constant 0 : index
      %c0_13 = arith.constant 0 : index
      %13 = vector.load %arg5[%c0_12, %c0_13] : memref<1x256xf32, #tpu.memory_space<vmem>>, vector<1x256xf32>
      %14 = vector.broadcast %13 : vector<1x256xf32> to vector<8x256xf32>
      %15 = arith.mulf %12, %14 : vector<8x256xf32>
      %c0_14 = arith.constant 0 : index
      %c0_15 = arith.constant 0 : index
      %16 = vector.load %arg6[%c0_14, %c0_15] : memref<1x256xf32, #tpu.memory_space<vmem>>, vector<1x256xf32>
      %17 = vector.broadcast %16 : vector<1x256xf32> to vector<8x256xf32>
      %18 = arith.addf %15, %17 : vector<8x256xf32>
      %19 = arith.truncf %18 : vector<8x256xf32> to vector<8x256xbf16>
      %c0_16 = arith.constant 0 : index
      %c0_17 = arith.constant 0 : index
      %20 = vector.load %arg7[%c0_16, %c0_17] : memref<8x256xbf16, #tpu.memory_space<vmem>>, vector<8x256xbf16>
      tpu.vector_store %arg7[%c0_16, %c0_17], %19 {strides = array<i32>} : memref<8x256xbf16, #tpu.memory_space<vmem>>, vector<8x256xbf16>,
    } else {
    }
    return
  }
  func.func @transform_0(%arg0: i32, %arg1: i32, %arg2: i32) -> (i32, i32) {
    %c0_i32 = arith.constant 0 : i32
    return %arg0, %arg2 : i32, i32
  }
  func.func @transform_1(%arg0: i32, %arg1: i32, %arg2: i32) -> (i32, i32) {
    %c0_i32 = arith.constant 0 : i32
    return %arg2, %arg1 : i32, i32
  }
  func.func @transform_2(%arg0: i32, %arg1: i32, %arg2: i32) -> (i32, i32) {
    %c0_i32 = arith.constant 0 : i32
    %c0_i32_0 = arith.constant 0 : i32
    return %c0_i32, %arg1 : i32, i32
  }
  func.func @transform_3(%arg0: i32, %arg1: i32, %arg2: i32) -> (i32, i32) {
    %c0_i32 = arith.constant 0 : i32
    %c0_i32_0 = arith.constant 0 : i32
    return %c0_i32, %arg1 : i32, i32
  }
  func.func @transform_4(%arg0: i32, %arg1: i32, %arg2: i32) -> (i32, i32) {
    %c0_i32 = arith.constant 0 : i32
    return %arg0, %arg1 : i32, i32
  }
}

module attributes {stable_mosaic.version = 11 : i64} {
  func.func @_gemm_affine_kernel(%arg0: i32, %arg1: i32, %arg2: i32, %arg3: memref<8x512xbf16, #tpu.memory_space<vmem>>, %arg4: memref<512x256xbf16, #tpu.memory_space<vmem>>, %arg5: memref<1x256xf32, #tpu.memory_space<vmem>>, %arg6: memref<1x256xf32, #tpu.memory_space<vmem>>, %arg7: memref<8x256xbf16, #tpu.memory_space<vmem>>, %arg8: memref<8x256xbf16, #tpu.memory_space<vmem>>, %arg9: memref<8x256xf32, #tpu.memory_space<vmem>>) attributes {dimension_semantics = [#tpu.dimension_semantics<parallel>, #tpu.dimension_semantics<parallel>, #tpu.dimension_semantics<arbitrary>], iteration_bounds = array<i64: 1, 2, 9>, scalar_prefetch = 0 : i64, scratch_operands = 1 : i64, tpu.core_type = #tpu.core_type<tc>, window_params = [{transform_indices = @transform_0, window_bounds = array<i64: 8, 512>}, {transform_indices = @transform_1, window_bounds = array<i64: 512, 256>}, {transform_indices = @transform_2, window_bounds = array<i64: 1, 256>}, {transform_indices = @transform_3, window_bounds = array<i64: 1, 256>}, {transform_indices = @transform_4, window_bounds = array<i64: 8, 256>}, {transform_indices = @transform_5, window_bounds = array<i64: 8, 256>}]} {
    %c0_i32 = arith.constant 0 : i32
    %0 = arith.cmpi eq, %arg2, %c0_i32 : i32
    %1 = arith.extui %0 : i1 to i32
    %c0_i32_0 = arith.constant 0 : i32
    %2 = arith.cmpi ne, %1, %c0_i32_0 : i32
    scf.if %2 {
      %cst_9 = arith.constant 0.000000e+00 : f32
      %12 = vector.broadcast %cst_9 : f32 to vector<8x256xf32>
      %c0_10 = arith.constant 0 : index
      %c0_11 = arith.constant 0 : index
      %13 = vector.load %arg9[%c0_10, %c0_11] : memref<8x256xf32, #tpu.memory_space<vmem>>, vector<8x256xf32>
      tpu.vector_store %arg9[%c0_10, %c0_11], %12 {strides = array<i32>} : memref<8x256xf32, #tpu.memory_space<vmem>>, vector<8x256xf32>,
    } else {
    }
    %c0 = arith.constant 0 : index
    %c0_1 = arith.constant 0 : index
    %3 = vector.load %arg9[%c0, %c0_1] : memref<8x256xf32, #tpu.memory_space<vmem>>, vector<8x256xf32>
    %c0_2 = arith.constant 0 : index
    %c0_3 = arith.constant 0 : index
    %4 = vector.load %arg3[%c0_2, %c0_3] : memref<8x512xbf16, #tpu.memory_space<vmem>>, vector<8x512xbf16>
    %c0_4 = arith.constant 0 : index
    %c0_5 = arith.constant 0 : index
    %5 = vector.load %arg4[%c0_4, %c0_5] : memref<512x256xbf16, #tpu.memory_space<vmem>>, vector<512x256xbf16>
    %cst = arith.constant dense<0.000000e+00> : vector<8x256xf32>
    %6 = tpu.matmul %4, %5, %cst {dimension_numbers = #tpu.dot_dimension_numbers<[1], [0], [0], [1], [0, 0, 1, 1], [], []>} : vector<8x512xbf16>, vector<512x256xbf16>, vector<8x256xf32> -> vector<8x256xf32>
    %7 = arith.addf %3, %6 : vector<8x256xf32>
    %c0_6 = arith.constant 0 : index
    %c0_7 = arith.constant 0 : index
    %8 = vector.load %arg9[%c0_6, %c0_7] : memref<8x256xf32, #tpu.memory_space<vmem>>, vector<8x256xf32>
    tpu.vector_store %arg9[%c0_6, %c0_7], %7 {strides = array<i32>} : memref<8x256xf32, #tpu.memory_space<vmem>>, vector<8x256xf32>,
    %c8_i32 = arith.constant 8 : i32
    %9 = arith.cmpi eq, %arg2, %c8_i32 : i32
    %10 = arith.extui %9 : i1 to i32
    %c0_i32_8 = arith.constant 0 : i32
    %11 = arith.cmpi ne, %10, %c0_i32_8 : i32
    scf.if %11 {
      %c0_9 = arith.constant 0 : index
      %c0_10 = arith.constant 0 : index
      %12 = vector.load %arg9[%c0_9, %c0_10] : memref<8x256xf32, #tpu.memory_space<vmem>>, vector<8x256xf32>
      %c0_11 = arith.constant 0 : index
      %c0_12 = arith.constant 0 : index
      %13 = vector.load %arg5[%c0_11, %c0_12] : memref<1x256xf32, #tpu.memory_space<vmem>>, vector<1x256xf32>
      %14 = vector.broadcast %13 : vector<1x256xf32> to vector<8x256xf32>
      %15 = arith.mulf %12, %14 : vector<8x256xf32>
      %c0_13 = arith.constant 0 : index
      %c0_14 = arith.constant 0 : index
      %16 = vector.load %arg6[%c0_13, %c0_14] : memref<1x256xf32, #tpu.memory_space<vmem>>, vector<1x256xf32>
      %17 = vector.broadcast %16 : vector<1x256xf32> to vector<8x256xf32>
      %18 = arith.addf %15, %17 : vector<8x256xf32>
      %c0_15 = arith.constant 0 : index
      %c0_16 = arith.constant 0 : index
      %19 = vector.load %arg7[%c0_15, %c0_16] : memref<8x256xbf16, #tpu.memory_space<vmem>>, vector<8x256xbf16>
      %20 = arith.extf %19 : vector<8x256xbf16> to vector<8x256xf32>
      %21 = arith.addf %18, %20 : vector<8x256xf32>
      %cst_17 = arith.constant 0.000000e+00 : f32
      %22 = vector.broadcast %cst_17 : f32 to vector<8x256xf32>
      %23 = arith.maximumf %21, %22 : vector<8x256xf32>
      %24 = arith.truncf %23 : vector<8x256xf32> to vector<8x256xbf16>
      %c0_18 = arith.constant 0 : index
      %c0_19 = arith.constant 0 : index
      %25 = vector.load %arg8[%c0_18, %c0_19] : memref<8x256xbf16, #tpu.memory_space<vmem>>, vector<8x256xbf16>
      tpu.vector_store %arg8[%c0_18, %c0_19], %24 {strides = array<i32>} : memref<8x256xbf16, #tpu.memory_space<vmem>>, vector<8x256xbf16>,
    } else {
    }
    return
  }
  func.func @transform_0(%arg0: i32, %arg1: i32, %arg2: i32) -> (i32, i32) {
    %c0_i32 = arith.constant 0 : i32
    return %arg0, %arg2 : i32, i32
  }
  func.func @transform_1(%arg0: i32, %arg1: i32, %arg2: i32) -> (i32, i32) {
    %c0_i32 = arith.constant 0 : i32
    return %arg2, %arg1 : i32, i32
  }
  func.func @transform_2(%arg0: i32, %arg1: i32, %arg2: i32) -> (i32, i32) {
    %c0_i32 = arith.constant 0 : i32
    %c0_i32_0 = arith.constant 0 : i32
    return %c0_i32, %arg1 : i32, i32
  }
  func.func @transform_3(%arg0: i32, %arg1: i32, %arg2: i32) -> (i32, i32) {
    %c0_i32 = arith.constant 0 : i32
    %c0_i32_0 = arith.constant 0 : i32
    return %c0_i32, %arg1 : i32, i32
  }
  func.func @transform_4(%arg0: i32, %arg1: i32, %arg2: i32) -> (i32, i32) {
    %c0_i32 = arith.constant 0 : i32
    return %arg0, %arg1 : i32, i32
  }
  func.func @transform_5(%arg0: i32, %arg1: i32, %arg2: i32) -> (i32, i32) {
    %c0_i32 = arith.constant 0 : i32
    return %arg0, %arg1 : i32, i32
  }
}

module attributes {stable_mosaic.version = 11 : i64} {
  func.func @_gemm_affine_kernel(%arg0: i32, %arg1: i32, %arg2: i32, %arg3: memref<8x512xbf16, #tpu.memory_space<vmem>>, %arg4: memref<512x256xbf16, #tpu.memory_space<vmem>>, %arg5: memref<1x256xf32, #tpu.memory_space<vmem>>, %arg6: memref<1x256xf32, #tpu.memory_space<vmem>>, %arg7: memref<8x256xbf16, #tpu.memory_space<vmem>>, %arg8: memref<8x256xf32, #tpu.memory_space<vmem>>) attributes {dimension_semantics = [#tpu.dimension_semantics<parallel>, #tpu.dimension_semantics<parallel>, #tpu.dimension_semantics<arbitrary>], iteration_bounds = array<i64: 1, 2, 9>, scalar_prefetch = 0 : i64, scratch_operands = 1 : i64, tpu.core_type = #tpu.core_type<tc>, window_params = [{transform_indices = @transform_0, window_bounds = array<i64: 8, 512>}, {transform_indices = @transform_1, window_bounds = array<i64: 512, 256>}, {transform_indices = @transform_2, window_bounds = array<i64: 1, 256>}, {transform_indices = @transform_3, window_bounds = array<i64: 1, 256>}, {transform_indices = @transform_4, window_bounds = array<i64: 8, 256>}]} {
    %c0_i32 = arith.constant 0 : i32
    %0 = arith.cmpi eq, %arg2, %c0_i32 : i32
    %1 = arith.extui %0 : i1 to i32
    %c0_i32_0 = arith.constant 0 : i32
    %2 = arith.cmpi ne, %1, %c0_i32_0 : i32
    scf.if %2 {
      %cst_9 = arith.constant 0.000000e+00 : f32
      %12 = vector.broadcast %cst_9 : f32 to vector<8x256xf32>
      %c0_10 = arith.constant 0 : index
      %c0_11 = arith.constant 0 : index
      %13 = vector.load %arg8[%c0_10, %c0_11] : memref<8x256xf32, #tpu.memory_space<vmem>>, vector<8x256xf32>
      tpu.vector_store %arg8[%c0_10, %c0_11], %12 {strides = array<i32>} : memref<8x256xf32, #tpu.memory_space<vmem>>, vector<8x256xf32>,
    } else {
    }
    %c0 = arith.constant 0 : index
    %c0_1 = arith.constant 0 : index
    %3 = vector.load %arg8[%c0, %c0_1] : memref<8x256xf32, #tpu.memory_space<vmem>>, vector<8x256xf32>
    %c0_2 = arith.constant 0 : index
    %c0_3 = arith.constant 0 : index
    %4 = vector.load %arg3[%c0_2, %c0_3] : memref<8x512xbf16, #tpu.memory_space<vmem>>, vector<8x512xbf16>
    %c0_4 = arith.constant 0 : index
    %c0_5 = arith.constant 0 : index
    %5 = vector.load %arg4[%c0_4, %c0_5] : memref<512x256xbf16, #tpu.memory_space<vmem>>, vector<512x256xbf16>
    %cst = arith.constant dense<0.000000e+00> : vector<8x256xf32>
    %6 = tpu.matmul %4, %5, %cst {dimension_numbers = #tpu.dot_dimension_numbers<[1], [0], [0], [1], [0, 0, 1, 1], [], []>} : vector<8x512xbf16>, vector<512x256xbf16>, vector<8x256xf32> -> vector<8x256xf32>
    %7 = arith.addf %3, %6 : vector<8x256xf32>
    %c0_6 = arith.constant 0 : index
    %c0_7 = arith.constant 0 : index
    %8 = vector.load %arg8[%c0_6, %c0_7] : memref<8x256xf32, #tpu.memory_space<vmem>>, vector<8x256xf32>
    tpu.vector_store %arg8[%c0_6, %c0_7], %7 {strides = array<i32>} : memref<8x256xf32, #tpu.memory_space<vmem>>, vector<8x256xf32>,
    %c8_i32 = arith.constant 8 : i32
    %9 = arith.cmpi eq, %arg2, %c8_i32 : i32
    %10 = arith.extui %9 : i1 to i32
    %c0_i32_8 = arith.constant 0 : i32
    %11 = arith.cmpi ne, %10, %c0_i32_8 : i32
    scf.if %11 {
      %c0_9 = arith.constant 0 : index
      %c0_10 = arith.constant 0 : index
      %12 = vector.load %arg8[%c0_9, %c0_10] : memref<8x256xf32, #tpu.memory_space<vmem>>, vector<8x256xf32>
      %c0_11 = arith.constant 0 : index
      %c0_12 = arith.constant 0 : index
      %13 = vector.load %arg5[%c0_11, %c0_12] : memref<1x256xf32, #tpu.memory_space<vmem>>, vector<1x256xf32>
      %14 = vector.broadcast %13 : vector<1x256xf32> to vector<8x256xf32>
      %15 = arith.mulf %12, %14 : vector<8x256xf32>
      %c0_13 = arith.constant 0 : index
      %c0_14 = arith.constant 0 : index
      %16 = vector.load %arg6[%c0_13, %c0_14] : memref<1x256xf32, #tpu.memory_space<vmem>>, vector<1x256xf32>
      %17 = vector.broadcast %16 : vector<1x256xf32> to vector<8x256xf32>
      %18 = arith.addf %15, %17 : vector<8x256xf32>
      %cst_15 = arith.constant 0.000000e+00 : f32
      %19 = vector.broadcast %cst_15 : f32 to vector<8x256xf32>
      %20 = arith.maximumf %18, %19 : vector<8x256xf32>
      %21 = arith.truncf %20 : vector<8x256xf32> to vector<8x256xbf16>
      %c0_16 = arith.constant 0 : index
      %c0_17 = arith.constant 0 : index
      %22 = vector.load %arg7[%c0_16, %c0_17] : memref<8x256xbf16, #tpu.memory_space<vmem>>, vector<8x256xbf16>
      tpu.vector_store %arg7[%c0_16, %c0_17], %21 {strides = array<i32>} : memref<8x256xbf16, #tpu.memory_space<vmem>>, vector<8x256xbf16>,
    } else {
    }
    return
  }
  func.func @transform_0(%arg0: i32, %arg1: i32, %arg2: i32) -> (i32, i32) {
    %c0_i32 = arith.constant 0 : i32
    return %arg0, %arg2 : i32, i32
  }
  func.func @transform_1(%arg0: i32, %arg1: i32, %arg2: i32) -> (i32, i32) {
    %c0_i32 = arith.constant 0 : i32
    return %arg2, %arg1 : i32, i32
  }
  func.func @transform_2(%arg0: i32, %arg1: i32, %arg2: i32) -> (i32, i32) {
    %c0_i32 = arith.constant 0 : i32
    %c0_i32_0 = arith.constant 0 : i32
    return %c0_i32, %arg1 : i32, i32
  }
  func.func @transform_3(%arg0: i32, %arg1: i32, %arg2: i32) -> (i32, i32) {
    %c0_i32 = arith.constant 0 : i32
    %c0_i32_0 = arith.constant 0 : i32
    return %c0_i32, %arg1 : i32, i32
  }
  func.func @transform_4(%arg0: i32, %arg1: i32, %arg2: i32) -> (i32, i32) {
    %c0_i32 = arith.constant 0 : i32
    return %arg0, %arg1 : i32, i32
  }
}

module attributes {stable_mosaic.version = 11 : i64} {
  func.func @_add_kernel(%arg0: i32, %arg1: memref<8x512xbf16, #tpu.memory_space<vmem>>, %arg2: memref<8x512xbf16, #tpu.memory_space<vmem>>, %arg3: memref<8x512xbf16, #tpu.memory_space<vmem>>) attributes {dimension_semantics = [#tpu.dimension_semantics<parallel>], iteration_bounds = array<i64: 1>, scalar_prefetch = 0 : i64, scratch_operands = 0 : i64, tpu.core_type = #tpu.core_type<tc>, window_params = [{transform_indices = @transform_0, window_bounds = array<i64: 8, 512>}, {transform_indices = @transform_1, window_bounds = array<i64: 8, 512>}, {transform_indices = @transform_2, window_bounds = array<i64: 8, 512>}]} {
    %c0 = arith.constant 0 : index
    %c0_0 = arith.constant 0 : index
    %0 = vector.load %arg1[%c0, %c0_0] : memref<8x512xbf16, #tpu.memory_space<vmem>>, vector<8x512xbf16>
    %1 = arith.extf %0 : vector<8x512xbf16> to vector<8x512xf32>
    %c0_1 = arith.constant 0 : index
    %c0_2 = arith.constant 0 : index
    %2 = vector.load %arg2[%c0_1, %c0_2] : memref<8x512xbf16, #tpu.memory_space<vmem>>, vector<8x512xbf16>
    %3 = arith.extf %2 : vector<8x512xbf16> to vector<8x512xf32>
    %4 = arith.addf %1, %3 : vector<8x512xf32>
    %5 = arith.truncf %4 : vector<8x512xf32> to vector<8x512xbf16>
    %c0_3 = arith.constant 0 : index
    %c0_4 = arith.constant 0 : index
    %6 = vector.load %arg3[%c0_3, %c0_4] : memref<8x512xbf16, #tpu.memory_space<vmem>>, vector<8x512xbf16>
    tpu.vector_store %arg3[%c0_3, %c0_4], %5 {strides = array<i32>} : memref<8x512xbf16, #tpu.memory_space<vmem>>, vector<8x512xbf16>,
    return
  }
  func.func @transform_0(%arg0: i32) -> (i32, i32) {
    %c0_i32 = arith.constant 0 : i32
    %c0_i32_0 = arith.constant 0 : i32
    return %arg0, %c0_i32 : i32, i32
  }
  func.func @transform_1(%arg0: i32) -> (i32, i32) {
    %c0_i32 = arith.constant 0 : i32
    %c0_i32_0 = arith.constant 0 : i32
    return %arg0, %c0_i32 : i32, i32
  }
  func.func @transform_2(%arg0: i32) -> (i32, i32) {
    %c0_i32 = arith.constant 0 : i32
    %c0_i32_0 = arith.constant 0 : i32
    return %arg0, %c0_i32 : i32, i32
  }
}

module attributes {stable_mosaic.version = 11 : i64} {
  func.func @_gemm_affine_kernel(%arg0: i32, %arg1: i32, %arg2: i32, %arg3: memref<8x512xbf16, #tpu.memory_space<vmem>>, %arg4: memref<512x256xbf16, #tpu.memory_space<vmem>>, %arg5: memref<1x256xf32, #tpu.memory_space<vmem>>, %arg6: memref<1x256xf32, #tpu.memory_space<vmem>>, %arg7: memref<8x256xbf16, #tpu.memory_space<vmem>>, %arg8: memref<8x256xbf16, #tpu.memory_space<vmem>>, %arg9: memref<8x256xf32, #tpu.memory_space<vmem>>) attributes {dimension_semantics = [#tpu.dimension_semantics<parallel>, #tpu.dimension_semantics<parallel>, #tpu.dimension_semantics<arbitrary>], iteration_bounds = array<i64: 1, 1, 1>, scalar_prefetch = 0 : i64, scratch_operands = 1 : i64, tpu.core_type = #tpu.core_type<tc>, window_params = [{transform_indices = @transform_0, window_bounds = array<i64: 8, 512>}, {transform_indices = @transform_1, window_bounds = array<i64: 512, 256>}, {transform_indices = @transform_2, window_bounds = array<i64: 1, 256>}, {transform_indices = @transform_3, window_bounds = array<i64: 1, 256>}, {transform_indices = @transform_4, window_bounds = array<i64: 8, 256>}, {transform_indices = @transform_5, window_bounds = array<i64: 8, 256>}]} {
    %c0_i32 = arith.constant 0 : i32
    %0 = arith.cmpi eq, %arg2, %c0_i32 : i32
    %1 = arith.extui %0 : i1 to i32
    %c0_i32_0 = arith.constant 0 : i32
    %2 = arith.cmpi ne, %1, %c0_i32_0 : i32
    scf.if %2 {
      %cst_10 = arith.constant 0.000000e+00 : f32
      %12 = vector.broadcast %cst_10 : f32 to vector<8x256xf32>
      %c0_11 = arith.constant 0 : index
      %c0_12 = arith.constant 0 : index
      %13 = vector.load %arg9[%c0_11, %c0_12] : memref<8x256xf32, #tpu.memory_space<vmem>>, vector<8x256xf32>
      tpu.vector_store %arg9[%c0_11, %c0_12], %12 {strides = array<i32>} : memref<8x256xf32, #tpu.memory_space<vmem>>, vector<8x256xf32>,
    } else {
    }
    %c0 = arith.constant 0 : index
    %c0_1 = arith.constant 0 : index
    %3 = vector.load %arg9[%c0, %c0_1] : memref<8x256xf32, #tpu.memory_space<vmem>>, vector<8x256xf32>
    %c0_2 = arith.constant 0 : index
    %c0_3 = arith.constant 0 : index
    %4 = vector.load %arg3[%c0_2, %c0_3] : memref<8x512xbf16, #tpu.memory_space<vmem>>, vector<8x512xbf16>
    %c0_4 = arith.constant 0 : index
    %c0_5 = arith.constant 0 : index
    %5 = vector.load %arg4[%c0_4, %c0_5] : memref<512x256xbf16, #tpu.memory_space<vmem>>, vector<512x256xbf16>
    %cst = arith.constant dense<0.000000e+00> : vector<8x256xf32>
    %6 = tpu.matmul %4, %5, %cst {dimension_numbers = #tpu.dot_dimension_numbers<[1], [0], [0], [1], [0, 0, 1, 1], [], []>} : vector<8x512xbf16>, vector<512x256xbf16>, vector<8x256xf32> -> vector<8x256xf32>
    %7 = arith.addf %3, %6 : vector<8x256xf32>
    %c0_6 = arith.constant 0 : index
    %c0_7 = arith.constant 0 : index
    %8 = vector.load %arg9[%c0_6, %c0_7] : memref<8x256xf32, #tpu.memory_space<vmem>>, vector<8x256xf32>
    tpu.vector_store %arg9[%c0_6, %c0_7], %7 {strides = array<i32>} : memref<8x256xf32, #tpu.memory_space<vmem>>, vector<8x256xf32>,
    %c0_i32_8 = arith.constant 0 : i32
    %9 = arith.cmpi eq, %arg2, %c0_i32_8 : i32
    %10 = arith.extui %9 : i1 to i32
    %c0_i32_9 = arith.constant 0 : i32
    %11 = arith.cmpi ne, %10, %c0_i32_9 : i32
    scf.if %11 {
      %c0_10 = arith.constant 0 : index
      %c0_11 = arith.constant 0 : index
      %12 = vector.load %arg9[%c0_10, %c0_11] : memref<8x256xf32, #tpu.memory_space<vmem>>, vector<8x256xf32>
      %c0_12 = arith.constant 0 : index
      %c0_13 = arith.constant 0 : index
      %13 = vector.load %arg6[%c0_12, %c0_13] : memref<1x256xf32, #tpu.memory_space<vmem>>, vector<1x256xf32>
      %14 = vector.broadcast %13 : vector<1x256xf32> to vector<8x256xf32>
      %15 = arith.addf %12, %14 : vector<8x256xf32>
      %c0_14 = arith.constant 0 : index
      %c0_15 = arith.constant 0 : index
      %16 = vector.load %arg7[%c0_14, %c0_15] : memref<8x256xbf16, #tpu.memory_space<vmem>>, vector<8x256xbf16>
      %17 = arith.extf %16 : vector<8x256xbf16> to vector<8x256xf32>
      %18 = arith.addf %15, %17 : vector<8x256xf32>
      %cst_16 = arith.constant 0.000000e+00 : f32
      %19 = vector.broadcast %cst_16 : f32 to vector<8x256xf32>
      %20 = arith.maximumf %18, %19 : vector<8x256xf32>
      %21 = arith.truncf %20 : vector<8x256xf32> to vector<8x256xbf16>
      %c0_17 = arith.constant 0 : index
      %c0_18 = arith.constant 0 : index
      %22 = vector.load %arg8[%c0_17, %c0_18] : memref<8x256xbf16, #tpu.memory_space<vmem>>, vector<8x256xbf16>
      tpu.vector_store %arg8[%c0_17, %c0_18], %21 {strides = array<i32>} : memref<8x256xbf16, #tpu.memory_space<vmem>>, vector<8x256xbf16>,
    } else {
    }
    return
  }
  func.func @transform_0(%arg0: i32, %arg1: i32, %arg2: i32) -> (i32, i32) {
    %c0_i32 = arith.constant 0 : i32
    return %arg0, %arg2 : i32, i32
  }
  func.func @transform_1(%arg0: i32, %arg1: i32, %arg2: i32) -> (i32, i32) {
    %c0_i32 = arith.constant 0 : i32
    return %arg2, %arg1 : i32, i32
  }
  func.func @transform_2(%arg0: i32, %arg1: i32, %arg2: i32) -> (i32, i32) {
    %c0_i32 = arith.constant 0 : i32
    %c0_i32_0 = arith.constant 0 : i32
    return %c0_i32, %arg1 : i32, i32
  }
  func.func @transform_3(%arg0: i32, %arg1: i32, %arg2: i32) -> (i32, i32) {
    %c0_i32 = arith.constant 0 : i32
    %c0_i32_0 = arith.constant 0 : i32
    return %c0_i32, %arg1 : i32, i32
  }
  func.func @transform_4(%arg0: i32, %arg1: i32, %arg2: i32) -> (i32, i32) {
    %c0_i32 = arith.constant 0 : i32
    return %arg0, %arg1 : i32, i32
  }
  func.func @transform_5(%arg0: i32, %arg1: i32, %arg2: i32) -> (i32, i32) {
    %c0_i32 = arith.constant 0 : i32
    return %arg0, %arg1 : i32, i32
  }
}

module attributes {stable_mosaic.version = 11 : i64} {
  func.func @_gemm_affine_kernel(%arg0: i32, %arg1: i32, %arg2: i32, %arg3: memref<8x256xbf16, #tpu.memory_space<vmem>>, %arg4: memref<256x128xbf16, #tpu.memory_space<vmem>>, %arg5: memref<1x128xf32, #tpu.memory_space<vmem>>, %arg6: memref<1x128xf32, #tpu.memory_space<vmem>>, %arg7: memref<8x128xbf16, #tpu.memory_space<vmem>>, %arg8: memref<8x128xbf16, #tpu.memory_space<vmem>>, %arg9: memref<8x128xf32, #tpu.memory_space<vmem>>) attributes {dimension_semantics = [#tpu.dimension_semantics<parallel>, #tpu.dimension_semantics<parallel>, #tpu.dimension_semantics<arbitrary>], iteration_bounds = array<i64: 1, 1, 1>, scalar_prefetch = 0 : i64, scratch_operands = 1 : i64, tpu.core_type = #tpu.core_type<tc>, window_params = [{transform_indices = @transform_0, window_bounds = array<i64: 8, 256>}, {transform_indices = @transform_1, window_bounds = array<i64: 256, 128>}, {transform_indices = @transform_2, window_bounds = array<i64: 1, 128>}, {transform_indices = @transform_3, window_bounds = array<i64: 1, 128>}, {transform_indices = @transform_4, window_bounds = array<i64: 8, 128>}, {transform_indices = @transform_5, window_bounds = array<i64: 8, 128>}]} {
    %c0_i32 = arith.constant 0 : i32
    %0 = arith.cmpi eq, %arg2, %c0_i32 : i32
    %1 = arith.extui %0 : i1 to i32
    %c0_i32_0 = arith.constant 0 : i32
    %2 = arith.cmpi ne, %1, %c0_i32_0 : i32
    scf.if %2 {
      %cst_10 = arith.constant 0.000000e+00 : f32
      %12 = vector.broadcast %cst_10 : f32 to vector<8x128xf32>
      %c0_11 = arith.constant 0 : index
      %c0_12 = arith.constant 0 : index
      %13 = vector.load %arg9[%c0_11, %c0_12] : memref<8x128xf32, #tpu.memory_space<vmem>>, vector<8x128xf32>
      tpu.vector_store %arg9[%c0_11, %c0_12], %12 {strides = array<i32>} : memref<8x128xf32, #tpu.memory_space<vmem>>, vector<8x128xf32>,
    } else {
    }
    %c0 = arith.constant 0 : index
    %c0_1 = arith.constant 0 : index
    %3 = vector.load %arg9[%c0, %c0_1] : memref<8x128xf32, #tpu.memory_space<vmem>>, vector<8x128xf32>
    %c0_2 = arith.constant 0 : index
    %c0_3 = arith.constant 0 : index
    %4 = vector.load %arg3[%c0_2, %c0_3] : memref<8x256xbf16, #tpu.memory_space<vmem>>, vector<8x256xbf16>
    %c0_4 = arith.constant 0 : index
    %c0_5 = arith.constant 0 : index
    %5 = vector.load %arg4[%c0_4, %c0_5] : memref<256x128xbf16, #tpu.memory_space<vmem>>, vector<256x128xbf16>
    %cst = arith.constant dense<0.000000e+00> : vector<8x128xf32>
    %6 = tpu.matmul %4, %5, %cst {dimension_numbers = #tpu.dot_dimension_numbers<[1], [0], [0], [1], [0, 0, 1, 1], [], []>} : vector<8x256xbf16>, vector<256x128xbf16>, vector<8x128xf32> -> vector<8x128xf32>
    %7 = arith.addf %3, %6 : vector<8x128xf32>
    %c0_6 = arith.constant 0 : index
    %c0_7 = arith.constant 0 : index
    %8 = vector.load %arg9[%c0_6, %c0_7] : memref<8x128xf32, #tpu.memory_space<vmem>>, vector<8x128xf32>
    tpu.vector_store %arg9[%c0_6, %c0_7], %7 {strides = array<i32>} : memref<8x128xf32, #tpu.memory_space<vmem>>, vector<8x128xf32>,
    %c0_i32_8 = arith.constant 0 : i32
    %9 = arith.cmpi eq, %arg2, %c0_i32_8 : i32
    %10 = arith.extui %9 : i1 to i32
    %c0_i32_9 = arith.constant 0 : i32
    %11 = arith.cmpi ne, %10, %c0_i32_9 : i32
    scf.if %11 {
      %c0_10 = arith.constant 0 : index
      %c0_11 = arith.constant 0 : index
      %12 = vector.load %arg9[%c0_10, %c0_11] : memref<8x128xf32, #tpu.memory_space<vmem>>, vector<8x128xf32>
      %c0_12 = arith.constant 0 : index
      %c0_13 = arith.constant 0 : index
      %13 = vector.load %arg6[%c0_12, %c0_13] : memref<1x128xf32, #tpu.memory_space<vmem>>, vector<1x128xf32>
      %14 = vector.broadcast %13 : vector<1x128xf32> to vector<8x128xf32>
      %15 = arith.addf %12, %14 : vector<8x128xf32>
      %c0_14 = arith.constant 0 : index
      %c0_15 = arith.constant 0 : index
      %16 = vector.load %arg7[%c0_14, %c0_15] : memref<8x128xbf16, #tpu.memory_space<vmem>>, vector<8x128xbf16>
      %17 = arith.extf %16 : vector<8x128xbf16> to vector<8x128xf32>
      %18 = arith.addf %15, %17 : vector<8x128xf32>
      %cst_16 = arith.constant 0.000000e+00 : f32
      %19 = vector.broadcast %cst_16 : f32 to vector<8x128xf32>
      %20 = arith.maximumf %18, %19 : vector<8x128xf32>
      %21 = arith.truncf %20 : vector<8x128xf32> to vector<8x128xbf16>
      %c0_17 = arith.constant 0 : index
      %c0_18 = arith.constant 0 : index
      %22 = vector.load %arg8[%c0_17, %c0_18] : memref<8x128xbf16, #tpu.memory_space<vmem>>, vector<8x128xbf16>
      tpu.vector_store %arg8[%c0_17, %c0_18], %21 {strides = array<i32>} : memref<8x128xbf16, #tpu.memory_space<vmem>>, vector<8x128xbf16>,
    } else {
    }
    return
  }
  func.func @transform_0(%arg0: i32, %arg1: i32, %arg2: i32) -> (i32, i32) {
    %c0_i32 = arith.constant 0 : i32
    return %arg0, %arg2 : i32, i32
  }
  func.func @transform_1(%arg0: i32, %arg1: i32, %arg2: i32) -> (i32, i32) {
    %c0_i32 = arith.constant 0 : i32
    return %arg2, %arg1 : i32, i32
  }
  func.func @transform_2(%arg0: i32, %arg1: i32, %arg2: i32) -> (i32, i32) {
    %c0_i32 = arith.constant 0 : i32
    %c0_i32_0 = arith.constant 0 : i32
    return %c0_i32, %arg1 : i32, i32
  }
  func.func @transform_3(%arg0: i32, %arg1: i32, %arg2: i32) -> (i32, i32) {
    %c0_i32 = arith.constant 0 : i32
    %c0_i32_0 = arith.constant 0 : i32
    return %c0_i32, %arg1 : i32, i32
  }
  func.func @transform_4(%arg0: i32, %arg1: i32, %arg2: i32) -> (i32, i32) {
    %c0_i32 = arith.constant 0 : i32
    return %arg0, %arg1 : i32, i32
  }
  func.func @transform_5(%arg0: i32, %arg1: i32, %arg2: i32) -> (i32, i32) {
    %c0_i32 = arith.constant 0 : i32
    return %arg0, %arg1 : i32, i32
  }
}

module attributes {stable_mosaic.version = 11 : i64} {
  func.func @_gemm_affine_kernel(%arg0: i32, %arg1: i32, %arg2: i32, %arg3: memref<32x128xbf16, #tpu.memory_space<vmem>>, %arg4: memref<128x64xbf16, #tpu.memory_space<vmem>>, %arg5: memref<1x64xf32, #tpu.memory_space<vmem>>, %arg6: memref<1x64xf32, #tpu.memory_space<vmem>>, %arg7: memref<32x64xbf16, #tpu.memory_space<vmem>>, %arg8: memref<32x64xbf16, #tpu.memory_space<vmem>>, %arg9: memref<32x64xf32, #tpu.memory_space<vmem>>) attributes {dimension_semantics = [#tpu.dimension_semantics<parallel>, #tpu.dimension_semantics<parallel>, #tpu.dimension_semantics<arbitrary>], iteration_bounds = array<i64: 1, 1, 1>, scalar_prefetch = 0 : i64, scratch_operands = 1 : i64, tpu.core_type = #tpu.core_type<tc>, window_params = [{transform_indices = @transform_0, window_bounds = array<i64: 32, 128>}, {transform_indices = @transform_1, window_bounds = array<i64: 128, 64>}, {transform_indices = @transform_2, window_bounds = array<i64: 1, 64>}, {transform_indices = @transform_3, window_bounds = array<i64: 1, 64>}, {transform_indices = @transform_4, window_bounds = array<i64: 32, 64>}, {transform_indices = @transform_5, window_bounds = array<i64: 32, 64>}]} {
    %c0_i32 = arith.constant 0 : i32
    %0 = arith.cmpi eq, %arg2, %c0_i32 : i32
    %1 = arith.extui %0 : i1 to i32
    %c0_i32_0 = arith.constant 0 : i32
    %2 = arith.cmpi ne, %1, %c0_i32_0 : i32
    scf.if %2 {
      %cst_10 = arith.constant 0.000000e+00 : f32
      %12 = vector.broadcast %cst_10 : f32 to vector<32x64xf32>
      %c0_11 = arith.constant 0 : index
      %c0_12 = arith.constant 0 : index
      %13 = vector.load %arg9[%c0_11, %c0_12] : memref<32x64xf32, #tpu.memory_space<vmem>>, vector<32x64xf32>
      tpu.vector_store %arg9[%c0_11, %c0_12], %12 {strides = array<i32>} : memref<32x64xf32, #tpu.memory_space<vmem>>, vector<32x64xf32>,
    } else {
    }
    %c0 = arith.constant 0 : index
    %c0_1 = arith.constant 0 : index
    %3 = vector.load %arg9[%c0, %c0_1] : memref<32x64xf32, #tpu.memory_space<vmem>>, vector<32x64xf32>
    %c0_2 = arith.constant 0 : index
    %c0_3 = arith.constant 0 : index
    %4 = vector.load %arg3[%c0_2, %c0_3] : memref<32x128xbf16, #tpu.memory_space<vmem>>, vector<32x128xbf16>
    %c0_4 = arith.constant 0 : index
    %c0_5 = arith.constant 0 : index
    %5 = vector.load %arg4[%c0_4, %c0_5] : memref<128x64xbf16, #tpu.memory_space<vmem>>, vector<128x64xbf16>
    %cst = arith.constant dense<0.000000e+00> : vector<32x64xf32>
    %6 = tpu.matmul %4, %5, %cst {dimension_numbers = #tpu.dot_dimension_numbers<[1], [0], [0], [1], [0, 0, 1, 1], [], []>} : vector<32x128xbf16>, vector<128x64xbf16>, vector<32x64xf32> -> vector<32x64xf32>
    %7 = arith.addf %3, %6 : vector<32x64xf32>
    %c0_6 = arith.constant 0 : index
    %c0_7 = arith.constant 0 : index
    %8 = vector.load %arg9[%c0_6, %c0_7] : memref<32x64xf32, #tpu.memory_space<vmem>>, vector<32x64xf32>
    tpu.vector_store %arg9[%c0_6, %c0_7], %7 {strides = array<i32>} : memref<32x64xf32, #tpu.memory_space<vmem>>, vector<32x64xf32>,
    %c0_i32_8 = arith.constant 0 : i32
    %9 = arith.cmpi eq, %arg2, %c0_i32_8 : i32
    %10 = arith.extui %9 : i1 to i32
    %c0_i32_9 = arith.constant 0 : i32
    %11 = arith.cmpi ne, %10, %c0_i32_9 : i32
    scf.if %11 {
      %c0_10 = arith.constant 0 : index
      %c0_11 = arith.constant 0 : index
      %12 = vector.load %arg9[%c0_10, %c0_11] : memref<32x64xf32, #tpu.memory_space<vmem>>, vector<32x64xf32>
      %c0_12 = arith.constant 0 : index
      %c0_13 = arith.constant 0 : index
      %13 = vector.load %arg6[%c0_12, %c0_13] : memref<1x64xf32, #tpu.memory_space<vmem>>, vector<1x64xf32>
      %14 = vector.broadcast %13 : vector<1x64xf32> to vector<32x64xf32>
      %15 = arith.addf %12, %14 : vector<32x64xf32>
      %c0_14 = arith.constant 0 : index
      %c0_15 = arith.constant 0 : index
      %16 = vector.load %arg7[%c0_14, %c0_15] : memref<32x64xbf16, #tpu.memory_space<vmem>>, vector<32x64xbf16>
      %17 = arith.extf %16 : vector<32x64xbf16> to vector<32x64xf32>
      %18 = arith.addf %15, %17 : vector<32x64xf32>
      %cst_16 = arith.constant 0.000000e+00 : f32
      %19 = vector.broadcast %cst_16 : f32 to vector<32x64xf32>
      %20 = arith.maximumf %18, %19 : vector<32x64xf32>
      %21 = arith.truncf %20 : vector<32x64xf32> to vector<32x64xbf16>
      %c0_17 = arith.constant 0 : index
      %c0_18 = arith.constant 0 : index
      %22 = vector.load %arg8[%c0_17, %c0_18] : memref<32x64xbf16, #tpu.memory_space<vmem>>, vector<32x64xbf16>
      tpu.vector_store %arg8[%c0_17, %c0_18], %21 {strides = array<i32>} : memref<32x64xbf16, #tpu.memory_space<vmem>>, vector<32x64xbf16>,
    } else {
    }
    return
  }
  func.func @transform_0(%arg0: i32, %arg1: i32, %arg2: i32) -> (i32, i32) {
    %c0_i32 = arith.constant 0 : i32
    return %arg0, %arg2 : i32, i32
  }
  func.func @transform_1(%arg0: i32, %arg1: i32, %arg2: i32) -> (i32, i32) {
    %c0_i32 = arith.constant 0 : i32
    return %arg2, %arg1 : i32, i32
  }
  func.func @transform_2(%arg0: i32, %arg1: i32, %arg2: i32) -> (i32, i32) {
    %c0_i32 = arith.constant 0 : i32
    %c0_i32_0 = arith.constant 0 : i32
    return %c0_i32, %arg1 : i32, i32
  }
  func.func @transform_3(%arg0: i32, %arg1: i32, %arg2: i32) -> (i32, i32) {
    %c0_i32 = arith.constant 0 : i32
    %c0_i32_0 = arith.constant 0 : i32
    return %c0_i32, %arg1 : i32, i32
  }
  func.func @transform_4(%arg0: i32, %arg1: i32, %arg2: i32) -> (i32, i32) {
    %c0_i32 = arith.constant 0 : i32
    return %arg0, %arg1 : i32, i32
  }
  func.func @transform_5(%arg0: i32, %arg1: i32, %arg2: i32) -> (i32, i32) {
    %c0_i32 = arith.constant 0 : i32
    return %arg0, %arg1 : i32, i32
  }
}

module attributes {stable_mosaic.version = 11 : i64} {
  func.func @_gemm_affine_kernel(%arg0: i32, %arg1: i32, %arg2: i32, %arg3: memref<32x64xbf16, #tpu.memory_space<vmem>>, %arg4: memref<64x21xbf16, #tpu.memory_space<vmem>>, %arg5: memref<1x21xf32, #tpu.memory_space<vmem>>, %arg6: memref<1x21xf32, #tpu.memory_space<vmem>>, %arg7: memref<32x21xf32, #tpu.memory_space<vmem>>, %arg8: memref<32x21xf32, #tpu.memory_space<vmem>>) attributes {dimension_semantics = [#tpu.dimension_semantics<parallel>, #tpu.dimension_semantics<parallel>, #tpu.dimension_semantics<arbitrary>], iteration_bounds = array<i64: 1, 1, 1>, scalar_prefetch = 0 : i64, scratch_operands = 1 : i64, tpu.core_type = #tpu.core_type<tc>, window_params = [{transform_indices = @transform_0, window_bounds = array<i64: 32, 64>}, {transform_indices = @transform_1, window_bounds = array<i64: 64, 21>}, {transform_indices = @transform_2, window_bounds = array<i64: 1, 21>}, {transform_indices = @transform_3, window_bounds = array<i64: 1, 21>}, {transform_indices = @transform_4, window_bounds = array<i64: 32, 21>}]} {
    %c0_i32 = arith.constant 0 : i32
    %0 = arith.cmpi eq, %arg2, %c0_i32 : i32
    %1 = arith.extui %0 : i1 to i32
    %c0_i32_0 = arith.constant 0 : i32
    %2 = arith.cmpi ne, %1, %c0_i32_0 : i32
    scf.if %2 {
      %cst_10 = arith.constant 0.000000e+00 : f32
      %12 = vector.broadcast %cst_10 : f32 to vector<32x21xf32>
      %c0_11 = arith.constant 0 : index
      %c0_12 = arith.constant 0 : index
      %13 = vector.load %arg8[%c0_11, %c0_12] : memref<32x21xf32, #tpu.memory_space<vmem>>, vector<32x21xf32>
      tpu.vector_store %arg8[%c0_11, %c0_12], %12 {strides = array<i32>} : memref<32x21xf32, #tpu.memory_space<vmem>>, vector<32x21xf32>,
    } else {
    }
    %c0 = arith.constant 0 : index
    %c0_1 = arith.constant 0 : index
    %3 = vector.load %arg8[%c0, %c0_1] : memref<32x21xf32, #tpu.memory_space<vmem>>, vector<32x21xf32>
    %c0_2 = arith.constant 0 : index
    %c0_3 = arith.constant 0 : index
    %4 = vector.load %arg3[%c0_2, %c0_3] : memref<32x64xbf16, #tpu.memory_space<vmem>>, vector<32x64xbf16>
    %c0_4 = arith.constant 0 : index
    %c0_5 = arith.constant 0 : index
    %5 = vector.load %arg4[%c0_4, %c0_5] : memref<64x21xbf16, #tpu.memory_space<vmem>>, vector<64x21xbf16>
    %cst = arith.constant dense<0.000000e+00> : vector<32x21xf32>
    %6 = tpu.matmul %4, %5, %cst {dimension_numbers = #tpu.dot_dimension_numbers<[1], [0], [0], [1], [0, 0, 1, 1], [], []>} : vector<32x64xbf16>, vector<64x21xbf16>, vector<32x21xf32> -> vector<32x21xf32>
    %7 = arith.addf %3, %6 : vector<32x21xf32>
    %c0_6 = arith.constant 0 : index
    %c0_7 = arith.constant 0 : index
    %8 = vector.load %arg8[%c0_6, %c0_7] : memref<32x21xf32, #tpu.memory_space<vmem>>, vector<32x21xf32>
    tpu.vector_store %arg8[%c0_6, %c0_7], %7 {strides = array<i32>} : memref<32x21xf32, #tpu.memory_space<vmem>>, vector<32x21xf32>,
    %c0_i32_8 = arith.constant 0 : i32
    %9 = arith.cmpi eq, %arg2, %c0_i32_8 : i32
    %10 = arith.extui %9 : i1 to i32
    %c0_i32_9 = arith.constant 0 : i32
    %11 = arith.cmpi ne, %10, %c0_i32_9 : i32
    scf.if %11 {
      %c0_10 = arith.constant 0 : index
      %c0_11 = arith.constant 0 : index
      %12 = vector.load %arg8[%c0_10, %c0_11] : memref<32x21xf32, #tpu.memory_space<vmem>>, vector<32x21xf32>
      %c0_12 = arith.constant 0 : index
      %c0_13 = arith.constant 0 : index
      %13 = vector.load %arg6[%c0_12, %c0_13] : memref<1x21xf32, #tpu.memory_space<vmem>>, vector<1x21xf32>
      %14 = vector.broadcast %13 : vector<1x21xf32> to vector<32x21xf32>
      %15 = arith.addf %12, %14 : vector<32x21xf32>
      %c0_14 = arith.constant 0 : index
      %c0_15 = arith.constant 0 : index
      %16 = vector.load %arg7[%c0_14, %c0_15] : memref<32x21xf32, #tpu.memory_space<vmem>>, vector<32x21xf32>
      tpu.vector_store %arg7[%c0_14, %c0_15], %15 {strides = array<i32>} : memref<32x21xf32, #tpu.memory_space<vmem>>, vector<32x21xf32>,
    } else {
    }
    return
  }
  func.func @transform_0(%arg0: i32, %arg1: i32, %arg2: i32) -> (i32, i32) {
    %c0_i32 = arith.constant 0 : i32
    return %arg0, %arg2 : i32, i32
  }
  func.func @transform_1(%arg0: i32, %arg1: i32, %arg2: i32) -> (i32, i32) {
    %c0_i32 = arith.constant 0 : i32
    return %arg2, %arg1 : i32, i32
  }
  func.func @transform_2(%arg0: i32, %arg1: i32, %arg2: i32) -> (i32, i32) {
    %c0_i32 = arith.constant 0 : i32
    %c0_i32_0 = arith.constant 0 : i32
    return %c0_i32, %arg1 : i32, i32
  }
  func.func @transform_3(%arg0: i32, %arg1: i32, %arg2: i32) -> (i32, i32) {
    %c0_i32 = arith.constant 0 : i32
    %c0_i32_0 = arith.constant 0 : i32
    return %c0_i32, %arg1 : i32, i32
  }
  func.func @transform_4(%arg0: i32, %arg1: i32, %arg2: i32) -> (i32, i32) {
    %c0_i32 = arith.constant 0 : i32
    return %arg0, %arg1 : i32, i32
  }
}

</mosaic_0001>

<bundles_post_ra>
// kernel: rfunet_forward.31
= control target key start
LH: loop header
LB: loop body
LE: loop exit
PB: predicated region body
PF: predicated region fallthrough
CT: control target
= control target key end

     0   :  { %v672_v0 = vmov 0   ;;  %vm22_vm0 = vcmask 523264   ;;  %v673_v3 = vmov 0.0   ;;  %vm219_vm1 = vcmask 154624   ;;  %s944_s1 = inlined_call_operand.vmem [shape: bf16[147,64], index: 1, kind: input, shape index: {}]   ;;  %s945_s0 = inlined_call_operand.vmem [shape: bf16[128,147], index: 0, kind: input, shape index: {}]   ;;  %s946_s2 = inlined_call_operand.vmem [shape: f32[1,64], index: 2, kind: input, shape index: {}]   ;;  %s947_s3 = inlined_call_operand.vmem [shape: f32[1,64], index: 3, kind: input, shape index: {}]   ;;  %s948_s4 = inlined_call_operand.vmem [shape: bf16[128,64], index: 4, kind: output, shape index: {}]  }
   0x1   :  { %251 = vmatprep.subr.bf16.mxu0 %v672_v0  ;;  %615 = vmatprep.subr.bf16.mxu1 %v672_v0  ;;  %v638_v1 = vld [vmem:[%s944_s1 + $0x38] sm:$0xff]   ;;  %v639_v2 = vld [vmem:[%s944_s1 + $0x30] sm:$0xff]   ;;  %23 = vst.msk [vmem:[#allocation2] sm:$0xff] %vm22_vm0, %v673_v3  ;;  %24 = vst.msk [vmem:[#allocation2 + $0x8] sm:$0xff] %vm22_vm0, %v673_v3  ;;  %vm244_vm2 = vcmask 1040384   ;;  %vm245_vm3 = vcmask 1041408  }
   0x2   :  { %252 = vmatpush1.bf16.msra.mxu0 %v638_v1  ;;  %625 = vmatpush1.bf16.msra.mxu1 %v638_v1  ;;  %25 = vst.msk [vmem:[#allocation2 + $0x10] sm:$0xff] %vm22_vm0, %v673_v3  ;;  %26 = vst.msk [vmem:[#allocation2 + $0x18] sm:$0xff] %vm22_vm0, %v673_v3  ;;  %v640_v4 = vld [vmem:[%s944_s1 + $0x28] sm:$0xff]   ;;  %v641_v5 = vld [vmem:[%s944_s1 + $0x20] sm:$0xff]   ;;  %v674_v11 = vmov 65535   ;;  %vm526_vm4 = vcmask 519168  }
   0x3   :  { %253 = vmatprep.subr.bf16.mxu0 %v672_v0  ;;  %616 = vmatprep.subr.bf16.mxu1 %v672_v0  ;;  %27 = vst.msk [vmem:[#allocation2 + $0x20] sm:$0xff] %vm22_vm0, %v673_v3  ;;  %28 = vst.msk [vmem:[#allocation2 + $0x28] sm:$0xff] %vm22_vm0, %v673_v3  ;;  %v650_v6 = vld [vmem:[%s945_s0 + $0x4] ss:$8 sps:$4 sm:$0xff]   ;;  %v642_v8 = vld [vmem:[%s944_s1 + $0x18] sm:$0xff]   ;;  %v246_v12 = vsel %vm244_vm2, 4294967295, %v674_v11 }
   0x4   :  { %29 = vst.msk [vmem:[#allocation2 + $0x30] sm:$0xff] %vm22_vm0, %v673_v3  ;;  %30 = vst.msk [vmem:[#allocation2 + $0x38] sm:$0xff] %vm22_vm0, %v673_v3  ;;  %573 = vmatprep.mubr.msk.bf16.mxu0 %vm219_vm1, %v650_v6  ;;  %v653_v7 = vld [vmem:[%s945_s0 + $0x44] ss:$8 sps:$4 sm:$0xff]   ;;  %v643_v9 = vld [vmem:[%s944_s1 + $0x10] sm:$0xff]   ;;  %v247_v15 = vsel %vm245_vm3, %v246_v12, 0 }
   0x5   :  { %31 = vst.msk [vmem:[#allocation2 + $0x40] sm:$0xff] %vm22_vm0, %v673_v3  ;;  %32 = vst.msk [vmem:[#allocation2 + $0x48] sm:$0xff] %vm22_vm0, %v673_v3  ;;  %577 = vmatprep.mubr.msk.bf16.mxu1 %vm219_vm1, %v653_v7  ;;  %v644_v10 = vld [vmem:[%s944_s1 + $0x8] sm:$0xff]   ;;  %v645_v13 = vld [vmem:[%s944_s1] sm:$0xff]  }
   0x6   :  { %33 = vst.msk [vmem:[#allocation2 + $0x50] sm:$0xff] %vm22_vm0, %v673_v3  ;;  %34 = vst.msk [vmem:[#allocation2 + $0x58] sm:$0xff] %vm22_vm0, %v673_v3  ;;  %254 = vmatpush1.bf16.msra.mxu0 %v639_v2  ;;  %626 = vmatpush1.bf16.msra.mxu1 %v639_v2  ;;  %v646_v14 = vld [vmem:[%s944_s1 + $0x48] ss:$0 sps:$4 sm:$0x33]   ;;  %v647_v17 = vld [vmem:[%s944_s1 + $0x40] sm:$0xff]  }
   0x7   :  { %35 = vst.msk [vmem:[#allocation2 + $0x60] sm:$0xff] %vm22_vm0, %v673_v3  ;;  %36 = vst.msk [vmem:[#allocation2 + $0x68] sm:$0xff] %vm22_vm0, %v673_v3  ;;  %255 = vmatprep.subr.bf16.mxu0 %v672_v0  ;;  %617 = vmatprep.subr.bf16.mxu1 %v672_v0  ;;  %v249_v16 = vand.u32 %v646_v14, %v247_v15  ;;  %v648_v18 = vld [vmem:[%s945_s0] ss:$8 sps:$4 sm:$0xff]   ;;  %v654_v20 = vld [vmem:[%s945_s0 + $0x14] ss:$8 sps:$4 sm:$0xff]  }
   0x8   :  { %37 = vst.msk [vmem:[#allocation2 + $0x70] sm:$0xff] %vm22_vm0, %v673_v3  ;;  %38 = vst.msk [vmem:[#allocation2 + $0x78] sm:$0xff] %vm22_vm0, %v673_v3  ;;  %v651_v19 = vld [vmem:[%s945_s0 + $0x40] ss:$8 sps:$4 sm:$0xff]   ;;  %v656_v21 = vld [vmem:[%s945_s0 + $0x54] ss:$8 sps:$4 sm:$0xff]  }
   0x9   :  { %v658_v22 = vld [vmem:[%s945_s0 + $0x10] ss:$8 sps:$4 sm:$0xff]   ;;  %v660_v24 = vld [vmem:[%s945_s0 + $0x24] ss:$8 sps:$4 sm:$0xff]   ;;  %v664_v26 = vld [vmem:[%s945_s0 + $0x20] ss:$8 sps:$4 sm:$0xff]  }
   0xa   :  { %256 = vmatpush1.bf16.msra.mxu0 %v640_v4  ;;  %627 = vmatpush1.bf16.msra.mxu1 %v640_v4  ;;  %v659_v23 = vld [vmem:[%s945_s0 + $0x50] ss:$8 sps:$4 sm:$0xff]   ;;  %v662_v25 = vld [vmem:[%s945_s0 + $0x64] ss:$8 sps:$4 sm:$0xff]   ;;  %v665_v27 = vld [vmem:[%s945_s0 + $0x60] ss:$8 sps:$4 sm:$0xff]  }
   0xb   :  { %257 = vmatprep.subr.bf16.mxu0 %v672_v0  ;;  %618 = vmatprep.subr.bf16.mxu1 %v672_v0  ;;  %v666_v28 = vld [vmem:[%s945_s0 + $0x34] ss:$8 sps:$4 sm:$0xff]   ;;  %v670_v30 = vld [vmem:[%s945_s0 + $0x30] ss:$8 sps:$4 sm:$0xff]   ;;  %v39_v32 = vld [vmem:[#allocation2] sm:$0xff] }
   0xc   :  { %v668_v29 = vld [vmem:[%s945_s0 + $0x74] ss:$8 sps:$4 sm:$0xff]   ;;  %v671_v31 = vld [vmem:[%s945_s0 + $0x70] ss:$8 sps:$4 sm:$0xff]   ;;  %v47_v33 = vld [vmem:[#allocation2 + $0x40] sm:$0xff] }
   0xd   :  { %v40_v40 = vld [vmem:[#allocation2 + $0x8] sm:$0xff]  ;;  %v41_v48 = vld [vmem:[#allocation2 + $0x10] sm:$0xff]  ;;  %v829_v50 = vld [vmem:[%s946_s2] ss:$0 sm:$0xff] }
   0xe   :  { %258 = vmatpush1.bf16.msra.mxu0 %v641_v5  ;;  %628 = vmatpush1.bf16.msra.mxu1 %v641_v5  ;;  %v48_v41 = vld [vmem:[#allocation2 + $0x48] sm:$0xff]  ;;  %v49_v49 = vld [vmem:[#allocation2 + $0x50] sm:$0xff]  ;;  %v834_v53 = vld [vmem:[%s947_s3] ss:$0 sm:$0xff] }
   0xf   :  { %259 = vmatprep.subr.bf16.mxu0 %v672_v0  ;;  %619 = vmatprep.subr.bf16.mxu1 %v672_v0  ;;  %v42_v56 = vld [vmem:[#allocation2 + $0x18] sm:$0xff]  ;;  %v43_v14 = vld [vmem:[#allocation2 + $0x20] sm:$0xff] }
  0x10   :  { %v50_v61 = vld [vmem:[#allocation2 + $0x58] sm:$0xff]  ;;  %v51_v15 = vld [vmem:[#allocation2 + $0x60] sm:$0xff] }
  0x12   :  { %260 = vmatpush1.bf16.msra.mxu0 %v642_v8  ;;  %629 = vmatpush1.bf16.msra.mxu1 %v642_v8 }
  0x13   :  { %261 = vmatprep.subr.bf16.mxu0 %v672_v0  ;;  %620 = vmatprep.subr.bf16.mxu1 %v672_v0 }
  0x16   :  { %262 = vmatpush1.bf16.msra.mxu0 %v643_v9  ;;  %630 = vmatpush1.bf16.msra.mxu1 %v643_v9 }
  0x17   :  { %263 = vmatprep.subr.bf16.mxu0 %v672_v0  ;;  %621 = vmatprep.subr.bf16.mxu1 %v672_v0 }
  0x1a   :  { %264 = vmatpush1.bf16.msra.mxu0 %v644_v10  ;;  %631 = vmatpush1.bf16.msra.mxu1 %v644_v10 }
  0x1b   :  { %265 = vmatprep.subr.bf16.mxu0 %v672_v0  ;;  %622 = vmatprep.subr.bf16.mxu1 %v672_v0 }
  0x1e   :  { %266 = vmatpush1.bf16.msra.mxu0 %v645_v13  ;;  %632 = vmatpush1.bf16.msra.mxu1 %v645_v13 }
  0x1f   :  { %279 = vmatprep.subr.bf16.mxu0 %v672_v0  ;;  %623 = vmatprep.subr.bf16.mxu1 %v672_v0 }
  0x22   :  { %280 = vmatpush2.bf16.msra.mxu0 %v249_v16  ;;  %633 = vmatpush2.bf16.msra.mxu1 %v249_v16 }
  0x23   :  { %281 = vmatprep.subr.bf16.mxu0 %v672_v0  ;;  %624 = vmatprep.subr.bf16.mxu1 %v672_v0 }
  0x26   :  { %282 = vmatpush2.bf16.msra.mxu0 %v647_v17  ;;  %634 = vmatpush2.bf16.msra.mxu1 %v647_v17 }
  0x29   :  { %284 = vmatmul.mubr.bf16.vlgmr.msra.gmra.mxu0 %v648_v18  ;;  %316 = vmatmul.mubr.bf16.vlgmr.msra.gmra.mxu1 %v651_v19 }
  0x2a   :  { %574 = vmatprep.mubr.msk.bf16.mxu0 %vm219_vm1, %v654_v20  ;;  %578 = vmatprep.mubr.msk.bf16.mxu1 %vm219_vm1, %v656_v21 }
  0x31   :  { %292 = vmatmul.mubr.bf16.gmra.mxu0 %v658_v22  ;;  %324 = vmatmul.mubr.bf16.gmra.mxu1 %v659_v23 }
  0x32   :  { %575 = vmatprep.mubr.msk.bf16.mxu0 %vm219_vm1, %v660_v24  ;;  %579 = vmatprep.mubr.msk.bf16.mxu1 %vm219_vm1, %v662_v25 }
  0x39   :  { %300 = vmatmul.mubr.bf16.gmra.mxu0 %v664_v26  ;;  %332 = vmatmul.mubr.bf16.gmra.mxu1 %v665_v27 }
  0x3a   :  { %576 = vmatprep.mubr.msk.bf16.mxu0 %vm219_vm1, %v666_v28  ;;  %580 = vmatprep.mubr.msk.bf16.mxu1 %vm219_vm1, %v668_v29 }
  0x41   :  { %308 = vmatmul.mubr.bf16.gmra.mxu0 %v670_v30  ;;  %340 = vmatmul.mubr.bf16.gmra.mxu1 %v671_v31 }
  0xe9   :  { %v285_v34 = vpop.f32.mrf.mxu0  ;;  %v317_v35 = vpop.f32.mrf.mxu1 }
  0xea   :  { %v348_v36 = vadd.f32 %v285_v34, %v39_v32  ;;  %v356_v37 = vadd.f32 %v317_v35, %v47_v33  ;;  %v44_v32 = vld [vmem:[#allocation2 + $0x28] sm:$0xff] }
  0xeb   :  { %v287_v38 = vpop.f32.mrf.mxu0  ;;  %v319_v39 = vpop.f32.mrf.mxu1  ;;  %v52_v33 = vld [vmem:[#allocation2 + $0x68] sm:$0xff] }
  0xec   :  { %365 = vst.msk [vmem:[#allocation2] sm:$0xff] %vm22_vm0, %v348_v36  ;;  %373 = vst.msk [vmem:[#allocation2 + $0x40] sm:$0xff] %vm22_vm0, %v356_v37 }
  0xed   :  { %v288_v42 = vpop.f32.mrf.mxu0  ;;  %v320_v43 = vpop.f32.mrf.mxu1 }
  0xee   :  { %v349_v44 = vadd.f32 %v288_v42, %v40_v40  ;;  %v357_v45 = vadd.f32 %v320_v43, %v48_v41 }
  0xef   :  { %v290_v46 = vpop.f32.mrf.mxu0  ;;  %v322_v47 = vpop.f32.mrf.mxu1 }
  0xf0   :  { %366 = vst.msk [vmem:[#allocation2 + $0x8] sm:$0xff] %vm22_vm0, %v349_v44  ;;  %374 = vst.msk [vmem:[#allocation2 + $0x48] sm:$0xff] %vm22_vm0, %v357_v45 }
  0xf1   :  { %v293_v51 = vpop.f32.mrf.mxu0  ;;  %v325_v52 = vpop.f32.mrf.mxu1 }
  0xf2   :  { %v350_v54 = vadd.f32 %v293_v51, %v41_v48  ;;  %v358_v55 = vadd.f32 %v325_v52, %v49_v49  ;;  %v45_v51 = vld [vmem:[#allocation2 + $0x30] sm:$0xff] }
  0xf3   :  { %v384_v57 = vld [vmem:[#allocation2] sm:$0xff]  ;;  %v295_v59 = vpop.f32.mrf.mxu0  ;;  %v327_v60 = vpop.f32.mrf.mxu1  ;;  %v53_v52 = vld [vmem:[#allocation2 + $0x70] sm:$0xff] }
  0xf4   :  { %v392_v58 = vld [vmem:[#allocation2 + $0x40] sm:$0xff]  ;;  %v407_v62 = vmul.f32 %v829_v50, %v384_v57  ;;  %367 = vst.msk [vmem:[#allocation2 + $0x10] sm:$0xff] %vm22_vm0, %v350_v54  ;;  %375 = vst.msk [vmem:[#allocation2 + $0x50] sm:$0xff] %vm22_vm0, %v358_v55 }
  0xf5   :  { %v415_v63 = vmul.f32 %v829_v50, %v392_v58  ;;  %v296_v0 = vpop.f32.mrf.mxu0  ;;  %v328_v1 = vpop.f32.mrf.mxu1 }
  0xf6   :  { %v430_v2 = vadd.f32 %v834_v53, %v407_v62  ;;  %v351_v4 = vadd.f32 %v296_v0, %v42_v56  ;;  %v359_v5 = vadd.f32 %v328_v1, %v50_v61  ;;  %v46_v0 = vld [vmem:[#allocation2 + $0x38] sm:$0xff] }
  0xf7   :  { %v438_v3 = vadd.f32 %v834_v53, %v415_v63  ;;  %v385_v6 = vld [vmem:[#allocation2 + $0x8] sm:$0xff]  ;;  %v298_v8 = vpop.f32.mrf.mxu0  ;;  %v330_v9 = vpop.f32.mrf.mxu1  ;;  %v54_v1 = vld [vmem:[#allocation2 + $0x78] sm:$0xff] }
  0xf8   :  { %v393_v7 = vld [vmem:[#allocation2 + $0x48] sm:$0xff]  ;;  %v446_v10 = vmax.f32 %v430_v2, 0.0  ;;  %v408_v12 = vmul.f32 %v829_v50, %v385_v6  ;;  %368 = vst.msk [vmem:[#allocation2 + $0x18] sm:$0xff] %vm22_vm0, %v351_v4  ;;  %376 = vst.msk [vmem:[#allocation2 + $0x58] sm:$0xff] %vm22_vm0, %v359_v5 }
  0xf9   :  { %v454_v11 = vmax.f32 %v438_v3, 0.0  ;;  %v416_v13 = vmul.f32 %v829_v50, %v393_v7  ;;  %v301_v16 = vpop.f32.mrf.mxu0  ;;  %v333_v17 = vpop.f32.mrf.mxu1 }
  0xfa   :  { %v599_v18 = vpack.c.bf16 %v446_v10, %v446_v10  ;;  %v431_v20 = vadd.f32 %v834_v53, %v408_v12  ;;  %v352_v24 = vadd.f32 %v301_v16, %v43_v14  ;;  %v360_v25 = vadd.f32 %v333_v17, %v51_v15 }
  0xfb   :  { %v607_v19 = vpack.c.bf16 %v454_v11, %v454_v11  ;;  %v439_v21 = vadd.f32 %v834_v53, %v416_v13  ;;  %v386_v22 = vld [vmem:[#allocation2 + $0x10] sm:$0xff]  ;;  %v303_v26 = vpop.f32.mrf.mxu0  ;;  %v335_v27 = vpop.f32.mrf.mxu1 }
  0xfc   :  { %v394_v23 = vld [vmem:[#allocation2 + $0x50] sm:$0xff]  ;;  %527 = vst.msk [vmem:[%s948_s4] sm:$0xf] %vm526_vm4, %v599_v18  ;;  %v447_v28 = vmax.f32 %v431_v20, 0.0  ;;  %v409_v30 = vmul.f32 %v829_v50, %v386_v22 }
  0xfd   :  { %535 = vst.msk [vmem:[%s948_s4 + $0x20] sm:$0xf] %vm526_vm4, %v607_v19  ;;  %v455_v29 = vmax.f32 %v439_v21, 0.0  ;;  %v417_v31 = vmul.f32 %v829_v50, %v394_v23  ;;  %v304_v34 = vpop.f32.mrf.mxu0  ;;  %v336_v35 = vpop.f32.mrf.mxu1 }
  0xfe   :  { %369 = vst.msk [vmem:[#allocation2 + $0x20] sm:$0xff] %vm22_vm0, %v352_v24  ;;  %377 = vst.msk [vmem:[#allocation2 + $0x60] sm:$0xff] %vm22_vm0, %v360_v25  ;;  %v600_v36 = vpack.c.bf16 %v447_v28, %v447_v28  ;;  %v432_v38 = vadd.f32 %v834_v53, %v409_v30  ;;  %v353_v42 = vadd.f32 %v304_v34, %v44_v32 }
  0xff   :  { %v608_v37 = vpack.c.bf16 %v455_v29, %v455_v29  ;;  %v440_v39 = vadd.f32 %v834_v53, %v417_v31  ;;  %v387_v40 = vld [vmem:[#allocation2 + $0x18] sm:$0xff]  ;;  %v361_v43 = vadd.f32 %v336_v35, %v52_v33  ;;  %v306_v44 = vpop.f32.mrf.mxu0  ;;  %v338_v45 = vpop.f32.mrf.mxu1 }
 0x100   :  { %v395_v41 = vld [vmem:[#allocation2 + $0x58] sm:$0xff]  ;;  %528 = vst.msk [vmem:[%s948_s4 + $0x4] sm:$0xf] %vm526_vm4, %v600_v36  ;;  %v448_v46 = vmax.f32 %v432_v38, 0.0  ;;  %v410_v48 = vmul.f32 %v829_v50, %v387_v40 }
 0x101   :  { %536 = vst.msk [vmem:[%s948_s4 + $0x24] sm:$0xf] %vm526_vm4, %v608_v37  ;;  %v456_v47 = vmax.f32 %v440_v39, 0.0  ;;  %v418_v49 = vmul.f32 %v829_v50, %v395_v41  ;;  %v309_v54 = vpop.f32.mrf.mxu0  ;;  %v341_v55 = vpop.f32.mrf.mxu1 }
 0x102   :  { %370 = vst.msk [vmem:[#allocation2 + $0x28] sm:$0xff] %vm22_vm0, %v353_v42  ;;  %378 = vst.msk [vmem:[#allocation2 + $0x68] sm:$0xff] %vm22_vm0, %v361_v43  ;;  %v601_v56 = vpack.c.bf16 %v448_v46, %v448_v46  ;;  %v433_v58 = vadd.f32 %v834_v53, %v410_v48  ;;  %v354_v60 = vadd.f32 %v309_v54, %v45_v51 }
 0x103   :  { %v609_v57 = vpack.c.bf16 %v456_v47, %v456_v47  ;;  %v441_v59 = vadd.f32 %v834_v53, %v418_v49  ;;  %v362_v61 = vadd.f32 %v341_v55, %v53_v52  ;;  %v311_v62 = vpop.f32.mrf.mxu0  ;;  %v343_v63 = vpop.f32.mrf.mxu1 }
 0x104   :  { %529 = vst.msk [vmem:[%s948_s4 + $0x8] sm:$0xf] %vm526_vm4, %v601_v56  ;;  %v449_v2 = vmax.f32 %v433_v58, 0.0 }
 0x105   :  { %537 = vst.msk [vmem:[%s948_s4 + $0x28] sm:$0xf] %vm526_vm4, %v609_v57  ;;  %v457_v3 = vmax.f32 %v441_v59, 0.0  ;;  %v388_v4 = vld [vmem:[#allocation2 + $0x20] sm:$0xff]  ;;  %v312_v8 = vpop.f32.mrf.mxu0  ;;  %v344_v9 = vpop.f32.mrf.mxu1 }
 0x106   :  { %v396_v5 = vld [vmem:[#allocation2 + $0x60] sm:$0xff]  ;;  %v411_v6 = vmul.f32 %v829_v50, %v388_v4  ;;  %371 = vst.msk [vmem:[#allocation2 + $0x30] sm:$0xff] %vm22_vm0, %v354_v60  ;;  %379 = vst.msk [vmem:[#allocation2 + $0x70] sm:$0xff] %vm22_vm0, %v362_v61  ;;  %v602_v10 = vpack.c.bf16 %v449_v2, %v449_v2  ;;  %v355_v12 = vadd.f32 %v312_v8, %v46_v0 }
 0x107   :  { %v419_v7 = vmul.f32 %v829_v50, %v396_v5  ;;  %v610_v11 = vpack.c.bf16 %v457_v3, %v457_v3  ;;  %v363_v13 = vadd.f32 %v344_v9, %v54_v1  ;;  %v314_v16 = vpop.f32.mrf.mxu0  ;;  %v346_v17 = vpop.f32.mrf.mxu1 }
 0x108   :  { %v434_v14 = vadd.f32 %v834_v53, %v411_v6  ;;  %530 = vst.msk [vmem:[%s948_s4 + $0xc] sm:$0xf] %vm526_vm4, %v602_v10 }
 0x109   :  { %v442_v15 = vadd.f32 %v834_v53, %v419_v7  ;;  %538 = vst.msk [vmem:[%s948_s4 + $0x2c] sm:$0xf] %vm526_vm4, %v610_v11  ;;  %v389_v18 = vld [vmem:[#allocation2 + $0x28] sm:$0xff] }
 0x10a   :  { %v397_v19 = vld [vmem:[#allocation2 + $0x68] sm:$0xff]  ;;  %372 = vst.msk [vmem:[#allocation2 + $0x38] sm:$0xff] %vm22_vm0, %v355_v12  ;;  %380 = vst.msk [vmem:[#allocation2 + $0x78] sm:$0xff] %vm22_vm0, %v363_v13  ;;  %v450_v20 = vmax.f32 %v434_v14, 0.0  ;;  %v412_v22 = vmul.f32 %v829_v50, %v389_v18 }
 0x10b   :  { %v458_v21 = vmax.f32 %v442_v15, 0.0  ;;  %v420_v23 = vmul.f32 %v829_v50, %v397_v19 }
 0x10c   :  { %v603_v24 = vpack.c.bf16 %v450_v20, %v450_v20  ;;  %v435_v26 = vadd.f32 %v834_v53, %v412_v22 }
 0x10d   :  { %v611_v25 = vpack.c.bf16 %v458_v21, %v458_v21  ;;  %v443_v27 = vadd.f32 %v834_v53, %v420_v23  ;;  %v390_v28 = vld [vmem:[#allocation2 + $0x30] sm:$0xff] }
 0x10e   :  { %v398_v29 = vld [vmem:[#allocation2 + $0x70] sm:$0xff]  ;;  %531 = vst.msk [vmem:[%s948_s4 + $0x10] sm:$0xf] %vm526_vm4, %v603_v24  ;;  %v451_v30 = vmax.f32 %v435_v26, 0.0  ;;  %v413_v32 = vmul.f32 %v829_v50, %v390_v28 }
 0x10f   :  { %539 = vst.msk [vmem:[%s948_s4 + $0x30] sm:$0xf] %vm526_vm4, %v611_v25  ;;  %v459_v31 = vmax.f32 %v443_v27, 0.0  ;;  %v421_v33 = vmul.f32 %v829_v50, %v398_v29 }
 0x110   :  { %v604_v34 = vpack.c.bf16 %v451_v30, %v451_v30  ;;  %v436_v36 = vadd.f32 %v834_v53, %v413_v32 }
 0x111   :  { %v612_v35 = vpack.c.bf16 %v459_v31, %v459_v31  ;;  %v444_v37 = vadd.f32 %v834_v53, %v421_v33  ;;  %v391_v38 = vld [vmem:[#allocation2 + $0x38] sm:$0xff] }
 0x112   :  { %v399_v39 = vld [vmem:[#allocation2 + $0x78] sm:$0xff]  ;;  %v414_v40 = vmul.f32 %v829_v50, %v391_v38  ;;  %532 = vst.msk [vmem:[%s948_s4 + $0x14] sm:$0xf] %vm526_vm4, %v604_v34  ;;  %v452_v42 = vmax.f32 %v436_v36, 0.0 }
 0x113   :  { %v422_v41 = vmul.f32 %v829_v50, %v399_v39  ;;  %540 = vst.msk [vmem:[%s948_s4 + $0x34] sm:$0xf] %vm526_vm4, %v612_v35  ;;  %v460_v43 = vmax.f32 %v444_v37, 0.0 }
 0x114   :  { %v437_v44 = vadd.f32 %v834_v53, %v414_v40  ;;  %v605_v46 = vpack.c.bf16 %v452_v42, %v452_v42 }
 0x115   :  { %v445_v45 = vadd.f32 %v834_v53, %v422_v41  ;;  %v613_v47 = vpack.c.bf16 %v460_v43, %v460_v43 }
 0x116   :  { %v453_v48 = vmax.f32 %v437_v44, 0.0  ;;  %533 = vst.msk [vmem:[%s948_s4 + $0x18] sm:$0xf] %vm526_vm4, %v605_v46 }
 0x117   :  { %v461_v50 = vmax.f32 %v445_v45, 0.0  ;;  %541 = vst.msk [vmem:[%s948_s4 + $0x38] sm:$0xf] %vm526_vm4, %v613_v47 }
 0x118   :  { %v606_v49 = vpack.c.bf16 %v453_v48, %v453_v48 }
 0x119   :  { %v614_v51 = vpack.c.bf16 %v461_v50, %v461_v50 }
 0x11a   :  { %534 = vst.msk [vmem:[%s948_s4 + $0x1c] sm:$0xf] %vm526_vm4, %v606_v49 }
 0x11b   :  { %542 = vst.msk [vmem:[%s948_s4 + $0x3c] sm:$0xf] %vm526_vm4, %v614_v51 }

// kernel: rfunet_forward.32
= control target key start
LH: loop header
LB: loop body
LE: loop exit
PB: predicated region body
PF: predicated region fallthrough
CT: control target
= control target key end

     0   :  { %vm155_vm0 = vcmask 519168   ;;  %s413_s0 = inlined_call_operand.vmem [shape: bf16[128,64], index: 0, kind: input, shape index: {}]   ;;  %s414_s1 = inlined_call_operand.vmem [shape: bf16[128,64], index: 1, kind: input, shape index: {}]   ;;  %s415_s2 = inlined_call_operand.vmem [shape: bf16[128,64], index: 2, kind: output, shape index: {}]  }
   0x1   :  { %v209_v0 = vld [vmem:[%s413_s0] sm:$0xff]   ;;  %v272_v2 = vld [vmem:[%s413_s0 + $0x8] sm:$0xff]   ;;  %v273_v8 = vld [vmem:[%s413_s0 + $0x10] sm:$0xff]  }
   0x2   :  { %v241_v1 = vld [vmem:[%s414_s1] sm:$0xff]   ;;  %v210_v3 = vunpack.c.l.bf16 %v209_v0  ;;  %v211_v5 = vunpack.c.h.bf16 %v209_v0  ;;  %v279_v7 = vld [vmem:[%s414_s1 + $0x8] sm:$0xff]   ;;  %v280_v9 = vld [vmem:[%s414_s1 + $0x10] sm:$0xff]   ;;  %v214_v10 = vunpack.c.l.bf16 %v272_v2  ;;  %v215_v12 = vunpack.c.h.bf16 %v272_v2 }
   0x3   :  { %v242_v4 = vunpack.c.l.bf16 %v241_v1  ;;  %v243_v6 = vunpack.c.h.bf16 %v241_v1  ;;  %v246_v11 = vunpack.c.l.bf16 %v279_v7  ;;  %v247_v13 = vunpack.c.h.bf16 %v279_v7  ;;  %v274_v14 = vld [vmem:[%s413_s0 + $0x18] sm:$0xff]   ;;  %v275_v24 = vld [vmem:[%s413_s0 + $0x20] sm:$0xff]   ;;  %v276_v34 = vld [vmem:[%s413_s0 + $0x28] sm:$0xff]  }
   0x4   :  { %v218_v17 = vunpack.c.l.bf16 %v273_v8  ;;  %v250_v18 = vunpack.c.l.bf16 %v280_v9  ;;  %v281_v19 = vld [vmem:[%s414_s1 + $0x18] sm:$0xff]   ;;  %v219_v22 = vunpack.c.h.bf16 %v273_v8  ;;  %v251_v23 = vunpack.c.h.bf16 %v280_v9  ;;  %v282_v29 = vld [vmem:[%s414_s1 + $0x20] sm:$0xff]   ;;  %v283_v35 = vld [vmem:[%s414_s1 + $0x28] sm:$0xff]  }
   0x5   :  { %v75_v15 = vadd.f32 %v242_v4, %v210_v3  ;;  %v76_v16 = vadd.f32 %v243_v6, %v211_v5  ;;  %v77_v20 = vadd.f32 %v246_v11, %v214_v10  ;;  %v78_v21 = vadd.f32 %v247_v13, %v215_v12  ;;  %v277_v44 = vld [vmem:[%s413_s0 + $0x30] sm:$0xff]   ;;  %v278_v54 = vld [vmem:[%s413_s0 + $0x38] sm:$0xff]  }
   0x6   :  { %v79_v27 = vadd.f32 %v250_v18, %v218_v17  ;;  %v222_v28 = vunpack.c.l.bf16 %v274_v14  ;;  %v80_v32 = vadd.f32 %v251_v23, %v219_v22  ;;  %v254_v33 = vunpack.c.l.bf16 %v281_v19  ;;  %v284_v49 = vld [vmem:[%s414_s1 + $0x30] sm:$0xff]   ;;  %v285_v59 = vld [vmem:[%s414_s1 + $0x38] sm:$0xff]  }
   0x7   :  { %v192_v25 = vpack.c.bf16 %v75_v15, %v75_v15  ;;  %v193_v26 = vpack.c.bf16 %v76_v16, %v76_v16  ;;  %v194_v30 = vpack.c.bf16 %v77_v20, %v77_v20  ;;  %v195_v31 = vpack.c.bf16 %v78_v21, %v78_v21 }
   0x8   :  { %v196_v36 = vpack.c.bf16 %v79_v27, %v79_v27  ;;  %v223_v37 = vunpack.c.h.bf16 %v274_v14  ;;  %v255_v38 = vunpack.c.h.bf16 %v281_v19  ;;  %v226_v39 = vunpack.c.l.bf16 %v275_v24 }
   0x9   :  { %156 = vst.msk [vmem:[%s415_s2] sm:$0xf] %vm155_vm0, %v192_v25  ;;  %157 = vst.msk [vmem:[%s415_s2 + $0x4] sm:$0xf] %vm155_vm0, %v193_v26  ;;  %v197_v40 = vpack.c.bf16 %v80_v32, %v80_v32  ;;  %v81_v41 = vadd.f32 %v254_v33, %v222_v28  ;;  %v258_v42 = vunpack.c.l.bf16 %v282_v29  ;;  %v227_v43 = vunpack.c.h.bf16 %v275_v24 }
   0xa   :  { %158 = vst.msk [vmem:[%s415_s2 + $0x8] sm:$0xf] %vm155_vm0, %v194_v30  ;;  %159 = vst.msk [vmem:[%s415_s2 + $0xc] sm:$0xf] %vm155_vm0, %v195_v31  ;;  %v82_v45 = vadd.f32 %v255_v38, %v223_v37  ;;  %v259_v46 = vunpack.c.h.bf16 %v282_v29  ;;  %v230_v47 = vunpack.c.l.bf16 %v276_v34  ;;  %v262_v48 = vunpack.c.l.bf16 %v283_v35 }
   0xb   :  { %160 = vst.msk [vmem:[%s415_s2 + $0x10] sm:$0xf] %vm155_vm0, %v196_v36  ;;  %161 = vst.msk [vmem:[%s415_s2 + $0x14] sm:$0xf] %vm155_vm0, %v197_v40  ;;  %v198_v50 = vpack.c.bf16 %v81_v41, %v81_v41  ;;  %v83_v51 = vadd.f32 %v258_v42, %v226_v39  ;;  %v231_v52 = vunpack.c.h.bf16 %v276_v34  ;;  %v263_v53 = vunpack.c.h.bf16 %v283_v35 }
   0xc   :  { %v199_v55 = vpack.c.bf16 %v82_v45, %v82_v45  ;;  %v84_v56 = vadd.f32 %v259_v46, %v227_v43  ;;  %v85_v57 = vadd.f32 %v262_v48, %v230_v47  ;;  %v234_v58 = vunpack.c.l.bf16 %v277_v44 }
   0xd   :  { %162 = vst.msk [vmem:[%s415_s2 + $0x18] sm:$0xf] %vm155_vm0, %v198_v50  ;;  %v200_v60 = vpack.c.bf16 %v83_v51, %v83_v51  ;;  %v86_v61 = vadd.f32 %v263_v53, %v231_v52  ;;  %v266_v62 = vunpack.c.l.bf16 %v284_v49  ;;  %v235_v63 = vunpack.c.h.bf16 %v277_v44 }
   0xe   :  { %163 = vst.msk [vmem:[%s415_s2 + $0x1c] sm:$0xf] %vm155_vm0, %v199_v55  ;;  %v201_v0 = vpack.c.bf16 %v84_v56, %v84_v56  ;;  %v202_v1 = vpack.c.bf16 %v85_v57, %v85_v57  ;;  %v267_v2 = vunpack.c.h.bf16 %v284_v49  ;;  %v238_v3 = vunpack.c.l.bf16 %v278_v54 }
   0xf   :  { %164 = vst.msk [vmem:[%s415_s2 + $0x20] sm:$0xf] %vm155_vm0, %v200_v60  ;;  %v203_v4 = vpack.c.bf16 %v86_v61, %v86_v61  ;;  %v87_v5 = vadd.f32 %v266_v62, %v234_v58  ;;  %v270_v6 = vunpack.c.l.bf16 %v285_v59  ;;  %v239_v7 = vunpack.c.h.bf16 %v278_v54 }
  0x10   :  { %165 = vst.msk [vmem:[%s415_s2 + $0x24] sm:$0xf] %vm155_vm0, %v201_v0  ;;  %166 = vst.msk [vmem:[%s415_s2 + $0x28] sm:$0xf] %vm155_vm0, %v202_v1  ;;  %v88_v8 = vadd.f32 %v267_v2, %v235_v63  ;;  %v271_v9 = vunpack.c.h.bf16 %v285_v59 }
  0x11   :  { %167 = vst.msk [vmem:[%s415_s2 + $0x2c] sm:$0xf] %vm155_vm0, %v203_v4  ;;  %v204_v10 = vpack.c.bf16 %v87_v5, %v87_v5  ;;  %v89_v11 = vadd.f32 %v270_v6, %v238_v3 }
  0x12   :  { %v205_v12 = vpack.c.bf16 %v88_v8, %v88_v8  ;;  %v90_v13 = vadd.f32 %v271_v9, %v239_v7 }
  0x13   :  { %168 = vst.msk [vmem:[%s415_s2 + $0x30] sm:$0xf] %vm155_vm0, %v204_v10  ;;  %v206_v14 = vpack.c.bf16 %v89_v11, %v89_v11 }
  0x14   :  { %169 = vst.msk [vmem:[%s415_s2 + $0x34] sm:$0xf] %vm155_vm0, %v205_v12  ;;  %v207_v15 = vpack.c.bf16 %v90_v13, %v90_v13 }
  0x15   :  { %170 = vst.msk [vmem:[%s415_s2 + $0x38] sm:$0xf] %vm155_vm0, %v206_v14 }
  0x16   :  { %171 = vst.msk [vmem:[%s415_s2 + $0x3c] sm:$0xf] %vm155_vm0, %v207_v15 }

// kernel: rfunet_forward.30
= control target key start
LH: loop header
LB: loop body
LE: loop exit
PB: predicated region body
PF: predicated region fallthrough
CT: control target
= control target key end

     0   :  { %vm164_vm0 = vcmask 1040384   ;;  %vm22_vm1 = vcmask 523264   ;;  %v578_v1 = vmov 0   ;;  %v579_v5 = vmov 0.0   ;;  %s787_s1 = inlined_call_operand.vmem [shape: bf16[49,64], index: 1, kind: input, shape index: {}]   ;;  %s788_s0 = inlined_call_operand.vmem [shape: bf16[128,49], index: 0, kind: input, shape index: {}]   ;;  %s789_s2 = inlined_call_operand.vmem [shape: f32[1,64], index: 2, kind: input, shape index: {}]   ;;  %s790_s3 = inlined_call_operand.vmem [shape: f32[1,64], index: 3, kind: input, shape index: {}]   ;;  %s791_s4 = inlined_call_operand.vmem [shape: bf16[128,64], index: 4, kind: output, shape index: {}]  }
   0x1   :  { %v566_v0 = vld [vmem:[%s787_s1 + $0x18] ss:$0 sps:$4 sm:$0x11]   ;;  %v166_v2 = vsel %vm164_vm0, 65535, %v578_v1  ;;  %v567_v4 = vld [vmem:[%s787_s1 + $0x10] sm:$0xff]   ;;  %25 = vst.msk [vmem:[#allocation2 + $0x10] sm:$0xff] %vm22_vm1, %v579_v5 }
   0x2   :  { %v168_v3 = vand.u32 %v566_v0, %v166_v2  ;;  %23 = vst.msk [vmem:[#allocation2] sm:$0xff] %vm22_vm1, %v579_v5  ;;  %24 = vst.msk [vmem:[#allocation2 + $0x8] sm:$0xff] %vm22_vm1, %v579_v5  ;;  %v570_v6 = vld [vmem:[%s788_s0] sm:$0xff]   ;;  %vm139_vm2 = vcmask 400384   ;;  %v568_v8 = vld [vmem:[%s787_s1 + $0x8] sm:$0xff]   ;;  %vm445_vm3 = vcmask 519168  }
   0x3   :  { %26 = vst.msk [vmem:[#allocation2 + $0x18] sm:$0xff] %vm22_vm1, %v579_v5  ;;  %27 = vst.msk [vmem:[#allocation2 + $0x20] sm:$0xff] %vm22_vm1, %v579_v5  ;;  %v571_v7 = vld [vmem:[%s788_s0 + $0x20] sm:$0xff]   ;;  %540 = vmatprep.mubr.msk.bf16.mxu0 %vm139_vm2, %v570_v6  ;;  %v572_v10 = vld [vmem:[%s788_s0 + $0x8] sm:$0xff]  }
   0x4   :  { %28 = vst.msk [vmem:[#allocation2 + $0x28] sm:$0xff] %vm22_vm1, %v579_v5  ;;  %29 = vst.msk [vmem:[#allocation2 + $0x30] sm:$0xff] %vm22_vm1, %v579_v5  ;;  %532 = vmatprep.subr.bf16.mxu0 %v168_v3  ;;  %556 = vmatprep.subr.bf16.mxu1 %v168_v3  ;;  %v569_v9 = vld [vmem:[%s787_s1] sm:$0xff]   ;;  %v573_v11 = vld [vmem:[%s788_s0 + $0x28] sm:$0xff]  }
   0x5   :  { %30 = vst.msk [vmem:[#allocation2 + $0x38] sm:$0xff] %vm22_vm1, %v579_v5  ;;  %31 = vst.msk [vmem:[#allocation2 + $0x40] sm:$0xff] %vm22_vm1, %v579_v5  ;;  %533 = vmatpush3.bf16.msra.mxu0 %v168_v3  ;;  %560 = vmatpush3.bf16.msra.mxu1 %v168_v3  ;;  %v574_v12 = vld [vmem:[%s788_s0 + $0x10] sm:$0xff]   ;;  %v576_v14 = vld [vmem:[%s788_s0 + $0x18] sm:$0xff]  }
   0x6   :  { %32 = vst.msk [vmem:[#allocation2 + $0x48] sm:$0xff] %vm22_vm1, %v579_v5  ;;  %33 = vst.msk [vmem:[#allocation2 + $0x50] sm:$0xff] %vm22_vm1, %v579_v5  ;;  %534 = vmatprep.subr.bf16.mxu0 %v567_v4  ;;  %557 = vmatprep.subr.bf16.mxu1 %v567_v4  ;;  %v575_v13 = vld [vmem:[%s788_s0 + $0x30] sm:$0xff]   ;;  %v577_v15 = vld [vmem:[%s788_s0 + $0x38] sm:$0xff]  }
   0x7   :  { %34 = vst.msk [vmem:[#allocation2 + $0x58] sm:$0xff] %vm22_vm1, %v579_v5  ;;  %35 = vst.msk [vmem:[#allocation2 + $0x60] sm:$0xff] %vm22_vm1, %v579_v5  ;;  %548 = vmatprep.mubr.msk.bf16.mxu1 %vm139_vm2, %v571_v7  ;;  %v674_v42 = vld [vmem:[%s789_s2] ss:$0 sm:$0xff] }
   0x8   :  { %36 = vst.msk [vmem:[#allocation2 + $0x68] sm:$0xff] %vm22_vm1, %v579_v5  ;;  %37 = vst.msk [vmem:[#allocation2 + $0x70] sm:$0xff] %vm22_vm1, %v579_v5  ;;  %v41_v16 = vld [vmem:[#allocation2 + $0x10] sm:$0xff]  ;;  %v681_v50 = vld [vmem:[%s790_s3] ss:$0 sm:$0xff] }
   0x9   :  { %38 = vst.msk [vmem:[#allocation2 + $0x78] sm:$0xff] %vm22_vm1, %v579_v5  ;;  %535 = vmatpush3.bf16.msra.mxu0 %v567_v4  ;;  %561 = vmatpush3.bf16.msra.mxu1 %v567_v4  ;;  %v39_v20 = vld [vmem:[#allocation2] sm:$0xff]  ;;  %v40_v32 = vld [vmem:[#allocation2 + $0x8] sm:$0xff] }
   0xa   :  { %536 = vmatprep.subr.bf16.mxu0 %v568_v8  ;;  %558 = vmatprep.subr.bf16.mxu1 %v568_v8  ;;  %v42_v26 = vld [vmem:[#allocation2 + $0x18] sm:$0xff]  ;;  %v43_v45 = vld [vmem:[#allocation2 + $0x20] sm:$0xff] }
   0xb   :  { %v45_v38 = vld [vmem:[#allocation2 + $0x30] sm:$0xff]  ;;  %v44_v4 = vld [vmem:[#allocation2 + $0x28] sm:$0xff] }
   0xc   :  { %v47_v21 = vld [vmem:[#allocation2 + $0x40] sm:$0xff]  ;;  %v46_v58 = vld [vmem:[#allocation2 + $0x38] sm:$0xff] }
   0xd   :  { %537 = vmatpush3.bf16.msra.mxu0 %v568_v8  ;;  %562 = vmatpush3.bf16.msra.mxu1 %v568_v8  ;;  %v49_v17 = vld [vmem:[#allocation2 + $0x50] sm:$0xff]  ;;  %v48_v33 = vld [vmem:[#allocation2 + $0x48] sm:$0xff] }
   0xe   :  { %538 = vmatprep.subr.bf16.mxu0 %v569_v9  ;;  %559 = vmatprep.subr.bf16.mxu1 %v569_v9  ;;  %v50_v27 = vld [vmem:[#allocation2 + $0x58] sm:$0xff]  ;;  %v51_v46 = vld [vmem:[#allocation2 + $0x60] sm:$0xff] }
   0xf   :  { %v53_v39 = vld [vmem:[#allocation2 + $0x70] sm:$0xff]  ;;  %v52_v5 = vld [vmem:[#allocation2 + $0x68] sm:$0xff] }
  0x10   :  { %v54_v59 = vld [vmem:[#allocation2 + $0x78] sm:$0xff] }
  0x11   :  { %539 = vmatpush3.bf16.msra.mxu0 %v569_v9  ;;  %563 = vmatpush3.bf16.msra.mxu1 %v569_v9 }
  0x14   :  { %541 = vmatmul.mubr.msk.bf16.vlgmr.msra.gmra.mxu0 %vm139_vm2, %v572_v10  ;;  %549 = vmatmul.mubr.msk.bf16.vlgmr.msra.gmra.mxu1 %vm139_vm2, %v573_v11 }
  0x15   :  { %544 = vmatprep.mubr.msk.bf16.mxu0 %vm139_vm2, %v574_v12  ;;  %552 = vmatprep.mubr.msk.bf16.mxu1 %vm139_vm2, %v575_v13 }
  0x1c   :  { %545 = vmatmul.mubr.msk.bf16.gmra.mxu0 %vm139_vm2, %v576_v14  ;;  %553 = vmatmul.mubr.msk.bf16.gmra.mxu1 %vm139_vm2, %v577_v15 }
  0xd4   :  { %v542_v18 = vpop.f32.mrf.mxu0  ;;  %v550_v19 = vpop.f32.mrf.mxu1 }
  0xd5   :  { %v269_v22 = vadd.f32 %v542_v18, %v41_v16  ;;  %v277_v23 = vadd.f32 %v550_v19, %v49_v17 }
  0xd6   :  { %v204_v24 = vpop.f32.mrf.mxu0  ;;  %v236_v25 = vpop.f32.mrf.mxu1 }
  0xd7   :  { %286 = vst.msk [vmem:[#allocation2 + $0x10] sm:$0xff] %vm22_vm1, %v269_v22  ;;  %294 = vst.msk [vmem:[#allocation2 + $0x50] sm:$0xff] %vm22_vm1, %v277_v23  ;;  %v267_v28 = vadd.f32 %v204_v24, %v39_v20  ;;  %v275_v29 = vadd.f32 %v236_v25, %v47_v21 }
  0xd8   :  { %v543_v30 = vpop.f32.mrf.mxu0  ;;  %v551_v31 = vpop.f32.mrf.mxu1 }
  0xd9   :  { %284 = vst.msk [vmem:[#allocation2] sm:$0xff] %vm22_vm1, %v267_v28  ;;  %292 = vst.msk [vmem:[#allocation2 + $0x40] sm:$0xff] %vm22_vm1, %v275_v29  ;;  %v270_v34 = vadd.f32 %v543_v30, %v42_v26  ;;  %v278_v35 = vadd.f32 %v551_v31, %v50_v27 }
  0xda   :  { %v207_v36 = vpop.f32.mrf.mxu0  ;;  %v239_v37 = vpop.f32.mrf.mxu1 }
  0xdb   :  { %287 = vst.msk [vmem:[#allocation2 + $0x18] sm:$0xff] %vm22_vm1, %v270_v34  ;;  %295 = vst.msk [vmem:[#allocation2 + $0x58] sm:$0xff] %vm22_vm1, %v278_v35  ;;  %v268_v40 = vadd.f32 %v207_v36, %v40_v32  ;;  %v276_v41 = vadd.f32 %v239_v37, %v48_v33 }
  0xdc   :  { %v546_v43 = vpop.f32.mrf.mxu0  ;;  %v554_v44 = vpop.f32.mrf.mxu1 }
  0xdd   :  { %285 = vst.msk [vmem:[#allocation2 + $0x8] sm:$0xff] %vm22_vm1, %v268_v40  ;;  %293 = vst.msk [vmem:[#allocation2 + $0x48] sm:$0xff] %vm22_vm1, %v276_v41  ;;  %v273_v47 = vadd.f32 %v546_v43, %v45_v38  ;;  %v281_v48 = vadd.f32 %v554_v44, %v53_v39 }
  0xde   :  { %v305_v49 = vld [vmem:[#allocation2 + $0x10] sm:$0xff]  ;;  %v220_v52 = vpop.f32.mrf.mxu0  ;;  %v252_v53 = vpop.f32.mrf.mxu1 }
  0xdf   :  { %v313_v51 = vld [vmem:[#allocation2 + $0x50] sm:$0xff]  ;;  %v328_v54 = vmul.f32 %v674_v42, %v305_v49  ;;  %290 = vst.msk [vmem:[#allocation2 + $0x30] sm:$0xff] %vm22_vm1, %v273_v47  ;;  %298 = vst.msk [vmem:[#allocation2 + $0x70] sm:$0xff] %vm22_vm1, %v281_v48  ;;  %v271_v56 = vadd.f32 %v220_v52, %v43_v45  ;;  %v279_v57 = vadd.f32 %v252_v53, %v51_v46 }
  0xe0   :  { %v336_v55 = vmul.f32 %v674_v42, %v313_v51  ;;  %v303_v60 = vld [vmem:[#allocation2] sm:$0xff]  ;;  %v547_v62 = vpop.f32.mrf.mxu0  ;;  %v555_v63 = vpop.f32.mrf.mxu1 }
  0xe1   :  { %v311_v61 = vld [vmem:[#allocation2 + $0x40] sm:$0xff]  ;;  %v351_v0 = vadd.f32 %v681_v50, %v328_v54  ;;  %v326_v2 = vmul.f32 %v674_v42, %v303_v60  ;;  %288 = vst.msk [vmem:[#allocation2 + $0x20] sm:$0xff] %vm22_vm1, %v271_v56  ;;  %296 = vst.msk [vmem:[#allocation2 + $0x60] sm:$0xff] %vm22_vm1, %v279_v57  ;;  %v274_v8 = vadd.f32 %v547_v62, %v46_v58 }
  0xe2   :  { %v359_v1 = vadd.f32 %v681_v50, %v336_v55  ;;  %v334_v3 = vmul.f32 %v674_v42, %v311_v61  ;;  %v306_v6 = vld [vmem:[#allocation2 + $0x18] sm:$0xff]  ;;  %v282_v9 = vadd.f32 %v555_v63, %v54_v59  ;;  %v223_v10 = vpop.f32.mrf.mxu0  ;;  %v255_v11 = vpop.f32.mrf.mxu1 }
  0xe3   :  { %v314_v7 = vld [vmem:[#allocation2 + $0x58] sm:$0xff]  ;;  %v367_v12 = vmax.f32 %v351_v0, 0.0  ;;  %v349_v14 = vadd.f32 %v681_v50, %v326_v2  ;;  %v329_v16 = vmul.f32 %v674_v42, %v306_v6  ;;  %291 = vst.msk [vmem:[#allocation2 + $0x38] sm:$0xff] %vm22_vm1, %v274_v8  ;;  %v272_v20 = vadd.f32 %v223_v10, %v44_v4 }
  0xe4   :  { %v375_v13 = vmax.f32 %v359_v1, 0.0  ;;  %v357_v15 = vadd.f32 %v681_v50, %v334_v3  ;;  %v337_v17 = vmul.f32 %v674_v42, %v314_v7  ;;  %v304_v18 = vld [vmem:[#allocation2 + $0x8] sm:$0xff]  ;;  %299 = vst.msk [vmem:[#allocation2 + $0x78] sm:$0xff] %vm22_vm1, %v282_v9  ;;  %v280_v21 = vadd.f32 %v255_v11, %v52_v5 }
  0xe5   :  { %v312_v19 = vld [vmem:[#allocation2 + $0x48] sm:$0xff]  ;;  %v506_v22 = vpack.c.bf16 %v367_v12, %v367_v12  ;;  %v365_v24 = vmax.f32 %v349_v14, 0.0  ;;  %v352_v26 = vadd.f32 %v681_v50, %v329_v16  ;;  %v327_v28 = vmul.f32 %v674_v42, %v304_v18  ;;  %289 = vst.msk [vmem:[#allocation2 + $0x28] sm:$0xff] %vm22_vm1, %v272_v20 }
  0xe6   :  { %v514_v23 = vpack.c.bf16 %v375_v13, %v375_v13  ;;  %v373_v25 = vmax.f32 %v357_v15, 0.0  ;;  %v360_v27 = vadd.f32 %v681_v50, %v337_v17  ;;  %v335_v29 = vmul.f32 %v674_v42, %v312_v19  ;;  %v309_v30 = vld [vmem:[#allocation2 + $0x30] sm:$0xff]  ;;  %297 = vst.msk [vmem:[#allocation2 + $0x68] sm:$0xff] %vm22_vm1, %v280_v21 }
  0xe7   :  { %v317_v31 = vld [vmem:[#allocation2 + $0x70] sm:$0xff]  ;;  %448 = vst.msk [vmem:[%s791_s4 + $0x8] sm:$0xf] %vm445_vm3, %v506_v22  ;;  %v504_v32 = vpack.c.bf16 %v365_v24, %v365_v24  ;;  %v332_v34 = vmul.f32 %v674_v42, %v309_v30  ;;  %v368_v36 = vmax.f32 %v352_v26, 0.0  ;;  %v350_v38 = vadd.f32 %v681_v50, %v327_v28 }
  0xe8   :  { %456 = vst.msk [vmem:[%s791_s4 + $0x28] sm:$0xf] %vm445_vm3, %v514_v23  ;;  %v512_v33 = vpack.c.bf16 %v373_v25, %v373_v25  ;;  %v340_v35 = vmul.f32 %v674_v42, %v317_v31  ;;  %v376_v37 = vmax.f32 %v360_v27, 0.0  ;;  %v358_v39 = vadd.f32 %v681_v50, %v335_v29  ;;  %v307_v40 = vld [vmem:[#allocation2 + $0x20] sm:$0xff] }
  0xe9   :  { %v315_v41 = vld [vmem:[#allocation2 + $0x60] sm:$0xff]  ;;  %446 = vst.msk [vmem:[%s791_s4] sm:$0xf] %vm445_vm3, %v504_v32  ;;  %v355_v43 = vadd.f32 %v681_v50, %v332_v34  ;;  %v330_v45 = vmul.f32 %v674_v42, %v307_v40  ;;  %v507_v47 = vpack.c.bf16 %v368_v36, %v368_v36  ;;  %v366_v49 = vmax.f32 %v350_v38, 0.0 }
  0xea   :  { %454 = vst.msk [vmem:[%s791_s4 + $0x20] sm:$0xf] %vm445_vm3, %v512_v33  ;;  %v363_v44 = vadd.f32 %v681_v50, %v340_v35  ;;  %v338_v46 = vmul.f32 %v674_v42, %v315_v41  ;;  %v515_v48 = vpack.c.bf16 %v376_v37, %v376_v37  ;;  %v374_v51 = vmax.f32 %v358_v39, 0.0  ;;  %v310_v56 = vld [vmem:[#allocation2 + $0x38] sm:$0xff] }
  0xeb   :  { %v371_v52 = vmax.f32 %v355_v43, 0.0  ;;  %v353_v54 = vadd.f32 %v681_v50, %v330_v45  ;;  %v318_v57 = vld [vmem:[#allocation2 + $0x78] sm:$0xff]  ;;  %449 = vst.msk [vmem:[%s791_s4 + $0xc] sm:$0xf] %vm445_vm3, %v507_v47  ;;  %v505_v58 = vpack.c.bf16 %v366_v49, %v366_v49  ;;  %v333_v60 = vmul.f32 %v674_v42, %v310_v56 }
  0xec   :  { %v379_v53 = vmax.f32 %v363_v44, 0.0  ;;  %v361_v55 = vadd.f32 %v681_v50, %v338_v46  ;;  %457 = vst.msk [vmem:[%s791_s4 + $0x2c] sm:$0xf] %vm445_vm3, %v515_v48  ;;  %v513_v59 = vpack.c.bf16 %v374_v51, %v374_v51  ;;  %v341_v61 = vmul.f32 %v674_v42, %v318_v57  ;;  %v308_v2 = vld [vmem:[#allocation2 + $0x28] sm:$0xff] }
  0xed   :  { %v510_v62 = vpack.c.bf16 %v371_v52, %v371_v52  ;;  %v369_v0 = vmax.f32 %v353_v54, 0.0  ;;  %v316_v3 = vld [vmem:[#allocation2 + $0x68] sm:$0xff]  ;;  %447 = vst.msk [vmem:[%s791_s4 + $0x4] sm:$0xf] %vm445_vm3, %v505_v58  ;;  %v356_v4 = vadd.f32 %v681_v50, %v333_v60  ;;  %v331_v6 = vmul.f32 %v674_v42, %v308_v2 }
  0xee   :  { %v518_v63 = vpack.c.bf16 %v379_v53, %v379_v53  ;;  %v377_v1 = vmax.f32 %v361_v55, 0.0  ;;  %455 = vst.msk [vmem:[%s791_s4 + $0x24] sm:$0xf] %vm445_vm3, %v513_v59  ;;  %v364_v5 = vadd.f32 %v681_v50, %v341_v61  ;;  %v339_v7 = vmul.f32 %v674_v42, %v316_v3 }
  0xef   :  { %452 = vst.msk [vmem:[%s791_s4 + $0x18] sm:$0xf] %vm445_vm3, %v510_v62  ;;  %v508_v8 = vpack.c.bf16 %v369_v0, %v369_v0  ;;  %v372_v10 = vmax.f32 %v356_v4, 0.0  ;;  %v354_v12 = vadd.f32 %v681_v50, %v331_v6 }
  0xf0   :  { %460 = vst.msk [vmem:[%s791_s4 + $0x38] sm:$0xf] %vm445_vm3, %v518_v63  ;;  %v516_v9 = vpack.c.bf16 %v377_v1, %v377_v1  ;;  %v380_v11 = vmax.f32 %v364_v5, 0.0  ;;  %v362_v13 = vadd.f32 %v681_v50, %v339_v7 }
  0xf1   :  { %450 = vst.msk [vmem:[%s791_s4 + $0x10] sm:$0xf] %vm445_vm3, %v508_v8  ;;  %v511_v42 = vpack.c.bf16 %v372_v10, %v372_v10  ;;  %v370_v15 = vmax.f32 %v354_v12, 0.0 }
  0xf2   :  { %458 = vst.msk [vmem:[%s791_s4 + $0x30] sm:$0xf] %vm445_vm3, %v516_v9  ;;  %v519_v14 = vpack.c.bf16 %v380_v11, %v380_v11  ;;  %v378_v16 = vmax.f32 %v362_v13, 0.0 }
  0xf3   :  { %453 = vst.msk [vmem:[%s791_s4 + $0x1c] sm:$0xf] %vm445_vm3, %v511_v42  ;;  %v509_v50 = vpack.c.bf16 %v370_v15, %v370_v15 }
  0xf4   :  { %461 = vst.msk [vmem:[%s791_s4 + $0x3c] sm:$0xf] %vm445_vm3, %v519_v14  ;;  %v517_v17 = vpack.c.bf16 %v378_v16, %v378_v16 }
  0xf5   :  { %451 = vst.msk [vmem:[%s791_s4 + $0x14] sm:$0xf] %vm445_vm3, %v509_v50 }
  0xf6   :  { %459 = vst.msk [vmem:[%s791_s4 + $0x34] sm:$0xf] %vm445_vm3, %v517_v17 }

// kernel: split.0
= control target key start
LH: loop header
LB: loop body
LE: loop exit
PB: predicated region body
PF: predicated region fallthrough
CT: control target
= control target key end

     0   :  { %v130_v14 = vmov 0.0   ;;  %s189_s0 = inlined_call_operand.vmem [shape: bf16[4,4,4,64], index: 0, kind: input, shape index: {}]   ;;  %s190_s1 = inlined_call_operand.vmem [shape: bf16[2,4,4,64], index: 1, kind: output, shape index: {}]  }
   0x1   :  { %v114_v0 = vld [vmem:[%s189_s0 + $0x10] sm:$0x3]  ;;  %v115_v1 = vld [vmem:[%s189_s0 + $0x18] sm:$0x3]  ;;  %v117_v2 = vld [vmem:[%s189_s0 + $0x12] sm:$0x3] }
   0x2   :  { %v12_v3 = vunpack.c.l.bf16 %v114_v0  ;;  %v24_v4 = vunpack.c.l.bf16 %v115_v1  ;;  %v37_v5 = vunpack.c.l.bf16 %v117_v2  ;;  %v119_v6 = vld [vmem:[%s189_s0 + $0x1a] sm:$0x3]  ;;  %v121_v7 = vld [vmem:[%s189_s0 + $0x14] sm:$0x3]  ;;  %v123_v8 = vld [vmem:[%s189_s0 + $0x1c] sm:$0x3] }
   0x3   :  { %v50_v9 = vunpack.c.l.bf16 %v119_v6  ;;  %v63_v10 = vunpack.c.l.bf16 %v121_v7  ;;  %v76_v11 = vunpack.c.l.bf16 %v123_v8  ;;  %v125_v12 = vld [vmem:[%s189_s0 + $0x16] sm:$0x3]  ;;  %v127_v13 = vld [vmem:[%s189_s0 + $0x1e] sm:$0x3] }
   0x4   :  { %v14_v15 = vpack.c.bf16 %v130_v14, %v12_v3  ;;  %v27_v16 = vpack.c.bf16 %v130_v14, %v24_v4  ;;  %v40_v17 = vpack.c.bf16 %v130_v14, %v37_v5  ;;  %v89_v18 = vunpack.c.l.bf16 %v125_v12 }
   0x5   :  { %v53_v19 = vpack.c.bf16 %v130_v14, %v50_v9  ;;  %v66_v20 = vpack.c.bf16 %v130_v14, %v63_v10  ;;  %v79_v21 = vpack.c.bf16 %v130_v14, %v76_v11  ;;  %v102_v22 = vunpack.c.l.bf16 %v127_v13 }
   0x6   :  { %15 = vst [vmem:[%s190_s1] sm:$0x3] %v14_v15  ;;  %116 = vst [vmem:[%s190_s1 + $0x8] sm:$0x3] %v27_v16  ;;  %v92_v23 = vpack.c.bf16 %v130_v14, %v89_v18 }
   0x7   :  { %118 = vst [vmem:[%s190_s1 + $0x2] sm:$0x3] %v40_v17  ;;  %120 = vst [vmem:[%s190_s1 + $0xa] sm:$0x3] %v53_v19  ;;  %v105_v24 = vpack.c.bf16 %v130_v14, %v102_v22 }
   0x8   :  { %122 = vst [vmem:[%s190_s1 + $0x4] sm:$0x3] %v66_v20  ;;  %124 = vst [vmem:[%s190_s1 + $0xc] sm:$0x3] %v79_v21 }
   0x9   :  { %126 = vst [vmem:[%s190_s1 + $0x6] sm:$0x3] %v92_v23  ;;  %128 = vst [vmem:[%s190_s1 + $0xe] sm:$0x3] %v105_v24 }

// kernel: rfunet_forward.37
= control target key start
LH: loop header
LB: loop body
LE: loop exit
PB: predicated region body
PF: predicated region fallthrough
CT: control target
= control target key end

     0   :  { %vm47_vm0 = vcmask 519168   ;;  %s121_s0 = inlined_call_operand.vmem [shape: bf16[32,64], index: 0, kind: input, shape index: {}]   ;;  %s122_s1 = inlined_call_operand.vmem [shape: bf16[32,64], index: 1, kind: input, shape index: {}]   ;;  %s123_s2 = inlined_call_operand.vmem [shape: bf16[32,64], index: 2, kind: output, shape index: {}]  }
   0x1   :  { %v65_v0 = vld [vmem:[%s121_s0] sm:$0xff]   ;;  %v80_v2 = vld [vmem:[%s121_s0 + $0x8] sm:$0xff]  }
   0x2   :  { %v73_v1 = vld [vmem:[%s122_s1] sm:$0xff]   ;;  %v66_v3 = vunpack.c.l.bf16 %v65_v0  ;;  %v67_v5 = vunpack.c.h.bf16 %v65_v0  ;;  %v81_v7 = vld [vmem:[%s122_s1 + $0x8] sm:$0xff]   ;;  %v70_v8 = vunpack.c.l.bf16 %v80_v2  ;;  %v71_v10 = vunpack.c.h.bf16 %v80_v2 }
   0x3   :  { %v74_v4 = vunpack.c.l.bf16 %v73_v1  ;;  %v75_v6 = vunpack.c.h.bf16 %v73_v1  ;;  %v78_v9 = vunpack.c.l.bf16 %v81_v7  ;;  %v79_v11 = vunpack.c.h.bf16 %v81_v7 }
   0x5   :  { %v27_v12 = vadd.f32 %v74_v4, %v66_v3  ;;  %v28_v13 = vadd.f32 %v75_v6, %v67_v5  ;;  %v29_v14 = vadd.f32 %v78_v9, %v70_v8  ;;  %v30_v15 = vadd.f32 %v79_v11, %v71_v10 }
   0x7   :  { %v60_v16 = vpack.c.bf16 %v27_v12, %v27_v12  ;;  %v61_v17 = vpack.c.bf16 %v28_v13, %v28_v13  ;;  %v62_v18 = vpack.c.bf16 %v29_v14, %v29_v14  ;;  %v63_v19 = vpack.c.bf16 %v30_v15, %v30_v15 }
   0x9   :  { %48 = vst.msk [vmem:[%s123_s2] sm:$0xf] %vm47_vm0, %v60_v16  ;;  %49 = vst.msk [vmem:[%s123_s2 + $0x4] sm:$0xf] %vm47_vm0, %v61_v17 }
   0xa   :  { %50 = vst.msk [vmem:[%s123_s2 + $0x8] sm:$0xf] %vm47_vm0, %v62_v18  ;;  %51 = vst.msk [vmem:[%s123_s2 + $0xc] sm:$0xf] %vm47_vm0, %v63_v19 }

// kernel: rfunet_forward.33
= control target key start
LH: loop header
LB: loop body
LE: loop exit
PB: predicated region body
PF: predicated region fallthrough
CT: control target
= control target key end

     0   :  { %vm22_vm0 = vcmask 523264   ;;  %v1024_v56 = vmov 0.0   ;;  %vm756_vm1 = vcmask 519168   ;;  %s1276_s1 = inlined_call_operand.vmem [shape: bf16[576,64], index: 1, kind: input, shape index: {}]   ;;  %s1277_s0 = inlined_call_operand.vmem [shape: bf16[64,576], index: 0, kind: input, shape index: {}]   ;;  %s1278_s2 = inlined_call_operand.vmem [shape: f32[1,64], index: 2, kind: input, shape index: {}]   ;;  %s1279_s3 = inlined_call_operand.vmem [shape: f32[1,64], index: 3, kind: input, shape index: {}]   ;;  %s1280_s4 = inlined_call_operand.vmem [shape: bf16[64,64], index: 4, kind: output, shape index: {}]  }
   0x1   :  { %v960_v0 = vld [vmem:[%s1276_s1 + $0x78] sm:$0xff]   ;;  %v964_v4 = vld [vmem:[%s1276_s1 + $0x70] sm:$0xff]   ;;  %v968_v8 = vld [vmem:[%s1276_s1 + $0x68] sm:$0xff]   ;;  %25 = vst.msk [vmem:[#allocation2 + $0x10] sm:$0xff] %vm22_vm0, %v1024_v56 }
   0x2   :  { %v961_v1 = vld [vmem:[%s1276_s1 + $0xf8] sm:$0xff]   ;;  %847 = vmatprep.subr.bf16.mxu0 %v960_v0  ;;  %v965_v5 = vld [vmem:[%s1276_s1 + $0xf0] sm:$0xff]   ;;  %v969_v9 = vld [vmem:[%s1276_s1 + $0xe8] sm:$0xff]   ;;  %23 = vst.msk [vmem:[#allocation2] sm:$0xff] %vm22_vm0, %v1024_v56 }
   0x3   :  { %v962_v2 = vld [vmem:[%s1276_s1 + $0x38] sm:$0xff]   ;;  %887 = vmatprep.subr.bf16.mxu1 %v961_v1  ;;  %v966_v6 = vld [vmem:[%s1276_s1 + $0x30] sm:$0xff]   ;;  %v970_v10 = vld [vmem:[%s1276_s1 + $0x28] sm:$0xff]   ;;  %24 = vst.msk [vmem:[#allocation2 + $0x8] sm:$0xff] %vm22_vm0, %v1024_v56 }
   0x4   :  { %v963_v3 = vld [vmem:[%s1276_s1 + $0xb8] sm:$0xff]   ;;  %848 = vmatpush3.bf16.msra.mxu0 %v962_v2  ;;  %v967_v7 = vld [vmem:[%s1276_s1 + $0xb0] sm:$0xff]   ;;  %v971_v11 = vld [vmem:[%s1276_s1 + $0xa8] sm:$0xff]   ;;  %26 = vst.msk [vmem:[#allocation2 + $0x18] sm:$0xff] %vm22_vm0, %v1024_v56 }
   0x5   :  { %888 = vmatpush3.bf16.msra.mxu1 %v963_v3  ;;  %849 = vmatprep.subr.bf16.mxu0 %v964_v4  ;;  %v972_v12 = vld [vmem:[%s1276_s1 + $0x60] sm:$0xff]   ;;  %v976_v16 = vld [vmem:[%s1276_s1 + $0x58] sm:$0xff]   ;;  %v980_v20 = vld [vmem:[%s1276_s1 + $0x50] sm:$0xff]   ;;  %27 = vst.msk [vmem:[#allocation2 + $0x20] sm:$0xff] %vm22_vm0, %v1024_v56 }
   0x6   :  { %889 = vmatprep.subr.bf16.mxu1 %v965_v5  ;;  %v973_v13 = vld [vmem:[%s1276_s1 + $0xe0] sm:$0xff]   ;;  %v977_v17 = vld [vmem:[%s1276_s1 + $0xd8] sm:$0xff]   ;;  %v981_v21 = vld [vmem:[%s1276_s1 + $0xd0] sm:$0xff]   ;;  %28 = vst.msk [vmem:[#allocation2 + $0x28] sm:$0xff] %vm22_vm0, %v1024_v56 }
   0x7   :  { %v974_v14 = vld [vmem:[%s1276_s1 + $0x20] sm:$0xff]   ;;  %v978_v18 = vld [vmem:[%s1276_s1 + $0x18] sm:$0xff]   ;;  %v982_v22 = vld [vmem:[%s1276_s1 + $0x10] sm:$0xff]   ;;  %29 = vst.msk [vmem:[#allocation2 + $0x30] sm:$0xff] %vm22_vm0, %v1024_v56 }
   0x8   :  { %850 = vmatpush3.bf16.msra.mxu0 %v966_v6  ;;  %v975_v15 = vld [vmem:[%s1276_s1 + $0xa0] sm:$0xff]   ;;  %v979_v19 = vld [vmem:[%s1276_s1 + $0x98] sm:$0xff]   ;;  %v983_v23 = vld [vmem:[%s1276_s1 + $0x90] sm:$0xff]   ;;  %30 = vst.msk [vmem:[#allocation2 + $0x38] sm:$0xff] %vm22_vm0, %v1024_v56 }
   0x9   :  { %890 = vmatpush3.bf16.msra.mxu1 %v967_v7  ;;  %851 = vmatprep.subr.bf16.mxu0 %v968_v8  ;;  %v984_v24 = vld [vmem:[%s1276_s1 + $0x48] sm:$0xff]   ;;  %v988_v28 = vld [vmem:[%s1276_s1 + $0x40] sm:$0xff]   ;;  %v998_v36 = vld [vmem:[%s1276_s1 + $0x118] sm:$0xff]  }
   0xa   :  { %891 = vmatprep.subr.bf16.mxu1 %v969_v9  ;;  %v985_v25 = vld [vmem:[%s1276_s1 + $0xc8] sm:$0xff]   ;;  %v989_v29 = vld [vmem:[%s1276_s1 + $0xc0] sm:$0xff]   ;;  %v1005_v39 = vld [vmem:[%s1276_s1 + $0x110] sm:$0xff]  }
   0xb   :  { %v986_v26 = vld [vmem:[%s1276_s1 + $0x8] sm:$0xff]   ;;  %v990_v30 = vld [vmem:[%s1276_s1] sm:$0xff]   ;;  %v1008_v43 = vld [vmem:[%s1277_s0 + $0x5c] ss:$20 sps:$4 sm:$0xff]  }
   0xc   :  { %852 = vmatpush3.bf16.msra.mxu0 %v970_v10  ;;  %v987_v27 = vld [vmem:[%s1276_s1 + $0x88] sm:$0xff]   ;;  %v991_v31 = vld [vmem:[%s1276_s1 + $0x80] sm:$0xff]   ;;  %v1013_v48 = vld [vmem:[%s1277_s0 + $0x7c] ss:$20 sps:$4 sm:$0xff]  }
   0xd   :  { %892 = vmatpush3.bf16.msra.mxu1 %v971_v11  ;;  %853 = vmatprep.subr.bf16.mxu0 %v972_v12  ;;  %v992_v32 = vld [vmem:[%s1277_s0] ss:$20 sps:$4 sm:$0xff]   ;;  %v994_v33 = vld [vmem:[%s1277_s0 + $0x4] ss:$20 sps:$4 sm:$0xff]   ;;  %v995_v34 = vld [vmem:[%s1277_s0 + $0x8] ss:$20 sps:$4 sm:$0xff]  }
   0xe   :  { %893 = vmatprep.subr.bf16.mxu1 %v973_v13  ;;  %v997_v35 = vld [vmem:[%s1277_s0 + $0xc] ss:$20 sps:$4 sm:$0xff]   ;;  %496 = vmatprep.mubr.bf16.mxu0 %v994_v33  ;;  %v1001_v38 = vld [vmem:[%s1277_s0 + $0x34] ss:$20 sps:$4 sm:$0xff]   ;;  %v1004_v41 = vld [vmem:[%s1277_s0 + $0x30] ss:$20 sps:$4 sm:$0xff]  }
   0xf   :  { %561 = vmatprep.mubr.bf16.mxu1 %v997_v35  ;;  %v999_v37 = vld [vmem:[%s1277_s0 + $0x2c] ss:$20 sps:$4 sm:$0xff]   ;;  %v1003_v40 = vld [vmem:[%s1277_s0 + $0x28] ss:$20 sps:$4 sm:$0xff]   ;;  %v1010_v46 = vld [vmem:[%s1277_s0 + $0x50] ss:$20 sps:$4 sm:$0xff]  }
  0x10   :  { %854 = vmatpush3.bf16.msra.mxu0 %v974_v14  ;;  %v1006_v42 = vld [vmem:[%s1277_s0 + $0x54] ss:$20 sps:$4 sm:$0xff]   ;;  %v1019_v45 = vld [vmem:[%s1276_s1 + $0x100] sm:$0xff]   ;;  %v1011_v47 = vld [vmem:[%s1277_s0 + $0x58] ss:$20 sps:$4 sm:$0xff]  }
  0x11   :  { %894 = vmatpush3.bf16.msra.mxu1 %v975_v15  ;;  %855 = vmatprep.subr.bf16.mxu0 %v976_v16  ;;  %v1012_v44 = vld [vmem:[%s1276_s1 + $0x108] sm:$0xff]   ;;  %v1015_v49 = vld [vmem:[%s1277_s0 + $0x84] ss:$20 sps:$4 sm:$0xff]   ;;  %v1018_v51 = vld [vmem:[%s1277_s0 + $0x80] ss:$20 sps:$4 sm:$0xff]  }
  0x12   :  { %895 = vmatprep.subr.bf16.mxu1 %v977_v17  ;;  %v1017_v50 = vld [vmem:[%s1277_s0 + $0x78] ss:$20 sps:$4 sm:$0xff]   ;;  %v1020_v52 = vld [vmem:[%s1277_s0 + $0x10] ss:$20 sps:$4 sm:$0xff]   ;;  %v1021_v53 = vld [vmem:[%s1277_s0 + $0x60] ss:$20 sps:$4 sm:$0xff]  }
  0x13   :  { %v1022_v54 = vld [vmem:[%s1277_s0 + $0x38] ss:$20 sps:$4 sm:$0xff]   ;;  %v1023_v55 = vld [vmem:[%s1277_s0 + $0x88] ss:$20 sps:$4 sm:$0xff]  }
  0x14   :  { %856 = vmatpush3.bf16.msra.mxu0 %v978_v18 }
  0x15   :  { %896 = vmatpush3.bf16.msra.mxu1 %v979_v19  ;;  %857 = vmatprep.subr.bf16.mxu0 %v980_v20 }
  0x16   :  { %897 = vmatprep.subr.bf16.mxu1 %v981_v21 }
  0x18   :  { %858 = vmatpush3.bf16.msra.mxu0 %v982_v22 }
  0x19   :  { %898 = vmatpush3.bf16.msra.mxu1 %v983_v23  ;;  %859 = vmatprep.subr.bf16.mxu0 %v984_v24 }
  0x1a   :  { %899 = vmatprep.subr.bf16.mxu1 %v985_v25 }
  0x1c   :  { %860 = vmatpush3.bf16.msra.mxu0 %v986_v26 }
  0x1d   :  { %900 = vmatpush3.bf16.msra.mxu1 %v987_v27  ;;  %861 = vmatprep.subr.bf16.mxu0 %v988_v28 }
  0x1e   :  { %901 = vmatprep.subr.bf16.mxu1 %v989_v29 }
  0x20   :  { %862 = vmatpush3.bf16.msra.mxu0 %v990_v30 }
  0x21   :  { %902 = vmatpush3.bf16.msra.mxu1 %v991_v31  ;;  %935 = vmatprep.subr.bf16.mxu0 %v998_v36 }
  0x22   :  { %951 = vmatprep.subr.bf16.mxu1 %v998_v36 }
  0x23   :  { %497 = vmatmul.mubr.bf16.vlgmr.msra.gmra.mxu0 %v992_v32 }
  0x24   :  { %562 = vmatmul.mubr.bf16.vlgmr.msra.gmra.mxu1 %v995_v34  ;;  %936 = vmatpush3.bf16.msra.mxu0 %v998_v36 }
  0x25   :  { %955 = vmatpush3.bf16.msra.mxu1 %v998_v36  ;;  %504 = vmatprep.mubr.bf16.mxu0 %v999_v37 }
  0x26   :  { %569 = vmatprep.mubr.bf16.mxu1 %v1001_v38  ;;  %937 = vmatprep.subr.bf16.mxu0 %v1005_v39  ;;  %v33_v38 = vld [vmem:[#allocation2 + $0x10] sm:$0xff] }
  0x27   :  { %952 = vmatprep.subr.bf16.mxu1 %v1005_v39 }
  0x28   :  { %938 = vmatpush3.bf16.msra.mxu0 %v1005_v39 }
  0x29   :  { %956 = vmatpush3.bf16.msra.mxu1 %v1005_v39  ;;  %939 = vmatprep.subr.bf16.mxu0 %v1012_v44 }
  0x2a   :  { %953 = vmatprep.subr.bf16.mxu1 %v1012_v44 }
  0x2b   :  { %505 = vmatmul.mubr.bf16.gmra.mxu0 %v1003_v40 }
  0x2c   :  { %570 = vmatmul.mubr.bf16.gmra.mxu1 %v1004_v41  ;;  %512 = vmatprep.mubr.bf16.mxu0 %v1006_v42 }
  0x2d   :  { %577 = vmatprep.mubr.bf16.mxu1 %v1008_v43  ;;  %940 = vmatpush3.bf16.msra.mxu0 %v1012_v44 }
  0x2e   :  { %957 = vmatpush3.bf16.msra.mxu1 %v1012_v44  ;;  %941 = vmatprep.subr.bf16.mxu0 %v1019_v45  ;;  %v37_v44 = vld [vmem:[#allocation2 + $0x30] sm:$0xff] }
  0x2f   :  { %954 = vmatprep.subr.bf16.mxu1 %v1019_v45 }
  0x31   :  { %942 = vmatpush3.bf16.msra.mxu0 %v1019_v45 }
  0x32   :  { %958 = vmatpush3.bf16.msra.mxu1 %v1019_v45 }
  0x33   :  { %513 = vmatmul.mubr.bf16.gmra.mxu0 %v1010_v46 }
  0x34   :  { %578 = vmatmul.mubr.bf16.gmra.mxu1 %v1011_v47  ;;  %520 = vmatprep.mubr.bf16.mxu0 %v1013_v48 }
  0x35   :  { %585 = vmatprep.mubr.bf16.mxu1 %v1015_v49 }
  0x3b   :  { %521 = vmatmul.mubr.bf16.gmra.mxu0 %v1017_v50  ;;  %v31_v50 = vld [vmem:[#allocation2] sm:$0xff] }
  0x3c   :  { %586 = vmatmul.mubr.bf16.gmra.mxu1 %v1018_v51  ;;  %943 = vmatprep.mubr.msk.bf16.mxu0 %vm22_vm0, %v1020_v52 }
  0x3d   :  { %947 = vmatprep.mubr.msk.bf16.mxu1 %vm22_vm0, %v1021_v53 }
  0x43   :  { %944 = vmatmul.mubr.msk.bf16.vlgmr.msra.gmra.mxu0 %vm22_vm0, %v1022_v54 }
  0x44   :  { %948 = vmatmul.mubr.msk.bf16.vlgmr.msra.gmra.mxu1 %vm22_vm0, %v1023_v55  ;;  %v35_v55 = vld [vmem:[#allocation2 + $0x20] sm:$0xff] }
  0xe3   :  { %v863_v57 = vpop.f32.mrf.mxu0 }
  0xe4   :  { %v903_v58 = vpop.f32.mrf.mxu1 }
  0xe5   :  { %v864_v59 = vpop.f32.mrf.mxu0 }
  0xe6   :  { %v904_v60 = vpop.f32.mrf.mxu1  ;;  %v865_v26 = vadd.f32 %v864_v59, %v863_v57 }
  0xe7   :  { %v866_v61 = vpop.f32.mrf.mxu0  ;;  %v905_v27 = vadd.f32 %v904_v60, %v903_v58  ;;  %v34_v60 = vld [vmem:[#allocation2 + $0x18] sm:$0xff] }
  0xe8   :  { %v906_v62 = vpop.f32.mrf.mxu1 }
  0xe9   :  { %v867_v63 = vpop.f32.mrf.mxu0  ;;  %v564_v46 = vadd.f32 %v905_v27, %v865_v26 }
  0xea   :  { %v907_v0 = vpop.f32.mrf.mxu1  ;;  %v868_v41 = vadd.f32 %v867_v63, %v866_v61 }
  0xeb   :  { %v869_v1 = vpop.f32.mrf.mxu0  ;;  %v908_v42 = vadd.f32 %v907_v0, %v906_v62 }
  0xec   :  { %v909_v2 = vpop.f32.mrf.mxu1 }
  0xed   :  { %v870_v3 = vpop.f32.mrf.mxu0 }
  0xee   :  { %v910_v4 = vpop.f32.mrf.mxu1  ;;  %v871_v20 = vadd.f32 %v870_v3, %v869_v1  ;;  %v38_v1 = vld [vmem:[#allocation2 + $0x38] sm:$0xff]  ;;  %v567_v3 = vadd.f32 %v908_v42, %v868_v41 }
  0xef   :  { %v872_v5 = vpop.f32.mrf.mxu0  ;;  %v911_v21 = vadd.f32 %v910_v4, %v909_v2 }
  0xf0   :  { %v912_v6 = vpop.f32.mrf.mxu1 }
  0xf1   :  { %v873_v7 = vpop.f32.mrf.mxu0  ;;  %v572_v35 = vadd.f32 %v911_v21, %v871_v20 }
  0xf2   :  { %v913_v8 = vpop.f32.mrf.mxu1  ;;  %v874_v32 = vadd.f32 %v873_v7, %v872_v5 }
  0xf3   :  { %v875_v9 = vpop.f32.mrf.mxu0  ;;  %v914_v33 = vadd.f32 %v913_v8, %v912_v6  ;;  %v32_v6 = vld [vmem:[#allocation2 + $0x8] sm:$0xff] }
  0xf4   :  { %v915_v10 = vpop.f32.mrf.mxu1 }
  0xf5   :  { %v876_v11 = vpop.f32.mrf.mxu0  ;;  %v575_v57 = vadd.f32 %v914_v33, %v874_v32 }
  0xf6   :  { %v916_v12 = vpop.f32.mrf.mxu1  ;;  %v877_v29 = vadd.f32 %v876_v11, %v875_v9  ;;  %v36_v11 = vld [vmem:[#allocation2 + $0x28] sm:$0xff] }
  0xf7   :  { %v878_v13 = vpop.f32.mrf.mxu0  ;;  %v917_v30 = vadd.f32 %v916_v12, %v915_v10 }
  0xf8   :  { %v918_v14 = vpop.f32.mrf.mxu1 }
  0xf9   :  { %v879_v15 = vpop.f32.mrf.mxu0  ;;  %v580_v52 = vadd.f32 %v917_v30, %v877_v29 }
  0xfa   :  { %v919_v16 = vpop.f32.mrf.mxu1  ;;  %v880_v47 = vadd.f32 %v879_v15, %v878_v13 }
  0xfb   :  { %v881_v17 = vpop.f32.mrf.mxu0  ;;  %v920_v48 = vadd.f32 %v919_v16, %v918_v14  ;;  %v829_v16 = vld [vmem:[%s1278_s2] ss:$0 sm:$0xff] }
  0xfc   :  { %v921_v18 = vpop.f32.mrf.mxu1 }
  0xfd   :  { %v882_v19 = vpop.f32.mrf.mxu0  ;;  %v583_v8 = vadd.f32 %v920_v48, %v880_v47 }
  0xfe   :  { %v922_v22 = vpop.f32.mrf.mxu1  ;;  %v883_v23 = vadd.f32 %v882_v19, %v881_v17  ;;  %v830_v19 = vld [vmem:[%s1279_s3] ss:$0 sm:$0xff] }
  0xff   :  { %v923_v24 = vadd.f32 %v922_v22, %v921_v18  ;;  %v884_v25 = vpop.f32.mrf.mxu0 }
 0x100   :  { %v924_v28 = vpop.f32.mrf.mxu1 }
 0x101   :  { %v885_v31 = vpop.f32.mrf.mxu0  ;;  %v588_v40 = vadd.f32 %v923_v24, %v883_v23 }
 0x102   :  { %v925_v34 = vpop.f32.mrf.mxu1  ;;  %v886_v36 = vadd.f32 %v885_v31, %v884_v25 }
 0x103   :  { %v926_v37 = vadd.f32 %v925_v34, %v924_v28  ;;  %v945_v39 = vpop.f32.mrf.mxu0 }
 0x104   :  { %v637_v43 = vadd.f32 %v945_v39, %v572_v35  ;;  %v949_v45 = vpop.f32.mrf.mxu1 }
 0x105   :  { %v653_v49 = vadd.f32 %v949_v45, %v588_v40  ;;  %v628_v51 = vpop.f32.mrf.mxu0  ;;  %v591_v62 = vadd.f32 %v926_v37, %v886_v36 }
 0x106   :  { %v661_v53 = vadd.f32 %v637_v43, %v33_v38  ;;  %v629_v54 = vadd.f32 %v628_v51, %v564_v46  ;;  %v644_v56 = vpop.f32.mrf.mxu1 }
 0x107   :  { %v665_v58 = vadd.f32 %v653_v49, %v37_v44  ;;  %v645_v59 = vadd.f32 %v644_v56, %v580_v52  ;;  %v946_v61 = vpop.f32.mrf.mxu0 }
 0x108   :  { %669 = vst.msk [vmem:[#allocation2 + $0x10] sm:$0xff] %vm22_vm0, %v661_v53  ;;  %v659_v63 = vadd.f32 %v629_v54, %v31_v50  ;;  %v640_v0 = vadd.f32 %v946_v61, %v575_v57  ;;  %v950_v2 = vpop.f32.mrf.mxu1 }
 0x109   :  { %673 = vst.msk [vmem:[#allocation2 + $0x30] sm:$0xff] %vm22_vm0, %v665_v58  ;;  %v663_v4 = vadd.f32 %v645_v59, %v35_v55  ;;  %v656_v5 = vadd.f32 %v950_v2, %v591_v62  ;;  %v631_v7 = vpop.f32.mrf.mxu0 }
 0x10a   :  { %667 = vst.msk [vmem:[#allocation2] sm:$0xff] %vm22_vm0, %v659_v63  ;;  %v662_v9 = vadd.f32 %v640_v0, %v34_v60  ;;  %v632_v10 = vadd.f32 %v631_v7, %v567_v3  ;;  %v647_v12 = vpop.f32.mrf.mxu1 }
 0x10b   :  { %671 = vst.msk [vmem:[#allocation2 + $0x20] sm:$0xff] %vm22_vm0, %v663_v4  ;;  %v666_v13 = vadd.f32 %v656_v5, %v38_v1  ;;  %v648_v14 = vadd.f32 %v647_v12, %v583_v8 }
 0x10c   :  { %670 = vst.msk [vmem:[#allocation2 + $0x18] sm:$0xff] %vm22_vm0, %v662_v9  ;;  %v660_v15 = vadd.f32 %v632_v10, %v32_v6 }
 0x10d   :  { %674 = vst.msk [vmem:[#allocation2 + $0x38] sm:$0xff] %vm22_vm0, %v666_v13  ;;  %v664_v17 = vadd.f32 %v648_v14, %v36_v11 }
 0x10e   :  { %668 = vst.msk [vmem:[#allocation2 + $0x8] sm:$0xff] %vm22_vm0, %v660_v15 }
 0x10f   :  { %v680_v18 = vld [vmem:[#allocation2 + $0x10] sm:$0xff]  ;;  %672 = vst.msk [vmem:[#allocation2 + $0x28] sm:$0xff] %vm22_vm0, %v664_v17 }
 0x110   :  { %v695_v20 = vmul.f32 %v829_v16, %v680_v18  ;;  %v684_v21 = vld [vmem:[#allocation2 + $0x30] sm:$0xff] }
 0x111   :  { %v699_v22 = vmul.f32 %v829_v16, %v684_v21  ;;  %v678_v23 = vld [vmem:[#allocation2] sm:$0xff] }
 0x112   :  { %v710_v24 = vadd.f32 %v830_v19, %v695_v20  ;;  %v693_v25 = vmul.f32 %v829_v16, %v678_v23  ;;  %v682_v26 = vld [vmem:[#allocation2 + $0x20] sm:$0xff] }
 0x113   :  { %v714_v27 = vadd.f32 %v830_v19, %v699_v22  ;;  %v697_v28 = vmul.f32 %v829_v16, %v682_v26  ;;  %v681_v29 = vld [vmem:[#allocation2 + $0x18] sm:$0xff] }
 0x114   :  { %v718_v30 = vmax.f32 %v710_v24, 0.0  ;;  %v708_v31 = vadd.f32 %v830_v19, %v693_v25  ;;  %v696_v32 = vmul.f32 %v829_v16, %v681_v29  ;;  %v685_v33 = vld [vmem:[#allocation2 + $0x38] sm:$0xff] }
 0x115   :  { %v722_v34 = vmax.f32 %v714_v27, 0.0  ;;  %v712_v35 = vadd.f32 %v830_v19, %v697_v28  ;;  %v700_v36 = vmul.f32 %v829_v16, %v685_v33  ;;  %v679_v37 = vld [vmem:[#allocation2 + $0x8] sm:$0xff] }
 0x116   :  { %v841_v38 = vpack.c.bf16 %v718_v30, %v718_v30  ;;  %v716_v39 = vmax.f32 %v708_v31, 0.0  ;;  %v711_v40 = vadd.f32 %v830_v19, %v696_v32  ;;  %v694_v41 = vmul.f32 %v829_v16, %v679_v37  ;;  %v683_v42 = vld [vmem:[#allocation2 + $0x28] sm:$0xff] }
 0x117   :  { %v845_v43 = vpack.c.bf16 %v722_v34, %v722_v34  ;;  %v720_v44 = vmax.f32 %v712_v35, 0.0  ;;  %v715_v45 = vadd.f32 %v830_v19, %v700_v36  ;;  %v698_v46 = vmul.f32 %v829_v16, %v683_v42 }
 0x118   :  { %759 = vst.msk [vmem:[%s1280_s4 + $0x8] sm:$0xf] %vm756_vm1, %v841_v38  ;;  %v839_v47 = vpack.c.bf16 %v716_v39, %v716_v39  ;;  %v719_v48 = vmax.f32 %v711_v40, 0.0  ;;  %v709_v49 = vadd.f32 %v830_v19, %v694_v41 }
 0x119   :  { %763 = vst.msk [vmem:[%s1280_s4 + $0x18] sm:$0xf] %vm756_vm1, %v845_v43  ;;  %v843_v50 = vpack.c.bf16 %v720_v44, %v720_v44  ;;  %v723_v51 = vmax.f32 %v715_v45, 0.0  ;;  %v713_v52 = vadd.f32 %v830_v19, %v698_v46 }
 0x11a   :  { %757 = vst.msk [vmem:[%s1280_s4] sm:$0xf] %vm756_vm1, %v839_v47  ;;  %v842_v53 = vpack.c.bf16 %v719_v48, %v719_v48  ;;  %v717_v54 = vmax.f32 %v709_v49, 0.0 }
 0x11b   :  { %761 = vst.msk [vmem:[%s1280_s4 + $0x10] sm:$0xf] %vm756_vm1, %v843_v50  ;;  %v846_v55 = vpack.c.bf16 %v723_v51, %v723_v51  ;;  %v721_v56 = vmax.f32 %v713_v52, 0.0 }
 0x11c   :  { %760 = vst.msk [vmem:[%s1280_s4 + $0xc] sm:$0xf] %vm756_vm1, %v842_v53  ;;  %v840_v57 = vpack.c.bf16 %v717_v54, %v717_v54 }
 0x11d   :  { %764 = vst.msk [vmem:[%s1280_s4 + $0x1c] sm:$0xf] %vm756_vm1, %v846_v55  ;;  %v844_v58 = vpack.c.bf16 %v721_v56, %v721_v56 }
 0x11e   :  { %758 = vst.msk [vmem:[%s1280_s4 + $0x4] sm:$0xf] %vm756_vm1, %v840_v57 }
 0x11f   :  { %762 = vst.msk [vmem:[%s1280_s4 + $0x14] sm:$0xf] %vm756_vm1, %v844_v58 }

// kernel: rfunet_forward.34
= control target key start
LH: loop header
LB: loop body
LE: loop exit
PB: predicated region body
PF: predicated region fallthrough
CT: control target
= control target key end

     0   :  { %vm25_vm0 = vcmask 523264   ;;  %v1070_v56 = vmov 0.0   ;;  %vm783_vm1 = vcmask 519168   ;;  %s1339_s1 = inlined_call_operand.vmem [shape: bf16[576,64], index: 1, kind: input, shape index: {}]   ;;  %s1340_s0 = inlined_call_operand.vmem [shape: bf16[64,576], index: 0, kind: input, shape index: {}]   ;;  %s1341_s2 = inlined_call_operand.vmem [shape: f32[1,64], index: 2, kind: input, shape index: {}]   ;;  %s1342_s4 = inlined_call_operand.vmem [shape: bf16[64,64], index: 4, kind: input, shape index: {}]   ;;  %s1343_s3 = inlined_call_operand.vmem [shape: f32[1,64], index: 3, kind: input, shape index: {}]   ;;  %s1344_s5 = inlined_call_operand.vmem [shape: bf16[64,64], index: 5, kind: output, shape index: {}]  }
   0x1   :  { %v1006_v0 = vld [vmem:[%s1339_s1 + $0x78] sm:$0xff]   ;;  %v1010_v4 = vld [vmem:[%s1339_s1 + $0x70] sm:$0xff]   ;;  %v1014_v8 = vld [vmem:[%s1339_s1 + $0x68] sm:$0xff]   ;;  %28 = vst.msk [vmem:[#allocation2 + $0x10] sm:$0xff] %vm25_vm0, %v1070_v56 }
   0x2   :  { %v1007_v1 = vld [vmem:[%s1339_s1 + $0xf8] sm:$0xff]   ;;  %893 = vmatprep.subr.bf16.mxu0 %v1006_v0  ;;  %v1011_v5 = vld [vmem:[%s1339_s1 + $0xf0] sm:$0xff]   ;;  %v1015_v9 = vld [vmem:[%s1339_s1 + $0xe8] sm:$0xff]   ;;  %26 = vst.msk [vmem:[#allocation2] sm:$0xff] %vm25_vm0, %v1070_v56 }
   0x3   :  { %v1008_v2 = vld [vmem:[%s1339_s1 + $0x38] sm:$0xff]   ;;  %933 = vmatprep.subr.bf16.mxu1 %v1007_v1  ;;  %v1012_v6 = vld [vmem:[%s1339_s1 + $0x30] sm:$0xff]   ;;  %v1016_v10 = vld [vmem:[%s1339_s1 + $0x28] sm:$0xff]   ;;  %27 = vst.msk [vmem:[#allocation2 + $0x8] sm:$0xff] %vm25_vm0, %v1070_v56 }
   0x4   :  { %v1009_v3 = vld [vmem:[%s1339_s1 + $0xb8] sm:$0xff]   ;;  %894 = vmatpush3.bf16.msra.mxu0 %v1008_v2  ;;  %v1013_v7 = vld [vmem:[%s1339_s1 + $0xb0] sm:$0xff]   ;;  %v1017_v11 = vld [vmem:[%s1339_s1 + $0xa8] sm:$0xff]   ;;  %29 = vst.msk [vmem:[#allocation2 + $0x18] sm:$0xff] %vm25_vm0, %v1070_v56 }
   0x5   :  { %934 = vmatpush3.bf16.msra.mxu1 %v1009_v3  ;;  %895 = vmatprep.subr.bf16.mxu0 %v1010_v4  ;;  %v1018_v12 = vld [vmem:[%s1339_s1 + $0x60] sm:$0xff]   ;;  %v1022_v16 = vld [vmem:[%s1339_s1 + $0x58] sm:$0xff]   ;;  %v1026_v20 = vld [vmem:[%s1339_s1 + $0x50] sm:$0xff]   ;;  %30 = vst.msk [vmem:[#allocation2 + $0x20] sm:$0xff] %vm25_vm0, %v1070_v56 }
   0x6   :  { %935 = vmatprep.subr.bf16.mxu1 %v1011_v5  ;;  %v1019_v13 = vld [vmem:[%s1339_s1 + $0xe0] sm:$0xff]   ;;  %v1023_v17 = vld [vmem:[%s1339_s1 + $0xd8] sm:$0xff]   ;;  %v1027_v21 = vld [vmem:[%s1339_s1 + $0xd0] sm:$0xff]   ;;  %31 = vst.msk [vmem:[#allocation2 + $0x28] sm:$0xff] %vm25_vm0, %v1070_v56 }
   0x7   :  { %v1020_v14 = vld [vmem:[%s1339_s1 + $0x20] sm:$0xff]   ;;  %v1024_v18 = vld [vmem:[%s1339_s1 + $0x18] sm:$0xff]   ;;  %v1028_v22 = vld [vmem:[%s1339_s1 + $0x10] sm:$0xff]   ;;  %32 = vst.msk [vmem:[#allocation2 + $0x30] sm:$0xff] %vm25_vm0, %v1070_v56 }
   0x8   :  { %896 = vmatpush3.bf16.msra.mxu0 %v1012_v6  ;;  %v1021_v15 = vld [vmem:[%s1339_s1 + $0xa0] sm:$0xff]   ;;  %v1025_v19 = vld [vmem:[%s1339_s1 + $0x98] sm:$0xff]   ;;  %v1029_v23 = vld [vmem:[%s1339_s1 + $0x90] sm:$0xff]   ;;  %33 = vst.msk [vmem:[#allocation2 + $0x38] sm:$0xff] %vm25_vm0, %v1070_v56 }
   0x9   :  { %936 = vmatpush3.bf16.msra.mxu1 %v1013_v7  ;;  %897 = vmatprep.subr.bf16.mxu0 %v1014_v8  ;;  %v1030_v24 = vld [vmem:[%s1339_s1 + $0x48] sm:$0xff]   ;;  %v1034_v28 = vld [vmem:[%s1339_s1 + $0x40] sm:$0xff]   ;;  %v1044_v36 = vld [vmem:[%s1339_s1 + $0x118] sm:$0xff]  }
   0xa   :  { %937 = vmatprep.subr.bf16.mxu1 %v1015_v9  ;;  %v1031_v25 = vld [vmem:[%s1339_s1 + $0xc8] sm:$0xff]   ;;  %v1035_v29 = vld [vmem:[%s1339_s1 + $0xc0] sm:$0xff]   ;;  %v1051_v39 = vld [vmem:[%s1339_s1 + $0x110] sm:$0xff]  }
   0xb   :  { %v1032_v26 = vld [vmem:[%s1339_s1 + $0x8] sm:$0xff]   ;;  %v1036_v30 = vld [vmem:[%s1339_s1] sm:$0xff]   ;;  %v1054_v43 = vld [vmem:[%s1340_s0 + $0x5c] ss:$20 sps:$4 sm:$0xff]  }
   0xc   :  { %898 = vmatpush3.bf16.msra.mxu0 %v1016_v10  ;;  %v1033_v27 = vld [vmem:[%s1339_s1 + $0x88] sm:$0xff]   ;;  %v1037_v31 = vld [vmem:[%s1339_s1 + $0x80] sm:$0xff]   ;;  %v1059_v48 = vld [vmem:[%s1340_s0 + $0x7c] ss:$20 sps:$4 sm:$0xff]  }
   0xd   :  { %938 = vmatpush3.bf16.msra.mxu1 %v1017_v11  ;;  %899 = vmatprep.subr.bf16.mxu0 %v1018_v12  ;;  %v1038_v32 = vld [vmem:[%s1340_s0] ss:$20 sps:$4 sm:$0xff]   ;;  %v1040_v33 = vld [vmem:[%s1340_s0 + $0x4] ss:$20 sps:$4 sm:$0xff]   ;;  %v1041_v34 = vld [vmem:[%s1340_s0 + $0x8] ss:$20 sps:$4 sm:$0xff]  }
   0xe   :  { %939 = vmatprep.subr.bf16.mxu1 %v1019_v13  ;;  %v1043_v35 = vld [vmem:[%s1340_s0 + $0xc] ss:$20 sps:$4 sm:$0xff]   ;;  %499 = vmatprep.mubr.bf16.mxu0 %v1040_v33  ;;  %v1047_v38 = vld [vmem:[%s1340_s0 + $0x34] ss:$20 sps:$4 sm:$0xff]   ;;  %v1050_v41 = vld [vmem:[%s1340_s0 + $0x30] ss:$20 sps:$4 sm:$0xff]  }
   0xf   :  { %564 = vmatprep.mubr.bf16.mxu1 %v1043_v35  ;;  %v1045_v37 = vld [vmem:[%s1340_s0 + $0x2c] ss:$20 sps:$4 sm:$0xff]   ;;  %v1049_v40 = vld [vmem:[%s1340_s0 + $0x28] ss:$20 sps:$4 sm:$0xff]   ;;  %v1056_v46 = vld [vmem:[%s1340_s0 + $0x50] ss:$20 sps:$4 sm:$0xff]  }
  0x10   :  { %900 = vmatpush3.bf16.msra.mxu0 %v1020_v14  ;;  %v1052_v42 = vld [vmem:[%s1340_s0 + $0x54] ss:$20 sps:$4 sm:$0xff]   ;;  %v1065_v45 = vld [vmem:[%s1339_s1 + $0x100] sm:$0xff]   ;;  %v1057_v47 = vld [vmem:[%s1340_s0 + $0x58] ss:$20 sps:$4 sm:$0xff]  }
  0x11   :  { %940 = vmatpush3.bf16.msra.mxu1 %v1021_v15  ;;  %901 = vmatprep.subr.bf16.mxu0 %v1022_v16  ;;  %v1058_v44 = vld [vmem:[%s1339_s1 + $0x108] sm:$0xff]   ;;  %v1061_v49 = vld [vmem:[%s1340_s0 + $0x84] ss:$20 sps:$4 sm:$0xff]   ;;  %v1064_v51 = vld [vmem:[%s1340_s0 + $0x80] ss:$20 sps:$4 sm:$0xff]  }
  0x12   :  { %941 = vmatprep.subr.bf16.mxu1 %v1023_v17  ;;  %v1063_v50 = vld [vmem:[%s1340_s0 + $0x78] ss:$20 sps:$4 sm:$0xff]   ;;  %v1066_v52 = vld [vmem:[%s1340_s0 + $0x10] ss:$20 sps:$4 sm:$0xff]   ;;  %v1067_v53 = vld [vmem:[%s1340_s0 + $0x60] ss:$20 sps:$4 sm:$0xff]  }
  0x13   :  { %v1068_v54 = vld [vmem:[%s1340_s0 + $0x38] ss:$20 sps:$4 sm:$0xff]   ;;  %v1069_v55 = vld [vmem:[%s1340_s0 + $0x88] ss:$20 sps:$4 sm:$0xff]  }
  0x14   :  { %902 = vmatpush3.bf16.msra.mxu0 %v1024_v18 }
  0x15   :  { %942 = vmatpush3.bf16.msra.mxu1 %v1025_v19  ;;  %903 = vmatprep.subr.bf16.mxu0 %v1026_v20 }
  0x16   :  { %943 = vmatprep.subr.bf16.mxu1 %v1027_v21 }
  0x18   :  { %904 = vmatpush3.bf16.msra.mxu0 %v1028_v22 }
  0x19   :  { %944 = vmatpush3.bf16.msra.mxu1 %v1029_v23  ;;  %905 = vmatprep.subr.bf16.mxu0 %v1030_v24 }
  0x1a   :  { %945 = vmatprep.subr.bf16.mxu1 %v1031_v25 }
  0x1c   :  { %906 = vmatpush3.bf16.msra.mxu0 %v1032_v26 }
  0x1d   :  { %946 = vmatpush3.bf16.msra.mxu1 %v1033_v27  ;;  %907 = vmatprep.subr.bf16.mxu0 %v1034_v28 }
  0x1e   :  { %947 = vmatprep.subr.bf16.mxu1 %v1035_v29 }
  0x20   :  { %908 = vmatpush3.bf16.msra.mxu0 %v1036_v30 }
  0x21   :  { %948 = vmatpush3.bf16.msra.mxu1 %v1037_v31  ;;  %981 = vmatprep.subr.bf16.mxu0 %v1044_v36 }
  0x22   :  { %997 = vmatprep.subr.bf16.mxu1 %v1044_v36 }
  0x23   :  { %500 = vmatmul.mubr.bf16.vlgmr.msra.gmra.mxu0 %v1038_v32 }
  0x24   :  { %565 = vmatmul.mubr.bf16.vlgmr.msra.gmra.mxu1 %v1041_v34  ;;  %982 = vmatpush3.bf16.msra.mxu0 %v1044_v36 }
  0x25   :  { %1001 = vmatpush3.bf16.msra.mxu1 %v1044_v36  ;;  %507 = vmatprep.mubr.bf16.mxu0 %v1045_v37 }
  0x26   :  { %572 = vmatprep.mubr.bf16.mxu1 %v1047_v38  ;;  %983 = vmatprep.subr.bf16.mxu0 %v1051_v39  ;;  %v36_v38 = vld [vmem:[#allocation2 + $0x10] sm:$0xff] }
  0x27   :  { %998 = vmatprep.subr.bf16.mxu1 %v1051_v39 }
  0x28   :  { %984 = vmatpush3.bf16.msra.mxu0 %v1051_v39 }
  0x29   :  { %1002 = vmatpush3.bf16.msra.mxu1 %v1051_v39  ;;  %985 = vmatprep.subr.bf16.mxu0 %v1058_v44 }
  0x2a   :  { %999 = vmatprep.subr.bf16.mxu1 %v1058_v44 }
  0x2b   :  { %508 = vmatmul.mubr.bf16.gmra.mxu0 %v1049_v40 }
  0x2c   :  { %573 = vmatmul.mubr.bf16.gmra.mxu1 %v1050_v41  ;;  %515 = vmatprep.mubr.bf16.mxu0 %v1052_v42 }
  0x2d   :  { %580 = vmatprep.mubr.bf16.mxu1 %v1054_v43  ;;  %986 = vmatpush3.bf16.msra.mxu0 %v1058_v44 }
  0x2e   :  { %1003 = vmatpush3.bf16.msra.mxu1 %v1058_v44  ;;  %987 = vmatprep.subr.bf16.mxu0 %v1065_v45  ;;  %v40_v44 = vld [vmem:[#allocation2 + $0x30] sm:$0xff] }
  0x2f   :  { %1000 = vmatprep.subr.bf16.mxu1 %v1065_v45 }
  0x31   :  { %988 = vmatpush3.bf16.msra.mxu0 %v1065_v45 }
  0x32   :  { %1004 = vmatpush3.bf16.msra.mxu1 %v1065_v45 }
  0x33   :  { %516 = vmatmul.mubr.bf16.gmra.mxu0 %v1056_v46 }
  0x34   :  { %581 = vmatmul.mubr.bf16.gmra.mxu1 %v1057_v47  ;;  %523 = vmatprep.mubr.bf16.mxu0 %v1059_v48 }
  0x35   :  { %588 = vmatprep.mubr.bf16.mxu1 %v1061_v49 }
  0x3b   :  { %524 = vmatmul.mubr.bf16.gmra.mxu0 %v1063_v50  ;;  %v34_v50 = vld [vmem:[#allocation2] sm:$0xff] }
  0x3c   :  { %589 = vmatmul.mubr.bf16.gmra.mxu1 %v1064_v51  ;;  %989 = vmatprep.mubr.msk.bf16.mxu0 %vm25_vm0, %v1066_v52 }
  0x3d   :  { %993 = vmatprep.mubr.msk.bf16.mxu1 %vm25_vm0, %v1067_v53 }
  0x43   :  { %990 = vmatmul.mubr.msk.bf16.vlgmr.msra.gmra.mxu0 %vm25_vm0, %v1068_v54 }
  0x44   :  { %994 = vmatmul.mubr.msk.bf16.vlgmr.msra.gmra.mxu1 %vm25_vm0, %v1069_v55  ;;  %v38_v55 = vld [vmem:[#allocation2 + $0x20] sm:$0xff] }
  0xe3   :  { %v909_v57 = vpop.f32.mrf.mxu0 }
  0xe4   :  { %v949_v58 = vpop.f32.mrf.mxu1 }
  0xe5   :  { %v910_v59 = vpop.f32.mrf.mxu0 }
  0xe6   :  { %v950_v60 = vpop.f32.mrf.mxu1  ;;  %v911_v26 = vadd.f32 %v910_v59, %v909_v57 }
  0xe7   :  { %v912_v61 = vpop.f32.mrf.mxu0  ;;  %v951_v27 = vadd.f32 %v950_v60, %v949_v58  ;;  %v37_v60 = vld [vmem:[#allocation2 + $0x18] sm:$0xff] }
  0xe8   :  { %v952_v62 = vpop.f32.mrf.mxu1 }
  0xe9   :  { %v913_v63 = vpop.f32.mrf.mxu0  ;;  %v567_v46 = vadd.f32 %v951_v27, %v911_v26 }
  0xea   :  { %v953_v0 = vpop.f32.mrf.mxu1  ;;  %v914_v41 = vadd.f32 %v913_v63, %v912_v61 }
  0xeb   :  { %v915_v1 = vpop.f32.mrf.mxu0  ;;  %v954_v42 = vadd.f32 %v953_v0, %v952_v62 }
  0xec   :  { %v955_v2 = vpop.f32.mrf.mxu1 }
  0xed   :  { %v916_v3 = vpop.f32.mrf.mxu0 }
  0xee   :  { %v956_v4 = vpop.f32.mrf.mxu1  ;;  %v917_v20 = vadd.f32 %v916_v3, %v915_v1  ;;  %v41_v1 = vld [vmem:[#allocation2 + $0x38] sm:$0xff]  ;;  %v570_v3 = vadd.f32 %v954_v42, %v914_v41 }
  0xef   :  { %v918_v5 = vpop.f32.mrf.mxu0  ;;  %v957_v21 = vadd.f32 %v956_v4, %v955_v2 }
  0xf0   :  { %v958_v6 = vpop.f32.mrf.mxu1 }
  0xf1   :  { %v919_v7 = vpop.f32.mrf.mxu0  ;;  %v575_v35 = vadd.f32 %v957_v21, %v917_v20  ;;  %v875_v20 = vld [vmem:[%s1342_s4] sm:$0xff]  }
  0xf2   :  { %v959_v8 = vpop.f32.mrf.mxu1  ;;  %v920_v32 = vadd.f32 %v919_v7, %v918_v5 }
  0xf3   :  { %v921_v9 = vpop.f32.mrf.mxu0  ;;  %v960_v33 = vadd.f32 %v959_v8, %v958_v6  ;;  %v35_v6 = vld [vmem:[#allocation2 + $0x8] sm:$0xff] }
  0xf4   :  { %v961_v10 = vpop.f32.mrf.mxu1 }
  0xf5   :  { %v922_v11 = vpop.f32.mrf.mxu0  ;;  %v578_v57 = vadd.f32 %v960_v33, %v920_v32 }
  0xf6   :  { %v962_v12 = vpop.f32.mrf.mxu1  ;;  %v923_v29 = vadd.f32 %v922_v11, %v921_v9  ;;  %v39_v11 = vld [vmem:[#allocation2 + $0x28] sm:$0xff] }
  0xf7   :  { %v924_v13 = vpop.f32.mrf.mxu0  ;;  %v963_v30 = vadd.f32 %v962_v12, %v961_v10 }
  0xf8   :  { %v964_v14 = vpop.f32.mrf.mxu1 }
  0xf9   :  { %v925_v15 = vpop.f32.mrf.mxu0  ;;  %v583_v52 = vadd.f32 %v963_v30, %v923_v29  ;;  %v876_v30 = vunpack.c.l.bf16 %v875_v20 }
  0xfa   :  { %v965_v16 = vpop.f32.mrf.mxu1  ;;  %v926_v47 = vadd.f32 %v925_v15, %v924_v13 }
  0xfb   :  { %v927_v17 = vpop.f32.mrf.mxu0  ;;  %v966_v48 = vadd.f32 %v965_v16, %v964_v14  ;;  %v856_v16 = vld [vmem:[%s1341_s2] ss:$0 sm:$0xff] }
  0xfc   :  { %v967_v18 = vpop.f32.mrf.mxu1 }
  0xfd   :  { %v928_v19 = vpop.f32.mrf.mxu0  ;;  %v586_v8 = vadd.f32 %v966_v48, %v926_v47 }
  0xfe   :  { %v968_v22 = vpop.f32.mrf.mxu1  ;;  %v929_v23 = vadd.f32 %v928_v19, %v927_v17  ;;  %v890_v17 = vld [vmem:[%s1342_s4 + $0x8] sm:$0xff]   ;;  %v892_v19 = vld [vmem:[%s1342_s4 + $0x18] sm:$0xff]  }
  0xff   :  { %v969_v24 = vadd.f32 %v968_v22, %v967_v18  ;;  %v930_v25 = vpop.f32.mrf.mxu0  ;;  %v857_v22 = vld [vmem:[%s1343_s3] ss:$0 sm:$0xff] }
 0x100   :  { %v970_v28 = vpop.f32.mrf.mxu1 }
 0x101   :  { %v931_v31 = vpop.f32.mrf.mxu0  ;;  %v591_v40 = vadd.f32 %v969_v24, %v929_v23  ;;  %v891_v23 = vld [vmem:[%s1342_s4 + $0x10] sm:$0xff]  }
 0x102   :  { %v971_v34 = vpop.f32.mrf.mxu1  ;;  %v932_v36 = vadd.f32 %v931_v31, %v930_v25  ;;  %v880_v25 = vunpack.c.l.bf16 %v890_v17 }
 0x103   :  { %v972_v37 = vadd.f32 %v971_v34, %v970_v28  ;;  %v991_v39 = vpop.f32.mrf.mxu0  ;;  %v888_v28 = vunpack.c.l.bf16 %v892_v19  ;;  %v884_v34 = vunpack.c.l.bf16 %v891_v23 }
 0x104   :  { %v640_v43 = vadd.f32 %v991_v39, %v575_v35  ;;  %v995_v45 = vpop.f32.mrf.mxu1  ;;  %v881_v35 = vunpack.c.h.bf16 %v890_v17  ;;  %v889_v39 = vunpack.c.h.bf16 %v892_v19 }
 0x105   :  { %v656_v49 = vadd.f32 %v995_v45, %v591_v40  ;;  %v631_v51 = vpop.f32.mrf.mxu0  ;;  %v594_v62 = vadd.f32 %v972_v37, %v932_v36 }
 0x106   :  { %v664_v53 = vadd.f32 %v640_v43, %v36_v38  ;;  %v632_v54 = vadd.f32 %v631_v51, %v567_v46  ;;  %v647_v56 = vpop.f32.mrf.mxu1 }
 0x107   :  { %v668_v58 = vadd.f32 %v656_v49, %v40_v44  ;;  %v648_v59 = vadd.f32 %v647_v56, %v583_v52  ;;  %v992_v61 = vpop.f32.mrf.mxu0  ;;  %v877_v44 = vunpack.c.h.bf16 %v875_v20  ;;  %v885_v49 = vunpack.c.h.bf16 %v891_v23 }
 0x108   :  { %672 = vst.msk [vmem:[#allocation2 + $0x10] sm:$0xff] %vm25_vm0, %v664_v53  ;;  %v662_v63 = vadd.f32 %v632_v54, %v34_v50  ;;  %v643_v0 = vadd.f32 %v992_v61, %v578_v57  ;;  %v996_v2 = vpop.f32.mrf.mxu1 }
 0x109   :  { %676 = vst.msk [vmem:[#allocation2 + $0x30] sm:$0xff] %vm25_vm0, %v668_v58  ;;  %v666_v4 = vadd.f32 %v648_v59, %v38_v55  ;;  %v659_v5 = vadd.f32 %v996_v2, %v594_v62  ;;  %v634_v7 = vpop.f32.mrf.mxu0 }
 0x10a   :  { %670 = vst.msk [vmem:[#allocation2] sm:$0xff] %vm25_vm0, %v662_v63  ;;  %v665_v9 = vadd.f32 %v643_v0, %v37_v60  ;;  %v635_v10 = vadd.f32 %v634_v7, %v570_v3  ;;  %v650_v12 = vpop.f32.mrf.mxu1 }
 0x10b   :  { %674 = vst.msk [vmem:[#allocation2 + $0x20] sm:$0xff] %vm25_vm0, %v666_v4  ;;  %v669_v13 = vadd.f32 %v659_v5, %v41_v1  ;;  %v651_v14 = vadd.f32 %v650_v12, %v586_v8 }
 0x10c   :  { %673 = vst.msk [vmem:[#allocation2 + $0x18] sm:$0xff] %vm25_vm0, %v665_v9  ;;  %v663_v15 = vadd.f32 %v635_v10, %v35_v6 }
 0x10d   :  { %677 = vst.msk [vmem:[#allocation2 + $0x38] sm:$0xff] %vm25_vm0, %v669_v13  ;;  %v667_v18 = vadd.f32 %v651_v14, %v39_v11 }
 0x10e   :  { %671 = vst.msk [vmem:[#allocation2 + $0x8] sm:$0xff] %vm25_vm0, %v663_v15 }
 0x10f   :  { %v683_v21 = vld [vmem:[#allocation2 + $0x10] sm:$0xff]  ;;  %675 = vst.msk [vmem:[#allocation2 + $0x28] sm:$0xff] %vm25_vm0, %v667_v18 }
 0x110   :  { %v698_v24 = vmul.f32 %v856_v16, %v683_v21  ;;  %v687_v26 = vld [vmem:[#allocation2 + $0x30] sm:$0xff] }
 0x111   :  { %v702_v27 = vmul.f32 %v856_v16, %v687_v26  ;;  %v681_v29 = vld [vmem:[#allocation2] sm:$0xff] }
 0x112   :  { %v713_v31 = vadd.f32 %v857_v22, %v698_v24  ;;  %v696_v32 = vmul.f32 %v856_v16, %v681_v29  ;;  %v685_v33 = vld [vmem:[#allocation2 + $0x20] sm:$0xff] }
 0x113   :  { %v717_v36 = vadd.f32 %v857_v22, %v702_v27  ;;  %v700_v37 = vmul.f32 %v856_v16, %v685_v33  ;;  %v684_v38 = vld [vmem:[#allocation2 + $0x18] sm:$0xff] }
 0x114   :  { %v737_v40 = vadd.f32 %v880_v25, %v713_v31  ;;  %v711_v41 = vadd.f32 %v857_v22, %v696_v32  ;;  %v699_v42 = vmul.f32 %v856_v16, %v684_v38  ;;  %v688_v43 = vld [vmem:[#allocation2 + $0x38] sm:$0xff] }
 0x115   :  { %v741_v45 = vadd.f32 %v888_v28, %v717_v36  ;;  %v715_v46 = vadd.f32 %v857_v22, %v700_v37  ;;  %v703_v47 = vmul.f32 %v856_v16, %v688_v43  ;;  %v682_v48 = vld [vmem:[#allocation2 + $0x8] sm:$0xff] }
 0x116   :  { %v745_v50 = vmax.f32 %v737_v40, 0.0  ;;  %v735_v51 = vadd.f32 %v876_v30, %v711_v41  ;;  %v714_v52 = vadd.f32 %v857_v22, %v699_v42  ;;  %v697_v53 = vmul.f32 %v856_v16, %v682_v48  ;;  %v686_v54 = vld [vmem:[#allocation2 + $0x28] sm:$0xff] }
 0x117   :  { %v749_v55 = vmax.f32 %v741_v45, 0.0  ;;  %v739_v56 = vadd.f32 %v884_v34, %v715_v46  ;;  %v718_v57 = vadd.f32 %v857_v22, %v703_v47  ;;  %v701_v58 = vmul.f32 %v856_v16, %v686_v54 }
 0x118   :  { %v868_v59 = vpack.c.bf16 %v745_v50, %v745_v50  ;;  %v743_v60 = vmax.f32 %v735_v51, 0.0  ;;  %v738_v61 = vadd.f32 %v881_v35, %v714_v52  ;;  %v712_v62 = vadd.f32 %v857_v22, %v697_v53 }
 0x119   :  { %v872_v63 = vpack.c.bf16 %v749_v55, %v749_v55  ;;  %v747_v0 = vmax.f32 %v739_v56, 0.0  ;;  %v742_v1 = vadd.f32 %v889_v39, %v718_v57  ;;  %v716_v2 = vadd.f32 %v857_v22, %v701_v58 }
 0x11a   :  { %786 = vst.msk [vmem:[%s1344_s5 + $0x8] sm:$0xf] %vm783_vm1, %v868_v59  ;;  %v866_v3 = vpack.c.bf16 %v743_v60, %v743_v60  ;;  %v746_v4 = vmax.f32 %v738_v61, 0.0  ;;  %v736_v5 = vadd.f32 %v877_v44, %v712_v62 }
 0x11b   :  { %790 = vst.msk [vmem:[%s1344_s5 + $0x18] sm:$0xf] %vm783_vm1, %v872_v63  ;;  %v870_v6 = vpack.c.bf16 %v747_v0, %v747_v0  ;;  %v750_v7 = vmax.f32 %v742_v1, 0.0  ;;  %v740_v8 = vadd.f32 %v885_v49, %v716_v2 }
 0x11c   :  { %784 = vst.msk [vmem:[%s1344_s5] sm:$0xf] %vm783_vm1, %v866_v3  ;;  %v869_v9 = vpack.c.bf16 %v746_v4, %v746_v4  ;;  %v744_v10 = vmax.f32 %v736_v5, 0.0 }
 0x11d   :  { %788 = vst.msk [vmem:[%s1344_s5 + $0x10] sm:$0xf] %vm783_vm1, %v870_v6  ;;  %v873_v11 = vpack.c.bf16 %v750_v7, %v750_v7  ;;  %v748_v12 = vmax.f32 %v740_v8, 0.0 }
 0x11e   :  { %787 = vst.msk [vmem:[%s1344_s5 + $0xc] sm:$0xf] %vm783_vm1, %v869_v9  ;;  %v867_v13 = vpack.c.bf16 %v744_v10, %v744_v10 }
 0x11f   :  { %791 = vst.msk [vmem:[%s1344_s5 + $0x1c] sm:$0xf] %vm783_vm1, %v873_v11  ;;  %v871_v14 = vpack.c.bf16 %v748_v12, %v748_v12 }
 0x120   :  { %785 = vst.msk [vmem:[%s1344_s5 + $0x4] sm:$0xf] %vm783_vm1, %v867_v13 }
 0x121   :  { %789 = vst.msk [vmem:[%s1344_s5 + $0x14] sm:$0xf] %vm783_vm1, %v871_v14 }

// kernel: rfunet_forward.39
= control target key start
LH: loop header
LB: loop body
LE: loop exit
PB: predicated region body
PF: predicated region fallthrough
CT: control target
= control target key end

     0   :  { %v674_v34 = vmov 0.0   ;;  %vm675_vm0 = vmmov 0   ;;  %vm345_vm1 = vcmask 523264   ;;  %s833_s1 = inlined_call_operand.vmem [shape: bf16[576,128], index: 1, kind: input, shape index: {}]   ;;  %s834_s0 = inlined_call_operand.vmem [shape: bf16[16,576], index: 0, kind: input, shape index: {}]   ;;  %s835_s2 = inlined_call_operand.vmem [shape: f32[1,128], index: 2, kind: input, shape index: {}]   ;;  %s836_s3 = inlined_call_operand.vmem [shape: f32[1,128], index: 3, kind: input, shape index: {}]   ;;  %s837_s4 = inlined_call_operand.vmem [shape: bf16[16,128], index: 4, kind: output, shape index: {}]  }
   0x1   :  { %v631_v0 = vld [vmem:[%s833_s1 + $0x78] sm:$0xff]   ;;  %v635_v4 = vld [vmem:[%s833_s1 + $0x70] sm:$0xff]   ;;  %v639_v8 = vld [vmem:[%s833_s1 + $0x68] sm:$0xff]  }
   0x2   :  { %v632_v1 = vld [vmem:[%s833_s1 + $0xf8] sm:$0xff]   ;;  %568 = vmatprep.subr.bf16.mxu0 %v631_v0  ;;  %v636_v5 = vld [vmem:[%s833_s1 + $0xf0] sm:$0xff]   ;;  %v640_v9 = vld [vmem:[%s833_s1 + $0xe8] sm:$0xff]  }
   0x3   :  { %v633_v2 = vld [vmem:[%s833_s1 + $0x38] sm:$0xff]   ;;  %590 = vmatprep.subr.bf16.mxu1 %v632_v1  ;;  %v637_v6 = vld [vmem:[%s833_s1 + $0x30] sm:$0xff]   ;;  %v641_v10 = vld [vmem:[%s833_s1 + $0x28] sm:$0xff]  }
   0x4   :  { %v634_v3 = vld [vmem:[%s833_s1 + $0xb8] sm:$0xff]   ;;  %569 = vmatpush3.bf16.msra.mxu0 %v633_v2  ;;  %v638_v7 = vld [vmem:[%s833_s1 + $0xb0] sm:$0xff]   ;;  %v642_v11 = vld [vmem:[%s833_s1 + $0xa8] sm:$0xff]  }
   0x5   :  { %591 = vmatpush3.bf16.msra.mxu1 %v634_v3  ;;  %570 = vmatprep.subr.bf16.mxu0 %v635_v4  ;;  %v643_v12 = vld [vmem:[%s833_s1 + $0x60] sm:$0xff]   ;;  %v647_v16 = vld [vmem:[%s833_s1 + $0x58] sm:$0xff]   ;;  %v651_v20 = vld [vmem:[%s833_s1 + $0x50] sm:$0xff]  }
   0x6   :  { %592 = vmatprep.subr.bf16.mxu1 %v636_v5  ;;  %v644_v13 = vld [vmem:[%s833_s1 + $0xe0] sm:$0xff]   ;;  %v648_v17 = vld [vmem:[%s833_s1 + $0xd8] sm:$0xff]   ;;  %v652_v21 = vld [vmem:[%s833_s1 + $0xd0] sm:$0xff]  }
   0x7   :  { %v645_v14 = vld [vmem:[%s833_s1 + $0x20] sm:$0xff]   ;;  %v649_v18 = vld [vmem:[%s833_s1 + $0x18] sm:$0xff]   ;;  %v653_v22 = vld [vmem:[%s833_s1 + $0x10] sm:$0xff]  }
   0x8   :  { %571 = vmatpush3.bf16.msra.mxu0 %v637_v6  ;;  %v646_v15 = vld [vmem:[%s833_s1 + $0xa0] sm:$0xff]   ;;  %v650_v19 = vld [vmem:[%s833_s1 + $0x98] sm:$0xff]   ;;  %v654_v23 = vld [vmem:[%s833_s1 + $0x90] sm:$0xff]  }
   0x9   :  { %593 = vmatpush3.bf16.msra.mxu1 %v638_v7  ;;  %572 = vmatprep.subr.bf16.mxu0 %v639_v8  ;;  %v655_v24 = vld [vmem:[%s833_s1 + $0x48] sm:$0xff]   ;;  %v659_v28 = vld [vmem:[%s833_s1 + $0x40] sm:$0xff]   ;;  %v669_v37 = vld [vmem:[%s833_s1 + $0x118] sm:$0xff]  }
   0xa   :  { %594 = vmatprep.subr.bf16.mxu1 %v640_v9  ;;  %v656_v25 = vld [vmem:[%s833_s1 + $0xc8] sm:$0xff]   ;;  %v660_v29 = vld [vmem:[%s833_s1 + $0xc0] sm:$0xff]   ;;  %v670_v38 = vld [vmem:[%s833_s1 + $0x110] sm:$0xff]  }
   0xb   :  { %v657_v26 = vld [vmem:[%s833_s1 + $0x8] sm:$0xff]   ;;  %v661_v30 = vld [vmem:[%s833_s1] sm:$0xff]  }
   0xc   :  { %573 = vmatpush3.bf16.msra.mxu0 %v641_v10  ;;  %v658_v27 = vld [vmem:[%s833_s1 + $0x88] sm:$0xff]   ;;  %v662_v31 = vld [vmem:[%s833_s1 + $0x80] sm:$0xff]  }
   0xd   :  { %595 = vmatpush3.bf16.msra.mxu1 %v642_v11  ;;  %574 = vmatprep.subr.bf16.mxu0 %v643_v12  ;;  %v663_v32 = vld [vmem:[%s834_s0] ss:$20 sps:$4 sm:$0xff]   ;;  %v665_v33 = vld [vmem:[%s834_s0 + $0x4] ss:$20 sps:$4 sm:$0xff]   ;;  %v666_v35 = vld [vmem:[%s834_s0 + $0x8] ss:$20 sps:$4 sm:$0xff]  }
   0xe   :  { %596 = vmatprep.subr.bf16.mxu1 %v644_v13  ;;  %v668_v36 = vld [vmem:[%s834_s0 + $0xc] ss:$20 sps:$4 sm:$0xff]   ;;  %381 = vmatprep.mubr.bf16.mxu0 %v665_v33  ;;  %v673_v41 = vld [vmem:[%s834_s0 + $0x10] ss:$20 sps:$4 sm:$0xff]  }
   0xf   :  { %422 = vmatprep.mubr.bf16.mxu1 %v668_v36  ;;  %v671_v39 = vld [vmem:[%s833_s1 + $0x108] sm:$0xff]   ;;  %v672_v40 = vld [vmem:[%s833_s1 + $0x100] sm:$0xff]  }
  0x10   :  { %575 = vmatpush3.bf16.msra.mxu0 %v645_v14  ;;  %v557_v56 = vld [vmem:[%s835_s2] ss:$0 sm:$0xff] }
  0x11   :  { %597 = vmatpush3.bf16.msra.mxu1 %v646_v15  ;;  %576 = vmatprep.subr.bf16.mxu0 %v647_v16  ;;  %v558_v61 = vld [vmem:[%s836_s3] ss:$0 sm:$0xff] }
  0x12   :  { %598 = vmatprep.subr.bf16.mxu1 %v648_v17 }
  0x14   :  { %577 = vmatpush3.bf16.msra.mxu0 %v649_v18 }
  0x15   :  { %599 = vmatpush3.bf16.msra.mxu1 %v650_v19  ;;  %578 = vmatprep.subr.bf16.mxu0 %v651_v20 }
  0x16   :  { %600 = vmatprep.subr.bf16.mxu1 %v652_v21 }
  0x18   :  { %579 = vmatpush3.bf16.msra.mxu0 %v653_v22 }
  0x19   :  { %601 = vmatpush3.bf16.msra.mxu1 %v654_v23  ;;  %580 = vmatprep.subr.bf16.mxu0 %v655_v24 }
  0x1a   :  { %602 = vmatprep.subr.bf16.mxu1 %v656_v25 }
  0x1c   :  { %581 = vmatpush3.bf16.msra.mxu0 %v657_v26 }
  0x1d   :  { %603 = vmatpush3.bf16.msra.mxu1 %v658_v27  ;;  %582 = vmatprep.subr.bf16.mxu0 %v659_v28 }
  0x1e   :  { %604 = vmatprep.subr.bf16.mxu1 %v660_v29 }
  0x20   :  { %583 = vmatpush3.bf16.msra.mxu0 %v661_v30 }
  0x21   :  { %605 = vmatpush3.bf16.msra.mxu1 %v662_v31  ;;  %617 = vmatprep.subr.bf16.mxu0 %v674_v34 }
  0x23   :  { %382 = vmatmul.mubr.bf16.vlgmr.msra.gmra.mxu0 %v663_v32 }
  0x24   :  { %423 = vmatmul.mubr.bf16.vlgmr.msra.gmra.mxu1 %v666_v35  ;;  %618 = vmatpush3.bf16.msra.mxu0 %v669_v37 }
  0x25   :  { %619 = vmatprep.subr.bf16.mxu0 %v674_v34  ;;  %625 = vmatprep.mubr.msk.bf16.mxu0 %vm675_vm0, %v674_v34 }
  0x28   :  { %620 = vmatpush3.bf16.msra.mxu0 %v670_v38 }
  0x29   :  { %621 = vmatprep.subr.bf16.mxu0 %v674_v34 }
  0x2c   :  { %622 = vmatpush3.bf16.msra.mxu0 %v671_v39 }
  0x2d   :  { %623 = vmatprep.subr.bf16.mxu0 %v674_v34 }
  0x30   :  { %624 = vmatpush3.bf16.msra.mxu0 %v672_v40 }
  0x33   :  { %626 = vmatmul.mubr.msk.bf16.vlgmr.msra.gmra.mxu0 %vm345_vm1, %v673_v41 }
  0xe3   :  { %v584_v42 = vpop.f32.mrf.mxu0 }
  0xe4   :  { %v606_v43 = vpop.f32.mrf.mxu1 }
  0xe5   :  { %v585_v44 = vpop.f32.mrf.mxu0 }
  0xe6   :  { %v607_v45 = vpop.f32.mrf.mxu1  ;;  %v586_v48 = vadd.f32 %v585_v44, %v584_v42 }
  0xe7   :  { %v587_v46 = vpop.f32.mrf.mxu0  ;;  %v608_v49 = vadd.f32 %v607_v45, %v606_v43 }
  0xe8   :  { %v609_v47 = vpop.f32.mrf.mxu1 }
  0xe9   :  { %v588_v50 = vpop.f32.mrf.mxu0  ;;  %v425_v54 = vadd.f32 %v608_v49, %v586_v48 }
  0xea   :  { %v610_v51 = vpop.f32.mrf.mxu1  ;;  %v589_v52 = vadd.f32 %v588_v50, %v587_v46 }
  0xeb   :  { %v611_v53 = vadd.f32 %v610_v51, %v609_v47 }
  0xed   :  { %v428_v60 = vadd.f32 %v611_v53, %v589_v52 }
  0xf3   :  { %v465_v55 = vpop.f32.mrf.mxu0 }
  0xf4   :  { %v466_v57 = vadd.f32 %v465_v55, %v425_v54 }
  0xf5   :  { %v627_v58 = vpop.f32.mrf.mxu0 }
  0xf6   :  { %v488_v59 = vmul.f32 %v557_v56, %v466_v57 }
  0xf7   :  { %v468_v62 = vpop.f32.mrf.mxu0 }
  0xf8   :  { %v469_v63 = vadd.f32 %v468_v62, %v428_v60  ;;  %v497_v1 = vadd.f32 %v558_v61, %v488_v59 }
  0xf9   :  { %v628_v0 = vpop.f32.mrf.mxu0 }
  0xfa   :  { %v489_v2 = vmul.f32 %v557_v56, %v469_v63  ;;  %v499_v4 = vmax.f32 %v497_v1, 0.0 }
  0xfc   :  { %v498_v3 = vadd.f32 %v558_v61, %v489_v2 }
  0xfe   :  { %v500_v5 = vmax.f32 %v498_v3, 0.0 }
 0x100   :  { %v566_v6 = vpack.c.bf16 %v500_v5, %v499_v4 }
 0x102   :  { %567 = vst [vmem:[%s837_s4] sm:$0xff] %v566_v6  }

// kernel: split.1
= control target key start
LH: loop header
LB: loop body
LE: loop exit
PB: predicated region body
PF: predicated region fallthrough
CT: control target
= control target key end

     0   :  { %v54_v8 = vmov 0.0   ;;  %s89_s0 = inlined_call_operand.vmem [shape: bf16[4,2,2,128], index: 0, kind: input, shape index: {}]   ;;  %s90_s1 = inlined_call_operand.vmem [shape: bf16[2,2,2,128], index: 1, kind: output, shape index: {}]  }
   0x1   :  { %v46_v0 = vld [vmem:[%s89_s0 + $0x4] sm:$0x1]  ;;  %v47_v1 = vld [vmem:[%s89_s0 + $0x6] sm:$0x1]  ;;  %v49_v2 = vld [vmem:[%s89_s0 + $0x5] sm:$0x1] }
   0x2   :  { %v9_v3 = vunpack.c.l.bf16 %v46_v0  ;;  %v18_v4 = vunpack.c.l.bf16 %v47_v1  ;;  %v28_v5 = vunpack.c.l.bf16 %v49_v2  ;;  %v51_v6 = vld [vmem:[%s89_s0 + $0x7] sm:$0x1] }
   0x3   :  { %v38_v7 = vunpack.c.l.bf16 %v51_v6 }
   0x4   :  { %v11_v9 = vpack.c.bf16 %v54_v8, %v9_v3  ;;  %v21_v10 = vpack.c.bf16 %v54_v8, %v18_v4  ;;  %v31_v11 = vpack.c.bf16 %v54_v8, %v28_v5 }
   0x5   :  { %v41_v12 = vpack.c.bf16 %v54_v8, %v38_v7 }
   0x6   :  { %12 = vst [vmem:[%s90_s1] sm:$0x1] %v11_v9  ;;  %48 = vst [vmem:[%s90_s1 + $0x2] sm:$0x1] %v21_v10 }
   0x7   :  { %50 = vst [vmem:[%s90_s1 + $0x1] sm:$0x1] %v31_v11  ;;  %52 = vst [vmem:[%s90_s1 + $0x3] sm:$0x1] %v41_v12 }

// kernel: rfunet_forward.38
= control target key start
LH: loop header
LB: loop body
LE: loop exit
PB: predicated region body
PF: predicated region fallthrough
CT: control target
= control target key end

     0   :  { %v192_v0 = vmov 0.0   ;;  %vm193_vm0 = vmmov 0   ;;  %vm65_vm1 = vcmask 523264   ;;  %s243_s1 = inlined_call_operand.vmem [shape: bf16[64,128], index: 1, kind: input, shape index: {}]   ;;  %s244_s0 = inlined_call_operand.vmem [shape: bf16[16,64], index: 0, kind: input, shape index: {}]   ;;  %s245_s2 = inlined_call_operand.vmem [shape: f32[1,128], index: 2, kind: input, shape index: {}]   ;;  %s246_s3 = inlined_call_operand.vmem [shape: f32[1,128], index: 3, kind: input, shape index: {}]   ;;  %s247_s4 = inlined_call_operand.vmem [shape: bf16[16,128], index: 4, kind: output, shape index: {}]  }
   0x1   :  { %173 = vmatprep.subr.bf16.mxu0 %v192_v0  ;;  %v187_v1 = vld [vmem:[%s243_s1 + $0x18] sm:$0xff]   ;;  %181 = vmatprep.mubr.msk.bf16.mxu0 %vm193_vm0, %v192_v0  ;;  %v188_v2 = vld [vmem:[%s243_s1 + $0x10] sm:$0xff]   ;;  %v189_v3 = vld [vmem:[%s243_s1 + $0x8] sm:$0xff]  }
   0x2   :  { %174 = vmatpush3.bf16.msra.mxu0 %v187_v1  ;;  %v190_v4 = vld [vmem:[%s243_s1] sm:$0xff]  }
   0x3   :  { %175 = vmatprep.subr.bf16.mxu0 %v192_v0  ;;  %v191_v5 = vld [vmem:[%s244_s0] sm:$0xff]  }
   0x4   :  { %v157_v7 = vld [vmem:[%s245_s2] ss:$0 sm:$0xff] }
   0x5   :  { %v158_v10 = vld [vmem:[%s246_s3] ss:$0 sm:$0xff] }
   0x6   :  { %176 = vmatpush3.bf16.msra.mxu0 %v188_v2 }
   0x7   :  { %177 = vmatprep.subr.bf16.mxu0 %v192_v0 }
   0xa   :  { %178 = vmatpush3.bf16.msra.mxu0 %v189_v3 }
   0xb   :  { %179 = vmatprep.subr.bf16.mxu0 %v192_v0 }
   0xe   :  { %180 = vmatpush3.bf16.msra.mxu0 %v190_v4 }
  0x11   :  { %182 = vmatmul.mubr.msk.bf16.vlgmr.msra.gmra.mxu0 %vm65_vm1, %v191_v5 }
  0xd1   :  { %v103_v6 = vpop.f32.mrf.mxu0 }
  0xd2   :  { %v126_v9 = vmul.f32 %v157_v7, %v103_v6 }
  0xd3   :  { %v183_v8 = vpop.f32.mrf.mxu0 }
  0xd4   :  { %v135_v14 = vadd.f32 %v158_v10, %v126_v9 }
  0xd5   :  { %v106_v11 = vpop.f32.mrf.mxu0 }
  0xd6   :  { %v127_v12 = vmul.f32 %v157_v7, %v106_v11 }
  0xd7   :  { %v184_v13 = vpop.f32.mrf.mxu0 }
  0xd8   :  { %v136_v15 = vadd.f32 %v158_v10, %v127_v12 }
  0xda   :  { %v166_v16 = vpack.c.bf16 %v136_v15, %v135_v14 }
  0xdc   :  { %167 = vst [vmem:[%s247_s4] sm:$0xff] %v166_v16  }

// kernel: rfunet_forward.41
= control target key start
LH: loop header
LB: loop body
LE: loop exit
PB: predicated region body
PF: predicated region fallthrough
CT: control target
= control target key end

     0   :  { %s810_s15 = smov 0   ;;  %s812_s16 = smov 0   ;;  %s901_s0 = inlined_call_operand.vmem [shape: bf16[16,1152], index: 0, kind: input, shape index: {}]   ;;  %s902_s1 = inlined_call_operand.vmem [shape: bf16[1152,128], index: 1, kind: input, shape index: {}]   ;;  %s903_s2 = inlined_call_operand.vmem [shape: f32[1,128], index: 2, kind: input, shape index: {}]   ;;  %s904_s3 = inlined_call_operand.vmem [shape: f32[1,128], index: 3, kind: input, shape index: {}]   ;;  %s905_s4 = inlined_call_operand.vmem [shape: bf16[16,128], index: 4, kind: output, shape index: {}]  }
   0x1   :  { %s814_s17 = smov 0   ;;  %s816_s18 = smov 0  }
   0x2   :  { %s818_s19 = smov 0  }
   0x3 LB: > { %s26_s20 = sadd.s32 1, %s776_s18  ;;  %p49_p1 = scmp.ne.s32.totalorder %s768_s16, %s764_s15  ;;  %s780_s19 = sphi %s818_s19, %s14_s19   ;;  %s776_s18 = sphi %s816_s18, %s909_s18   ;;  %s772_s17 = sphi %s814_s17, %s908_s17   ;;  %s768_s16 = sphi %s812_s16, %s907_s16   ;;  %s764_s15 = sphi %s810_s15, %s906_s15  }
   0x4   : > { %p27_p0 = scmp.ge.s32.totalorder %s26_s20, 9  ;;  %p50_p2 = scmp.eq.s32.totalorder %s780_s19, 0 }
   0x5   : > { %s42_s22 = sadd.s32 1, %s768_s16  ;;  %p628_p5 = scmp.ge.s32.totalorder %s780_s19, 9 }
   0x6   : > { %s911_s20 = smov (%p27_p0, %s26_s20), 0  ;;  %p51_p3 = por %p50_p2, %p49_p1 }
   0x7   : > { %s38_s21 = ssub.s32 %s776_s18, %s911_s20  ;;  %195 = sbr.rel (%p628_p5) target bundleno = 17 (0x11), region = 24 }
   0x8   : > { %p40_p4 = scmp.eq.s32.totalorder %s38_s21, 0 }
   0xa   : > { %s845_s23 = scalar_select %p40_p4, %s768_s16, %s42_s22  }
   0xc   : > { %198 = sbr.rel (!%p51_p3) target bundleno = 17 (0x11), region = 28  ;;  %s200_s24 = sand.u32 (%p51_p3), 1, %s768_s16  }
   0xd   : > { %s630_s25 = sshll.u32 (%p51_p3), %s776_s18, 2  ;;  %s629_s26 = sshll.u32 (%p51_p3), %s200_s24, 3 }
   0xe   : > { %s207_s29 = scalar_lea.vmem (%p51_p3), %s901_s0, %s630_s25  ;;  %s202_s30 = scalar_lea.vmem (%p51_p3), [#allocation3], %s629_s26 }
   0xf   : > { %v224_v0 = vld [vmem:[%s207_s29] sm:$0xf] (%p51_p3)  ;;  %v226_v1 = vld [vmem:[%s207_s29 + $0x24] sm:$0xf] (%p51_p3) }
  0x10   : > { %225 = vst [vmem:[%s202_s30] sm:$0xf] (%p51_p3), %v224_v0  ;;  %227 = vst [vmem:[%s202_s30 + $0x4] sm:$0xf] (%p51_p3), %v226_v1 }
  0x11 PF: > { %p631_p6 = scmp.ge.s32.totalorder %s780_s19, 1  ;;  %p266_p7 = scmp.lt.s32.totalorder %s780_s19, 10 }
  0x13   : > { %p267_p8 = pnand %p631_p6, %p266_p7 }
  0x14   : > { %s273_s5 = sand.u32 (!%p267_p8), 1, %s764_s15   ;;  %s633_s6 = sshll.u32 (!%p267_p8), %s772_s17, 4 }
  0x15   : > { %270 = sbr.rel (%p267_p8) target bundleno = 282 (0x11a), region = 73  ;;  %s857_s7 = sshll.u32 (!%p267_p8), %s273_s5, 3 }
  0x16   : > { %p317_p9 = scmp.lt.s32.totalorder (!%p267_p8), %s633_s6, 143  ;;  %s275_s12 = scalar_lea.vmem (!%p267_p8), [#allocation3], %s857_s7 }
  0x17   : > { %p635_p10 = scmp.ne.s32.totalorder (!%p267_p8), %s772_s17, 0 }
  0x1a   : > { %s913_s6 = smov (!%p317_p9, %s633_s6), 143  ;;  %344 = sbr.rel (%p635_p10) target bundleno = 33 (0x21), region = 81 }
  0x1b   : > { %s634_s8 = sshll.u32 %s913_s6, 2 }
  0x1c   : > { %s862_s11 = scalar_lea.vmem %s902_s1, %s634_s8 }
  0x1f   : > { %v782_v2 = vmov 0.0  }
  0x20   : > { %345 = vst [vmem:[#allocation2] sm:$0xff] %v782_v2  ;;  %346 = vst [vmem:[#allocation2 + $0x8] sm:$0xff] %v782_v2 }
  0x21 PF: > { %v733_v3 = vld [vmem:[%s862_s11 + $0x38] sm:$0xff]   ;;  %v783_v4 = vmov 0.0   ;;  %v734_v5 = vld [vmem:[%s862_s11 + $0x30] sm:$0xff]   ;;  %vm784_vm0 = vmmov 0   ;;  %v735_v6 = vld [vmem:[%s862_s11 + $0x28] sm:$0xff]   ;;  %p645_p11 = scmp.ne.s32.totalorder %s772_s17, 8 }
  0x22   : > { %670 = vmatprep.subr.bf16.mxu0 %v783_v4  ;;  %686 = vmatprep.mubr.msk.bf16.mxu0 %vm784_vm0, %v783_v4  ;;  %v736_v7 = vld [vmem:[%s862_s11 + $0x20] sm:$0xff]   ;;  %v737_v8 = vld [vmem:[%s862_s11 + $0x18] sm:$0xff]   ;;  %v738_v9 = vld [vmem:[%s862_s11 + $0x10] sm:$0xff]  }
  0x23   : > { %671 = vmatpush3.bf16.msra.mxu0 %v733_v3  ;;  %v739_v10 = vld [vmem:[%s862_s11 + $0x8] sm:$0xff]   ;;  %v740_v11 = vld [vmem:[%s862_s11] sm:$0xff]   ;;  %v741_v12 = vld [vmem:[%s275_s12] sm:$0xff]  }
  0x24   : > { %672 = vmatprep.subr.bf16.mxu0 %v783_v4 }
  0x27   : > { %673 = vmatpush3.bf16.msra.mxu0 %v734_v5  ;;  %v347_v13 = vld [vmem:[#allocation2] sm:$0xff]  ;;  %v348_v17 = vld [vmem:[#allocation2 + $0x8] sm:$0xff] }
  0x28   : > { %674 = vmatprep.subr.bf16.mxu0 %v783_v4 }
  0x2b   : > { %675 = vmatpush3.bf16.msra.mxu0 %v735_v6 }
  0x2c   : > { %676 = vmatprep.subr.bf16.mxu0 %v783_v4 }
  0x2f   : > { %677 = vmatpush3.bf16.msra.mxu0 %v736_v7 }
  0x30   : > { %678 = vmatprep.subr.bf16.mxu0 %v783_v4 }
  0x33   : > { %679 = vmatpush3.bf16.msra.mxu0 %v737_v8 }
  0x34   : > { %680 = vmatprep.subr.bf16.mxu0 %v783_v4 }
  0x37   : > { %681 = vmatpush3.bf16.msra.mxu0 %v738_v9 }
  0x38   : > { %682 = vmatprep.subr.bf16.mxu0 %v783_v4 }
  0x3b   : > { %683 = vmatpush3.bf16.msra.mxu0 %v739_v10 }
  0x3c   : > { %684 = vmatprep.subr.bf16.mxu0 %v783_v4 }
  0x3f   : > { %685 = vmatpush3.bf16.msra.mxu0 %v740_v11 }
  0x42   : > { %687 = vmatmul.mubr.bf16.vlgmr.msra.gmra.mxu0 %v741_v12 }
 0x102   : > { %v455_v14 = vpop.f32.mrf.mxu0 }
 0x103   : > { %v462_v15 = vadd.f32 %v455_v14, %v347_v13 }
 0x104   : > { %v688_v16 = vpop.f32.mrf.mxu0 }
 0x105   : > { %464 = vst [vmem:[#allocation2] sm:$0xff] %v462_v15  ;;  %469 = sbr.rel (%p645_p11) target bundleno = 282 (0x11a), region = 85 }
 0x106   : > { %v458_v18 = vpop.f32.mrf.mxu0 }
 0x107   : > { %v463_v19 = vadd.f32 %v458_v18, %v348_v17 }
 0x108   : > { %v689_v20 = vpop.f32.mrf.mxu0 }
 0x109   : > { %465 = vst [vmem:[#allocation2 + $0x8] sm:$0xff] %v463_v19 }
 0x10a   : > { %v646_v23 = vld [vmem:[%s903_s2] ss:$0 sm:$0xff] }
 0x10b   : > { %v647_v26 = vld [vmem:[%s904_s3] ss:$0 sm:$0xff] }
 0x10c   : > { %v470_v21 = vld [vmem:[#allocation2] sm:$0xff] }
 0x10d   : > { %v479_v24 = vmul.f32 %v646_v23, %v470_v21 }
 0x10f   : > { %v488_v27 = vadd.f32 %v647_v26, %v479_v24 }
 0x110   : > { %v471_v22 = vld [vmem:[#allocation2 + $0x8] sm:$0xff] }
 0x111   : > { %v480_v25 = vmul.f32 %v646_v23, %v471_v22  ;;  %v490_v29 = vmax.f32 %v488_v27, 0.0 }
 0x113   : > { %v489_v28 = vadd.f32 %v647_v26, %v480_v25 }
 0x115   : > { %v491_v30 = vmax.f32 %v489_v28, 0.0 }
 0x117   : > { %v659_v31 = vpack.c.bf16 %v491_v30, %v490_v29 }
 0x119   : > { %660 = vst [vmem:[%s905_s4] sm:$0xff] %v659_v31  }
 0x11a PF: > { %s14_s19 = sadd.s32 1, %s780_s19   ;;  %s906_s15 = smov %s768_s16 }
 0x11b   : > { %p11_p12 = scmp.ge.s32.totalorder %s14_s19, 11   ;;  %s907_s16 = smov %s845_s23 }
 0x11c   : > { %s908_s17 = smov %s776_s18  ;;  %s909_s18 = smov %s911_s20 }
 0x11d   :  { %13 = sbr.rel (!%p11_p12) target bundleno = 3 (0x3), region = 129 }

// kernel: rfunet_forward.43
= control target key start
LH: loop header
LB: loop body
LE: loop exit
PB: predicated region body
PF: predicated region fallthrough
CT: control target
= control target key end

     0   :  { %s46_s0 = inlined_call_operand.vmem [shape: bf16[8,128], index: 0, kind: input, shape index: {}]   ;;  %s47_s1 = inlined_call_operand.vmem [shape: bf16[8,128], index: 1, kind: input, shape index: {}]   ;;  %s48_s2 = inlined_call_operand.vmem [shape: bf16[8,128], index: 2, kind: output, shape index: {}]  }
   0x1   :  { %v11_v0 = vld [vmem:[%s46_s0] sm:$0xf] }
   0x2   :  { %v13_v1 = vld [vmem:[%s47_s1] sm:$0xf]  ;;  %v12_v2 = vunpack.c.l.bf16 %v11_v0 }
   0x3   :  { %v14_v3 = vunpack.c.l.bf16 %v13_v1 }
   0x5   :  { %v15_v4 = vadd.f32 %v14_v3, %v12_v2 }
   0x7   :  { %v16_v5 = vpack.c.bf16 %v15_v4, %v15_v4 }
   0x9   :  { %17 = vst [vmem:[%s48_s2] sm:$0xf] %v16_v5 }

// kernel: rfunet_forward.40
= control target key start
LH: loop header
LB: loop body
LE: loop exit
PB: predicated region body
PF: predicated region fallthrough
CT: control target
= control target key end

     0   :  { %s904_s18 = smov 0   ;;  %s906_s19 = smov 0   ;;  %s998_s0 = inlined_call_operand.vmem [shape: bf16[16,1152], index: 0, kind: input, shape index: {}]   ;;  %s999_s1 = inlined_call_operand.vmem [shape: bf16[1152,128], index: 1, kind: input, shape index: {}]   ;;  %s1000_s2 = inlined_call_operand.vmem [shape: f32[1,128], index: 2, kind: input, shape index: {}]   ;;  %s1001_s3 = inlined_call_operand.vmem [shape: f32[1,128], index: 3, kind: input, shape index: {}]   ;;  %s1002_s4 = inlined_call_operand.vmem [shape: bf16[16,128], index: 4, kind: input, shape index: {}]   ;;  %s1003_s5 = inlined_call_operand.vmem [shape: bf16[16,128], index: 5, kind: output, shape index: {}]  }
   0x1   :  { %s908_s20 = smov 0   ;;  %s910_s21 = smov 0  }
   0x2   :  { %s912_s22 = smov 0  }
   0x3 LB: > { %s27_s23 = sadd.s32 1, %s865_s21  ;;  %p50_p1 = scmp.ne.s32.totalorder %s857_s19, %s853_s18  ;;  %s869_s22 = sphi %s912_s22, %s15_s22   ;;  %s865_s21 = sphi %s910_s21, %s1007_s21   ;;  %s861_s20 = sphi %s908_s20, %s1006_s20   ;;  %s857_s19 = sphi %s906_s19, %s1005_s19   ;;  %s853_s18 = sphi %s904_s18, %s1004_s18  }
   0x4   : > { %p28_p0 = scmp.ge.s32.totalorder %s27_s23, 9  ;;  %p51_p2 = scmp.eq.s32.totalorder %s869_s22, 0 }
   0x5   : > { %s43_s25 = sadd.s32 1, %s857_s19  ;;  %p713_p5 = scmp.ge.s32.totalorder %s869_s22, 9 }
   0x6   : > { %s1009_s23 = smov (%p28_p0, %s27_s23), 0  ;;  %p52_p3 = por %p51_p2, %p50_p1 }
   0x7   : > { %s39_s24 = ssub.s32 %s865_s21, %s1009_s23  ;;  %236 = sbr.rel (%p713_p5) target bundleno = 17 (0x11), region = 28 }
   0x8   : > { %p41_p4 = scmp.eq.s32.totalorder %s39_s24, 0 }
   0xa   : > { %s939_s26 = scalar_select %p41_p4, %s857_s19, %s43_s25  }
   0xc   : > { %239 = sbr.rel (!%p52_p3) target bundleno = 17 (0x11), region = 32  ;;  %s241_s27 = sand.u32 (%p52_p3), 1, %s857_s19  }
   0xd   : > { %s715_s28 = sshll.u32 (%p52_p3), %s865_s21, 2  ;;  %s714_s29 = sshll.u32 (%p52_p3), %s241_s27, 3 }
   0xe   : > { %s248_s7 = scalar_lea.vmem (%p52_p3), %s998_s0, %s715_s28  ;;  %s243_s8 = scalar_lea.vmem (%p52_p3), [#allocation3], %s714_s29 }
   0xf   : > { %v265_v0 = vld [vmem:[%s248_s7] sm:$0xf] (%p52_p3)  ;;  %v267_v1 = vld [vmem:[%s248_s7 + $0x24] sm:$0xf] (%p52_p3) }
  0x10   : > { %266 = vst [vmem:[%s243_s8] sm:$0xf] (%p52_p3), %v265_v0  ;;  %268 = vst [vmem:[%s243_s8 + $0x4] sm:$0xf] (%p52_p3), %v267_v1 }
  0x11 PF: > { %p716_p6 = scmp.ge.s32.totalorder %s869_s22, 1  ;;  %p307_p7 = scmp.lt.s32.totalorder %s869_s22, 10 }
  0x13   : > { %p308_p8 = pnand %p716_p6, %p307_p7 }
  0x14   : > { %s314_s9 = sand.u32 (!%p308_p8), 1, %s853_s18   ;;  %s718_s10 = sshll.u32 (!%p308_p8), %s861_s20, 4 }
  0x15   : > { %311 = sbr.rel (%p308_p8) target bundleno = 284 (0x11c), region = 77  ;;  %s951_s11 = sshll.u32 (!%p308_p8), %s314_s9, 3 }
  0x16   : > { %p368_p9 = scmp.lt.s32.totalorder (!%p308_p8), %s718_s10, 143  ;;  %s316_s16 = scalar_lea.vmem (!%p308_p8), [#allocation3], %s951_s11 }
  0x17   : > { %p720_p10 = scmp.ne.s32.totalorder (!%p308_p8), %s861_s20, 0 }
  0x1a   : > { %s1011_s10 = smov (!%p368_p9, %s718_s10), 143  ;;  %404 = sbr.rel (%p720_p10) target bundleno = 33 (0x21), region = 85 }
  0x1b   : > { %s719_s12 = sshll.u32 %s1011_s10, 2 }
  0x1c   : > { %s956_s15 = scalar_lea.vmem %s999_s1, %s719_s12 }
  0x1f   : > { %v871_v2 = vmov 0.0  }
  0x20   : > { %405 = vst [vmem:[#allocation2] sm:$0xff] %v871_v2  ;;  %406 = vst [vmem:[#allocation2 + $0x8] sm:$0xff] %v871_v2 }
  0x21 PF: > { %v822_v3 = vld [vmem:[%s956_s15 + $0x38] sm:$0xff]   ;;  %v872_v4 = vmov 0.0   ;;  %v823_v5 = vld [vmem:[%s956_s15 + $0x30] sm:$0xff]   ;;  %vm873_vm0 = vmmov 0   ;;  %v824_v6 = vld [vmem:[%s956_s15 + $0x28] sm:$0xff]   ;;  %p730_p11 = scmp.ne.s32.totalorder %s861_s20, 8 }
  0x22   : > { %759 = vmatprep.subr.bf16.mxu0 %v872_v4  ;;  %775 = vmatprep.mubr.msk.bf16.mxu0 %vm873_vm0, %v872_v4  ;;  %v825_v7 = vld [vmem:[%s956_s15 + $0x20] sm:$0xff]   ;;  %v826_v8 = vld [vmem:[%s956_s15 + $0x18] sm:$0xff]   ;;  %v827_v9 = vld [vmem:[%s956_s15 + $0x10] sm:$0xff]  }
  0x23   : > { %760 = vmatpush3.bf16.msra.mxu0 %v822_v3  ;;  %v828_v10 = vld [vmem:[%s956_s15 + $0x8] sm:$0xff]   ;;  %v829_v11 = vld [vmem:[%s956_s15] sm:$0xff]   ;;  %v830_v12 = vld [vmem:[%s316_s16] sm:$0xff]  }
  0x24   : > { %761 = vmatprep.subr.bf16.mxu0 %v872_v4 }
  0x27   : > { %762 = vmatpush3.bf16.msra.mxu0 %v823_v5  ;;  %v407_v13 = vld [vmem:[#allocation2] sm:$0xff]  ;;  %v408_v17 = vld [vmem:[#allocation2 + $0x8] sm:$0xff] }
  0x28   : > { %763 = vmatprep.subr.bf16.mxu0 %v872_v4 }
  0x2b   : > { %764 = vmatpush3.bf16.msra.mxu0 %v824_v6 }
  0x2c   : > { %765 = vmatprep.subr.bf16.mxu0 %v872_v4 }
  0x2f   : > { %766 = vmatpush3.bf16.msra.mxu0 %v825_v7 }
  0x30   : > { %767 = vmatprep.subr.bf16.mxu0 %v872_v4 }
  0x33   : > { %768 = vmatpush3.bf16.msra.mxu0 %v826_v8 }
  0x34   : > { %769 = vmatprep.subr.bf16.mxu0 %v872_v4 }
  0x37   : > { %770 = vmatpush3.bf16.msra.mxu0 %v827_v9 }
  0x38   : > { %771 = vmatprep.subr.bf16.mxu0 %v872_v4 }
  0x3b   : > { %772 = vmatpush3.bf16.msra.mxu0 %v828_v10 }
  0x3c   : > { %773 = vmatprep.subr.bf16.mxu0 %v872_v4 }
  0x3f   : > { %774 = vmatpush3.bf16.msra.mxu0 %v829_v11 }
  0x42   : > { %776 = vmatmul.mubr.bf16.vlgmr.msra.gmra.mxu0 %v830_v12 }
 0x102   : > { %v515_v14 = vpop.f32.mrf.mxu0 }
 0x103   : > { %v522_v15 = vadd.f32 %v515_v14, %v407_v13 }
 0x104   : > { %v777_v16 = vpop.f32.mrf.mxu0 }
 0x105   : > { %524 = vst [vmem:[#allocation2] sm:$0xff] %v522_v15  ;;  %529 = sbr.rel (%p730_p11) target bundleno = 284 (0x11c), region = 89 }
 0x106   : > { %v518_v18 = vpop.f32.mrf.mxu0 }
 0x107   : > { %v523_v19 = vadd.f32 %v518_v18, %v408_v17 }
 0x108   : > { %v778_v20 = vpop.f32.mrf.mxu0 }
 0x109   : > { %525 = vst [vmem:[#allocation2 + $0x8] sm:$0xff] %v523_v19 }
 0x10a   : > { %v731_v23 = vld [vmem:[%s1000_s2] ss:$0 sm:$0xff] }
 0x10b   : > { %v732_v26 = vld [vmem:[%s1001_s3] ss:$0 sm:$0xff] }
 0x10c   : > { %v530_v21 = vld [vmem:[#allocation2] sm:$0xff] }
 0x10d   : > { %v539_v24 = vmul.f32 %v731_v23, %v530_v21  ;;  %v742_v27 = vld [vmem:[%s1002_s4] sm:$0xff]  }
 0x10e   : > { %v743_v28 = vunpack.c.l.bf16 %v742_v27  ;;  %v744_v29 = vunpack.c.h.bf16 %v742_v27 }
 0x10f   : > { %v548_v30 = vadd.f32 %v732_v26, %v539_v24 }
 0x110   : > { %v531_v22 = vld [vmem:[#allocation2 + $0x8] sm:$0xff] }
 0x111   : > { %v540_v25 = vmul.f32 %v731_v23, %v531_v22  ;;  %v554_v32 = vadd.f32 %v743_v28, %v548_v30 }
 0x113   : > { %v549_v31 = vadd.f32 %v732_v26, %v540_v25  ;;  %v556_v34 = vmax.f32 %v554_v32, 0.0 }
 0x115   : > { %v555_v33 = vadd.f32 %v744_v29, %v549_v31 }
 0x117   : > { %v557_v35 = vmax.f32 %v555_v33, 0.0 }
 0x119   : > { %v748_v36 = vpack.c.bf16 %v557_v35, %v556_v34 }
 0x11b   : > { %749 = vst [vmem:[%s1003_s5] sm:$0xff] %v748_v36  }
 0x11c PF: > { %s15_s22 = sadd.s32 1, %s869_s22   ;;  %s1004_s18 = smov %s857_s19 }
 0x11d   : > { %p12_p12 = scmp.ge.s32.totalorder %s15_s22, 11   ;;  %s1005_s19 = smov %s939_s26 }
 0x11e   : > { %s1006_s20 = smov %s865_s21  ;;  %s1007_s21 = smov %s1009_s23 }
 0x11f   :  { %14 = sbr.rel (!%p12_p12) target bundleno = 3 (0x3), region = 136 }

// kernel: rfunet_forward.45
= control target key start
LH: loop header
LB: loop body
LE: loop exit
PB: predicated region body
PF: predicated region fallthrough
CT: control target
= control target key end

     0   :  { %s779_s15 = smov 0   ;;  %s781_s16 = smov 0   ;;  %s849_s0 = inlined_call_operand.vmem [shape: bf16[8,1152], index: 0, kind: input, shape index: {}]   ;;  %s850_s1 = inlined_call_operand.vmem [shape: bf16[1152,256], index: 1, kind: input, shape index: {}]   ;;  %s851_s2 = inlined_call_operand.vmem [shape: f32[1,256], index: 2, kind: input, shape index: {}]   ;;  %s852_s3 = inlined_call_operand.vmem [shape: f32[1,256], index: 3, kind: input, shape index: {}]   ;;  %s853_s4 = inlined_call_operand.vmem [shape: bf16[8,256], index: 4, kind: output, shape index: {}]  }
   0x1   :  { %s783_s17 = smov 0  }
   0x2 LB: > { %s26_s18 = sadd.s32 1, %s746_s16  ;;  %p648_p0 = scmp.ge.s32.totalorder %s750_s17, 1  ;;  %s750_s17 = sphi %s783_s17, %s14_s17   ;;  %s746_s16 = sphi %s781_s16, %s855_s16   ;;  %s742_s15 = sphi %s779_s15, %s854_s15  }
   0x3   : > { %p27_p1 = scmp.ge.s32.totalorder %s26_s18, 9  ;;  %p227_p2 = scmp.lt.s32.totalorder %s750_s17, 10 }
   0x5   : > { %s857_s18 = smov (%p27_p1, %s26_s18), 0  ;;  %p228_p3 = pnand %p648_p0, %p227_p2 }
   0x6   : > { %p280_p4 = scmp.lt.s32.totalorder (!%p228_p3), %s742_s15, 8  ;;  %s650_s19 = sshll.u32 (!%p228_p3), %s742_s15, 4 }
   0x7   : > { %231 = sbr.rel (%p228_p3) target bundleno = 269 (0x10d), region = 36  ;;  %p288_p5 = scmp.lt.s32.totalorder (!%p228_p3), %s650_s19, 143 }
   0x8   : > { %p653_p6 = scmp.ne.s32.totalorder (!%p228_p3), %s742_s15, 0 }
   0xc   : > { %s281_s20 = scalar_select %p280_p4, %s742_s15, 8 }
   0xd   : > { %s859_s19 = smov (!%p288_p5, %s650_s19), 143  ;;  %322 = sbr.rel (%p653_p6) target bundleno = 20 (0x14), region = 40 }
   0xe   : > { %s649_s21 = sshll.u32 %s281_s20, 2  ;;  %s676_s25 = sshll.u32 %s859_s19, 3 }
   0xf   : > { %s805_s24 = scalar_lea.vmem %s849_s0, %s649_s21  ;;  %s810_s28 = scalar_lea.vmem %s850_s1, %s676_s25 }
  0x12   : > { %v752_v0 = vmov 0.0  }
  0x13   : > { %323 = vst [vmem:[#allocation2] sm:$0xff] %v752_v0  ;;  %324 = vst [vmem:[#allocation2 + $0x8] sm:$0xff] %v752_v0 }
  0x14 PF: > { %v704_v1 = vld [vmem:[%s810_s28 + $0x74] ss:$8 sps:$4 sm:$0xff]   ;;  %v706_v2 = vld [vmem:[%s810_s28 + $0x70] ss:$8 sps:$4 sm:$0xff]   ;;  %v753_v3 = vmov 0   ;;  %p670_p7 = scmp.ne.s32.totalorder %s742_s15, 8 }
  0x15   : > { %456 = vmatprep.mubr.bf16.mxu0 %v753_v3  ;;  %424 = vmatprep.subr.bf16.mxu0 %v704_v1  ;;  %v707_v4 = vld [vmem:[%s810_s28 + $0x64] ss:$8 sps:$4 sm:$0xff]   ;;  %v709_v5 = vld [vmem:[%s810_s28 + $0x60] ss:$8 sps:$4 sm:$0xff]   ;;  %v710_v6 = vld [vmem:[%s810_s28 + $0x54] ss:$8 sps:$4 sm:$0xff]  }
  0x16   : > { %425 = vmatpush1.bf16.msra.mxu0 %v706_v2  ;;  %v712_v7 = vld [vmem:[%s810_s28 + $0x50] ss:$8 sps:$4 sm:$0xff]   ;;  %v713_v8 = vld [vmem:[%s810_s28 + $0x44] ss:$8 sps:$4 sm:$0xff]   ;;  %v715_v9 = vld [vmem:[%s810_s28 + $0x40] ss:$8 sps:$4 sm:$0xff]  }
  0x17   : > { %426 = vmatprep.subr.bf16.mxu0 %v707_v4  ;;  %v716_v10 = vld [vmem:[%s810_s28 + $0x34] ss:$8 sps:$4 sm:$0xff]   ;;  %v718_v11 = vld [vmem:[%s810_s28 + $0x30] ss:$8 sps:$4 sm:$0xff]   ;;  %v719_v12 = vld [vmem:[%s810_s28 + $0x24] ss:$8 sps:$4 sm:$0xff]  }
  0x18   : > { %v721_v13 = vld [vmem:[%s810_s28 + $0x20] ss:$8 sps:$4 sm:$0xff]   ;;  %v722_v14 = vld [vmem:[%s810_s28 + $0x14] ss:$8 sps:$4 sm:$0xff]   ;;  %v724_v15 = vld [vmem:[%s810_s28 + $0x10] ss:$8 sps:$4 sm:$0xff]  }
  0x19   : > { %v725_v16 = vld [vmem:[%s810_s28 + $0x4] ss:$8 sps:$4 sm:$0xff]   ;;  %v727_v17 = vld [vmem:[%s810_s28] ss:$8 sps:$4 sm:$0xff]  }
  0x1a   : > { %427 = vmatpush1.bf16.msra.mxu0 %v709_v5  ;;  %v327_v18 = vld [vmem:[%s805_s24] sm:$0xf]  ;;  %v326_v21 = vld [vmem:[#allocation2 + $0x8] sm:$0xff] }
  0x1b   : > { %428 = vmatprep.subr.bf16.mxu0 %v710_v6  ;;  %v325_v19 = vld [vmem:[#allocation2] sm:$0xff] }
  0x1e   : > { %429 = vmatpush1.bf16.msra.mxu0 %v712_v7 }
  0x1f   : > { %430 = vmatprep.subr.bf16.mxu0 %v713_v8 }
  0x22   : > { %431 = vmatpush1.bf16.msra.mxu0 %v715_v9 }
  0x23   : > { %432 = vmatprep.subr.bf16.mxu0 %v716_v10 }
  0x26   : > { %433 = vmatpush1.bf16.msra.mxu0 %v718_v11 }
  0x27   : > { %434 = vmatprep.subr.bf16.mxu0 %v719_v12 }
  0x2a   : > { %435 = vmatpush1.bf16.msra.mxu0 %v721_v13 }
  0x2b   : > { %436 = vmatprep.subr.bf16.mxu0 %v722_v14 }
  0x2e   : > { %437 = vmatpush1.bf16.msra.mxu0 %v724_v15 }
  0x2f   : > { %438 = vmatprep.subr.bf16.mxu0 %v725_v16 }
  0x32   : > { %439 = vmatpush1.bf16.msra.mxu0 %v727_v17 }
  0x35   : > { %457 = vmatmul.mubr.bf16.vlgmr.msra.gmra.mxu0 %v327_v18 }
  0xf5   : > { %v458_v20 = vpop.f32.mrf.mxu0 }
  0xf6   : > { %v465_v22 = vadd.f32 %v458_v20, %v325_v19 }
  0xf7   : > { %v460_v23 = vpop.f32.mrf.mxu0  ;;  %472 = sbr.rel (%p670_p7) target bundleno = 269 (0x10d), region = 44 }
  0xf8   : > { %467 = vst [vmem:[#allocation2] sm:$0xff] %v465_v22  ;;  %v466_v24 = vadd.f32 %v460_v23, %v326_v21 }
  0xf9   : > { %v462_v25 = vpop.f32.mrf.mxu0 }
  0xfa   : > { %468 = vst [vmem:[#allocation2 + $0x8] sm:$0xff] %v466_v24 }
  0xfb   : > { %v463_v26 = vpop.f32.mrf.mxu0 }
  0xfc   : > { %v477_v27 = vlaneseq  ;;  %v475_v29 = vld [vmem:[%s851_s2] sm:$0x3] }
  0xfd   : > { %v489_v30 = vld [vmem:[%s852_s3] sm:$0x3] }
  0xfe   : > { %v478_v28 = vshrl.u32 %v477_v27, 7 }
  0xff   : > { %v473_v33 = vld [vmem:[#allocation2] sm:$0xff] }
 0x100   : > { %v479_v31 = vsub.s32 0, %v478_v28  ;;  %v483_v32 = vsub.s32 1, %v478_v28 }
 0x101   : > { %v474_v34 = vld [vmem:[#allocation2 + $0x8] sm:$0xff] }
 0x102   : > { %v480_v35 = vrot.slane %v475_v29, %v479_v31  ;;  %v484_v36 = vrot.slane %v475_v29, %v483_v32  ;;  %v494_v37 = vrot.slane %v489_v30, %v479_v31  ;;  %v498_v38 = vrot.slane %v489_v30, %v483_v32 }
 0x104   : > { %v487_v39 = vmul.f32 %v480_v35, %v473_v33  ;;  %v488_v40 = vmul.f32 %v484_v36, %v474_v34 }
 0x106   : > { %v501_v41 = vadd.f32 %v494_v37, %v487_v39  ;;  %v502_v42 = vadd.f32 %v498_v38, %v488_v40 }
 0x108   : > { %v503_v43 = vmax.f32 %v501_v41, 0.0  ;;  %v504_v44 = vmax.f32 %v502_v42, 0.0 }
 0x10a   : > { %v677_v45 = vpack.c.bf16 %v504_v44, %v503_v43 }
 0x10c   : > { %513 = vst [vmem:[%s853_s4] sm:$0xff] %v677_v45 }
 0x10d PF: > { %s14_s17 = sadd.s32 1, %s750_s17   ;;  %s854_s15 = smov %s746_s16 }
 0x10e   : > { %p11_p8 = scmp.ge.s32.totalorder %s14_s17, 11   ;;  %s855_s16 = smov %s857_s18 }
 0x110   :  { %13 = sbr.rel (!%p11_p8) target bundleno = 2 (0x2), region = 83 }

// kernel: rfunet_forward.44
= control target key start
LH: loop header
LB: loop body
LE: loop exit
PB: predicated region body
PF: predicated region fallthrough
CT: control target
= control target key end

     0   :  { %v257_v1 = vmov 0   ;;  %v175_v18 = vlaneseq  ;;  %s343_s1 = inlined_call_operand.vmem [shape: bf16[128,256], index: 1, kind: input, shape index: {}]   ;;  %s344_s0 = inlined_call_operand.vmem [shape: bf16[8,128], index: 0, kind: input, shape index: {}]   ;;  %s345_s2 = inlined_call_operand.vmem [shape: f32[1,256], index: 2, kind: input, shape index: {}]   ;;  %s346_s3 = inlined_call_operand.vmem [shape: f32[1,256], index: 3, kind: input, shape index: {}]   ;;  %s347_s4 = inlined_call_operand.vmem [shape: bf16[8,256], index: 4, kind: output, shape index: {}]  }
   0x1   :  { %v233_v0 = vld [vmem:[%s343_s1 + $0x74] ss:$8 sps:$4 sm:$0xff]   ;;  %155 = vmatprep.mubr.bf16.mxu0 %v257_v1  ;;  %v235_v2 = vld [vmem:[%s343_s1 + $0x70] ss:$8 sps:$4 sm:$0xff]   ;;  %v236_v3 = vld [vmem:[%s343_s1 + $0x64] ss:$8 sps:$4 sm:$0xff]  }
   0x2   :  { %123 = vmatprep.subr.bf16.mxu0 %v233_v0  ;;  %v238_v4 = vld [vmem:[%s343_s1 + $0x60] ss:$8 sps:$4 sm:$0xff]   ;;  %v239_v5 = vld [vmem:[%s343_s1 + $0x54] ss:$8 sps:$4 sm:$0xff]   ;;  %v241_v6 = vld [vmem:[%s343_s1 + $0x50] ss:$8 sps:$4 sm:$0xff]  }
   0x3   :  { %124 = vmatpush1.bf16.msra.mxu0 %v235_v2  ;;  %v242_v7 = vld [vmem:[%s343_s1 + $0x44] ss:$8 sps:$4 sm:$0xff]   ;;  %v244_v8 = vld [vmem:[%s343_s1 + $0x40] ss:$8 sps:$4 sm:$0xff]   ;;  %v245_v9 = vld [vmem:[%s343_s1 + $0x34] ss:$8 sps:$4 sm:$0xff]  }
   0x4   :  { %125 = vmatprep.subr.bf16.mxu0 %v236_v3  ;;  %v247_v10 = vld [vmem:[%s343_s1 + $0x30] ss:$8 sps:$4 sm:$0xff]   ;;  %v248_v11 = vld [vmem:[%s343_s1 + $0x24] ss:$8 sps:$4 sm:$0xff]   ;;  %v250_v12 = vld [vmem:[%s343_s1 + $0x20] ss:$8 sps:$4 sm:$0xff]  }
   0x5   :  { %v251_v13 = vld [vmem:[%s343_s1 + $0x14] ss:$8 sps:$4 sm:$0xff]   ;;  %v253_v14 = vld [vmem:[%s343_s1 + $0x10] ss:$8 sps:$4 sm:$0xff]   ;;  %v254_v15 = vld [vmem:[%s343_s1 + $0x4] ss:$8 sps:$4 sm:$0xff]  }
   0x6   :  { %v256_v16 = vld [vmem:[%s343_s1] ss:$8 sps:$4 sm:$0xff]   ;;  %v176_v19 = vshrl.u32 %v175_v18, 7 }
   0x7   :  { %126 = vmatpush1.bf16.msra.mxu0 %v238_v4  ;;  %v26_v17 = vld [vmem:[%s344_s0] sm:$0xf] }
   0x8   :  { %127 = vmatprep.subr.bf16.mxu0 %v239_v5  ;;  %v177_v20 = vsub.s32 0, %v176_v19  ;;  %v173_v21 = vld [vmem:[%s345_s2] sm:$0x3]  ;;  %v181_v22 = vsub.s32 1, %v176_v19 }
   0x9   :  { %v187_v24 = vld [vmem:[%s346_s3] sm:$0x3] }
   0xa   :  { %v178_v23 = vrot.slane %v173_v21, %v177_v20  ;;  %v182_v25 = vrot.slane %v173_v21, %v181_v22  ;;  %v192_v28 = vrot.slane %v187_v24, %v177_v20  ;;  %v196_v29 = vrot.slane %v187_v24, %v181_v22 }
   0xb   :  { %128 = vmatpush1.bf16.msra.mxu0 %v241_v6 }
   0xc   :  { %129 = vmatprep.subr.bf16.mxu0 %v242_v7 }
   0xf   :  { %130 = vmatpush1.bf16.msra.mxu0 %v244_v8 }
  0x10   :  { %131 = vmatprep.subr.bf16.mxu0 %v245_v9 }
  0x13   :  { %132 = vmatpush1.bf16.msra.mxu0 %v247_v10 }
  0x14   :  { %133 = vmatprep.subr.bf16.mxu0 %v248_v11 }
  0x17   :  { %134 = vmatpush1.bf16.msra.mxu0 %v250_v12 }
  0x18   :  { %135 = vmatprep.subr.bf16.mxu0 %v251_v13 }
  0x1b   :  { %136 = vmatpush1.bf16.msra.mxu0 %v253_v14 }
  0x1c   :  { %137 = vmatprep.subr.bf16.mxu0 %v254_v15 }
  0x1f   :  { %138 = vmatpush1.bf16.msra.mxu0 %v256_v16 }
  0x22   :  { %156 = vmatmul.mubr.bf16.vlgmr.msra.gmra.mxu0 %v26_v17 }
  0xe2   :  { %v157_v26 = vpop.f32.mrf.mxu0 }
  0xe3   :  { %v185_v27 = vmul.f32 %v178_v23, %v157_v26 }
  0xe4   :  { %v159_v30 = vpop.f32.mrf.mxu0 }
  0xe5   :  { %v186_v31 = vmul.f32 %v182_v25, %v159_v30  ;;  %v199_v33 = vadd.f32 %v192_v28, %v185_v27 }
  0xe6   :  { %v161_v32 = vpop.f32.mrf.mxu0 }
  0xe7   :  { %v200_v34 = vadd.f32 %v196_v29, %v186_v31 }
  0xe8   :  { %v162_v35 = vpop.f32.mrf.mxu0 }
  0xe9   :  { %v231_v36 = vpack.c.bf16 %v200_v34, %v199_v33 }
  0xeb   :  { %209 = vst [vmem:[%s347_s4] sm:$0xff] %v231_v36 }

// kernel: rfunet_forward.46
= control target key start
LH: loop header
LB: loop body
LE: loop exit
PB: predicated region body
PF: predicated region fallthrough
CT: control target
= control target key end

     0   :  { %s1024_s18 = smov 0   ;;  %s1026_s19 = smov 0   ;;  %s1112_s0 = inlined_call_operand.vmem [shape: bf16[8,2304], index: 0, kind: input, shape index: {}]   ;;  %s1113_s1 = inlined_call_operand.vmem [shape: bf16[2304,256], index: 1, kind: input, shape index: {}]   ;;  %s1114_s2 = inlined_call_operand.vmem [shape: f32[1,256], index: 2, kind: input, shape index: {}]   ;;  %s1115_s3 = inlined_call_operand.vmem [shape: f32[1,256], index: 3, kind: input, shape index: {}]   ;;  %s1116_s4 = inlined_call_operand.vmem [shape: bf16[8,256], index: 4, kind: input, shape index: {}]   ;;  %s1117_s5 = inlined_call_operand.vmem [shape: bf16[8,256], index: 5, kind: output, shape index: {}]  }
   0x1   :  { %s1028_s20 = smov 0  }
   0x2 LB: > { %s27_s21 = sadd.s32 1, %s987_s19  ;;  %p845_p0 = scmp.ge.s32.totalorder %s991_s20, 1  ;;  %s991_s20 = sphi %s1028_s20, %s15_s20   ;;  %s987_s19 = sphi %s1026_s19, %s1119_s19   ;;  %s983_s18 = sphi %s1024_s18, %s1118_s18  }
   0x3   : > { %p28_p1 = scmp.ge.s32.totalorder %s27_s21, 9  ;;  %p271_p2 = scmp.lt.s32.totalorder %s991_s20, 10 }
   0x5   : > { %s1121_s21 = smov (%p28_p1, %s27_s21), 0  ;;  %p272_p3 = pnand %p845_p0, %p271_p2 }
   0x6   : > { %s846_s22 = sshll.u32 (!%p272_p3), %s983_s18, 1  ;;  %s848_s23 = sshll.u32 (!%p272_p3), %s983_s18, 5 }
   0x7   : > { %275 = sbr.rel (%p272_p3) target bundleno = 305 (0x131), region = 40  ;;  %p337_p4 = scmp.lt.s32.totalorder (!%p272_p3), %s846_s22, 17 }
   0x8   : > { %p346_p5 = scmp.lt.s32.totalorder (!%p272_p3), %s848_s23, 287  ;;  %p851_p6 = scmp.ne.s32.totalorder (!%p272_p3), %s983_s18, 0 }
   0xc   : > { %s1123_s22 = smov (!%p337_p4, %s846_s22), 17  ;;  %s1125_s23 = smov (!%p346_p5, %s848_s23), 287 }
   0xd   : > { %s847_s24 = sshll.u32 %s1123_s22, 2  ;;  %s892_s28 = sshll.u32 %s1125_s23, 3 }
   0xe   : > { %s1049_s27 = scalar_lea.vmem %s1112_s0, %s847_s24  ;;  %s1054_s6 = scalar_lea.vmem %s1113_s1, %s892_s28 }
   0xf   : > { %389 = sbr.rel (%p851_p6) target bundleno = 22 (0x16), region = 44 }
  0x14   : > { %v993_v0 = vmov 0.0  }
  0x15   : > { %390 = vst [vmem:[#allocation2] sm:$0xff] %v993_v0  ;;  %391 = vst [vmem:[#allocation2 + $0x8] sm:$0xff] %v993_v0 }
  0x16 PF: > { %v919_v1 = vld [vmem:[%s1054_s6 + $0x74] ss:$8 sps:$4 sm:$0xff]   ;;  %v921_v2 = vld [vmem:[%s1054_s6 + $0x70] ss:$8 sps:$4 sm:$0xff]   ;;  %v922_v3 = vld [vmem:[%s1054_s6 + $0x64] ss:$8 sps:$4 sm:$0xff]  }
  0x17   : > { %594 = vmatprep.subr.bf16.mxu0 %v919_v1  ;;  %v924_v4 = vld [vmem:[%s1054_s6 + $0x60] ss:$8 sps:$4 sm:$0xff]   ;;  %v925_v5 = vld [vmem:[%s1054_s6 + $0x54] ss:$8 sps:$4 sm:$0xff]   ;;  %v927_v6 = vld [vmem:[%s1054_s6 + $0x50] ss:$8 sps:$4 sm:$0xff]  }
  0x18   : > { %595 = vmatpush1.bf16.msra.mxu0 %v921_v2  ;;  %v928_v7 = vld [vmem:[%s1054_s6 + $0x44] ss:$8 sps:$4 sm:$0xff]   ;;  %v930_v8 = vld [vmem:[%s1054_s6 + $0x40] ss:$8 sps:$4 sm:$0xff]   ;;  %v931_v9 = vld [vmem:[%s1054_s6 + $0x34] ss:$8 sps:$4 sm:$0xff]  }
  0x19   : > { %596 = vmatprep.subr.bf16.mxu0 %v922_v3  ;;  %v933_v10 = vld [vmem:[%s1054_s6 + $0x30] ss:$8 sps:$4 sm:$0xff]   ;;  %v934_v11 = vld [vmem:[%s1054_s6 + $0x24] ss:$8 sps:$4 sm:$0xff]   ;;  %v936_v12 = vld [vmem:[%s1054_s6 + $0x20] ss:$8 sps:$4 sm:$0xff]  }
  0x1a   : > { %v937_v13 = vld [vmem:[%s1054_s6 + $0x14] ss:$8 sps:$4 sm:$0xff]   ;;  %v394_v14 = vld [vmem:[%s1049_s27] sm:$0xff]  ;;  %v939_v16 = vld [vmem:[%s1054_s6 + $0x10] ss:$8 sps:$4 sm:$0xff]   ;;  %p886_p7 = scmp.ne.s32.totalorder %s983_s18, 8 }
  0x1b   : > { %v853_v15 = vcombine.high %v394_v14, %v394_v14  ;;  %v940_v17 = vld [vmem:[%s1054_s6 + $0x4] ss:$8 sps:$4 sm:$0xff]   ;;  %v942_v18 = vld [vmem:[%s1054_s6] ss:$8 sps:$4 sm:$0xff]   ;;  %v943_v19 = vld [vmem:[%s1054_s6 + $0xf4] ss:$8 sps:$4 sm:$0xff]   ;;  %v852_v35 = vcombine.low %v394_v14, %v394_v14 }
  0x1c   : > { %597 = vmatpush1.bf16.msra.mxu0 %v924_v4  ;;  %v945_v20 = vld [vmem:[%s1054_s6 + $0xf0] ss:$8 sps:$4 sm:$0xff]   ;;  %v946_v21 = vld [vmem:[%s1054_s6 + $0xe4] ss:$8 sps:$4 sm:$0xff]   ;;  %v948_v22 = vld [vmem:[%s1054_s6 + $0xe0] ss:$8 sps:$4 sm:$0xff]  }
  0x1d   : > { %598 = vmatprep.subr.bf16.mxu0 %v925_v5  ;;  %626 = vmatprep.mubr.bf16.mxu0 %v853_v15  ;;  %v949_v23 = vld [vmem:[%s1054_s6 + $0xd4] ss:$8 sps:$4 sm:$0xff]   ;;  %v951_v24 = vld [vmem:[%s1054_s6 + $0xd0] ss:$8 sps:$4 sm:$0xff]   ;;  %v952_v25 = vld [vmem:[%s1054_s6 + $0xc4] ss:$8 sps:$4 sm:$0xff]  }
  0x1e   : > { %v954_v26 = vld [vmem:[%s1054_s6 + $0xc0] ss:$8 sps:$4 sm:$0xff]   ;;  %v955_v27 = vld [vmem:[%s1054_s6 + $0xb4] ss:$8 sps:$4 sm:$0xff]   ;;  %v957_v28 = vld [vmem:[%s1054_s6 + $0xb0] ss:$8 sps:$4 sm:$0xff]  }
  0x1f   : > { %v958_v29 = vld [vmem:[%s1054_s6 + $0xa4] ss:$8 sps:$4 sm:$0xff]   ;;  %v960_v30 = vld [vmem:[%s1054_s6 + $0xa0] ss:$8 sps:$4 sm:$0xff]   ;;  %v961_v31 = vld [vmem:[%s1054_s6 + $0x94] ss:$8 sps:$4 sm:$0xff]  }
  0x20   : > { %599 = vmatpush1.bf16.msra.mxu0 %v927_v6  ;;  %v963_v32 = vld [vmem:[%s1054_s6 + $0x90] ss:$8 sps:$4 sm:$0xff]   ;;  %v964_v33 = vld [vmem:[%s1054_s6 + $0x84] ss:$8 sps:$4 sm:$0xff]   ;;  %v966_v34 = vld [vmem:[%s1054_s6 + $0x80] ss:$8 sps:$4 sm:$0xff]  }
  0x21   : > { %600 = vmatprep.subr.bf16.mxu0 %v928_v7  ;;  %v392_v36 = vld [vmem:[#allocation2] sm:$0xff]  ;;  %v393_v38 = vld [vmem:[#allocation2 + $0x8] sm:$0xff] }
  0x24   : > { %601 = vmatpush1.bf16.msra.mxu0 %v930_v8 }
  0x25   : > { %602 = vmatprep.subr.bf16.mxu0 %v931_v9 }
  0x28   : > { %603 = vmatpush1.bf16.msra.mxu0 %v933_v10 }
  0x29   : > { %604 = vmatprep.subr.bf16.mxu0 %v934_v11 }
  0x2c   : > { %605 = vmatpush1.bf16.msra.mxu0 %v936_v12 }
  0x2d   : > { %606 = vmatprep.subr.bf16.mxu0 %v937_v13 }
  0x30   : > { %607 = vmatpush1.bf16.msra.mxu0 %v939_v16 }
  0x31   : > { %608 = vmatprep.subr.bf16.mxu0 %v940_v17 }
  0x34   : > { %609 = vmatpush1.bf16.msra.mxu0 %v942_v18 }
  0x35   : > { %610 = vmatprep.subr.bf16.mxu0 %v943_v19 }
  0x38   : > { %611 = vmatpush2.bf16.msra.mxu0 %v945_v20 }
  0x39   : > { %612 = vmatprep.subr.bf16.mxu0 %v946_v21 }
  0x3c   : > { %613 = vmatpush2.bf16.msra.mxu0 %v948_v22 }
  0x3d   : > { %614 = vmatprep.subr.bf16.mxu0 %v949_v23 }
  0x40   : > { %615 = vmatpush2.bf16.msra.mxu0 %v951_v24 }
  0x41   : > { %616 = vmatprep.subr.bf16.mxu0 %v952_v25 }
  0x44   : > { %617 = vmatpush2.bf16.msra.mxu0 %v954_v26 }
  0x45   : > { %618 = vmatprep.subr.bf16.mxu0 %v955_v27 }
  0x48   : > { %619 = vmatpush2.bf16.msra.mxu0 %v957_v28 }
  0x49   : > { %620 = vmatprep.subr.bf16.mxu0 %v958_v29 }
  0x4c   : > { %621 = vmatpush2.bf16.msra.mxu0 %v960_v30 }
  0x4d   : > { %622 = vmatprep.subr.bf16.mxu0 %v961_v31 }
  0x50   : > { %623 = vmatpush2.bf16.msra.mxu0 %v963_v32 }
  0x51   : > { %624 = vmatprep.subr.bf16.mxu0 %v964_v33 }
  0x54   : > { %625 = vmatpush2.bf16.msra.mxu0 %v966_v34 }
  0x57   : > { %627 = vmatmul.mubr.bf16.vlgmr.msra.gmra.mxu0 %v852_v35 }
 0x117   : > { %v628_v37 = vpop.f32.mrf.mxu0 }
 0x118   : > { %v635_v39 = vadd.f32 %v628_v37, %v392_v36 }
 0x119   : > { %v630_v40 = vpop.f32.mrf.mxu0  ;;  %642 = sbr.rel (%p886_p7) target bundleno = 305 (0x131), region = 48 }
 0x11a   : > { %637 = vst [vmem:[#allocation2] sm:$0xff] %v635_v39  ;;  %v636_v41 = vadd.f32 %v630_v40, %v393_v38 }
 0x11b   : > { %v632_v42 = vpop.f32.mrf.mxu0 }
 0x11c   : > { %638 = vst [vmem:[#allocation2 + $0x8] sm:$0xff] %v636_v41 }
 0x11d   : > { %v633_v43 = vpop.f32.mrf.mxu0 }
 0x11e   : > { %v647_v44 = vlaneseq  ;;  %v645_v46 = vld [vmem:[%s1114_s2] sm:$0x3] }
 0x11f   : > { %v659_v47 = vld [vmem:[%s1115_s3] sm:$0x3] }
 0x120   : > { %v648_v45 = vshrl.u32 %v647_v44, 7  ;;  %v673_v52 = vld [vmem:[%s1116_s4] sm:$0xff] }
 0x121   : > { %v643_v50 = vld [vmem:[#allocation2] sm:$0xff]  ;;  %v674_v59 = vunpack.c.l.bf16 %v673_v52  ;;  %v675_v60 = vunpack.c.h.bf16 %v673_v52 }
 0x122   : > { %v649_v48 = vsub.s32 0, %v648_v45  ;;  %v653_v49 = vsub.s32 1, %v648_v45 }
 0x123   : > { %v644_v51 = vld [vmem:[#allocation2 + $0x8] sm:$0xff] }
 0x124   : > { %v650_v53 = vrot.slane %v645_v46, %v649_v48  ;;  %v654_v54 = vrot.slane %v645_v46, %v653_v49  ;;  %v664_v55 = vrot.slane %v659_v47, %v649_v48  ;;  %v668_v56 = vrot.slane %v659_v47, %v653_v49 }
 0x126   : > { %v657_v57 = vmul.f32 %v650_v53, %v643_v50  ;;  %v658_v58 = vmul.f32 %v654_v54, %v644_v51 }
 0x128   : > { %v671_v61 = vadd.f32 %v664_v55, %v657_v57  ;;  %v672_v62 = vadd.f32 %v668_v56, %v658_v58 }
 0x12a   : > { %v676_v63 = vadd.f32 %v674_v59, %v671_v61  ;;  %v677_v0 = vadd.f32 %v675_v60, %v672_v62 }
 0x12c   : > { %v678_v1 = vmax.f32 %v676_v63, 0.0  ;;  %v679_v2 = vmax.f32 %v677_v0, 0.0 }
 0x12e   : > { %v893_v3 = vpack.c.bf16 %v679_v2, %v678_v1 }
 0x130   : > { %688 = vst [vmem:[%s1117_s5] sm:$0xff] %v893_v3 }
 0x131 PF: > { %s15_s20 = sadd.s32 1, %s991_s20   ;;  %s1118_s18 = smov %s987_s19 }
 0x132   : > { %p12_p8 = scmp.ge.s32.totalorder %s15_s20, 11   ;;  %s1119_s19 = smov %s1121_s21 }
 0x134   :  { %14 = sbr.rel (!%p12_p8) target bundleno = 2 (0x2), region = 90 }

// kernel: rfunet_forward.47
= control target key start
LH: loop header
LB: loop body
LE: loop exit
PB: predicated region body
PF: predicated region fallthrough
CT: control target
= control target key end

     0   :  { %s929_s15 = smov 0   ;;  %s931_s16 = smov 0   ;;  %s1014_s0 = inlined_call_operand.vmem [shape: bf16[8,2304], index: 0, kind: input, shape index: {}]   ;;  %s1015_s1 = inlined_call_operand.vmem [shape: bf16[2304,256], index: 1, kind: input, shape index: {}]   ;;  %s1016_s2 = inlined_call_operand.vmem [shape: f32[1,256], index: 2, kind: input, shape index: {}]   ;;  %s1017_s3 = inlined_call_operand.vmem [shape: f32[1,256], index: 3, kind: input, shape index: {}]   ;;  %s1018_s4 = inlined_call_operand.vmem [shape: bf16[8,256], index: 4, kind: output, shape index: {}]  }
   0x1   :  { %s933_s17 = smov 0  }
   0x2 LB: > { %s26_s18 = sadd.s32 1, %s897_s16  ;;  %p755_p0 = scmp.ge.s32.totalorder %s901_s17, 1  ;;  %s901_s17 = sphi %s933_s17, %s14_s17   ;;  %s897_s16 = sphi %s931_s16, %s1020_s16   ;;  %s893_s15 = sphi %s929_s15, %s1019_s15  }
   0x3   : > { %p27_p1 = scmp.ge.s32.totalorder %s26_s18, 9  ;;  %p229_p2 = scmp.lt.s32.totalorder %s901_s17, 10 }
   0x5   : > { %s1022_s18 = smov (%p27_p1, %s26_s18), 0  ;;  %p230_p3 = pnand %p755_p0, %p229_p2 }
   0x6   : > { %s756_s19 = sshll.u32 (!%p230_p3), %s893_s15, 1  ;;  %s758_s20 = sshll.u32 (!%p230_p3), %s893_s15, 5 }
   0x7   : > { %233 = sbr.rel (%p230_p3) target bundleno = 303 (0x12f), region = 36  ;;  %p284_p4 = scmp.lt.s32.totalorder (!%p230_p3), %s756_s19, 17 }
   0x8   : > { %p293_p5 = scmp.lt.s32.totalorder (!%p230_p3), %s758_s20, 287  ;;  %p761_p6 = scmp.ne.s32.totalorder (!%p230_p3), %s893_s15, 0 }
   0xc   : > { %s1024_s19 = smov (!%p284_p4, %s756_s19), 17  ;;  %s1026_s20 = smov (!%p293_p5, %s758_s20), 287 }
   0xd   : > { %s757_s21 = sshll.u32 %s1024_s19, 2  ;;  %s802_s25 = sshll.u32 %s1026_s20, 3 }
   0xe   : > { %s954_s24 = scalar_lea.vmem %s1014_s0, %s757_s21  ;;  %s959_s28 = scalar_lea.vmem %s1015_s1, %s802_s25 }
   0xf   : > { %326 = sbr.rel (%p761_p6) target bundleno = 22 (0x16), region = 40 }
  0x14   : > { %v903_v0 = vmov 0.0  }
  0x15   : > { %327 = vst [vmem:[#allocation2] sm:$0xff] %v903_v0  ;;  %328 = vst [vmem:[#allocation2 + $0x8] sm:$0xff] %v903_v0 }
  0x16 PF: > { %v829_v1 = vld [vmem:[%s959_s28 + $0x74] ss:$8 sps:$4 sm:$0xff]   ;;  %v831_v2 = vld [vmem:[%s959_s28 + $0x70] ss:$8 sps:$4 sm:$0xff]   ;;  %v832_v3 = vld [vmem:[%s959_s28 + $0x64] ss:$8 sps:$4 sm:$0xff]  }
  0x17   : > { %531 = vmatprep.subr.bf16.mxu0 %v829_v1  ;;  %v834_v4 = vld [vmem:[%s959_s28 + $0x60] ss:$8 sps:$4 sm:$0xff]   ;;  %v835_v5 = vld [vmem:[%s959_s28 + $0x54] ss:$8 sps:$4 sm:$0xff]   ;;  %v837_v6 = vld [vmem:[%s959_s28 + $0x50] ss:$8 sps:$4 sm:$0xff]  }
  0x18   : > { %532 = vmatpush1.bf16.msra.mxu0 %v831_v2  ;;  %v838_v7 = vld [vmem:[%s959_s28 + $0x44] ss:$8 sps:$4 sm:$0xff]   ;;  %v840_v8 = vld [vmem:[%s959_s28 + $0x40] ss:$8 sps:$4 sm:$0xff]   ;;  %v841_v9 = vld [vmem:[%s959_s28 + $0x34] ss:$8 sps:$4 sm:$0xff]  }
  0x19   : > { %533 = vmatprep.subr.bf16.mxu0 %v832_v3  ;;  %v843_v10 = vld [vmem:[%s959_s28 + $0x30] ss:$8 sps:$4 sm:$0xff]   ;;  %v844_v11 = vld [vmem:[%s959_s28 + $0x24] ss:$8 sps:$4 sm:$0xff]   ;;  %v846_v12 = vld [vmem:[%s959_s28 + $0x20] ss:$8 sps:$4 sm:$0xff]  }
  0x1a   : > { %v847_v13 = vld [vmem:[%s959_s28 + $0x14] ss:$8 sps:$4 sm:$0xff]   ;;  %v331_v14 = vld [vmem:[%s954_s24] sm:$0xff]  ;;  %v849_v16 = vld [vmem:[%s959_s28 + $0x10] ss:$8 sps:$4 sm:$0xff]   ;;  %p796_p7 = scmp.ne.s32.totalorder %s893_s15, 8 }
  0x1b   : > { %v763_v15 = vcombine.high %v331_v14, %v331_v14  ;;  %v850_v17 = vld [vmem:[%s959_s28 + $0x4] ss:$8 sps:$4 sm:$0xff]   ;;  %v852_v18 = vld [vmem:[%s959_s28] ss:$8 sps:$4 sm:$0xff]   ;;  %v853_v19 = vld [vmem:[%s959_s28 + $0xf4] ss:$8 sps:$4 sm:$0xff]   ;;  %v762_v35 = vcombine.low %v331_v14, %v331_v14 }
  0x1c   : > { %534 = vmatpush1.bf16.msra.mxu0 %v834_v4  ;;  %v855_v20 = vld [vmem:[%s959_s28 + $0xf0] ss:$8 sps:$4 sm:$0xff]   ;;  %v856_v21 = vld [vmem:[%s959_s28 + $0xe4] ss:$8 sps:$4 sm:$0xff]   ;;  %v858_v22 = vld [vmem:[%s959_s28 + $0xe0] ss:$8 sps:$4 sm:$0xff]  }
  0x1d   : > { %535 = vmatprep.subr.bf16.mxu0 %v835_v5  ;;  %563 = vmatprep.mubr.bf16.mxu0 %v763_v15  ;;  %v859_v23 = vld [vmem:[%s959_s28 + $0xd4] ss:$8 sps:$4 sm:$0xff]   ;;  %v861_v24 = vld [vmem:[%s959_s28 + $0xd0] ss:$8 sps:$4 sm:$0xff]   ;;  %v862_v25 = vld [vmem:[%s959_s28 + $0xc4] ss:$8 sps:$4 sm:$0xff]  }
  0x1e   : > { %v864_v26 = vld [vmem:[%s959_s28 + $0xc0] ss:$8 sps:$4 sm:$0xff]   ;;  %v865_v27 = vld [vmem:[%s959_s28 + $0xb4] ss:$8 sps:$4 sm:$0xff]   ;;  %v867_v28 = vld [vmem:[%s959_s28 + $0xb0] ss:$8 sps:$4 sm:$0xff]  }
  0x1f   : > { %v868_v29 = vld [vmem:[%s959_s28 + $0xa4] ss:$8 sps:$4 sm:$0xff]   ;;  %v870_v30 = vld [vmem:[%s959_s28 + $0xa0] ss:$8 sps:$4 sm:$0xff]   ;;  %v871_v31 = vld [vmem:[%s959_s28 + $0x94] ss:$8 sps:$4 sm:$0xff]  }
  0x20   : > { %536 = vmatpush1.bf16.msra.mxu0 %v837_v6  ;;  %v873_v32 = vld [vmem:[%s959_s28 + $0x90] ss:$8 sps:$4 sm:$0xff]   ;;  %v874_v33 = vld [vmem:[%s959_s28 + $0x84] ss:$8 sps:$4 sm:$0xff]   ;;  %v876_v34 = vld [vmem:[%s959_s28 + $0x80] ss:$8 sps:$4 sm:$0xff]  }
  0x21   : > { %537 = vmatprep.subr.bf16.mxu0 %v838_v7  ;;  %v329_v36 = vld [vmem:[#allocation2] sm:$0xff]  ;;  %v330_v38 = vld [vmem:[#allocation2 + $0x8] sm:$0xff] }
  0x24   : > { %538 = vmatpush1.bf16.msra.mxu0 %v840_v8 }
  0x25   : > { %539 = vmatprep.subr.bf16.mxu0 %v841_v9 }
  0x28   : > { %540 = vmatpush1.bf16.msra.mxu0 %v843_v10 }
  0x29   : > { %541 = vmatprep.subr.bf16.mxu0 %v844_v11 }
  0x2c   : > { %542 = vmatpush1.bf16.msra.mxu0 %v846_v12 }
  0x2d   : > { %543 = vmatprep.subr.bf16.mxu0 %v847_v13 }
  0x30   : > { %544 = vmatpush1.bf16.msra.mxu0 %v849_v16 }
  0x31   : > { %545 = vmatprep.subr.bf16.mxu0 %v850_v17 }
  0x34   : > { %546 = vmatpush1.bf16.msra.mxu0 %v852_v18 }
  0x35   : > { %547 = vmatprep.subr.bf16.mxu0 %v853_v19 }
  0x38   : > { %548 = vmatpush2.bf16.msra.mxu0 %v855_v20 }
  0x39   : > { %549 = vmatprep.subr.bf16.mxu0 %v856_v21 }
  0x3c   : > { %550 = vmatpush2.bf16.msra.mxu0 %v858_v22 }
  0x3d   : > { %551 = vmatprep.subr.bf16.mxu0 %v859_v23 }
  0x40   : > { %552 = vmatpush2.bf16.msra.mxu0 %v861_v24 }
  0x41   : > { %553 = vmatprep.subr.bf16.mxu0 %v862_v25 }
  0x44   : > { %554 = vmatpush2.bf16.msra.mxu0 %v864_v26 }
  0x45   : > { %555 = vmatprep.subr.bf16.mxu0 %v865_v27 }
  0x48   : > { %556 = vmatpush2.bf16.msra.mxu0 %v867_v28 }
  0x49   : > { %557 = vmatprep.subr.bf16.mxu0 %v868_v29 }
  0x4c   : > { %558 = vmatpush2.bf16.msra.mxu0 %v870_v30 }
  0x4d   : > { %559 = vmatprep.subr.bf16.mxu0 %v871_v31 }
  0x50   : > { %560 = vmatpush2.bf16.msra.mxu0 %v873_v32 }
  0x51   : > { %561 = vmatprep.subr.bf16.mxu0 %v874_v33 }
  0x54   : > { %562 = vmatpush2.bf16.msra.mxu0 %v876_v34 }
  0x57   : > { %564 = vmatmul.mubr.bf16.vlgmr.msra.gmra.mxu0 %v762_v35 }
 0x117   : > { %v565_v37 = vpop.f32.mrf.mxu0 }
 0x118   : > { %v572_v39 = vadd.f32 %v565_v37, %v329_v36 }
 0x119   : > { %v567_v40 = vpop.f32.mrf.mxu0  ;;  %579 = sbr.rel (%p796_p7) target bundleno = 303 (0x12f), region = 44 }
 0x11a   : > { %574 = vst [vmem:[#allocation2] sm:$0xff] %v572_v39  ;;  %v573_v41 = vadd.f32 %v567_v40, %v330_v38 }
 0x11b   : > { %v569_v42 = vpop.f32.mrf.mxu0 }
 0x11c   : > { %575 = vst [vmem:[#allocation2 + $0x8] sm:$0xff] %v573_v41 }
 0x11d   : > { %v570_v43 = vpop.f32.mrf.mxu0 }
 0x11e   : > { %v584_v44 = vlaneseq  ;;  %v582_v46 = vld [vmem:[%s1016_s2] sm:$0x3] }
 0x11f   : > { %v596_v47 = vld [vmem:[%s1017_s3] sm:$0x3] }
 0x120   : > { %v585_v45 = vshrl.u32 %v584_v44, 7 }
 0x121   : > { %v580_v50 = vld [vmem:[#allocation2] sm:$0xff] }
 0x122   : > { %v586_v48 = vsub.s32 0, %v585_v45  ;;  %v590_v49 = vsub.s32 1, %v585_v45 }
 0x123   : > { %v581_v51 = vld [vmem:[#allocation2 + $0x8] sm:$0xff] }
 0x124   : > { %v587_v52 = vrot.slane %v582_v46, %v586_v48  ;;  %v591_v53 = vrot.slane %v582_v46, %v590_v49  ;;  %v601_v54 = vrot.slane %v596_v47, %v586_v48  ;;  %v605_v55 = vrot.slane %v596_v47, %v590_v49 }
 0x126   : > { %v594_v56 = vmul.f32 %v587_v52, %v580_v50  ;;  %v595_v57 = vmul.f32 %v591_v53, %v581_v51 }
 0x128   : > { %v608_v58 = vadd.f32 %v601_v54, %v594_v56  ;;  %v609_v59 = vadd.f32 %v605_v55, %v595_v57 }
 0x12a   : > { %v610_v60 = vmax.f32 %v608_v58, 0.0  ;;  %v611_v61 = vmax.f32 %v609_v59, 0.0 }
 0x12c   : > { %v803_v62 = vpack.c.bf16 %v611_v61, %v610_v60 }
 0x12e   : > { %620 = vst [vmem:[%s1018_s4] sm:$0xff] %v803_v62 }
 0x12f PF: > { %s14_s17 = sadd.s32 1, %s901_s17   ;;  %s1019_s15 = smov %s897_s16 }
 0x130   : > { %p11_p8 = scmp.ge.s32.totalorder %s14_s17, 11   ;;  %s1020_s16 = smov %s1022_s18 }
 0x132   :  { %13 = sbr.rel (!%p11_p8) target bundleno = 2 (0x2), region = 83 }

// kernel: rfunet_forward.49
= control target key start
LH: loop header
LB: loop body
LE: loop exit
PB: predicated region body
PF: predicated region fallthrough
CT: control target
= control target key end

     0   :  { %s58_s0 = inlined_call_operand.vmem [shape: bf16[8,256], index: 0, kind: input, shape index: {}]   ;;  %s59_s1 = inlined_call_operand.vmem [shape: bf16[8,256], index: 1, kind: input, shape index: {}]   ;;  %s60_s2 = inlined_call_operand.vmem [shape: bf16[8,256], index: 2, kind: output, shape index: {}]  }
   0x1   :  { %v11_v0 = vld [vmem:[%s58_s0] sm:$0xff] }
   0x2   :  { %v14_v1 = vld [vmem:[%s59_s1] sm:$0xff]  ;;  %v12_v2 = vunpack.c.l.bf16 %v11_v0  ;;  %v13_v3 = vunpack.c.h.bf16 %v11_v0 }
   0x3   :  { %v15_v4 = vunpack.c.l.bf16 %v14_v1  ;;  %v16_v5 = vunpack.c.h.bf16 %v14_v1 }
   0x5   :  { %v17_v6 = vadd.f32 %v15_v4, %v12_v2  ;;  %v18_v7 = vadd.f32 %v16_v5, %v13_v3 }
   0x7   :  { %v33_v8 = vpack.c.bf16 %v18_v7, %v17_v6 }
   0x9   :  { %27 = vst [vmem:[%s60_s2] sm:$0xff] %v33_v8 }

// kernel: rfunet_forward.51
= control target key start
LH: loop header
LB: loop body
LE: loop exit
PB: predicated region body
PF: predicated region fallthrough
CT: control target
= control target key end

     0   :  { %s1146_s15 = smov 0   ;;  %s1148_s16 = smov 0   ;;  %s1369_s0 = inlined_call_operand.vmem [shape: bf16[8,2304], index: 0, kind: input, shape index: {}]   ;;  %s1370_s1 = inlined_call_operand.vmem [shape: bf16[2304,512], index: 1, kind: input, shape index: {}]   ;;  %s1371_s2 = inlined_call_operand.vmem [shape: f32[1,512], index: 2, kind: input, shape index: {}]   ;;  %s1372_s3 = inlined_call_operand.vmem [shape: f32[1,512], index: 3, kind: input, shape index: {}]   ;;  %s1373_s4 = inlined_call_operand.vmem [shape: bf16[8,512], index: 4, kind: output, shape index: {}]  }
   0x1   :  { %s1150_s17 = smov 0   ;;  %s1152_s18 = smov 0  }
   0x2   :  { %s1154_s19 = smov 0   ;;  %s1156_s20 = smov 0  }
   0x3   :  { %s1158_s21 = smov 0  }
   0x4 LB: > { %s26_s22 = sadd.s32 1, %s1110_s19  ;;  %s29_s23 = sadd.s32 1, %s1114_s20  ;;  %s1118_s21 = sphi %s1158_s21, %s14_s21   ;;  %s1114_s20 = sphi %s1156_s20, %s1379_s20   ;;  %s1110_s19 = sphi %s1154_s19, %s1378_s19   ;;  %s1106_s18 = sphi %s1152_s18, %s1377_s18   ;;  %s1102_s17 = sphi %s1150_s17, %s1376_s17   ;;  %s1098_s16 = sphi %s1148_s16, %s1375_s16   ;;  %s1094_s15 = sphi %s1146_s15, %s1374_s15  }
   0x5   : > { %p27_p0 = scmp.ge.s32.totalorder %s26_s22, 9  ;;  %p77_p1 = scmp.ne.s32.totalorder %s1098_s16, %s1094_s15 }
   0x6   : > { %p78_p2 = scmp.eq.s32.totalorder %s1118_s21, 0  ;;  %s70_s27 = sadd.s32 1, %s1098_s16 }
   0x7   : > { %s1381_s22 = smov (%p27_p0, %s26_s22), 0  ;;  %s1383_s23 = smov (!%p27_p0, %s29_s23), %s1114_s20 }
   0x8   : > { %p79_p3 = por %p78_p2, %p77_p1  ;;  %p31_p4 = scmp.ge.s32.totalorder %s1383_s23, 2 }
   0x9   : > { %s65_s24 = ssub.s32 %s1110_s19, %s1381_s22  ;;  %p902_p6 = scmp.ge.s32.totalorder %s1118_s21, 18 }
   0xa   : > { %s1385_s23 = smov (%p31_p4, %s1383_s23), 0 }
   0xb   : > { %s66_s25 = ssub.s32 %s1114_s20, %s1385_s23  ;;  %183 = sbr.rel (%p902_p6) target bundleno = 39 (0x27), region = 16 }
   0xc   : > { %s67_s26 = sor.u32 %s66_s25, %s65_s24 }
   0xd   : > { %p68_p5 = scmp.eq.s32.totalorder %s67_s26, 0 }
   0xf   : > { %s1197_s28 = scalar_select %p68_p5, %s1098_s16, %s70_s27  }
  0x10   : > { %199 = sbr.rel (!%p79_p3) target bundleno = 39 (0x27), region = 24  ;;  %s201_s29 = sand.u32 (%p79_p3), 1, %s1098_s16  }
  0x11   : > { %s905_s30 = sshll.u32 (%p79_p3), %s1114_s20, 1  ;;  %s903_s5 = sshll.u32 (%p79_p3), %s201_s29, 8 }
  0x12   : > { %s955_s6 = sshll.u32 (%p79_p3), %s1110_s19, 7  ;;  %s1211_s12 = scalar_lea.vmem (%p79_p3), [#allocation3], %s903_s5 }
  0x13   : > { %s207_s7 = sadd.s32 (%p79_p3), %s955_s6, %s905_s30 }
  0x14   : > { %s907_s8 = sshll.u32 (%p79_p3), %s207_s7, 2 }
  0x15   : > { %s1206_s11 = scalar_lea.vmem %s1370_s1, %s907_s8 }
  0x16   : > { %v300_v0 = vld [vmem:[%s1206_s11] sm:$0xff]  ;;  %v302_v1 = vld [vmem:[%s1206_s11 + $0x10] sm:$0xff] }
  0x17   : > { %v304_v2 = vld [vmem:[%s1206_s11 + $0x20] sm:$0xff]  ;;  %301 = vst [vmem:[%s1211_s12] sm:$0xff] %v300_v0  ;;  %303 = vst [vmem:[%s1211_s12 + $0x8] sm:$0xff] %v302_v1  ;;  %v306_v3 = vld [vmem:[%s1206_s11 + $0x30] sm:$0xff] }
  0x18   : > { %305 = vst [vmem:[%s1211_s12 + $0x10] sm:$0xff] %v304_v2  ;;  %v308_v4 = vld [vmem:[%s1206_s11 + $0x40] sm:$0xff]  ;;  %v310_v5 = vld [vmem:[%s1206_s11 + $0x50] sm:$0xff]  ;;  %307 = vst [vmem:[%s1211_s12 + $0x18] sm:$0xff] %v306_v3 }
  0x19   : > { %309 = vst [vmem:[%s1211_s12 + $0x20] sm:$0xff] %v308_v4  ;;  %311 = vst [vmem:[%s1211_s12 + $0x28] sm:$0xff] %v310_v5  ;;  %v312_v6 = vld [vmem:[%s1206_s11 + $0x60] sm:$0xff]  ;;  %v314_v7 = vld [vmem:[%s1206_s11 + $0x70] sm:$0xff] }
  0x1a   : > { %v316_v8 = vld [vmem:[%s1206_s11 + $0x80] sm:$0xff]  ;;  %313 = vst [vmem:[%s1211_s12 + $0x30] sm:$0xff] %v312_v6  ;;  %315 = vst [vmem:[%s1211_s12 + $0x38] sm:$0xff] %v314_v7  ;;  %v318_v9 = vld [vmem:[%s1206_s11 + $0x90] sm:$0xff] }
  0x1b   : > { %317 = vst [vmem:[%s1211_s12 + $0x40] sm:$0xff] %v316_v8  ;;  %v320_v10 = vld [vmem:[%s1206_s11 + $0xa0] sm:$0xff]  ;;  %v322_v11 = vld [vmem:[%s1206_s11 + $0xb0] sm:$0xff]  ;;  %319 = vst [vmem:[%s1211_s12 + $0x48] sm:$0xff] %v318_v9 }
  0x1c   : > { %321 = vst [vmem:[%s1211_s12 + $0x50] sm:$0xff] %v320_v10  ;;  %323 = vst [vmem:[%s1211_s12 + $0x58] sm:$0xff] %v322_v11  ;;  %v324_v12 = vld [vmem:[%s1206_s11 + $0xc0] sm:$0xff]  ;;  %v326_v13 = vld [vmem:[%s1206_s11 + $0xd0] sm:$0xff] }
  0x1d   : > { %v328_v14 = vld [vmem:[%s1206_s11 + $0xe0] sm:$0xff]  ;;  %325 = vst [vmem:[%s1211_s12 + $0x60] sm:$0xff] %v324_v12  ;;  %327 = vst [vmem:[%s1211_s12 + $0x68] sm:$0xff] %v326_v13  ;;  %v330_v15 = vld [vmem:[%s1206_s11 + $0xf0] sm:$0xff] }
  0x1e   : > { %329 = vst [vmem:[%s1211_s12 + $0x70] sm:$0xff] %v328_v14  ;;  %v332_v16 = vld [vmem:[%s1206_s11 + $0x100] sm:$0xff]  ;;  %v334_v17 = vld [vmem:[%s1206_s11 + $0x110] sm:$0xff]  ;;  %331 = vst [vmem:[%s1211_s12 + $0x78] sm:$0xff] %v330_v15 }
  0x1f   : > { %333 = vst [vmem:[%s1211_s12 + $0x80] sm:$0xff] %v332_v16  ;;  %335 = vst [vmem:[%s1211_s12 + $0x88] sm:$0xff] %v334_v17  ;;  %v336_v18 = vld [vmem:[%s1206_s11 + $0x120] sm:$0xff]  ;;  %v338_v19 = vld [vmem:[%s1206_s11 + $0x130] sm:$0xff] }
  0x20   : > { %v340_v20 = vld [vmem:[%s1206_s11 + $0x140] sm:$0xff]  ;;  %337 = vst [vmem:[%s1211_s12 + $0x90] sm:$0xff] %v336_v18  ;;  %339 = vst [vmem:[%s1211_s12 + $0x98] sm:$0xff] %v338_v19  ;;  %v342_v21 = vld [vmem:[%s1206_s11 + $0x150] sm:$0xff] }
  0x21   : > { %341 = vst [vmem:[%s1211_s12 + $0xa0] sm:$0xff] %v340_v20  ;;  %v344_v22 = vld [vmem:[%s1206_s11 + $0x160] sm:$0xff]  ;;  %v346_v23 = vld [vmem:[%s1206_s11 + $0x170] sm:$0xff]  ;;  %343 = vst [vmem:[%s1211_s12 + $0xa8] sm:$0xff] %v342_v21 }
  0x22   : > { %345 = vst [vmem:[%s1211_s12 + $0xb0] sm:$0xff] %v344_v22  ;;  %347 = vst [vmem:[%s1211_s12 + $0xb8] sm:$0xff] %v346_v23  ;;  %v348_v24 = vld [vmem:[%s1206_s11 + $0x180] sm:$0xff]  ;;  %v350_v25 = vld [vmem:[%s1206_s11 + $0x190] sm:$0xff] }
  0x23   : > { %v352_v26 = vld [vmem:[%s1206_s11 + $0x1a0] sm:$0xff]  ;;  %349 = vst [vmem:[%s1211_s12 + $0xc0] sm:$0xff] %v348_v24  ;;  %351 = vst [vmem:[%s1211_s12 + $0xc8] sm:$0xff] %v350_v25  ;;  %v354_v27 = vld [vmem:[%s1206_s11 + $0x1b0] sm:$0xff] }
  0x24   : > { %353 = vst [vmem:[%s1211_s12 + $0xd0] sm:$0xff] %v352_v26  ;;  %v356_v28 = vld [vmem:[%s1206_s11 + $0x1c0] sm:$0xff]  ;;  %v358_v29 = vld [vmem:[%s1206_s11 + $0x1d0] sm:$0xff]  ;;  %355 = vst [vmem:[%s1211_s12 + $0xd8] sm:$0xff] %v354_v27 }
  0x25   : > { %357 = vst [vmem:[%s1211_s12 + $0xe0] sm:$0xff] %v356_v28  ;;  %359 = vst [vmem:[%s1211_s12 + $0xe8] sm:$0xff] %v358_v29  ;;  %v360_v30 = vld [vmem:[%s1206_s11 + $0x1e0] sm:$0xff]  ;;  %v362_v31 = vld [vmem:[%s1206_s11 + $0x1f0] sm:$0xff] }
  0x26   : > { %361 = vst [vmem:[%s1211_s12 + $0xf0] sm:$0xff] %v360_v30  ;;  %363 = vst [vmem:[%s1211_s12 + $0xf8] sm:$0xff] %v362_v31 }
  0x27 PF: > { %p908_p7 = scmp.ge.s32.totalorder %s1118_s21, 1  ;;  %p384_p8 = scmp.lt.s32.totalorder %s1118_s21, 19 }
  0x29   : > { %p385_p9 = pnand %p908_p7, %p384_p8 }
  0x2a   : > { %s391_s13 = sand.u32 (!%p385_p9), 1, %s1094_s15   ;;  %s910_s14 = sshll.u32 (!%p385_p9), %s1102_s17, 1 }
  0x2b   : > { %388 = sbr.rel (%p385_p9) target bundleno = 339 (0x153), region = 70  ;;  %s909_s24 = sshll.u32 (!%p385_p9), %s391_s13, 8 }
  0x2c   : > { %p440_p10 = scmp.lt.s32.totalorder (!%p385_p9), %s910_s14, 17  ;;  %s912_s25 = sshll.u32 (!%p385_p9), %s1106_s18, 1 }
  0x2d   : > { %p450_p11 = scmp.lt.s32.totalorder (!%p385_p9), %s912_s25, 3  ;;  %s1300_s13 = scalar_lea.vmem (!%p385_p9), [#allocation3], %s909_s24 }
  0x2e   : > { %p916_p12 = scmp.ne.s32.totalorder (!%p385_p9), %s1102_s17, 0 }
  0x30   : > { %s1387_s14 = smov (!%p440_p10, %s910_s14), 17  ;;  %s1389_s25 = smov (!%p450_p11, %s912_s25), 3 }
  0x31   : > { %s911_s26 = sshll.u32 %s1387_s14, 2  ;;  %s452_s15 = scalar_lea.vmem %s1371_s2, %s1389_s25 }
  0x32   : > { %s1282_s30 = scalar_lea.vmem %s1369_s0, %s911_s26  ;;  %s457_s18 = scalar_lea.vmem %s1372_s3, %s1389_s25 }
  0x33   : > { %s915_s9 = sshll.u32 %s1389_s25, 2  ;;  %472 = sbr.rel (%p916_p12) target bundleno = 58 (0x3a), region = 78 }
  0x34   : > { %s1298_s12 = scalar_lea.vmem %s1373_s4, %s915_s9 }
  0x38   : > { %v1120_v32 = vmov 0.0  }
  0x39   : > { %473 = vst [vmem:[#allocation2] sm:$0xff] %v1120_v32  ;;  %474 = vst [vmem:[#allocation2 + $0x8] sm:$0xff] %v1120_v32 }
  0x3a PF: > { %v1014_v33 = vld [vmem:[%s1300_s13 + $0x74] ss:$8 sps:$4 sm:$0xff]   ;;  %v1016_v34 = vld [vmem:[%s1300_s13 + $0x70] ss:$8 sps:$4 sm:$0xff]   ;;  %v1017_v35 = vld [vmem:[%s1300_s13 + $0x64] ss:$8 sps:$4 sm:$0xff]  }
  0x3b   : > { %677 = vmatprep.subr.bf16.mxu0 %v1014_v33  ;;  %v1019_v36 = vld [vmem:[%s1300_s13 + $0x60] ss:$8 sps:$4 sm:$0xff]   ;;  %v1020_v37 = vld [vmem:[%s1300_s13 + $0x54] ss:$8 sps:$4 sm:$0xff]   ;;  %v1022_v38 = vld [vmem:[%s1300_s13 + $0x50] ss:$8 sps:$4 sm:$0xff]  }
  0x3c   : > { %678 = vmatpush1.bf16.msra.mxu0 %v1016_v34  ;;  %v1023_v39 = vld [vmem:[%s1300_s13 + $0x44] ss:$8 sps:$4 sm:$0xff]   ;;  %v1025_v40 = vld [vmem:[%s1300_s13 + $0x40] ss:$8 sps:$4 sm:$0xff]   ;;  %v1026_v41 = vld [vmem:[%s1300_s13 + $0x34] ss:$8 sps:$4 sm:$0xff]  }
  0x3d   : > { %679 = vmatprep.subr.bf16.mxu0 %v1017_v35  ;;  %v1028_v42 = vld [vmem:[%s1300_s13 + $0x30] ss:$8 sps:$4 sm:$0xff]   ;;  %v1029_v43 = vld [vmem:[%s1300_s13 + $0x24] ss:$8 sps:$4 sm:$0xff]   ;;  %v1031_v44 = vld [vmem:[%s1300_s13 + $0x20] ss:$8 sps:$4 sm:$0xff]  }
  0x3e   : > { %v1032_v45 = vld [vmem:[%s1300_s13 + $0x14] ss:$8 sps:$4 sm:$0xff]   ;;  %v1034_v48 = vld [vmem:[%s1300_s13 + $0x10] ss:$8 sps:$4 sm:$0xff]   ;;  %v1035_v49 = vld [vmem:[%s1300_s13 + $0x4] ss:$8 sps:$4 sm:$0xff]  }
  0x3f   : > { %v477_v46 = vld [vmem:[%s1282_s30] sm:$0xff]  ;;  %v1037_v50 = vld [vmem:[%s1300_s13] ss:$8 sps:$4 sm:$0xff]   ;;  %v1041_v53 = vld [vmem:[%s1300_s13 + $0xe4] ss:$8 sps:$4 sm:$0xff]   ;;  %p951_p13 = scmp.ne.s32.totalorder %s1102_s17, 8 }
  0x40   : > { %680 = vmatpush1.bf16.msra.mxu0 %v1019_v36  ;;  %v918_v47 = vcombine.high %v477_v46, %v477_v46  ;;  %v1038_v51 = vld [vmem:[%s1300_s13 + $0xf4] ss:$8 sps:$4 sm:$0xff]   ;;  %v1040_v52 = vld [vmem:[%s1300_s13 + $0xf0] ss:$8 sps:$4 sm:$0xff]   ;;  %v1043_v54 = vld [vmem:[%s1300_s13 + $0xe0] ss:$8 sps:$4 sm:$0xff]   ;;  %v917_v3 = vcombine.low %v477_v46, %v477_v46 }
  0x41   : > { %681 = vmatprep.subr.bf16.mxu0 %v1020_v37  ;;  %v1044_v55 = vld [vmem:[%s1300_s13 + $0xd4] ss:$8 sps:$4 sm:$0xff]   ;;  %v1046_v56 = vld [vmem:[%s1300_s13 + $0xd0] ss:$8 sps:$4 sm:$0xff]   ;;  %v1047_v57 = vld [vmem:[%s1300_s13 + $0xc4] ss:$8 sps:$4 sm:$0xff]  }
  0x42   : > { %709 = vmatprep.mubr.bf16.mxu0 %v918_v47  ;;  %v1049_v58 = vld [vmem:[%s1300_s13 + $0xc0] ss:$8 sps:$4 sm:$0xff]   ;;  %v1050_v59 = vld [vmem:[%s1300_s13 + $0xb4] ss:$8 sps:$4 sm:$0xff]   ;;  %v1052_v60 = vld [vmem:[%s1300_s13 + $0xb0] ss:$8 sps:$4 sm:$0xff]  }
  0x43   : > { %v1053_v61 = vld [vmem:[%s1300_s13 + $0xa4] ss:$8 sps:$4 sm:$0xff]   ;;  %v1055_v62 = vld [vmem:[%s1300_s13 + $0xa0] ss:$8 sps:$4 sm:$0xff]   ;;  %v1056_v63 = vld [vmem:[%s1300_s13 + $0x94] ss:$8 sps:$4 sm:$0xff]  }
  0x44   : > { %682 = vmatpush1.bf16.msra.mxu0 %v1022_v38  ;;  %v1058_v0 = vld [vmem:[%s1300_s13 + $0x90] ss:$8 sps:$4 sm:$0xff]   ;;  %v1059_v1 = vld [vmem:[%s1300_s13 + $0x84] ss:$8 sps:$4 sm:$0xff]   ;;  %v1061_v2 = vld [vmem:[%s1300_s13 + $0x80] ss:$8 sps:$4 sm:$0xff]  }
  0x45   : > { %683 = vmatprep.subr.bf16.mxu0 %v1023_v39  ;;  %v475_v4 = vld [vmem:[#allocation2] sm:$0xff]  ;;  %v476_v6 = vld [vmem:[#allocation2 + $0x8] sm:$0xff] }
  0x48   : > { %684 = vmatpush1.bf16.msra.mxu0 %v1025_v40 }
  0x49   : > { %685 = vmatprep.subr.bf16.mxu0 %v1026_v41 }
  0x4c   : > { %686 = vmatpush1.bf16.msra.mxu0 %v1028_v42 }
  0x4d   : > { %687 = vmatprep.subr.bf16.mxu0 %v1029_v43 }
  0x50   : > { %688 = vmatpush1.bf16.msra.mxu0 %v1031_v44 }
  0x51   : > { %689 = vmatprep.subr.bf16.mxu0 %v1032_v45 }
  0x54   : > { %690 = vmatpush1.bf16.msra.mxu0 %v1034_v48 }
  0x55   : > { %691 = vmatprep.subr.bf16.mxu0 %v1035_v49 }
  0x58   : > { %692 = vmatpush1.bf16.msra.mxu0 %v1037_v50 }
  0x59   : > { %693 = vmatprep.subr.bf16.mxu0 %v1038_v51 }
  0x5c   : > { %694 = vmatpush2.bf16.msra.mxu0 %v1040_v52 }
  0x5d   : > { %695 = vmatprep.subr.bf16.mxu0 %v1041_v53 }
  0x60   : > { %696 = vmatpush2.bf16.msra.mxu0 %v1043_v54 }
  0x61   : > { %697 = vmatprep.subr.bf16.mxu0 %v1044_v55 }
  0x64   : > { %698 = vmatpush2.bf16.msra.mxu0 %v1046_v56 }
  0x65   : > { %699 = vmatprep.subr.bf16.mxu0 %v1047_v57 }
  0x68   : > { %700 = vmatpush2.bf16.msra.mxu0 %v1049_v58 }
  0x69   : > { %701 = vmatprep.subr.bf16.mxu0 %v1050_v59 }
  0x6c   : > { %702 = vmatpush2.bf16.msra.mxu0 %v1052_v60 }
  0x6d   : > { %703 = vmatprep.subr.bf16.mxu0 %v1053_v61 }
  0x70   : > { %704 = vmatpush2.bf16.msra.mxu0 %v1055_v62 }
  0x71   : > { %705 = vmatprep.subr.bf16.mxu0 %v1056_v63 }
  0x74   : > { %706 = vmatpush2.bf16.msra.mxu0 %v1058_v0 }
  0x75   : > { %707 = vmatprep.subr.bf16.mxu0 %v1059_v1 }
  0x78   : > { %708 = vmatpush2.bf16.msra.mxu0 %v1061_v2 }
  0x7b   : > { %710 = vmatmul.mubr.bf16.vlgmr.msra.gmra.mxu0 %v917_v3 }
 0x13b   : > { %v711_v5 = vpop.f32.mrf.mxu0 }
 0x13c   : > { %v718_v7 = vadd.f32 %v711_v5, %v475_v4 }
 0x13d   : > { %v713_v8 = vpop.f32.mrf.mxu0  ;;  %725 = sbr.rel (%p951_p13) target bundleno = 339 (0x153), region = 82 }
 0x13e   : > { %720 = vst [vmem:[#allocation2] sm:$0xff] %v718_v7  ;;  %v719_v9 = vadd.f32 %v713_v8, %v476_v6 }
 0x13f   : > { %v715_v10 = vpop.f32.mrf.mxu0 }
 0x140   : > { %721 = vst [vmem:[#allocation2 + $0x8] sm:$0xff] %v719_v9 }
 0x141   : > { %v716_v11 = vpop.f32.mrf.mxu0 }
 0x142   : > { %v730_v12 = vlaneseq  ;;  %v728_v14 = vld [vmem:[%s452_s15] sm:$0x3] }
 0x143   : > { %v742_v15 = vld [vmem:[%s457_s18] sm:$0x3] }
 0x144   : > { %v731_v13 = vshrl.u32 %v730_v12, 7 }
 0x145   : > { %v726_v18 = vld [vmem:[#allocation2] sm:$0xff] }
 0x146   : > { %v732_v16 = vsub.s32 0, %v731_v13  ;;  %v736_v17 = vsub.s32 1, %v731_v13 }
 0x147   : > { %v727_v19 = vld [vmem:[#allocation2 + $0x8] sm:$0xff] }
 0x148   : > { %v733_v20 = vrot.slane %v728_v14, %v732_v16  ;;  %v737_v21 = vrot.slane %v728_v14, %v736_v17  ;;  %v747_v22 = vrot.slane %v742_v15, %v732_v16  ;;  %v751_v23 = vrot.slane %v742_v15, %v736_v17 }
 0x14a   : > { %v740_v24 = vmul.f32 %v733_v20, %v726_v18  ;;  %v741_v25 = vmul.f32 %v737_v21, %v727_v19 }
 0x14c   : > { %v754_v26 = vadd.f32 %v747_v22, %v740_v24  ;;  %v755_v27 = vadd.f32 %v751_v23, %v741_v25 }
 0x14e   : > { %v756_v28 = vmax.f32 %v754_v26, 0.0  ;;  %v757_v29 = vmax.f32 %v755_v27, 0.0 }
 0x150   : > { %v956_v30 = vpack.c.bf16 %v757_v29, %v756_v28 }
 0x152   : > { %766 = vst [vmem:[%s1298_s12] sm:$0xff] %v956_v30 }
 0x153 PF: > { %s14_s21 = sadd.s32 1, %s1118_s21   ;;  %s1374_s15 = smov %s1098_s16 }
 0x154   : > { %p11_p0 = scmp.ge.s32.totalorder %s14_s21, 20   ;;  %s1375_s16 = smov %s1197_s28 }
 0x155   : > { %s1376_s17 = smov %s1110_s19  ;;  %s1377_s18 = smov %s1114_s20 }
 0x156   : > { %s1378_s19 = smov %s1381_s22  ;;  %s1379_s20 = smov %s1385_s23 }
 0x157   :  { %13 = sbr.rel (!%p11_p0) target bundleno = 4 (0x4), region = 126 }

// kernel: rfunet_forward.50
= control target key start
LH: loop header
LB: loop body
LE: loop exit
PB: predicated region body
PF: predicated region fallthrough
CT: control target
= control target key end

     0   :  { %s1104_s15 = smov 0   ;;  %s1106_s16 = smov 0   ;;  %s1286_s0 = inlined_call_operand.vmem [shape: bf16[8,256], index: 0, kind: input, shape index: {}]   ;;  %s1287_s1 = inlined_call_operand.vmem [shape: bf16[256,512], index: 1, kind: input, shape index: {}]   ;;  %s1288_s2 = inlined_call_operand.vmem [shape: f32[1,512], index: 2, kind: input, shape index: {}]   ;;  %s1289_s3 = inlined_call_operand.vmem [shape: f32[1,512], index: 3, kind: input, shape index: {}]   ;;  %s1290_s4 = inlined_call_operand.vmem [shape: bf16[8,512], index: 4, kind: output, shape index: {}]  }
   0x1   :  { %s1108_s17 = smov 0   ;;  %s1110_s18 = smov 0  }
   0x2   :  { %s1112_s19 = smov 0  }
   0x3 LB: > { %s29_s20 = sadd.s32 1, %s1073_s18  ;;  %p77_p1 = scmp.ne.s32.totalorder %s1065_s16, %s1061_s15  ;;  %s1077_s19 = sphi %s1112_s19, %s14_s19   ;;  %s1073_s18 = sphi %s1110_s18, %s1294_s18   ;;  %s1069_s17 = sphi %s1108_s17, %s1293_s17   ;;  %s1065_s16 = sphi %s1106_s16, %s1292_s16   ;;  %s1061_s15 = sphi %s1104_s15, %s1291_s15  }
   0x4   : > { %p31_p0 = scmp.ge.s32.totalorder %s29_s20, 2  ;;  %p78_p2 = scmp.eq.s32.totalorder %s1077_s19, 0 }
   0x5   : > { %s70_s22 = sadd.s32 1, %s1065_s16  ;;  %p900_p5 = scmp.ge.s32.totalorder %s1077_s19, 2 }
   0x6   : > { %s1296_s20 = smov (%p31_p0, %s29_s20), 0  ;;  %p79_p3 = por %p78_p2, %p77_p1 }
   0x7   : > { %s66_s21 = ssub.s32 %s1073_s18, %s1296_s20  ;;  %196 = sbr.rel (%p900_p5) target bundleno = 32 (0x20), region = 20 }
   0x8   : > { %p68_p4 = scmp.eq.s32.totalorder %s66_s21, 0 }
   0xa   : > { %s1139_s23 = scalar_select %p68_p4, %s1065_s16, %s70_s22  }
   0xc   : > { %199 = sbr.rel (!%p79_p3) target bundleno = 32 (0x20), region = 24  ;;  %s201_s24 = sand.u32 (%p79_p3), 1, %s1065_s16  }
   0xd   : > { %s947_s25 = sshll.u32 (%p79_p3), %s1073_s18, 3  ;;  %s901_s26 = sshll.u32 (%p79_p3), %s201_s24, 8 }
   0xe   : > { %s1147_s29 = scalar_lea.vmem (%p79_p3), %s1287_s1, %s947_s25  ;;  %s1152_s30 = scalar_lea.vmem (%p79_p3), [#allocation3], %s901_s26 }
   0xf   : > { %v300_v0 = vld [vmem:[%s1147_s29] sm:$0xff] (%p79_p3)  ;;  %v302_v1 = vld [vmem:[%s1147_s29 + $0x10] sm:$0xff] (%p79_p3) }
  0x10   : > { %v304_v2 = vld [vmem:[%s1147_s29 + $0x20] sm:$0xff] (%p79_p3)  ;;  %301 = vst [vmem:[%s1152_s30] sm:$0xff] (%p79_p3), %v300_v0  ;;  %303 = vst [vmem:[%s1152_s30 + $0x8] sm:$0xff] (%p79_p3), %v302_v1  ;;  %v306_v3 = vld [vmem:[%s1147_s29 + $0x30] sm:$0xff] (%p79_p3) }
  0x11   : > { %305 = vst [vmem:[%s1152_s30 + $0x10] sm:$0xff] %v304_v2  ;;  %v308_v4 = vld [vmem:[%s1147_s29 + $0x40] sm:$0xff]  ;;  %v310_v5 = vld [vmem:[%s1147_s29 + $0x50] sm:$0xff]  ;;  %307 = vst [vmem:[%s1152_s30 + $0x18] sm:$0xff] %v306_v3 }
  0x12   : > { %309 = vst [vmem:[%s1152_s30 + $0x20] sm:$0xff] %v308_v4  ;;  %311 = vst [vmem:[%s1152_s30 + $0x28] sm:$0xff] %v310_v5  ;;  %v312_v6 = vld [vmem:[%s1147_s29 + $0x60] sm:$0xff]  ;;  %v314_v7 = vld [vmem:[%s1147_s29 + $0x70] sm:$0xff] }
  0x13   : > { %v316_v8 = vld [vmem:[%s1147_s29 + $0x80] sm:$0xff]  ;;  %313 = vst [vmem:[%s1152_s30 + $0x30] sm:$0xff] %v312_v6  ;;  %315 = vst [vmem:[%s1152_s30 + $0x38] sm:$0xff] %v314_v7  ;;  %v318_v9 = vld [vmem:[%s1147_s29 + $0x90] sm:$0xff] }
  0x14   : > { %317 = vst [vmem:[%s1152_s30 + $0x40] sm:$0xff] %v316_v8  ;;  %v320_v10 = vld [vmem:[%s1147_s29 + $0xa0] sm:$0xff]  ;;  %v322_v11 = vld [vmem:[%s1147_s29 + $0xb0] sm:$0xff]  ;;  %319 = vst [vmem:[%s1152_s30 + $0x48] sm:$0xff] %v318_v9 }
  0x15   : > { %321 = vst [vmem:[%s1152_s30 + $0x50] sm:$0xff] %v320_v10  ;;  %323 = vst [vmem:[%s1152_s30 + $0x58] sm:$0xff] %v322_v11  ;;  %v324_v12 = vld [vmem:[%s1147_s29 + $0xc0] sm:$0xff]  ;;  %v326_v13 = vld [vmem:[%s1147_s29 + $0xd0] sm:$0xff] }
  0x16   : > { %v328_v14 = vld [vmem:[%s1147_s29 + $0xe0] sm:$0xff]  ;;  %325 = vst [vmem:[%s1152_s30 + $0x60] sm:$0xff] %v324_v12  ;;  %327 = vst [vmem:[%s1152_s30 + $0x68] sm:$0xff] %v326_v13  ;;  %v330_v15 = vld [vmem:[%s1147_s29 + $0xf0] sm:$0xff] }
  0x17   : > { %329 = vst [vmem:[%s1152_s30 + $0x70] sm:$0xff] %v328_v14  ;;  %v332_v16 = vld [vmem:[%s1147_s29 + $0x100] sm:$0xff]  ;;  %v334_v17 = vld [vmem:[%s1147_s29 + $0x110] sm:$0xff]  ;;  %331 = vst [vmem:[%s1152_s30 + $0x78] sm:$0xff] %v330_v15 }
  0x18   : > { %333 = vst [vmem:[%s1152_s30 + $0x80] sm:$0xff] %v332_v16  ;;  %335 = vst [vmem:[%s1152_s30 + $0x88] sm:$0xff] %v334_v17  ;;  %v336_v18 = vld [vmem:[%s1147_s29 + $0x120] sm:$0xff]  ;;  %v338_v19 = vld [vmem:[%s1147_s29 + $0x130] sm:$0xff] }
  0x19   : > { %v340_v20 = vld [vmem:[%s1147_s29 + $0x140] sm:$0xff]  ;;  %337 = vst [vmem:[%s1152_s30 + $0x90] sm:$0xff] %v336_v18  ;;  %339 = vst [vmem:[%s1152_s30 + $0x98] sm:$0xff] %v338_v19  ;;  %v342_v21 = vld [vmem:[%s1147_s29 + $0x150] sm:$0xff] }
  0x1a   : > { %341 = vst [vmem:[%s1152_s30 + $0xa0] sm:$0xff] %v340_v20  ;;  %v344_v22 = vld [vmem:[%s1147_s29 + $0x160] sm:$0xff]  ;;  %v346_v23 = vld [vmem:[%s1147_s29 + $0x170] sm:$0xff]  ;;  %343 = vst [vmem:[%s1152_s30 + $0xa8] sm:$0xff] %v342_v21 }
  0x1b   : > { %345 = vst [vmem:[%s1152_s30 + $0xb0] sm:$0xff] %v344_v22  ;;  %347 = vst [vmem:[%s1152_s30 + $0xb8] sm:$0xff] %v346_v23  ;;  %v348_v24 = vld [vmem:[%s1147_s29 + $0x180] sm:$0xff]  ;;  %v350_v25 = vld [vmem:[%s1147_s29 + $0x190] sm:$0xff] }
  0x1c   : > { %v352_v26 = vld [vmem:[%s1147_s29 + $0x1a0] sm:$0xff]  ;;  %349 = vst [vmem:[%s1152_s30 + $0xc0] sm:$0xff] %v348_v24  ;;  %351 = vst [vmem:[%s1152_s30 + $0xc8] sm:$0xff] %v350_v25  ;;  %v354_v27 = vld [vmem:[%s1147_s29 + $0x1b0] sm:$0xff] }
  0x1d   : > { %353 = vst [vmem:[%s1152_s30 + $0xd0] sm:$0xff] %v352_v26  ;;  %v356_v28 = vld [vmem:[%s1147_s29 + $0x1c0] sm:$0xff]  ;;  %v358_v29 = vld [vmem:[%s1147_s29 + $0x1d0] sm:$0xff]  ;;  %355 = vst [vmem:[%s1152_s30 + $0xd8] sm:$0xff] %v354_v27 }
  0x1e   : > { %357 = vst [vmem:[%s1152_s30 + $0xe0] sm:$0xff] %v356_v28  ;;  %359 = vst [vmem:[%s1152_s30 + $0xe8] sm:$0xff] %v358_v29  ;;  %v360_v30 = vld [vmem:[%s1147_s29 + $0x1e0] sm:$0xff]  ;;  %v362_v31 = vld [vmem:[%s1147_s29 + $0x1f0] sm:$0xff] }
  0x1f   : > { %361 = vst [vmem:[%s1152_s30 + $0xf0] sm:$0xff] %v360_v30  ;;  %363 = vst [vmem:[%s1152_s30 + $0xf8] sm:$0xff] %v362_v31 }
  0x20 PF: > { %p904_p6 = scmp.ge.s32.totalorder %s1077_s19, 1  ;;  %p384_p7 = scmp.lt.s32.totalorder %s1077_s19, 3 }
  0x22   : > { %p385_p8 = pnand %p904_p6, %p384_p7 }
  0x23   : > { %s391_s5 = sand.u32 (!%p385_p8), 1, %s1061_s15   ;;  %s906_s10 = sshll.u32 (!%p385_p8), %s1069_s17, 1 }
  0x24   : > { %388 = sbr.rel (%p385_p8) target bundleno = 308 (0x134), region = 70  ;;  %s905_s8 = sshll.u32 (!%p385_p8), %s391_s5, 8 }
  0x25   : > { %s1225_s9 = scalar_lea.vmem (!%p385_p8), [#allocation3], %s905_s8  ;;  %p450_p9 = scmp.lt.s32.totalorder (!%p385_p8), %s906_s10, 3 }
  0x29   : > { %v1221_v32 = vld [vmem:[%s1286_s0] sm:$0xff]  ;;  %v989_v34 = vld [vmem:[%s1225_s9 + $0x74] ss:$8 sps:$4 sm:$0xff]   ;;  %v991_v35 = vld [vmem:[%s1225_s9 + $0x70] ss:$8 sps:$4 sm:$0xff]   ;;  %v729_v3 = vlaneseq  ;;  %s1298_s10 = smov (!%p450_p9, %s906_s10), 3 }
  0x2a   : > { %v911_v33 = vcombine.high %v1221_v32, %v1221_v32  ;;  %677 = vmatprep.subr.bf16.mxu0 %v989_v34  ;;  %v992_v36 = vld [vmem:[%s1225_s9 + $0x64] ss:$8 sps:$4 sm:$0xff]   ;;  %v994_v37 = vld [vmem:[%s1225_s9 + $0x60] ss:$8 sps:$4 sm:$0xff]   ;;  %v995_v38 = vld [vmem:[%s1225_s9 + $0x54] ss:$8 sps:$4 sm:$0xff]   ;;  %v910_v2 = vcombine.low %v1221_v32, %v1221_v32  ;;  %s452_s13 = scalar_lea.vmem %s1288_s2, %s1298_s10  ;;  %s457_s21 = scalar_lea.vmem %s1289_s3, %s1298_s10 }
  0x2b   : > { %678 = vmatpush1.bf16.msra.mxu0 %v991_v35  ;;  %v997_v39 = vld [vmem:[%s1225_s9 + $0x50] ss:$8 sps:$4 sm:$0xff]   ;;  %v998_v40 = vld [vmem:[%s1225_s9 + $0x44] ss:$8 sps:$4 sm:$0xff]   ;;  %v1000_v41 = vld [vmem:[%s1225_s9 + $0x40] ss:$8 sps:$4 sm:$0xff]  }
  0x2c   : > { %709 = vmatprep.mubr.bf16.mxu0 %v911_v33  ;;  %679 = vmatprep.subr.bf16.mxu0 %v992_v36  ;;  %v1001_v42 = vld [vmem:[%s1225_s9 + $0x34] ss:$8 sps:$4 sm:$0xff]   ;;  %v1003_v43 = vld [vmem:[%s1225_s9 + $0x30] ss:$8 sps:$4 sm:$0xff]   ;;  %v1004_v44 = vld [vmem:[%s1225_s9 + $0x24] ss:$8 sps:$4 sm:$0xff]  }
  0x2d   : > { %v1006_v45 = vld [vmem:[%s1225_s9 + $0x20] ss:$8 sps:$4 sm:$0xff]   ;;  %v1007_v46 = vld [vmem:[%s1225_s9 + $0x14] ss:$8 sps:$4 sm:$0xff]   ;;  %v1009_v47 = vld [vmem:[%s1225_s9 + $0x10] ss:$8 sps:$4 sm:$0xff]  }
  0x2e   : > { %v1010_v48 = vld [vmem:[%s1225_s9 + $0x4] ss:$8 sps:$4 sm:$0xff]   ;;  %v1012_v49 = vld [vmem:[%s1225_s9] ss:$8 sps:$4 sm:$0xff]   ;;  %v1013_v50 = vld [vmem:[%s1225_s9 + $0xf4] ss:$8 sps:$4 sm:$0xff]  }
  0x2f   : > { %680 = vmatpush1.bf16.msra.mxu0 %v994_v37  ;;  %v1015_v51 = vld [vmem:[%s1225_s9 + $0xf0] ss:$8 sps:$4 sm:$0xff]   ;;  %v1016_v52 = vld [vmem:[%s1225_s9 + $0xe4] ss:$8 sps:$4 sm:$0xff]   ;;  %v1018_v53 = vld [vmem:[%s1225_s9 + $0xe0] ss:$8 sps:$4 sm:$0xff]  }
  0x30   : > { %681 = vmatprep.subr.bf16.mxu0 %v995_v38  ;;  %v1019_v54 = vld [vmem:[%s1225_s9 + $0xd4] ss:$8 sps:$4 sm:$0xff]   ;;  %v1021_v55 = vld [vmem:[%s1225_s9 + $0xd0] ss:$8 sps:$4 sm:$0xff]   ;;  %v1022_v56 = vld [vmem:[%s1225_s9 + $0xc4] ss:$8 sps:$4 sm:$0xff]  }
  0x31   : > { %v1024_v57 = vld [vmem:[%s1225_s9 + $0xc0] ss:$8 sps:$4 sm:$0xff]   ;;  %v1025_v58 = vld [vmem:[%s1225_s9 + $0xb4] ss:$8 sps:$4 sm:$0xff]   ;;  %v1027_v59 = vld [vmem:[%s1225_s9 + $0xb0] ss:$8 sps:$4 sm:$0xff]  }
  0x32   : > { %v1028_v60 = vld [vmem:[%s1225_s9 + $0xa4] ss:$8 sps:$4 sm:$0xff]   ;;  %v1030_v61 = vld [vmem:[%s1225_s9 + $0xa0] ss:$8 sps:$4 sm:$0xff]   ;;  %v1031_v62 = vld [vmem:[%s1225_s9 + $0x94] ss:$8 sps:$4 sm:$0xff]  }
  0x33   : > { %682 = vmatpush1.bf16.msra.mxu0 %v997_v39  ;;  %v1033_v63 = vld [vmem:[%s1225_s9 + $0x90] ss:$8 sps:$4 sm:$0xff]   ;;  %v1034_v0 = vld [vmem:[%s1225_s9 + $0x84] ss:$8 sps:$4 sm:$0xff]   ;;  %v1036_v1 = vld [vmem:[%s1225_s9 + $0x80] ss:$8 sps:$4 sm:$0xff]  }
  0x34   : > { %683 = vmatprep.subr.bf16.mxu0 %v998_v40  ;;  %v730_v4 = vshrl.u32 %v729_v3, 7  ;;  %v727_v6 = vld [vmem:[%s452_s13] sm:$0x3]  ;;  %s909_s17 = sshll.u32 %s1298_s10, 2 }
  0x35   : > { %v741_v9 = vld [vmem:[%s457_s21] sm:$0x3]  ;;  %s467_s25 = scalar_lea.vmem %s1290_s4, %s909_s17 }
  0x36   : > { %v731_v5 = vsub.s32 0, %v730_v4  ;;  %v735_v7 = vsub.s32 1, %v730_v4 }
  0x37   : > { %684 = vmatpush1.bf16.msra.mxu0 %v1000_v41 }
  0x38   : > { %685 = vmatprep.subr.bf16.mxu0 %v1001_v42  ;;  %v732_v8 = vrot.slane %v727_v6, %v731_v5  ;;  %v736_v10 = vrot.slane %v727_v6, %v735_v7  ;;  %v746_v13 = vrot.slane %v741_v9, %v731_v5  ;;  %v750_v14 = vrot.slane %v741_v9, %v735_v7 }
  0x3b   : > { %686 = vmatpush1.bf16.msra.mxu0 %v1003_v43 }
  0x3c   : > { %687 = vmatprep.subr.bf16.mxu0 %v1004_v44 }
  0x3f   : > { %688 = vmatpush1.bf16.msra.mxu0 %v1006_v45 }
  0x40   : > { %689 = vmatprep.subr.bf16.mxu0 %v1007_v46 }
  0x43   : > { %690 = vmatpush1.bf16.msra.mxu0 %v1009_v47 }
  0x44   : > { %691 = vmatprep.subr.bf16.mxu0 %v1010_v48 }
  0x47   : > { %692 = vmatpush1.bf16.msra.mxu0 %v1012_v49 }
  0x48   : > { %693 = vmatprep.subr.bf16.mxu0 %v1013_v50 }
  0x4b   : > { %694 = vmatpush2.bf16.msra.mxu0 %v1015_v51 }
  0x4c   : > { %695 = vmatprep.subr.bf16.mxu0 %v1016_v52 }
  0x4f   : > { %696 = vmatpush2.bf16.msra.mxu0 %v1018_v53 }
  0x50   : > { %697 = vmatprep.subr.bf16.mxu0 %v1019_v54 }
  0x53   : > { %698 = vmatpush2.bf16.msra.mxu0 %v1021_v55 }
  0x54   : > { %699 = vmatprep.subr.bf16.mxu0 %v1022_v56 }
  0x57   : > { %700 = vmatpush2.bf16.msra.mxu0 %v1024_v57 }
  0x58   : > { %701 = vmatprep.subr.bf16.mxu0 %v1025_v58 }
  0x5b   : > { %702 = vmatpush2.bf16.msra.mxu0 %v1027_v59 }
  0x5c   : > { %703 = vmatprep.subr.bf16.mxu0 %v1028_v60 }
  0x5f   : > { %704 = vmatpush2.bf16.msra.mxu0 %v1030_v61 }
  0x60   : > { %705 = vmatprep.subr.bf16.mxu0 %v1031_v62 }
  0x63   : > { %706 = vmatpush2.bf16.msra.mxu0 %v1033_v63 }
  0x64   : > { %707 = vmatprep.subr.bf16.mxu0 %v1034_v0 }
  0x67   : > { %708 = vmatpush2.bf16.msra.mxu0 %v1036_v1 }
  0x6a   : > { %710 = vmatmul.mubr.bf16.vlgmr.msra.gmra.mxu0 %v910_v2 }
 0x12a   : > { %v711_v11 = vpop.f32.mrf.mxu0 }
 0x12b   : > { %v739_v12 = vmul.f32 %v732_v8, %v711_v11 }
 0x12c   : > { %v713_v15 = vpop.f32.mrf.mxu0 }
 0x12d   : > { %v740_v16 = vmul.f32 %v736_v10, %v713_v15  ;;  %v753_v18 = vadd.f32 %v746_v13, %v739_v12 }
 0x12e   : > { %v715_v17 = vpop.f32.mrf.mxu0 }
 0x12f   : > { %v754_v19 = vadd.f32 %v750_v14, %v740_v16 }
 0x130   : > { %v716_v20 = vpop.f32.mrf.mxu0 }
 0x131   : > { %v948_v21 = vpack.c.bf16 %v754_v19, %v753_v18 }
 0x133   : > { %763 = vst [vmem:[%s467_s25] sm:$0xff] %v948_v21 }
 0x134 PF: > { %s14_s19 = sadd.s32 1, %s1077_s19   ;;  %s1291_s15 = smov %s1065_s16 }
 0x135   : > { %p11_p10 = scmp.ge.s32.totalorder %s14_s19, 4   ;;  %s1292_s16 = smov %s1139_s23 }
 0x136   : > { %s1293_s17 = smov %s1073_s18  ;;  %s1294_s18 = smov %s1296_s20 }
 0x137   :  { %13 = sbr.rel (!%p11_p10) target bundleno = 3 (0x3), region = 126 }

// kernel: rfunet_forward.53
= control target key start
LH: loop header
LB: loop body
LE: loop exit
PB: predicated region body
PF: predicated region fallthrough
CT: control target
= control target key end

     0   :  { %s1599_s15 = smov 0   ;;  %s1601_s16 = smov 0   ;;  %s1919_s0 = inlined_call_operand.vmem [shape: bf16[8,4608], index: 0, kind: input, shape index: {}]   ;;  %s1920_s1 = inlined_call_operand.vmem [shape: bf16[4608,512], index: 1, kind: input, shape index: {}]   ;;  %s1921_s2 = inlined_call_operand.vmem [shape: f32[1,512], index: 2, kind: input, shape index: {}]   ;;  %s1922_s3 = inlined_call_operand.vmem [shape: f32[1,512], index: 3, kind: input, shape index: {}]   ;;  %s1923_s4 = inlined_call_operand.vmem [shape: bf16[8,512], index: 4, kind: output, shape index: {}]  }
   0x1   :  { %s1603_s17 = smov 0   ;;  %s1605_s18 = smov 0  }
   0x2   :  { %s1607_s19 = smov 0   ;;  %s1609_s20 = smov 0  }
   0x3   :  { %s1611_s21 = smov 0  }
   0x4 LB: > { %s26_s22 = sadd.s32 1, %s1563_s19  ;;  %s29_s23 = sadd.s32 1, %s1567_s20  ;;  %s1571_s21 = sphi %s1611_s21, %s14_s21   ;;  %s1567_s20 = sphi %s1609_s20, %s1929_s20   ;;  %s1563_s19 = sphi %s1607_s19, %s1928_s19   ;;  %s1559_s18 = sphi %s1605_s18, %s1927_s18   ;;  %s1555_s17 = sphi %s1603_s17, %s1926_s17   ;;  %s1551_s16 = sphi %s1601_s16, %s1925_s16   ;;  %s1547_s15 = sphi %s1599_s15, %s1924_s15  }
   0x5   : > { %p27_p0 = scmp.ge.s32.totalorder %s26_s22, 9  ;;  %p77_p1 = scmp.ne.s32.totalorder %s1551_s16, %s1547_s15 }
   0x6   : > { %p78_p2 = scmp.eq.s32.totalorder %s1571_s21, 0  ;;  %s70_s27 = sadd.s32 1, %s1551_s16 }
   0x7   : > { %s1931_s22 = smov (%p27_p0, %s26_s22), 0  ;;  %s1933_s23 = smov (!%p27_p0, %s29_s23), %s1567_s20 }
   0x8   : > { %p79_p3 = por %p78_p2, %p77_p1  ;;  %p31_p4 = scmp.ge.s32.totalorder %s1933_s23, 2 }
   0x9   : > { %s65_s24 = ssub.s32 %s1563_s19, %s1931_s22  ;;  %p1271_p6 = scmp.ge.s32.totalorder %s1571_s21, 18 }
   0xa   : > { %s1935_s23 = smov (%p31_p4, %s1933_s23), 0 }
   0xb   : > { %s66_s25 = ssub.s32 %s1567_s20, %s1935_s23  ;;  %183 = sbr.rel (%p1271_p6) target bundleno = 55 (0x37), region = 16 }
   0xc   : > { %s67_s26 = sor.u32 %s66_s25, %s65_s24 }
   0xd   : > { %p68_p5 = scmp.eq.s32.totalorder %s67_s26, 0 }
   0xf   : > { %s1650_s28 = scalar_select %p68_p5, %s1551_s16, %s70_s27  }
  0x10   : > { %199 = sbr.rel (!%p79_p3) target bundleno = 55 (0x37), region = 24  ;;  %s201_s29 = sand.u32 (%p79_p3), 1, %s1551_s16  }
  0x11   : > { %s1274_s30 = sshll.u32 (%p79_p3), %s1567_s20, 1  ;;  %s1272_s5 = sshll.u32 (%p79_p3), %s201_s29, 9 }
  0x12   : > { %s1358_s6 = sshll.u32 (%p79_p3), %s1563_s19, 8  ;;  %s1664_s12 = scalar_lea.vmem (%p79_p3), [#allocation3], %s1272_s5 }
  0x13   : > { %s207_s7 = sadd.s32 (%p79_p3), %s1358_s6, %s1274_s30 }
  0x14   : > { %s1276_s8 = sshll.u32 (%p79_p3), %s207_s7, 2 }
  0x15   : > { %s1659_s11 = scalar_lea.vmem %s1920_s1, %s1276_s8 }
  0x16   : > { %v364_v0 = vld [vmem:[%s1659_s11] sm:$0xff]  ;;  %v366_v1 = vld [vmem:[%s1659_s11 + $0x10] sm:$0xff] }
  0x17   : > { %v368_v2 = vld [vmem:[%s1659_s11 + $0x20] sm:$0xff]  ;;  %365 = vst [vmem:[%s1664_s12] sm:$0xff] %v364_v0  ;;  %367 = vst [vmem:[%s1664_s12 + $0x8] sm:$0xff] %v366_v1  ;;  %v370_v3 = vld [vmem:[%s1659_s11 + $0x30] sm:$0xff] }
  0x18   : > { %369 = vst [vmem:[%s1664_s12 + $0x10] sm:$0xff] %v368_v2  ;;  %v372_v4 = vld [vmem:[%s1659_s11 + $0x40] sm:$0xff]  ;;  %v374_v5 = vld [vmem:[%s1659_s11 + $0x50] sm:$0xff]  ;;  %371 = vst [vmem:[%s1664_s12 + $0x18] sm:$0xff] %v370_v3 }
  0x19   : > { %373 = vst [vmem:[%s1664_s12 + $0x20] sm:$0xff] %v372_v4  ;;  %375 = vst [vmem:[%s1664_s12 + $0x28] sm:$0xff] %v374_v5  ;;  %v376_v6 = vld [vmem:[%s1659_s11 + $0x60] sm:$0xff]  ;;  %v378_v7 = vld [vmem:[%s1659_s11 + $0x70] sm:$0xff] }
  0x1a   : > { %v380_v8 = vld [vmem:[%s1659_s11 + $0x80] sm:$0xff]  ;;  %377 = vst [vmem:[%s1664_s12 + $0x30] sm:$0xff] %v376_v6  ;;  %379 = vst [vmem:[%s1664_s12 + $0x38] sm:$0xff] %v378_v7  ;;  %v382_v9 = vld [vmem:[%s1659_s11 + $0x90] sm:$0xff] }
  0x1b   : > { %381 = vst [vmem:[%s1664_s12 + $0x40] sm:$0xff] %v380_v8  ;;  %v384_v10 = vld [vmem:[%s1659_s11 + $0xa0] sm:$0xff]  ;;  %v386_v11 = vld [vmem:[%s1659_s11 + $0xb0] sm:$0xff]  ;;  %383 = vst [vmem:[%s1664_s12 + $0x48] sm:$0xff] %v382_v9 }
  0x1c   : > { %385 = vst [vmem:[%s1664_s12 + $0x50] sm:$0xff] %v384_v10  ;;  %387 = vst [vmem:[%s1664_s12 + $0x58] sm:$0xff] %v386_v11  ;;  %v388_v12 = vld [vmem:[%s1659_s11 + $0xc0] sm:$0xff]  ;;  %v390_v13 = vld [vmem:[%s1659_s11 + $0xd0] sm:$0xff] }
  0x1d   : > { %v392_v14 = vld [vmem:[%s1659_s11 + $0xe0] sm:$0xff]  ;;  %389 = vst [vmem:[%s1664_s12 + $0x60] sm:$0xff] %v388_v12  ;;  %391 = vst [vmem:[%s1664_s12 + $0x68] sm:$0xff] %v390_v13  ;;  %v394_v15 = vld [vmem:[%s1659_s11 + $0xf0] sm:$0xff] }
  0x1e   : > { %393 = vst [vmem:[%s1664_s12 + $0x70] sm:$0xff] %v392_v14  ;;  %v396_v16 = vld [vmem:[%s1659_s11 + $0x100] sm:$0xff]  ;;  %v398_v17 = vld [vmem:[%s1659_s11 + $0x110] sm:$0xff]  ;;  %395 = vst [vmem:[%s1664_s12 + $0x78] sm:$0xff] %v394_v15 }
  0x1f   : > { %397 = vst [vmem:[%s1664_s12 + $0x80] sm:$0xff] %v396_v16  ;;  %399 = vst [vmem:[%s1664_s12 + $0x88] sm:$0xff] %v398_v17  ;;  %v400_v18 = vld [vmem:[%s1659_s11 + $0x120] sm:$0xff]  ;;  %v402_v19 = vld [vmem:[%s1659_s11 + $0x130] sm:$0xff] }
  0x20   : > { %v404_v20 = vld [vmem:[%s1659_s11 + $0x140] sm:$0xff]  ;;  %401 = vst [vmem:[%s1664_s12 + $0x90] sm:$0xff] %v400_v18  ;;  %403 = vst [vmem:[%s1664_s12 + $0x98] sm:$0xff] %v402_v19  ;;  %v406_v21 = vld [vmem:[%s1659_s11 + $0x150] sm:$0xff] }
  0x21   : > { %405 = vst [vmem:[%s1664_s12 + $0xa0] sm:$0xff] %v404_v20  ;;  %v408_v22 = vld [vmem:[%s1659_s11 + $0x160] sm:$0xff]  ;;  %v410_v23 = vld [vmem:[%s1659_s11 + $0x170] sm:$0xff]  ;;  %407 = vst [vmem:[%s1664_s12 + $0xa8] sm:$0xff] %v406_v21 }
  0x22   : > { %409 = vst [vmem:[%s1664_s12 + $0xb0] sm:$0xff] %v408_v22  ;;  %411 = vst [vmem:[%s1664_s12 + $0xb8] sm:$0xff] %v410_v23  ;;  %v412_v24 = vld [vmem:[%s1659_s11 + $0x180] sm:$0xff]  ;;  %v414_v25 = vld [vmem:[%s1659_s11 + $0x190] sm:$0xff] }
  0x23   : > { %v416_v26 = vld [vmem:[%s1659_s11 + $0x1a0] sm:$0xff]  ;;  %413 = vst [vmem:[%s1664_s12 + $0xc0] sm:$0xff] %v412_v24  ;;  %415 = vst [vmem:[%s1664_s12 + $0xc8] sm:$0xff] %v414_v25  ;;  %v418_v27 = vld [vmem:[%s1659_s11 + $0x1b0] sm:$0xff] }
  0x24   : > { %417 = vst [vmem:[%s1664_s12 + $0xd0] sm:$0xff] %v416_v26  ;;  %v420_v28 = vld [vmem:[%s1659_s11 + $0x1c0] sm:$0xff]  ;;  %v422_v29 = vld [vmem:[%s1659_s11 + $0x1d0] sm:$0xff]  ;;  %419 = vst [vmem:[%s1664_s12 + $0xd8] sm:$0xff] %v418_v27 }
  0x25   : > { %421 = vst [vmem:[%s1664_s12 + $0xe0] sm:$0xff] %v420_v28  ;;  %423 = vst [vmem:[%s1664_s12 + $0xe8] sm:$0xff] %v422_v29  ;;  %v424_v30 = vld [vmem:[%s1659_s11 + $0x1e0] sm:$0xff]  ;;  %v426_v31 = vld [vmem:[%s1659_s11 + $0x1f0] sm:$0xff] }
  0x26   : > { %v428_v32 = vld [vmem:[%s1659_s11 + $0x200] sm:$0xff]  ;;  %425 = vst [vmem:[%s1664_s12 + $0xf0] sm:$0xff] %v424_v30  ;;  %427 = vst [vmem:[%s1664_s12 + $0xf8] sm:$0xff] %v426_v31  ;;  %v430_v33 = vld [vmem:[%s1659_s11 + $0x210] sm:$0xff] }
  0x27   : > { %429 = vst [vmem:[%s1664_s12 + $0x100] sm:$0xff] %v428_v32  ;;  %v432_v34 = vld [vmem:[%s1659_s11 + $0x220] sm:$0xff]  ;;  %v434_v35 = vld [vmem:[%s1659_s11 + $0x230] sm:$0xff]  ;;  %431 = vst [vmem:[%s1664_s12 + $0x108] sm:$0xff] %v430_v33 }
  0x28   : > { %433 = vst [vmem:[%s1664_s12 + $0x110] sm:$0xff] %v432_v34  ;;  %435 = vst [vmem:[%s1664_s12 + $0x118] sm:$0xff] %v434_v35  ;;  %v436_v36 = vld [vmem:[%s1659_s11 + $0x240] sm:$0xff]  ;;  %v438_v37 = vld [vmem:[%s1659_s11 + $0x250] sm:$0xff] }
  0x29   : > { %v440_v38 = vld [vmem:[%s1659_s11 + $0x260] sm:$0xff]  ;;  %437 = vst [vmem:[%s1664_s12 + $0x120] sm:$0xff] %v436_v36  ;;  %439 = vst [vmem:[%s1664_s12 + $0x128] sm:$0xff] %v438_v37  ;;  %v442_v39 = vld [vmem:[%s1659_s11 + $0x270] sm:$0xff] }
  0x2a   : > { %441 = vst [vmem:[%s1664_s12 + $0x130] sm:$0xff] %v440_v38  ;;  %v444_v40 = vld [vmem:[%s1659_s11 + $0x280] sm:$0xff]  ;;  %v446_v41 = vld [vmem:[%s1659_s11 + $0x290] sm:$0xff]  ;;  %443 = vst [vmem:[%s1664_s12 + $0x138] sm:$0xff] %v442_v39 }
  0x2b   : > { %445 = vst [vmem:[%s1664_s12 + $0x140] sm:$0xff] %v444_v40  ;;  %447 = vst [vmem:[%s1664_s12 + $0x148] sm:$0xff] %v446_v41  ;;  %v448_v42 = vld [vmem:[%s1659_s11 + $0x2a0] sm:$0xff]  ;;  %v450_v43 = vld [vmem:[%s1659_s11 + $0x2b0] sm:$0xff] }
  0x2c   : > { %v452_v44 = vld [vmem:[%s1659_s11 + $0x2c0] sm:$0xff]  ;;  %449 = vst [vmem:[%s1664_s12 + $0x150] sm:$0xff] %v448_v42  ;;  %451 = vst [vmem:[%s1664_s12 + $0x158] sm:$0xff] %v450_v43  ;;  %v454_v45 = vld [vmem:[%s1659_s11 + $0x2d0] sm:$0xff] }
  0x2d   : > { %453 = vst [vmem:[%s1664_s12 + $0x160] sm:$0xff] %v452_v44  ;;  %v456_v46 = vld [vmem:[%s1659_s11 + $0x2e0] sm:$0xff]  ;;  %v458_v47 = vld [vmem:[%s1659_s11 + $0x2f0] sm:$0xff]  ;;  %455 = vst [vmem:[%s1664_s12 + $0x168] sm:$0xff] %v454_v45 }
  0x2e   : > { %457 = vst [vmem:[%s1664_s12 + $0x170] sm:$0xff] %v456_v46  ;;  %459 = vst [vmem:[%s1664_s12 + $0x178] sm:$0xff] %v458_v47  ;;  %v460_v48 = vld [vmem:[%s1659_s11 + $0x300] sm:$0xff]  ;;  %v462_v49 = vld [vmem:[%s1659_s11 + $0x310] sm:$0xff] }
  0x2f   : > { %v464_v50 = vld [vmem:[%s1659_s11 + $0x320] sm:$0xff]  ;;  %461 = vst [vmem:[%s1664_s12 + $0x180] sm:$0xff] %v460_v48  ;;  %463 = vst [vmem:[%s1664_s12 + $0x188] sm:$0xff] %v462_v49  ;;  %v466_v51 = vld [vmem:[%s1659_s11 + $0x330] sm:$0xff] }
  0x30   : > { %465 = vst [vmem:[%s1664_s12 + $0x190] sm:$0xff] %v464_v50  ;;  %v468_v52 = vld [vmem:[%s1659_s11 + $0x340] sm:$0xff]  ;;  %v470_v53 = vld [vmem:[%s1659_s11 + $0x350] sm:$0xff]  ;;  %467 = vst [vmem:[%s1664_s12 + $0x198] sm:$0xff] %v466_v51 }
  0x31   : > { %469 = vst [vmem:[%s1664_s12 + $0x1a0] sm:$0xff] %v468_v52  ;;  %471 = vst [vmem:[%s1664_s12 + $0x1a8] sm:$0xff] %v470_v53  ;;  %v472_v54 = vld [vmem:[%s1659_s11 + $0x360] sm:$0xff]  ;;  %v474_v55 = vld [vmem:[%s1659_s11 + $0x370] sm:$0xff] }
  0x32   : > { %v476_v56 = vld [vmem:[%s1659_s11 + $0x380] sm:$0xff]  ;;  %473 = vst [vmem:[%s1664_s12 + $0x1b0] sm:$0xff] %v472_v54  ;;  %475 = vst [vmem:[%s1664_s12 + $0x1b8] sm:$0xff] %v474_v55  ;;  %v478_v57 = vld [vmem:[%s1659_s11 + $0x390] sm:$0xff] }
  0x33   : > { %477 = vst [vmem:[%s1664_s12 + $0x1c0] sm:$0xff] %v476_v56  ;;  %v480_v58 = vld [vmem:[%s1659_s11 + $0x3a0] sm:$0xff]  ;;  %v482_v59 = vld [vmem:[%s1659_s11 + $0x3b0] sm:$0xff]  ;;  %479 = vst [vmem:[%s1664_s12 + $0x1c8] sm:$0xff] %v478_v57 }
  0x34   : > { %481 = vst [vmem:[%s1664_s12 + $0x1d0] sm:$0xff] %v480_v58  ;;  %483 = vst [vmem:[%s1664_s12 + $0x1d8] sm:$0xff] %v482_v59  ;;  %v484_v60 = vld [vmem:[%s1659_s11 + $0x3c0] sm:$0xff]  ;;  %v486_v61 = vld [vmem:[%s1659_s11 + $0x3d0] sm:$0xff] }
  0x35   : > { %v488_v62 = vld [vmem:[%s1659_s11 + $0x3e0] sm:$0xff]  ;;  %485 = vst [vmem:[%s1664_s12 + $0x1e0] sm:$0xff] %v484_v60  ;;  %487 = vst [vmem:[%s1664_s12 + $0x1e8] sm:$0xff] %v486_v61  ;;  %v490_v63 = vld [vmem:[%s1659_s11 + $0x3f0] sm:$0xff] }
  0x36   : > { %489 = vst [vmem:[%s1664_s12 + $0x1f0] sm:$0xff] %v488_v62  ;;  %491 = vst [vmem:[%s1664_s12 + $0x1f8] sm:$0xff] %v490_v63 }
  0x37 PF: > { %p1277_p7 = scmp.ge.s32.totalorder %s1571_s21, 1  ;;  %p512_p8 = scmp.lt.s32.totalorder %s1571_s21, 19 }
  0x39   : > { %p513_p9 = pnand %p1277_p7, %p512_p8 }
  0x3a   : > { %s519_s13 = sand.u32 (!%p513_p9), 1, %s1547_s15   ;;  %s1279_s14 = sshll.u32 (!%p513_p9), %s1555_s17, 2 }
  0x3b   : > { %516 = sbr.rel (%p513_p9) target bundleno = 357 (0x165), region = 70  ;;  %s1278_s24 = sshll.u32 (!%p513_p9), %s519_s13, 9 }
  0x3c   : > { %p568_p10 = scmp.lt.s32.totalorder (!%p513_p9), %s1279_s14, 35  ;;  %s1281_s25 = sshll.u32 (!%p513_p9), %s1559_s18, 1 }
  0x3d   : > { %p578_p11 = scmp.lt.s32.totalorder (!%p513_p9), %s1281_s25, 3  ;;  %s1817_s13 = scalar_lea.vmem (!%p513_p9), [#allocation3], %s1278_s24 }
  0x3e   : > { %p1285_p12 = scmp.ne.s32.totalorder (!%p513_p9), %s1555_s17, 0 }
  0x40   : > { %s1937_s14 = smov (!%p568_p10, %s1279_s14), 35  ;;  %s1939_s25 = smov (!%p578_p11, %s1281_s25), 3 }
  0x41   : > { %s1280_s26 = sshll.u32 %s1937_s14, 2  ;;  %s580_s15 = scalar_lea.vmem %s1921_s2, %s1939_s25 }
  0x42   : > { %s1799_s30 = scalar_lea.vmem %s1919_s0, %s1280_s26  ;;  %s585_s18 = scalar_lea.vmem %s1922_s3, %s1939_s25 }
  0x43   : > { %s1284_s9 = sshll.u32 %s1939_s25, 2  ;;  %600 = sbr.rel (%p1285_p12) target bundleno = 74 (0x4a), region = 78 }
  0x44   : > { %s1815_s12 = scalar_lea.vmem %s1923_s4, %s1284_s9 }
  0x48   : > { %v1573_v0 = vmov 0.0  }
  0x49   : > { %601 = vst [vmem:[#allocation2] sm:$0xff] %v1573_v0  ;;  %602 = vst [vmem:[#allocation2 + $0x8] sm:$0xff] %v1573_v0 }
  0x4a PF: > { %v1417_v1 = vld [vmem:[%s1817_s13 + $0x74] ss:$8 sps:$4 sm:$0xff]   ;;  %v1421_v3 = vld [vmem:[%s1817_s13 + $0x70] ss:$8 sps:$4 sm:$0xff]   ;;  %v1423_v5 = vld [vmem:[%s1817_s13 + $0x64] ss:$8 sps:$4 sm:$0xff]  }
  0x4b   : > { %v1419_v2 = vld [vmem:[%s1817_s13 + $0x174] ss:$8 sps:$4 sm:$0xff]   ;;  %1005 = vmatprep.subr.bf16.mxu0 %v1417_v1  ;;  %v1422_v4 = vld [vmem:[%s1817_s13 + $0x170] ss:$8 sps:$4 sm:$0xff]   ;;  %v1425_v6 = vld [vmem:[%s1817_s13 + $0x164] ss:$8 sps:$4 sm:$0xff]  }
  0x4c   : > { %1046 = vmatprep.subr.bf16.mxu1 %v1419_v2  ;;  %1006 = vmatpush1.bf16.msra.mxu0 %v1421_v3  ;;  %v1427_v7 = vld [vmem:[%s1817_s13 + $0x60] ss:$8 sps:$4 sm:$0xff]   ;;  %v1429_v9 = vld [vmem:[%s1817_s13 + $0x54] ss:$8 sps:$4 sm:$0xff]   ;;  %v1433_v11 = vld [vmem:[%s1817_s13 + $0x50] ss:$8 sps:$4 sm:$0xff]  }
  0x4d   : > { %1047 = vmatpush1.bf16.msra.mxu1 %v1422_v4  ;;  %1007 = vmatprep.subr.bf16.mxu0 %v1423_v5  ;;  %v1428_v8 = vld [vmem:[%s1817_s13 + $0x160] ss:$8 sps:$4 sm:$0xff]   ;;  %v1431_v10 = vld [vmem:[%s1817_s13 + $0x154] ss:$8 sps:$4 sm:$0xff]   ;;  %v1434_v12 = vld [vmem:[%s1817_s13 + $0x150] ss:$8 sps:$4 sm:$0xff]  }
  0x4e   : > { %1048 = vmatprep.subr.bf16.mxu1 %v1425_v6  ;;  %v1435_v13 = vld [vmem:[%s1817_s13 + $0x44] ss:$8 sps:$4 sm:$0xff]   ;;  %v1439_v15 = vld [vmem:[%s1817_s13 + $0x40] ss:$8 sps:$4 sm:$0xff]   ;;  %v1441_v17 = vld [vmem:[%s1817_s13 + $0x34] ss:$8 sps:$4 sm:$0xff]  }
  0x4f   : > { %v1437_v14 = vld [vmem:[%s1817_s13 + $0x144] ss:$8 sps:$4 sm:$0xff]   ;;  %v1440_v16 = vld [vmem:[%s1817_s13 + $0x140] ss:$8 sps:$4 sm:$0xff]   ;;  %v1443_v18 = vld [vmem:[%s1817_s13 + $0x134] ss:$8 sps:$4 sm:$0xff]  }
  0x50   : > { %1008 = vmatpush1.bf16.msra.mxu0 %v1427_v7  ;;  %v1445_v19 = vld [vmem:[%s1817_s13 + $0x30] ss:$8 sps:$4 sm:$0xff]   ;;  %v1447_v21 = vld [vmem:[%s1817_s13 + $0x24] ss:$8 sps:$4 sm:$0xff]   ;;  %v1451_v23 = vld [vmem:[%s1817_s13 + $0x20] ss:$8 sps:$4 sm:$0xff]  }
  0x51   : > { %1049 = vmatpush1.bf16.msra.mxu1 %v1428_v8  ;;  %1009 = vmatprep.subr.bf16.mxu0 %v1429_v9  ;;  %v1446_v20 = vld [vmem:[%s1817_s13 + $0x130] ss:$8 sps:$4 sm:$0xff]   ;;  %v1449_v22 = vld [vmem:[%s1817_s13 + $0x124] ss:$8 sps:$4 sm:$0xff]   ;;  %v1452_v24 = vld [vmem:[%s1817_s13 + $0x120] ss:$8 sps:$4 sm:$0xff]  }
  0x52   : > { %1050 = vmatprep.subr.bf16.mxu1 %v1431_v10  ;;  %v1453_v25 = vld [vmem:[%s1817_s13 + $0x14] ss:$8 sps:$4 sm:$0xff]   ;;  %v1457_v27 = vld [vmem:[%s1817_s13 + $0x10] ss:$8 sps:$4 sm:$0xff]   ;;  %v1459_v29 = vld [vmem:[%s1817_s13 + $0x4] ss:$8 sps:$4 sm:$0xff]  }
  0x53   : > { %v1455_v26 = vld [vmem:[%s1817_s13 + $0x114] ss:$8 sps:$4 sm:$0xff]   ;;  %v1458_v28 = vld [vmem:[%s1817_s13 + $0x110] ss:$8 sps:$4 sm:$0xff]   ;;  %v1461_v30 = vld [vmem:[%s1817_s13 + $0x104] ss:$8 sps:$4 sm:$0xff]  }
  0x54   : > { %1010 = vmatpush1.bf16.msra.mxu0 %v1433_v11  ;;  %v1463_v31 = vld [vmem:[%s1817_s13] ss:$8 sps:$4 sm:$0xff]   ;;  %v1465_v33 = vld [vmem:[%s1817_s13 + $0xf4] ss:$8 sps:$4 sm:$0xff]   ;;  %v1469_v35 = vld [vmem:[%s1817_s13 + $0xf0] ss:$8 sps:$4 sm:$0xff]  }
  0x55   : > { %1051 = vmatpush1.bf16.msra.mxu1 %v1434_v12  ;;  %1011 = vmatprep.subr.bf16.mxu0 %v1435_v13  ;;  %v1464_v32 = vld [vmem:[%s1817_s13 + $0x100] ss:$8 sps:$4 sm:$0xff]   ;;  %v1467_v34 = vld [vmem:[%s1817_s13 + $0x1f4] ss:$8 sps:$4 sm:$0xff]   ;;  %v1470_v36 = vld [vmem:[%s1817_s13 + $0x1f0] ss:$8 sps:$4 sm:$0xff]  }
  0x56   : > { %1052 = vmatprep.subr.bf16.mxu1 %v1437_v14  ;;  %v1471_v37 = vld [vmem:[%s1817_s13 + $0xe4] ss:$8 sps:$4 sm:$0xff]   ;;  %v1475_v39 = vld [vmem:[%s1817_s13 + $0xe0] ss:$8 sps:$4 sm:$0xff]   ;;  %v1477_v41 = vld [vmem:[%s1817_s13 + $0xd4] ss:$8 sps:$4 sm:$0xff]  }
  0x57   : > { %v1473_v38 = vld [vmem:[%s1817_s13 + $0x1e4] ss:$8 sps:$4 sm:$0xff]   ;;  %v1476_v40 = vld [vmem:[%s1817_s13 + $0x1e0] ss:$8 sps:$4 sm:$0xff]   ;;  %v1479_v42 = vld [vmem:[%s1817_s13 + $0x1d4] ss:$8 sps:$4 sm:$0xff]  }
  0x58   : > { %1012 = vmatpush1.bf16.msra.mxu0 %v1439_v15  ;;  %v1481_v43 = vld [vmem:[%s1817_s13 + $0xd0] ss:$8 sps:$4 sm:$0xff]   ;;  %v1483_v45 = vld [vmem:[%s1817_s13 + $0xc4] ss:$8 sps:$4 sm:$0xff]   ;;  %v1487_v50 = vld [vmem:[%s1817_s13 + $0xc0] ss:$8 sps:$4 sm:$0xff]  }
  0x59   : > { %1053 = vmatpush1.bf16.msra.mxu1 %v1440_v16  ;;  %1013 = vmatprep.subr.bf16.mxu0 %v1441_v17  ;;  %v1482_v44 = vld [vmem:[%s1817_s13 + $0x1d0] ss:$8 sps:$4 sm:$0xff]   ;;  %v1485_v46 = vld [vmem:[%s1817_s13 + $0x1c4] ss:$8 sps:$4 sm:$0xff]   ;;  %v1488_v51 = vld [vmem:[%s1817_s13 + $0x1c0] ss:$8 sps:$4 sm:$0xff]  }
  0x5a   : > { %1054 = vmatprep.subr.bf16.mxu1 %v1443_v18  ;;  %v605_v47 = vld [vmem:[%s1799_s30] sm:$0xff]  ;;  %v606_v49 = vld [vmem:[%s1799_s30 + $0x8] sm:$0xff]  ;;  %v1495_v57 = vld [vmem:[%s1817_s13 + $0xa4] ss:$8 sps:$4 sm:$0xff]   ;;  %p1354_p13 = scmp.ne.s32.totalorder %s1555_s17, 8 }
  0x5b   : > { %v1287_v48 = vcombine.high %v605_v47, %v605_v47  ;;  %v1289_v52 = vcombine.high %v606_v49, %v606_v49  ;;  %v1489_v53 = vld [vmem:[%s1817_s13 + $0xb4] ss:$8 sps:$4 sm:$0xff]   ;;  %v1493_v55 = vld [vmem:[%s1817_s13 + $0xb0] ss:$8 sps:$4 sm:$0xff]   ;;  %v1497_v58 = vld [vmem:[%s1817_s13 + $0x1a4] ss:$8 sps:$4 sm:$0xff]   ;;  %v1286_v5 = vcombine.low %v605_v47, %v605_v47  ;;  %v1288_v6 = vcombine.low %v606_v49, %v606_v49 }
  0x5c   : > { %1014 = vmatpush1.bf16.msra.mxu0 %v1445_v19  ;;  %v1491_v54 = vld [vmem:[%s1817_s13 + $0x1b4] ss:$8 sps:$4 sm:$0xff]   ;;  %v1494_v56 = vld [vmem:[%s1817_s13 + $0x1b0] ss:$8 sps:$4 sm:$0xff]   ;;  %v1499_v59 = vld [vmem:[%s1817_s13 + $0xa0] ss:$8 sps:$4 sm:$0xff]  }
  0x5d   : > { %1055 = vmatpush1.bf16.msra.mxu1 %v1446_v20  ;;  %1015 = vmatprep.subr.bf16.mxu0 %v1447_v21  ;;  %v1500_v60 = vld [vmem:[%s1817_s13 + $0x1a0] ss:$8 sps:$4 sm:$0xff]   ;;  %v1501_v61 = vld [vmem:[%s1817_s13 + $0x94] ss:$8 sps:$4 sm:$0xff]   ;;  %v1505_v63 = vld [vmem:[%s1817_s13 + $0x90] ss:$8 sps:$4 sm:$0xff]  }
  0x5e   : > { %1056 = vmatprep.subr.bf16.mxu1 %v1449_v22  ;;  %1037 = vmatprep.mubr.bf16.mxu0 %v1287_v48  ;;  %v1503_v62 = vld [vmem:[%s1817_s13 + $0x194] ss:$8 sps:$4 sm:$0xff]   ;;  %v1506_v0 = vld [vmem:[%s1817_s13 + $0x190] ss:$8 sps:$4 sm:$0xff]   ;;  %v1507_v1 = vld [vmem:[%s1817_s13 + $0x84] ss:$8 sps:$4 sm:$0xff]  }
  0x5f   : > { %1078 = vmatprep.mubr.bf16.mxu1 %v1289_v52  ;;  %v1509_v2 = vld [vmem:[%s1817_s13 + $0x184] ss:$8 sps:$4 sm:$0xff]   ;;  %v1511_v3 = vld [vmem:[%s1817_s13 + $0x80] ss:$8 sps:$4 sm:$0xff]   ;;  %v603_v8 = vld [vmem:[#allocation2] sm:$0xff] }
  0x60   : > { %1016 = vmatpush1.bf16.msra.mxu0 %v1451_v23  ;;  %v1512_v4 = vld [vmem:[%s1817_s13 + $0x180] ss:$8 sps:$4 sm:$0xff]   ;;  %v604_v12 = vld [vmem:[#allocation2 + $0x8] sm:$0xff] }
  0x61   : > { %1057 = vmatpush1.bf16.msra.mxu1 %v1452_v24  ;;  %1017 = vmatprep.subr.bf16.mxu0 %v1453_v25 }
  0x62   : > { %1058 = vmatprep.subr.bf16.mxu1 %v1455_v26 }
  0x64   : > { %1018 = vmatpush1.bf16.msra.mxu0 %v1457_v27 }
  0x65   : > { %1059 = vmatpush1.bf16.msra.mxu1 %v1458_v28  ;;  %1019 = vmatprep.subr.bf16.mxu0 %v1459_v29 }
  0x66   : > { %1060 = vmatprep.subr.bf16.mxu1 %v1461_v30 }
  0x68   : > { %1020 = vmatpush1.bf16.msra.mxu0 %v1463_v31 }
  0x69   : > { %1061 = vmatpush1.bf16.msra.mxu1 %v1464_v32  ;;  %1021 = vmatprep.subr.bf16.mxu0 %v1465_v33 }
  0x6a   : > { %1062 = vmatprep.subr.bf16.mxu1 %v1467_v34 }
  0x6c   : > { %1022 = vmatpush2.bf16.msra.mxu0 %v1469_v35 }
  0x6d   : > { %1063 = vmatpush2.bf16.msra.mxu1 %v1470_v36  ;;  %1023 = vmatprep.subr.bf16.mxu0 %v1471_v37 }
  0x6e   : > { %1064 = vmatprep.subr.bf16.mxu1 %v1473_v38 }
  0x70   : > { %1024 = vmatpush2.bf16.msra.mxu0 %v1475_v39 }
  0x71   : > { %1065 = vmatpush2.bf16.msra.mxu1 %v1476_v40  ;;  %1025 = vmatprep.subr.bf16.mxu0 %v1477_v41 }
  0x72   : > { %1066 = vmatprep.subr.bf16.mxu1 %v1479_v42 }
  0x74   : > { %1026 = vmatpush2.bf16.msra.mxu0 %v1481_v43 }
  0x75   : > { %1067 = vmatpush2.bf16.msra.mxu1 %v1482_v44  ;;  %1027 = vmatprep.subr.bf16.mxu0 %v1483_v45 }
  0x76   : > { %1068 = vmatprep.subr.bf16.mxu1 %v1485_v46 }
  0x78   : > { %1028 = vmatpush2.bf16.msra.mxu0 %v1487_v50 }
  0x79   : > { %1069 = vmatpush2.bf16.msra.mxu1 %v1488_v51  ;;  %1029 = vmatprep.subr.bf16.mxu0 %v1489_v53 }
  0x7a   : > { %1070 = vmatprep.subr.bf16.mxu1 %v1491_v54 }
  0x7c   : > { %1030 = vmatpush2.bf16.msra.mxu0 %v1493_v55 }
  0x7d   : > { %1071 = vmatpush2.bf16.msra.mxu1 %v1494_v56  ;;  %1031 = vmatprep.subr.bf16.mxu0 %v1495_v57 }
  0x7e   : > { %1072 = vmatprep.subr.bf16.mxu1 %v1497_v58 }
  0x80   : > { %1032 = vmatpush2.bf16.msra.mxu0 %v1499_v59 }
  0x81   : > { %1073 = vmatpush2.bf16.msra.mxu1 %v1500_v60  ;;  %1033 = vmatprep.subr.bf16.mxu0 %v1501_v61 }
  0x82   : > { %1074 = vmatprep.subr.bf16.mxu1 %v1503_v62 }
  0x84   : > { %1034 = vmatpush2.bf16.msra.mxu0 %v1505_v63 }
  0x85   : > { %1075 = vmatpush2.bf16.msra.mxu1 %v1506_v0  ;;  %1035 = vmatprep.subr.bf16.mxu0 %v1507_v1 }
  0x86   : > { %1076 = vmatprep.subr.bf16.mxu1 %v1509_v2 }
  0x88   : > { %1036 = vmatpush2.bf16.msra.mxu0 %v1511_v3 }
  0x89   : > { %1077 = vmatpush2.bf16.msra.mxu1 %v1512_v4 }
  0x8b   : > { %1038 = vmatmul.mubr.bf16.vlgmr.msra.gmra.mxu0 %v1286_v5 }
  0x8c   : > { %1079 = vmatmul.mubr.bf16.vlgmr.msra.gmra.mxu1 %v1288_v6 }
 0x14b   : > { %v1039_v7 = vpop.f32.mrf.mxu0 }
 0x14c   : > { %v1080_v9 = vpop.f32.mrf.mxu1 }
 0x14d   : > { %v1081_v10 = vadd.f32 %v1080_v9, %v1039_v7  ;;  %v1041_v11 = vpop.f32.mrf.mxu0 }
 0x14e   : > { %v1082_v13 = vpop.f32.mrf.mxu1 }
 0x14f   : > { %v1087_v14 = vadd.f32 %v1081_v10, %v603_v8  ;;  %v1083_v15 = vadd.f32 %v1082_v13, %v1041_v11  ;;  %v1043_v16 = vpop.f32.mrf.mxu0  ;;  %1094 = sbr.rel (%p1354_p13) target bundleno = 357 (0x165), region = 82 }
 0x150   : > { %v1084_v17 = vpop.f32.mrf.mxu1 }
 0x151   : > { %1089 = vst [vmem:[#allocation2] sm:$0xff] %v1087_v14  ;;  %v1088_v18 = vadd.f32 %v1083_v15, %v604_v12  ;;  %v1044_v19 = vpop.f32.mrf.mxu0 }
 0x152   : > { %v1085_v20 = vpop.f32.mrf.mxu1 }
 0x153   : > { %1090 = vst [vmem:[#allocation2 + $0x8] sm:$0xff] %v1088_v18 }
 0x154   : > { %v1099_v21 = vlaneseq  ;;  %v1097_v23 = vld [vmem:[%s580_s15] sm:$0x3] }
 0x155   : > { %v1111_v24 = vld [vmem:[%s585_s18] sm:$0x3] }
 0x156   : > { %v1100_v22 = vshrl.u32 %v1099_v21, 7 }
 0x158   : > { %v1101_v25 = vsub.s32 0, %v1100_v22  ;;  %v1105_v26 = vsub.s32 1, %v1100_v22  ;;  %v1095_v27 = vld [vmem:[#allocation2] sm:$0xff] }
 0x15a   : > { %v1096_v28 = vld [vmem:[#allocation2 + $0x8] sm:$0xff]  ;;  %v1102_v29 = vrot.slane %v1097_v23, %v1101_v25  ;;  %v1106_v30 = vrot.slane %v1097_v23, %v1105_v26  ;;  %v1116_v31 = vrot.slane %v1111_v24, %v1101_v25  ;;  %v1120_v32 = vrot.slane %v1111_v24, %v1105_v26 }
 0x15c   : > { %v1109_v33 = vmul.f32 %v1102_v29, %v1095_v27  ;;  %v1110_v34 = vmul.f32 %v1106_v30, %v1096_v28 }
 0x15e   : > { %v1123_v35 = vadd.f32 %v1116_v31, %v1109_v33  ;;  %v1124_v36 = vadd.f32 %v1120_v32, %v1110_v34 }
 0x160   : > { %v1125_v37 = vmax.f32 %v1123_v35, 0.0  ;;  %v1126_v38 = vmax.f32 %v1124_v36, 0.0 }
 0x162   : > { %v1359_v39 = vpack.c.bf16 %v1126_v38, %v1125_v37 }
 0x164   : > { %1135 = vst [vmem:[%s1815_s12] sm:$0xff] %v1359_v39 }
 0x165 PF: > { %s14_s21 = sadd.s32 1, %s1571_s21   ;;  %s1924_s15 = smov %s1551_s16 }
 0x166   : > { %p11_p0 = scmp.ge.s32.totalorder %s14_s21, 20   ;;  %s1925_s16 = smov %s1650_s28 }
 0x167   : > { %s1926_s17 = smov %s1563_s19  ;;  %s1927_s18 = smov %s1567_s20 }
 0x168   : > { %s1928_s19 = smov %s1931_s22  ;;  %s1929_s20 = smov %s1935_s23 }
 0x169   :  { %13 = sbr.rel (!%p11_p0) target bundleno = 4 (0x4), region = 126 }

// kernel: rfunet_forward.52
= control target key start
LH: loop header
LB: loop body
LE: loop exit
PB: predicated region body
PF: predicated region fallthrough
CT: control target
= control target key end

     0   :  { %s1692_s18 = smov 0   ;;  %s1694_s19 = smov 0   ;;  %s2018_s0 = inlined_call_operand.vmem [shape: bf16[8,4608], index: 0, kind: input, shape index: {}]   ;;  %s2019_s1 = inlined_call_operand.vmem [shape: bf16[4608,512], index: 1, kind: input, shape index: {}]   ;;  %s2020_s2 = inlined_call_operand.vmem [shape: f32[1,512], index: 2, kind: input, shape index: {}]   ;;  %s2021_s3 = inlined_call_operand.vmem [shape: f32[1,512], index: 3, kind: input, shape index: {}]   ;;  %s2022_s4 = inlined_call_operand.vmem [shape: bf16[8,512], index: 4, kind: input, shape index: {}]   ;;  %s2023_s5 = inlined_call_operand.vmem [shape: bf16[8,512], index: 5, kind: output, shape index: {}]  }
   0x1   :  { %s1696_s20 = smov 0   ;;  %s1698_s21 = smov 0  }
   0x2   :  { %s1700_s22 = smov 0   ;;  %s1702_s23 = smov 0  }
   0x3   :  { %s1704_s24 = smov 0  }
   0x4 LB: > { %s27_s25 = sadd.s32 1, %s1651_s22  ;;  %s30_s26 = sadd.s32 1, %s1655_s23  ;;  %s1659_s24 = sphi %s1704_s24, %s15_s24   ;;  %s1655_s23 = sphi %s1702_s23, %s2029_s23   ;;  %s1651_s22 = sphi %s1700_s22, %s2028_s22   ;;  %s1647_s21 = sphi %s1698_s21, %s2027_s21   ;;  %s1643_s20 = sphi %s1696_s20, %s2026_s20   ;;  %s1639_s19 = sphi %s1694_s19, %s2025_s19   ;;  %s1635_s18 = sphi %s1692_s18, %s2024_s18  }
   0x5   : > { %p28_p0 = scmp.ge.s32.totalorder %s27_s25, 9  ;;  %p78_p1 = scmp.ne.s32.totalorder %s1639_s19, %s1635_s18 }
   0x6   : > { %p79_p2 = scmp.eq.s32.totalorder %s1659_s24, 0  ;;  %s71_s30 = sadd.s32 1, %s1639_s19 }
   0x7   : > { %s2031_s25 = smov (%p28_p0, %s27_s25), 0  ;;  %s2033_s26 = smov (!%p28_p0, %s30_s26), %s1655_s23 }
   0x8   : > { %p80_p3 = por %p79_p2, %p78_p1  ;;  %p32_p4 = scmp.ge.s32.totalorder %s2033_s26, 2 }
   0x9   : > { %s66_s27 = ssub.s32 %s1651_s22, %s2031_s25  ;;  %p1357_p6 = scmp.ge.s32.totalorder %s1659_s24, 18 }
   0xa   : > { %s2035_s26 = smov (%p32_p4, %s2033_s26), 0 }
   0xb   : > { %s67_s28 = ssub.s32 %s1655_s23, %s2035_s26  ;;  %212 = sbr.rel (%p1357_p6) target bundleno = 55 (0x37), region = 16 }
   0xc   : > { %s68_s29 = sor.u32 %s67_s28, %s66_s27 }
   0xd   : > { %p69_p5 = scmp.eq.s32.totalorder %s68_s29, 0 }
   0xf   : > { %s1743_s6 = scalar_select %p69_p5, %s1639_s19, %s71_s30  }
  0x10   : > { %228 = sbr.rel (!%p80_p3) target bundleno = 55 (0x37), region = 24  ;;  %s230_s7 = sand.u32 (%p80_p3), 1, %s1639_s19  }
  0x11   : > { %s1360_s8 = sshll.u32 (%p80_p3), %s1655_s23, 1  ;;  %s1358_s9 = sshll.u32 (%p80_p3), %s230_s7, 9 }
  0x12   : > { %s1446_s10 = sshll.u32 (%p80_p3), %s1651_s22, 8  ;;  %s1757_s16 = scalar_lea.vmem (%p80_p3), [#allocation3], %s1358_s9 }
  0x13   : > { %s236_s11 = sadd.s32 (%p80_p3), %s1446_s10, %s1360_s8 }
  0x14   : > { %s1362_s12 = sshll.u32 (%p80_p3), %s236_s11, 2 }
  0x15   : > { %s1752_s15 = scalar_lea.vmem %s2019_s1, %s1362_s12 }
  0x16   : > { %v393_v0 = vld [vmem:[%s1752_s15] sm:$0xff]  ;;  %v395_v1 = vld [vmem:[%s1752_s15 + $0x10] sm:$0xff] }
  0x17   : > { %v397_v2 = vld [vmem:[%s1752_s15 + $0x20] sm:$0xff]  ;;  %394 = vst [vmem:[%s1757_s16] sm:$0xff] %v393_v0  ;;  %396 = vst [vmem:[%s1757_s16 + $0x8] sm:$0xff] %v395_v1  ;;  %v399_v3 = vld [vmem:[%s1752_s15 + $0x30] sm:$0xff] }
  0x18   : > { %398 = vst [vmem:[%s1757_s16 + $0x10] sm:$0xff] %v397_v2  ;;  %v401_v4 = vld [vmem:[%s1752_s15 + $0x40] sm:$0xff]  ;;  %v403_v5 = vld [vmem:[%s1752_s15 + $0x50] sm:$0xff]  ;;  %400 = vst [vmem:[%s1757_s16 + $0x18] sm:$0xff] %v399_v3 }
  0x19   : > { %402 = vst [vmem:[%s1757_s16 + $0x20] sm:$0xff] %v401_v4  ;;  %404 = vst [vmem:[%s1757_s16 + $0x28] sm:$0xff] %v403_v5  ;;  %v405_v6 = vld [vmem:[%s1752_s15 + $0x60] sm:$0xff]  ;;  %v407_v7 = vld [vmem:[%s1752_s15 + $0x70] sm:$0xff] }
  0x1a   : > { %v409_v8 = vld [vmem:[%s1752_s15 + $0x80] sm:$0xff]  ;;  %406 = vst [vmem:[%s1757_s16 + $0x30] sm:$0xff] %v405_v6  ;;  %408 = vst [vmem:[%s1757_s16 + $0x38] sm:$0xff] %v407_v7  ;;  %v411_v9 = vld [vmem:[%s1752_s15 + $0x90] sm:$0xff] }
  0x1b   : > { %410 = vst [vmem:[%s1757_s16 + $0x40] sm:$0xff] %v409_v8  ;;  %v413_v10 = vld [vmem:[%s1752_s15 + $0xa0] sm:$0xff]  ;;  %v415_v11 = vld [vmem:[%s1752_s15 + $0xb0] sm:$0xff]  ;;  %412 = vst [vmem:[%s1757_s16 + $0x48] sm:$0xff] %v411_v9 }
  0x1c   : > { %414 = vst [vmem:[%s1757_s16 + $0x50] sm:$0xff] %v413_v10  ;;  %416 = vst [vmem:[%s1757_s16 + $0x58] sm:$0xff] %v415_v11  ;;  %v417_v12 = vld [vmem:[%s1752_s15 + $0xc0] sm:$0xff]  ;;  %v419_v13 = vld [vmem:[%s1752_s15 + $0xd0] sm:$0xff] }
  0x1d   : > { %v421_v14 = vld [vmem:[%s1752_s15 + $0xe0] sm:$0xff]  ;;  %418 = vst [vmem:[%s1757_s16 + $0x60] sm:$0xff] %v417_v12  ;;  %420 = vst [vmem:[%s1757_s16 + $0x68] sm:$0xff] %v419_v13  ;;  %v423_v15 = vld [vmem:[%s1752_s15 + $0xf0] sm:$0xff] }
  0x1e   : > { %422 = vst [vmem:[%s1757_s16 + $0x70] sm:$0xff] %v421_v14  ;;  %v425_v16 = vld [vmem:[%s1752_s15 + $0x100] sm:$0xff]  ;;  %v427_v17 = vld [vmem:[%s1752_s15 + $0x110] sm:$0xff]  ;;  %424 = vst [vmem:[%s1757_s16 + $0x78] sm:$0xff] %v423_v15 }
  0x1f   : > { %426 = vst [vmem:[%s1757_s16 + $0x80] sm:$0xff] %v425_v16  ;;  %428 = vst [vmem:[%s1757_s16 + $0x88] sm:$0xff] %v427_v17  ;;  %v429_v18 = vld [vmem:[%s1752_s15 + $0x120] sm:$0xff]  ;;  %v431_v19 = vld [vmem:[%s1752_s15 + $0x130] sm:$0xff] }
  0x20   : > { %v433_v20 = vld [vmem:[%s1752_s15 + $0x140] sm:$0xff]  ;;  %430 = vst [vmem:[%s1757_s16 + $0x90] sm:$0xff] %v429_v18  ;;  %432 = vst [vmem:[%s1757_s16 + $0x98] sm:$0xff] %v431_v19  ;;  %v435_v21 = vld [vmem:[%s1752_s15 + $0x150] sm:$0xff] }
  0x21   : > { %434 = vst [vmem:[%s1757_s16 + $0xa0] sm:$0xff] %v433_v20  ;;  %v437_v22 = vld [vmem:[%s1752_s15 + $0x160] sm:$0xff]  ;;  %v439_v23 = vld [vmem:[%s1752_s15 + $0x170] sm:$0xff]  ;;  %436 = vst [vmem:[%s1757_s16 + $0xa8] sm:$0xff] %v435_v21 }
  0x22   : > { %438 = vst [vmem:[%s1757_s16 + $0xb0] sm:$0xff] %v437_v22  ;;  %440 = vst [vmem:[%s1757_s16 + $0xb8] sm:$0xff] %v439_v23  ;;  %v441_v24 = vld [vmem:[%s1752_s15 + $0x180] sm:$0xff]  ;;  %v443_v25 = vld [vmem:[%s1752_s15 + $0x190] sm:$0xff] }
  0x23   : > { %v445_v26 = vld [vmem:[%s1752_s15 + $0x1a0] sm:$0xff]  ;;  %442 = vst [vmem:[%s1757_s16 + $0xc0] sm:$0xff] %v441_v24  ;;  %444 = vst [vmem:[%s1757_s16 + $0xc8] sm:$0xff] %v443_v25  ;;  %v447_v27 = vld [vmem:[%s1752_s15 + $0x1b0] sm:$0xff] }
  0x24   : > { %446 = vst [vmem:[%s1757_s16 + $0xd0] sm:$0xff] %v445_v26  ;;  %v449_v28 = vld [vmem:[%s1752_s15 + $0x1c0] sm:$0xff]  ;;  %v451_v29 = vld [vmem:[%s1752_s15 + $0x1d0] sm:$0xff]  ;;  %448 = vst [vmem:[%s1757_s16 + $0xd8] sm:$0xff] %v447_v27 }
  0x25   : > { %450 = vst [vmem:[%s1757_s16 + $0xe0] sm:$0xff] %v449_v28  ;;  %452 = vst [vmem:[%s1757_s16 + $0xe8] sm:$0xff] %v451_v29  ;;  %v453_v30 = vld [vmem:[%s1752_s15 + $0x1e0] sm:$0xff]  ;;  %v455_v31 = vld [vmem:[%s1752_s15 + $0x1f0] sm:$0xff] }
  0x26   : > { %v457_v32 = vld [vmem:[%s1752_s15 + $0x200] sm:$0xff]  ;;  %454 = vst [vmem:[%s1757_s16 + $0xf0] sm:$0xff] %v453_v30  ;;  %456 = vst [vmem:[%s1757_s16 + $0xf8] sm:$0xff] %v455_v31  ;;  %v459_v33 = vld [vmem:[%s1752_s15 + $0x210] sm:$0xff] }
  0x27   : > { %458 = vst [vmem:[%s1757_s16 + $0x100] sm:$0xff] %v457_v32  ;;  %v461_v34 = vld [vmem:[%s1752_s15 + $0x220] sm:$0xff]  ;;  %v463_v35 = vld [vmem:[%s1752_s15 + $0x230] sm:$0xff]  ;;  %460 = vst [vmem:[%s1757_s16 + $0x108] sm:$0xff] %v459_v33 }
  0x28   : > { %462 = vst [vmem:[%s1757_s16 + $0x110] sm:$0xff] %v461_v34  ;;  %464 = vst [vmem:[%s1757_s16 + $0x118] sm:$0xff] %v463_v35  ;;  %v465_v36 = vld [vmem:[%s1752_s15 + $0x240] sm:$0xff]  ;;  %v467_v37 = vld [vmem:[%s1752_s15 + $0x250] sm:$0xff] }
  0x29   : > { %v469_v38 = vld [vmem:[%s1752_s15 + $0x260] sm:$0xff]  ;;  %466 = vst [vmem:[%s1757_s16 + $0x120] sm:$0xff] %v465_v36  ;;  %468 = vst [vmem:[%s1757_s16 + $0x128] sm:$0xff] %v467_v37  ;;  %v471_v39 = vld [vmem:[%s1752_s15 + $0x270] sm:$0xff] }
  0x2a   : > { %470 = vst [vmem:[%s1757_s16 + $0x130] sm:$0xff] %v469_v38  ;;  %v473_v40 = vld [vmem:[%s1752_s15 + $0x280] sm:$0xff]  ;;  %v475_v41 = vld [vmem:[%s1752_s15 + $0x290] sm:$0xff]  ;;  %472 = vst [vmem:[%s1757_s16 + $0x138] sm:$0xff] %v471_v39 }
  0x2b   : > { %474 = vst [vmem:[%s1757_s16 + $0x140] sm:$0xff] %v473_v40  ;;  %476 = vst [vmem:[%s1757_s16 + $0x148] sm:$0xff] %v475_v41  ;;  %v477_v42 = vld [vmem:[%s1752_s15 + $0x2a0] sm:$0xff]  ;;  %v479_v43 = vld [vmem:[%s1752_s15 + $0x2b0] sm:$0xff] }
  0x2c   : > { %v481_v44 = vld [vmem:[%s1752_s15 + $0x2c0] sm:$0xff]  ;;  %478 = vst [vmem:[%s1757_s16 + $0x150] sm:$0xff] %v477_v42  ;;  %480 = vst [vmem:[%s1757_s16 + $0x158] sm:$0xff] %v479_v43  ;;  %v483_v45 = vld [vmem:[%s1752_s15 + $0x2d0] sm:$0xff] }
  0x2d   : > { %482 = vst [vmem:[%s1757_s16 + $0x160] sm:$0xff] %v481_v44  ;;  %v485_v46 = vld [vmem:[%s1752_s15 + $0x2e0] sm:$0xff]  ;;  %v487_v47 = vld [vmem:[%s1752_s15 + $0x2f0] sm:$0xff]  ;;  %484 = vst [vmem:[%s1757_s16 + $0x168] sm:$0xff] %v483_v45 }
  0x2e   : > { %486 = vst [vmem:[%s1757_s16 + $0x170] sm:$0xff] %v485_v46  ;;  %488 = vst [vmem:[%s1757_s16 + $0x178] sm:$0xff] %v487_v47  ;;  %v489_v48 = vld [vmem:[%s1752_s15 + $0x300] sm:$0xff]  ;;  %v491_v49 = vld [vmem:[%s1752_s15 + $0x310] sm:$0xff] }
  0x2f   : > { %v493_v50 = vld [vmem:[%s1752_s15 + $0x320] sm:$0xff]  ;;  %490 = vst [vmem:[%s1757_s16 + $0x180] sm:$0xff] %v489_v48  ;;  %492 = vst [vmem:[%s1757_s16 + $0x188] sm:$0xff] %v491_v49  ;;  %v495_v51 = vld [vmem:[%s1752_s15 + $0x330] sm:$0xff] }
  0x30   : > { %494 = vst [vmem:[%s1757_s16 + $0x190] sm:$0xff] %v493_v50  ;;  %v497_v52 = vld [vmem:[%s1752_s15 + $0x340] sm:$0xff]  ;;  %v499_v53 = vld [vmem:[%s1752_s15 + $0x350] sm:$0xff]  ;;  %496 = vst [vmem:[%s1757_s16 + $0x198] sm:$0xff] %v495_v51 }
  0x31   : > { %498 = vst [vmem:[%s1757_s16 + $0x1a0] sm:$0xff] %v497_v52  ;;  %500 = vst [vmem:[%s1757_s16 + $0x1a8] sm:$0xff] %v499_v53  ;;  %v501_v54 = vld [vmem:[%s1752_s15 + $0x360] sm:$0xff]  ;;  %v503_v55 = vld [vmem:[%s1752_s15 + $0x370] sm:$0xff] }
  0x32   : > { %v505_v56 = vld [vmem:[%s1752_s15 + $0x380] sm:$0xff]  ;;  %502 = vst [vmem:[%s1757_s16 + $0x1b0] sm:$0xff] %v501_v54  ;;  %504 = vst [vmem:[%s1757_s16 + $0x1b8] sm:$0xff] %v503_v55  ;;  %v507_v57 = vld [vmem:[%s1752_s15 + $0x390] sm:$0xff] }
  0x33   : > { %506 = vst [vmem:[%s1757_s16 + $0x1c0] sm:$0xff] %v505_v56  ;;  %v509_v58 = vld [vmem:[%s1752_s15 + $0x3a0] sm:$0xff]  ;;  %v511_v59 = vld [vmem:[%s1752_s15 + $0x3b0] sm:$0xff]  ;;  %508 = vst [vmem:[%s1757_s16 + $0x1c8] sm:$0xff] %v507_v57 }
  0x34   : > { %510 = vst [vmem:[%s1757_s16 + $0x1d0] sm:$0xff] %v509_v58  ;;  %512 = vst [vmem:[%s1757_s16 + $0x1d8] sm:$0xff] %v511_v59  ;;  %v513_v60 = vld [vmem:[%s1752_s15 + $0x3c0] sm:$0xff]  ;;  %v515_v61 = vld [vmem:[%s1752_s15 + $0x3d0] sm:$0xff] }
  0x35   : > { %v517_v62 = vld [vmem:[%s1752_s15 + $0x3e0] sm:$0xff]  ;;  %514 = vst [vmem:[%s1757_s16 + $0x1e0] sm:$0xff] %v513_v60  ;;  %516 = vst [vmem:[%s1757_s16 + $0x1e8] sm:$0xff] %v515_v61  ;;  %v519_v63 = vld [vmem:[%s1752_s15 + $0x3f0] sm:$0xff] }
  0x36   : > { %518 = vst [vmem:[%s1757_s16 + $0x1f0] sm:$0xff] %v517_v62  ;;  %520 = vst [vmem:[%s1757_s16 + $0x1f8] sm:$0xff] %v519_v63 }
  0x37 PF: > { %p1363_p7 = scmp.ge.s32.totalorder %s1659_s24, 1  ;;  %p554_p8 = scmp.lt.s32.totalorder %s1659_s24, 19 }
  0x39   : > { %p555_p9 = pnand %p1363_p7, %p554_p8 }
  0x3a   : > { %s561_s17 = sand.u32 (!%p555_p9), 1, %s1635_s18   ;;  %s1365_s27 = sshll.u32 (!%p555_p9), %s1643_s20, 2 }
  0x3b   : > { %558 = sbr.rel (%p555_p9) target bundleno = 359 (0x167), region = 74  ;;  %s1364_s28 = sshll.u32 (!%p555_p9), %s561_s17, 9 }
  0x3c   : > { %p621_p10 = scmp.lt.s32.totalorder (!%p555_p9), %s1365_s27, 35  ;;  %s1367_s29 = sshll.u32 (!%p555_p9), %s1647_s21, 1 }
  0x3d   : > { %p631_p11 = scmp.lt.s32.totalorder (!%p555_p9), %s1367_s29, 3  ;;  %s1915_s8 = scalar_lea.vmem (!%p555_p9), [#allocation3], %s1364_s28 }
  0x3e   : > { %p1373_p12 = scmp.ne.s32.totalorder (!%p555_p9), %s1643_s20, 0 }
  0x40   : > { %s2037_s27 = smov (!%p621_p10, %s1365_s27), 35  ;;  %s2039_s29 = smov (!%p631_p11, %s1367_s29), 3 }
  0x41   : > { %s1366_s30 = sshll.u32 %s2037_s27, 2  ;;  %s633_s18 = scalar_lea.vmem %s2020_s2, %s2039_s29 }
  0x42   : > { %s1892_s9 = scalar_lea.vmem %s2018_s0, %s1366_s30  ;;  %s638_s21 = scalar_lea.vmem %s2021_s3, %s2039_s29 }
  0x43   : > { %s1370_s14 = sshll.u32 %s2039_s29, 2  ;;  %663 = sbr.rel (%p1373_p12) target bundleno = 74 (0x4a), region = 82 }
  0x44   : > { %s1908_s17 = scalar_lea.vmem %s2022_s4, %s1370_s14  ;;  %s1913_s7 = scalar_lea.vmem %s2023_s5, %s1370_s14 }
  0x48   : > { %v1661_v0 = vmov 0.0  }
  0x49   : > { %664 = vst [vmem:[#allocation2] sm:$0xff] %v1661_v0  ;;  %665 = vst [vmem:[#allocation2 + $0x8] sm:$0xff] %v1661_v0 }
  0x4a PF: > { %v1505_v1 = vld [vmem:[%s1915_s8 + $0x74] ss:$8 sps:$4 sm:$0xff]   ;;  %v1509_v3 = vld [vmem:[%s1915_s8 + $0x70] ss:$8 sps:$4 sm:$0xff]   ;;  %v1511_v5 = vld [vmem:[%s1915_s8 + $0x64] ss:$8 sps:$4 sm:$0xff]  }
  0x4b   : > { %v1507_v2 = vld [vmem:[%s1915_s8 + $0x174] ss:$8 sps:$4 sm:$0xff]   ;;  %1068 = vmatprep.subr.bf16.mxu0 %v1505_v1  ;;  %v1510_v4 = vld [vmem:[%s1915_s8 + $0x170] ss:$8 sps:$4 sm:$0xff]   ;;  %v1513_v6 = vld [vmem:[%s1915_s8 + $0x164] ss:$8 sps:$4 sm:$0xff]  }
  0x4c   : > { %1109 = vmatprep.subr.bf16.mxu1 %v1507_v2  ;;  %1069 = vmatpush1.bf16.msra.mxu0 %v1509_v3  ;;  %v1515_v7 = vld [vmem:[%s1915_s8 + $0x60] ss:$8 sps:$4 sm:$0xff]   ;;  %v1517_v9 = vld [vmem:[%s1915_s8 + $0x54] ss:$8 sps:$4 sm:$0xff]   ;;  %v1521_v11 = vld [vmem:[%s1915_s8 + $0x50] ss:$8 sps:$4 sm:$0xff]  }
  0x4d   : > { %1110 = vmatpush1.bf16.msra.mxu1 %v1510_v4  ;;  %1070 = vmatprep.subr.bf16.mxu0 %v1511_v5  ;;  %v1516_v8 = vld [vmem:[%s1915_s8 + $0x160] ss:$8 sps:$4 sm:$0xff]   ;;  %v1519_v10 = vld [vmem:[%s1915_s8 + $0x154] ss:$8 sps:$4 sm:$0xff]   ;;  %v1522_v12 = vld [vmem:[%s1915_s8 + $0x150] ss:$8 sps:$4 sm:$0xff]  }
  0x4e   : > { %1111 = vmatprep.subr.bf16.mxu1 %v1513_v6  ;;  %v1523_v13 = vld [vmem:[%s1915_s8 + $0x44] ss:$8 sps:$4 sm:$0xff]   ;;  %v1527_v15 = vld [vmem:[%s1915_s8 + $0x40] ss:$8 sps:$4 sm:$0xff]   ;;  %v1529_v17 = vld [vmem:[%s1915_s8 + $0x34] ss:$8 sps:$4 sm:$0xff]  }
  0x4f   : > { %v1525_v14 = vld [vmem:[%s1915_s8 + $0x144] ss:$8 sps:$4 sm:$0xff]   ;;  %v1528_v16 = vld [vmem:[%s1915_s8 + $0x140] ss:$8 sps:$4 sm:$0xff]   ;;  %v1531_v18 = vld [vmem:[%s1915_s8 + $0x134] ss:$8 sps:$4 sm:$0xff]  }
  0x50   : > { %1071 = vmatpush1.bf16.msra.mxu0 %v1515_v7  ;;  %v1533_v19 = vld [vmem:[%s1915_s8 + $0x30] ss:$8 sps:$4 sm:$0xff]   ;;  %v1535_v21 = vld [vmem:[%s1915_s8 + $0x24] ss:$8 sps:$4 sm:$0xff]   ;;  %v1539_v23 = vld [vmem:[%s1915_s8 + $0x20] ss:$8 sps:$4 sm:$0xff]  }
  0x51   : > { %1112 = vmatpush1.bf16.msra.mxu1 %v1516_v8  ;;  %1072 = vmatprep.subr.bf16.mxu0 %v1517_v9  ;;  %v1534_v20 = vld [vmem:[%s1915_s8 + $0x130] ss:$8 sps:$4 sm:$0xff]   ;;  %v1537_v22 = vld [vmem:[%s1915_s8 + $0x124] ss:$8 sps:$4 sm:$0xff]   ;;  %v1540_v24 = vld [vmem:[%s1915_s8 + $0x120] ss:$8 sps:$4 sm:$0xff]  }
  0x52   : > { %1113 = vmatprep.subr.bf16.mxu1 %v1519_v10  ;;  %v1541_v25 = vld [vmem:[%s1915_s8 + $0x14] ss:$8 sps:$4 sm:$0xff]   ;;  %v1545_v27 = vld [vmem:[%s1915_s8 + $0x10] ss:$8 sps:$4 sm:$0xff]   ;;  %v1547_v29 = vld [vmem:[%s1915_s8 + $0x4] ss:$8 sps:$4 sm:$0xff]  }
  0x53   : > { %v1543_v26 = vld [vmem:[%s1915_s8 + $0x114] ss:$8 sps:$4 sm:$0xff]   ;;  %v1546_v28 = vld [vmem:[%s1915_s8 + $0x110] ss:$8 sps:$4 sm:$0xff]   ;;  %v1549_v30 = vld [vmem:[%s1915_s8 + $0x104] ss:$8 sps:$4 sm:$0xff]  }
  0x54   : > { %1073 = vmatpush1.bf16.msra.mxu0 %v1521_v11  ;;  %v1551_v31 = vld [vmem:[%s1915_s8] ss:$8 sps:$4 sm:$0xff]   ;;  %v1553_v33 = vld [vmem:[%s1915_s8 + $0xf4] ss:$8 sps:$4 sm:$0xff]   ;;  %v1557_v35 = vld [vmem:[%s1915_s8 + $0xf0] ss:$8 sps:$4 sm:$0xff]  }
  0x55   : > { %1114 = vmatpush1.bf16.msra.mxu1 %v1522_v12  ;;  %1074 = vmatprep.subr.bf16.mxu0 %v1523_v13  ;;  %v1552_v32 = vld [vmem:[%s1915_s8 + $0x100] ss:$8 sps:$4 sm:$0xff]   ;;  %v1555_v34 = vld [vmem:[%s1915_s8 + $0x1f4] ss:$8 sps:$4 sm:$0xff]   ;;  %v1558_v36 = vld [vmem:[%s1915_s8 + $0x1f0] ss:$8 sps:$4 sm:$0xff]  }
  0x56   : > { %1115 = vmatprep.subr.bf16.mxu1 %v1525_v14  ;;  %v1559_v37 = vld [vmem:[%s1915_s8 + $0xe4] ss:$8 sps:$4 sm:$0xff]   ;;  %v1563_v39 = vld [vmem:[%s1915_s8 + $0xe0] ss:$8 sps:$4 sm:$0xff]   ;;  %v1565_v41 = vld [vmem:[%s1915_s8 + $0xd4] ss:$8 sps:$4 sm:$0xff]  }
  0x57   : > { %v1561_v38 = vld [vmem:[%s1915_s8 + $0x1e4] ss:$8 sps:$4 sm:$0xff]   ;;  %v1564_v40 = vld [vmem:[%s1915_s8 + $0x1e0] ss:$8 sps:$4 sm:$0xff]   ;;  %v1567_v42 = vld [vmem:[%s1915_s8 + $0x1d4] ss:$8 sps:$4 sm:$0xff]  }
  0x58   : > { %1075 = vmatpush1.bf16.msra.mxu0 %v1527_v15  ;;  %v1569_v43 = vld [vmem:[%s1915_s8 + $0xd0] ss:$8 sps:$4 sm:$0xff]   ;;  %v1571_v45 = vld [vmem:[%s1915_s8 + $0xc4] ss:$8 sps:$4 sm:$0xff]   ;;  %v1575_v50 = vld [vmem:[%s1915_s8 + $0xc0] ss:$8 sps:$4 sm:$0xff]  }
  0x59   : > { %1116 = vmatpush1.bf16.msra.mxu1 %v1528_v16  ;;  %1076 = vmatprep.subr.bf16.mxu0 %v1529_v17  ;;  %v1570_v44 = vld [vmem:[%s1915_s8 + $0x1d0] ss:$8 sps:$4 sm:$0xff]   ;;  %v1573_v46 = vld [vmem:[%s1915_s8 + $0x1c4] ss:$8 sps:$4 sm:$0xff]   ;;  %v1576_v51 = vld [vmem:[%s1915_s8 + $0x1c0] ss:$8 sps:$4 sm:$0xff]  }
  0x5a   : > { %1117 = vmatprep.subr.bf16.mxu1 %v1531_v18  ;;  %v668_v47 = vld [vmem:[%s1892_s9] sm:$0xff]  ;;  %v669_v49 = vld [vmem:[%s1892_s9 + $0x8] sm:$0xff]  ;;  %v1583_v57 = vld [vmem:[%s1915_s8 + $0xa4] ss:$8 sps:$4 sm:$0xff]   ;;  %p1442_p13 = scmp.ne.s32.totalorder %s1643_s20, 8 }
  0x5b   : > { %v1375_v48 = vcombine.high %v668_v47, %v668_v47  ;;  %v1377_v52 = vcombine.high %v669_v49, %v669_v49  ;;  %v1577_v53 = vld [vmem:[%s1915_s8 + $0xb4] ss:$8 sps:$4 sm:$0xff]   ;;  %v1581_v55 = vld [vmem:[%s1915_s8 + $0xb0] ss:$8 sps:$4 sm:$0xff]   ;;  %v1585_v58 = vld [vmem:[%s1915_s8 + $0x1a4] ss:$8 sps:$4 sm:$0xff]   ;;  %v1374_v5 = vcombine.low %v668_v47, %v668_v47  ;;  %v1376_v6 = vcombine.low %v669_v49, %v669_v49 }
  0x5c   : > { %1077 = vmatpush1.bf16.msra.mxu0 %v1533_v19  ;;  %v1579_v54 = vld [vmem:[%s1915_s8 + $0x1b4] ss:$8 sps:$4 sm:$0xff]   ;;  %v1582_v56 = vld [vmem:[%s1915_s8 + $0x1b0] ss:$8 sps:$4 sm:$0xff]   ;;  %v1587_v59 = vld [vmem:[%s1915_s8 + $0xa0] ss:$8 sps:$4 sm:$0xff]  }
  0x5d   : > { %1118 = vmatpush1.bf16.msra.mxu1 %v1534_v20  ;;  %1078 = vmatprep.subr.bf16.mxu0 %v1535_v21  ;;  %v1588_v60 = vld [vmem:[%s1915_s8 + $0x1a0] ss:$8 sps:$4 sm:$0xff]   ;;  %v1589_v61 = vld [vmem:[%s1915_s8 + $0x94] ss:$8 sps:$4 sm:$0xff]   ;;  %v1593_v63 = vld [vmem:[%s1915_s8 + $0x90] ss:$8 sps:$4 sm:$0xff]  }
  0x5e   : > { %1119 = vmatprep.subr.bf16.mxu1 %v1537_v22  ;;  %1100 = vmatprep.mubr.bf16.mxu0 %v1375_v48  ;;  %v1591_v62 = vld [vmem:[%s1915_s8 + $0x194] ss:$8 sps:$4 sm:$0xff]   ;;  %v1594_v0 = vld [vmem:[%s1915_s8 + $0x190] ss:$8 sps:$4 sm:$0xff]   ;;  %v1595_v1 = vld [vmem:[%s1915_s8 + $0x84] ss:$8 sps:$4 sm:$0xff]  }
  0x5f   : > { %1141 = vmatprep.mubr.bf16.mxu1 %v1377_v52  ;;  %v1597_v2 = vld [vmem:[%s1915_s8 + $0x184] ss:$8 sps:$4 sm:$0xff]   ;;  %v1599_v3 = vld [vmem:[%s1915_s8 + $0x80] ss:$8 sps:$4 sm:$0xff]   ;;  %v666_v8 = vld [vmem:[#allocation2] sm:$0xff] }
  0x60   : > { %1079 = vmatpush1.bf16.msra.mxu0 %v1539_v23  ;;  %v1600_v4 = vld [vmem:[%s1915_s8 + $0x180] ss:$8 sps:$4 sm:$0xff]   ;;  %v667_v12 = vld [vmem:[#allocation2 + $0x8] sm:$0xff] }
  0x61   : > { %1120 = vmatpush1.bf16.msra.mxu1 %v1540_v24  ;;  %1080 = vmatprep.subr.bf16.mxu0 %v1541_v25 }
  0x62   : > { %1121 = vmatprep.subr.bf16.mxu1 %v1543_v26 }
  0x64   : > { %1081 = vmatpush1.bf16.msra.mxu0 %v1545_v27 }
  0x65   : > { %1122 = vmatpush1.bf16.msra.mxu1 %v1546_v28  ;;  %1082 = vmatprep.subr.bf16.mxu0 %v1547_v29 }
  0x66   : > { %1123 = vmatprep.subr.bf16.mxu1 %v1549_v30 }
  0x68   : > { %1083 = vmatpush1.bf16.msra.mxu0 %v1551_v31 }
  0x69   : > { %1124 = vmatpush1.bf16.msra.mxu1 %v1552_v32  ;;  %1084 = vmatprep.subr.bf16.mxu0 %v1553_v33 }
  0x6a   : > { %1125 = vmatprep.subr.bf16.mxu1 %v1555_v34 }
  0x6c   : > { %1085 = vmatpush2.bf16.msra.mxu0 %v1557_v35 }
  0x6d   : > { %1126 = vmatpush2.bf16.msra.mxu1 %v1558_v36  ;;  %1086 = vmatprep.subr.bf16.mxu0 %v1559_v37 }
  0x6e   : > { %1127 = vmatprep.subr.bf16.mxu1 %v1561_v38 }
  0x70   : > { %1087 = vmatpush2.bf16.msra.mxu0 %v1563_v39 }
  0x71   : > { %1128 = vmatpush2.bf16.msra.mxu1 %v1564_v40  ;;  %1088 = vmatprep.subr.bf16.mxu0 %v1565_v41 }
  0x72   : > { %1129 = vmatprep.subr.bf16.mxu1 %v1567_v42 }
  0x74   : > { %1089 = vmatpush2.bf16.msra.mxu0 %v1569_v43 }
  0x75   : > { %1130 = vmatpush2.bf16.msra.mxu1 %v1570_v44  ;;  %1090 = vmatprep.subr.bf16.mxu0 %v1571_v45 }
  0x76   : > { %1131 = vmatprep.subr.bf16.mxu1 %v1573_v46 }
  0x78   : > { %1091 = vmatpush2.bf16.msra.mxu0 %v1575_v50 }
  0x79   : > { %1132 = vmatpush2.bf16.msra.mxu1 %v1576_v51  ;;  %1092 = vmatprep.subr.bf16.mxu0 %v1577_v53 }
  0x7a   : > { %1133 = vmatprep.subr.bf16.mxu1 %v1579_v54 }
  0x7c   : > { %1093 = vmatpush2.bf16.msra.mxu0 %v1581_v55 }
  0x7d   : > { %1134 = vmatpush2.bf16.msra.mxu1 %v1582_v56  ;;  %1094 = vmatprep.subr.bf16.mxu0 %v1583_v57 }
  0x7e   : > { %1135 = vmatprep.subr.bf16.mxu1 %v1585_v58 }
  0x80   : > { %1095 = vmatpush2.bf16.msra.mxu0 %v1587_v59 }
  0x81   : > { %1136 = vmatpush2.bf16.msra.mxu1 %v1588_v60  ;;  %1096 = vmatprep.subr.bf16.mxu0 %v1589_v61 }
  0x82   : > { %1137 = vmatprep.subr.bf16.mxu1 %v1591_v62 }
  0x84   : > { %1097 = vmatpush2.bf16.msra.mxu0 %v1593_v63 }
  0x85   : > { %1138 = vmatpush2.bf16.msra.mxu1 %v1594_v0  ;;  %1098 = vmatprep.subr.bf16.mxu0 %v1595_v1 }
  0x86   : > { %1139 = vmatprep.subr.bf16.mxu1 %v1597_v2 }
  0x88   : > { %1099 = vmatpush2.bf16.msra.mxu0 %v1599_v3 }
  0x89   : > { %1140 = vmatpush2.bf16.msra.mxu1 %v1600_v4 }
  0x8b   : > { %1101 = vmatmul.mubr.bf16.vlgmr.msra.gmra.mxu0 %v1374_v5 }
  0x8c   : > { %1142 = vmatmul.mubr.bf16.vlgmr.msra.gmra.mxu1 %v1376_v6 }
 0x14b   : > { %v1102_v7 = vpop.f32.mrf.mxu0 }
 0x14c   : > { %v1143_v9 = vpop.f32.mrf.mxu1 }
 0x14d   : > { %v1144_v10 = vadd.f32 %v1143_v9, %v1102_v7  ;;  %v1104_v11 = vpop.f32.mrf.mxu0 }
 0x14e   : > { %v1145_v13 = vpop.f32.mrf.mxu1 }
 0x14f   : > { %v1150_v14 = vadd.f32 %v1144_v10, %v666_v8  ;;  %v1146_v15 = vadd.f32 %v1145_v13, %v1104_v11  ;;  %v1106_v16 = vpop.f32.mrf.mxu0  ;;  %1157 = sbr.rel (%p1442_p13) target bundleno = 359 (0x167), region = 86 }
 0x150   : > { %v1147_v17 = vpop.f32.mrf.mxu1 }
 0x151   : > { %1152 = vst [vmem:[#allocation2] sm:$0xff] %v1150_v14  ;;  %v1151_v18 = vadd.f32 %v1146_v15, %v667_v12  ;;  %v1107_v19 = vpop.f32.mrf.mxu0 }
 0x152   : > { %v1148_v20 = vpop.f32.mrf.mxu1 }
 0x153   : > { %1153 = vst [vmem:[#allocation2 + $0x8] sm:$0xff] %v1151_v18 }
 0x154   : > { %v1162_v21 = vlaneseq  ;;  %v1160_v23 = vld [vmem:[%s633_s18] sm:$0x3] }
 0x155   : > { %v1174_v24 = vld [vmem:[%s638_s21] sm:$0x3] }
 0x156   : > { %v1163_v22 = vshrl.u32 %v1162_v21, 7  ;;  %v1188_v29 = vld [vmem:[%s1908_s17] sm:$0xff] }
 0x157   : > { %v1189_v36 = vunpack.c.l.bf16 %v1188_v29  ;;  %v1190_v37 = vunpack.c.h.bf16 %v1188_v29 }
 0x158   : > { %v1164_v25 = vsub.s32 0, %v1163_v22  ;;  %v1168_v26 = vsub.s32 1, %v1163_v22  ;;  %v1158_v27 = vld [vmem:[#allocation2] sm:$0xff] }
 0x15a   : > { %v1159_v28 = vld [vmem:[#allocation2 + $0x8] sm:$0xff]  ;;  %v1165_v30 = vrot.slane %v1160_v23, %v1164_v25  ;;  %v1169_v31 = vrot.slane %v1160_v23, %v1168_v26  ;;  %v1179_v32 = vrot.slane %v1174_v24, %v1164_v25  ;;  %v1183_v33 = vrot.slane %v1174_v24, %v1168_v26 }
 0x15c   : > { %v1172_v34 = vmul.f32 %v1165_v30, %v1158_v27  ;;  %v1173_v35 = vmul.f32 %v1169_v31, %v1159_v28 }
 0x15e   : > { %v1186_v38 = vadd.f32 %v1179_v32, %v1172_v34  ;;  %v1187_v39 = vadd.f32 %v1183_v33, %v1173_v35 }
 0x160   : > { %v1191_v40 = vadd.f32 %v1189_v36, %v1186_v38  ;;  %v1192_v41 = vadd.f32 %v1190_v37, %v1187_v39 }
 0x162   : > { %v1193_v42 = vmax.f32 %v1191_v40, 0.0  ;;  %v1194_v43 = vmax.f32 %v1192_v41, 0.0 }
 0x164   : > { %v1447_v44 = vpack.c.bf16 %v1194_v43, %v1193_v42 }
 0x166   : > { %1203 = vst [vmem:[%s1913_s7] sm:$0xff] %v1447_v44 }
 0x167 PF: > { %s15_s24 = sadd.s32 1, %s1659_s24   ;;  %s2024_s18 = smov %s1639_s19 }
 0x168   : > { %p12_p0 = scmp.ge.s32.totalorder %s15_s24, 20   ;;  %s2025_s19 = smov %s1743_s6 }
 0x169   : > { %s2026_s20 = smov %s1651_s22  ;;  %s2027_s21 = smov %s1655_s23 }
 0x16a   : > { %s2028_s22 = smov %s2031_s25  ;;  %s2029_s23 = smov %s2035_s26 }
 0x16b   :  { %14 = sbr.rel (!%p12_p0) target bundleno = 4 (0x4), region = 133 }

// kernel: rfunet_forward.55
= control target key start
LH: loop header
LB: loop body
LE: loop exit
PB: predicated region body
PF: predicated region fallthrough
CT: control target
= control target key end

     0   :  { %s86_s0 = inlined_call_operand.vmem [shape: bf16[8,512], index: 0, kind: input, shape index: {}]   ;;  %s87_s1 = inlined_call_operand.vmem [shape: bf16[8,512], index: 1, kind: input, shape index: {}]   ;;  %s88_s2 = inlined_call_operand.vmem [shape: bf16[8,512], index: 2, kind: output, shape index: {}]  }
   0x1   :  { %v11_v0 = vld [vmem:[%s86_s0] sm:$0xff]  ;;  %v12_v2 = vld [vmem:[%s86_s0 + $0x8] sm:$0xff] }
   0x2   :  { %v17_v1 = vld [vmem:[%s87_s1] sm:$0xff]  ;;  %v13_v3 = vunpack.c.l.bf16 %v11_v0  ;;  %v14_v4 = vunpack.c.h.bf16 %v11_v0  ;;  %v18_v7 = vld [vmem:[%s87_s1 + $0x8] sm:$0xff]  ;;  %v15_v8 = vunpack.c.l.bf16 %v12_v2  ;;  %v16_v9 = vunpack.c.h.bf16 %v12_v2 }
   0x3   :  { %v19_v5 = vunpack.c.l.bf16 %v17_v1  ;;  %v20_v6 = vunpack.c.h.bf16 %v17_v1  ;;  %v21_v10 = vunpack.c.l.bf16 %v18_v7  ;;  %v22_v11 = vunpack.c.h.bf16 %v18_v7 }
   0x5   :  { %v23_v12 = vadd.f32 %v19_v5, %v13_v3  ;;  %v24_v13 = vadd.f32 %v20_v6, %v14_v4  ;;  %v25_v14 = vadd.f32 %v21_v10, %v15_v8  ;;  %v26_v15 = vadd.f32 %v22_v11, %v16_v9 }
   0x7   :  { %v51_v16 = vpack.c.bf16 %v24_v13, %v23_v12  ;;  %v52_v17 = vpack.c.bf16 %v26_v15, %v25_v14 }
   0x9   :  { %43 = vst [vmem:[%s88_s2] sm:$0xff] %v51_v16  ;;  %44 = vst [vmem:[%s88_s2 + $0x8] sm:$0xff] %v52_v17 }

// kernel: rfunet_forward.56
= control target key start
LH: loop header
LB: loop body
LE: loop exit
PB: predicated region body
PF: predicated region fallthrough
CT: control target
= control target key end

     0   :  { %s960_s1 = inlined_call_operand.vmem [shape: bf16[512,256], index: 1, kind: input, shape index: {}]   ;;  %s961_s2 = inlined_call_operand.vmem [shape: f32[1,256], index: 2, kind: input, shape index: {}]   ;;  %s962_s0 = inlined_call_operand.vmem [shape: bf16[8,512], index: 0, kind: input, shape index: {}]   ;;  %s963_s3 = inlined_call_operand.vmem [shape: f32[1,256], index: 3, kind: input, shape index: {}]   ;;  %s964_s4 = inlined_call_operand.vmem [shape: bf16[8,256], index: 4, kind: input, shape index: {}]   ;;  %s965_s5 = inlined_call_operand.vmem [shape: bf16[8,256], index: 5, kind: output, shape index: {}]  }
   0x1   :  { %v623_v0 = vld [vmem:[%s960_s1 + $0x74] ss:$8 sps:$4 sm:$0xff]   ;;  %v627_v2 = vld [vmem:[%s960_s1 + $0x70] ss:$8 sps:$4 sm:$0xff]   ;;  %v629_v4 = vld [vmem:[%s960_s1 + $0x64] ss:$8 sps:$4 sm:$0xff]  }
   0x2   :  { %v625_v1 = vld [vmem:[%s960_s1 + $0x174] ss:$8 sps:$4 sm:$0xff]   ;;  %428 = vmatprep.subr.bf16.mxu0 %v623_v0  ;;  %v628_v3 = vld [vmem:[%s960_s1 + $0x170] ss:$8 sps:$4 sm:$0xff]   ;;  %v631_v5 = vld [vmem:[%s960_s1 + $0x164] ss:$8 sps:$4 sm:$0xff]  }
   0x3   :  { %469 = vmatprep.subr.bf16.mxu1 %v625_v1  ;;  %429 = vmatpush1.bf16.msra.mxu0 %v627_v2  ;;  %v633_v6 = vld [vmem:[%s960_s1 + $0x60] ss:$8 sps:$4 sm:$0xff]   ;;  %v635_v8 = vld [vmem:[%s960_s1 + $0x54] ss:$8 sps:$4 sm:$0xff]   ;;  %v639_v10 = vld [vmem:[%s960_s1 + $0x50] ss:$8 sps:$4 sm:$0xff]  }
   0x4   :  { %470 = vmatpush1.bf16.msra.mxu1 %v628_v3  ;;  %430 = vmatprep.subr.bf16.mxu0 %v629_v4  ;;  %v634_v7 = vld [vmem:[%s960_s1 + $0x160] ss:$8 sps:$4 sm:$0xff]   ;;  %v637_v9 = vld [vmem:[%s960_s1 + $0x154] ss:$8 sps:$4 sm:$0xff]   ;;  %v640_v11 = vld [vmem:[%s960_s1 + $0x150] ss:$8 sps:$4 sm:$0xff]  }
   0x5   :  { %471 = vmatprep.subr.bf16.mxu1 %v631_v5  ;;  %v641_v12 = vld [vmem:[%s960_s1 + $0x44] ss:$8 sps:$4 sm:$0xff]   ;;  %v645_v14 = vld [vmem:[%s960_s1 + $0x40] ss:$8 sps:$4 sm:$0xff]   ;;  %v647_v16 = vld [vmem:[%s960_s1 + $0x34] ss:$8 sps:$4 sm:$0xff]  }
   0x6   :  { %v643_v13 = vld [vmem:[%s960_s1 + $0x144] ss:$8 sps:$4 sm:$0xff]   ;;  %v646_v15 = vld [vmem:[%s960_s1 + $0x140] ss:$8 sps:$4 sm:$0xff]   ;;  %v649_v17 = vld [vmem:[%s960_s1 + $0x134] ss:$8 sps:$4 sm:$0xff]  }
   0x7   :  { %431 = vmatpush1.bf16.msra.mxu0 %v633_v6  ;;  %v651_v18 = vld [vmem:[%s960_s1 + $0x30] ss:$8 sps:$4 sm:$0xff]   ;;  %v653_v20 = vld [vmem:[%s960_s1 + $0x24] ss:$8 sps:$4 sm:$0xff]   ;;  %v657_v22 = vld [vmem:[%s960_s1 + $0x20] ss:$8 sps:$4 sm:$0xff]   ;;  %v521_v6 = vlaneseq }
   0x8   :  { %472 = vmatpush1.bf16.msra.mxu1 %v634_v7  ;;  %432 = vmatprep.subr.bf16.mxu0 %v635_v8  ;;  %v652_v19 = vld [vmem:[%s960_s1 + $0x130] ss:$8 sps:$4 sm:$0xff]   ;;  %v655_v21 = vld [vmem:[%s960_s1 + $0x124] ss:$8 sps:$4 sm:$0xff]   ;;  %v658_v23 = vld [vmem:[%s960_s1 + $0x120] ss:$8 sps:$4 sm:$0xff]  }
   0x9   :  { %473 = vmatprep.subr.bf16.mxu1 %v637_v9  ;;  %v659_v24 = vld [vmem:[%s960_s1 + $0x14] ss:$8 sps:$4 sm:$0xff]   ;;  %v663_v26 = vld [vmem:[%s960_s1 + $0x10] ss:$8 sps:$4 sm:$0xff]   ;;  %v665_v28 = vld [vmem:[%s960_s1 + $0x4] ss:$8 sps:$4 sm:$0xff]  }
   0xa   :  { %v661_v25 = vld [vmem:[%s960_s1 + $0x114] ss:$8 sps:$4 sm:$0xff]   ;;  %v664_v27 = vld [vmem:[%s960_s1 + $0x110] ss:$8 sps:$4 sm:$0xff]   ;;  %v667_v29 = vld [vmem:[%s960_s1 + $0x104] ss:$8 sps:$4 sm:$0xff]  }
   0xb   :  { %433 = vmatpush1.bf16.msra.mxu0 %v639_v10  ;;  %v669_v30 = vld [vmem:[%s960_s1] ss:$8 sps:$4 sm:$0xff]   ;;  %v671_v32 = vld [vmem:[%s960_s1 + $0xf4] ss:$8 sps:$4 sm:$0xff]   ;;  %v675_v34 = vld [vmem:[%s960_s1 + $0xf0] ss:$8 sps:$4 sm:$0xff]  }
   0xc   :  { %474 = vmatpush1.bf16.msra.mxu1 %v640_v11  ;;  %434 = vmatprep.subr.bf16.mxu0 %v641_v12  ;;  %v670_v31 = vld [vmem:[%s960_s1 + $0x100] ss:$8 sps:$4 sm:$0xff]   ;;  %v673_v33 = vld [vmem:[%s960_s1 + $0x1f4] ss:$8 sps:$4 sm:$0xff]   ;;  %v676_v35 = vld [vmem:[%s960_s1 + $0x1f0] ss:$8 sps:$4 sm:$0xff]  }
   0xd   :  { %475 = vmatprep.subr.bf16.mxu1 %v643_v13  ;;  %v677_v36 = vld [vmem:[%s960_s1 + $0xe4] ss:$8 sps:$4 sm:$0xff]   ;;  %v681_v38 = vld [vmem:[%s960_s1 + $0xe0] ss:$8 sps:$4 sm:$0xff]   ;;  %v683_v40 = vld [vmem:[%s960_s1 + $0xd4] ss:$8 sps:$4 sm:$0xff]  }
   0xe   :  { %v679_v37 = vld [vmem:[%s960_s1 + $0x1e4] ss:$8 sps:$4 sm:$0xff]   ;;  %v682_v39 = vld [vmem:[%s960_s1 + $0x1e0] ss:$8 sps:$4 sm:$0xff]   ;;  %v685_v41 = vld [vmem:[%s960_s1 + $0x1d4] ss:$8 sps:$4 sm:$0xff]  }
   0xf   :  { %435 = vmatpush1.bf16.msra.mxu0 %v645_v14  ;;  %v687_v42 = vld [vmem:[%s960_s1 + $0xd0] ss:$8 sps:$4 sm:$0xff]   ;;  %v689_v44 = vld [vmem:[%s960_s1 + $0xc4] ss:$8 sps:$4 sm:$0xff]   ;;  %v693_v49 = vld [vmem:[%s960_s1 + $0xc0] ss:$8 sps:$4 sm:$0xff]  }
  0x10   :  { %476 = vmatpush1.bf16.msra.mxu1 %v646_v15  ;;  %436 = vmatprep.subr.bf16.mxu0 %v647_v16  ;;  %v688_v43 = vld [vmem:[%s960_s1 + $0x1d0] ss:$8 sps:$4 sm:$0xff]   ;;  %v691_v45 = vld [vmem:[%s960_s1 + $0x1c4] ss:$8 sps:$4 sm:$0xff]   ;;  %v694_v50 = vld [vmem:[%s960_s1 + $0x1c0] ss:$8 sps:$4 sm:$0xff]  }
  0x11   :  { %477 = vmatprep.subr.bf16.mxu1 %v649_v17  ;;  %v28_v46 = vld [vmem:[%s962_s0] sm:$0xff]  ;;  %v29_v48 = vld [vmem:[%s962_s0 + $0x8] sm:$0xff]  ;;  %v695_v52 = vld [vmem:[%s960_s1 + $0xb4] ss:$8 sps:$4 sm:$0xff]   ;;  %v522_v7 = vshrl.u32 %v521_v6, 7 }
  0x12   :  { %v554_v47 = vcombine.high %v28_v46, %v28_v46  ;;  %v556_v51 = vcombine.high %v29_v48, %v29_v48  ;;  %v697_v53 = vld [vmem:[%s960_s1 + $0x1b4] ss:$8 sps:$4 sm:$0xff]   ;;  %v699_v54 = vld [vmem:[%s960_s1 + $0xb0] ss:$8 sps:$4 sm:$0xff]   ;;  %v701_v56 = vld [vmem:[%s960_s1 + $0xa4] ss:$8 sps:$4 sm:$0xff]   ;;  %v553_v4 = vcombine.low %v28_v46, %v28_v46  ;;  %v555_v5 = vcombine.low %v29_v48, %v29_v48 }
  0x13   :  { %437 = vmatpush1.bf16.msra.mxu0 %v651_v18  ;;  %v700_v55 = vld [vmem:[%s960_s1 + $0x1b0] ss:$8 sps:$4 sm:$0xff]   ;;  %v703_v57 = vld [vmem:[%s960_s1 + $0x1a4] ss:$8 sps:$4 sm:$0xff]   ;;  %v705_v58 = vld [vmem:[%s960_s1 + $0xa0] ss:$8 sps:$4 sm:$0xff]  }
  0x14   :  { %478 = vmatpush1.bf16.msra.mxu1 %v652_v19  ;;  %438 = vmatprep.subr.bf16.mxu0 %v653_v20  ;;  %v706_v59 = vld [vmem:[%s960_s1 + $0x1a0] ss:$8 sps:$4 sm:$0xff]   ;;  %v707_v60 = vld [vmem:[%s960_s1 + $0x94] ss:$8 sps:$4 sm:$0xff]   ;;  %v711_v62 = vld [vmem:[%s960_s1 + $0x90] ss:$8 sps:$4 sm:$0xff]  }
  0x15   :  { %479 = vmatprep.subr.bf16.mxu1 %v655_v21  ;;  %460 = vmatprep.mubr.bf16.mxu0 %v554_v47  ;;  %v709_v61 = vld [vmem:[%s960_s1 + $0x194] ss:$8 sps:$4 sm:$0xff]   ;;  %v712_v63 = vld [vmem:[%s960_s1 + $0x190] ss:$8 sps:$4 sm:$0xff]   ;;  %v713_v0 = vld [vmem:[%s960_s1 + $0x84] ss:$8 sps:$4 sm:$0xff]  }
  0x16   :  { %501 = vmatprep.mubr.bf16.mxu1 %v556_v51  ;;  %v715_v1 = vld [vmem:[%s960_s1 + $0x184] ss:$8 sps:$4 sm:$0xff]   ;;  %v717_v2 = vld [vmem:[%s960_s1 + $0x80] ss:$8 sps:$4 sm:$0xff]   ;;  %v523_v8 = vsub.s32 0, %v522_v7  ;;  %v527_v10 = vsub.s32 1, %v522_v7 }
  0x17   :  { %439 = vmatpush1.bf16.msra.mxu0 %v657_v22  ;;  %v718_v3 = vld [vmem:[%s960_s1 + $0x180] ss:$8 sps:$4 sm:$0xff]  }
  0x18   :  { %480 = vmatpush1.bf16.msra.mxu1 %v658_v23  ;;  %440 = vmatprep.subr.bf16.mxu0 %v659_v24  ;;  %v519_v9 = vld [vmem:[%s963_s3] sm:$0x3] }
  0x19   :  { %481 = vmatprep.subr.bf16.mxu1 %v661_v25  ;;  %v533_v11 = vld [vmem:[%s964_s4] sm:$0xff]  ;;  %v524_v12 = vrot.slane %v519_v9, %v523_v8  ;;  %v528_v17 = vrot.slane %v519_v9, %v527_v10 }
  0x1a   :  { %v534_v16 = vunpack.c.l.bf16 %v533_v11  ;;  %v535_v22 = vunpack.c.h.bf16 %v533_v11 }
  0x1b   :  { %441 = vmatpush1.bf16.msra.mxu0 %v663_v26 }
  0x1c   :  { %482 = vmatpush1.bf16.msra.mxu1 %v664_v27  ;;  %442 = vmatprep.subr.bf16.mxu0 %v665_v28 }
  0x1d   :  { %483 = vmatprep.subr.bf16.mxu1 %v667_v29 }
  0x1f   :  { %443 = vmatpush1.bf16.msra.mxu0 %v669_v30 }
  0x20   :  { %484 = vmatpush1.bf16.msra.mxu1 %v670_v31  ;;  %444 = vmatprep.subr.bf16.mxu0 %v671_v32 }
  0x21   :  { %485 = vmatprep.subr.bf16.mxu1 %v673_v33 }
  0x23   :  { %445 = vmatpush2.bf16.msra.mxu0 %v675_v34 }
  0x24   :  { %486 = vmatpush2.bf16.msra.mxu1 %v676_v35  ;;  %446 = vmatprep.subr.bf16.mxu0 %v677_v36 }
  0x25   :  { %487 = vmatprep.subr.bf16.mxu1 %v679_v37 }
  0x27   :  { %447 = vmatpush2.bf16.msra.mxu0 %v681_v38 }
  0x28   :  { %488 = vmatpush2.bf16.msra.mxu1 %v682_v39  ;;  %448 = vmatprep.subr.bf16.mxu0 %v683_v40 }
  0x29   :  { %489 = vmatprep.subr.bf16.mxu1 %v685_v41 }
  0x2b   :  { %449 = vmatpush2.bf16.msra.mxu0 %v687_v42 }
  0x2c   :  { %490 = vmatpush2.bf16.msra.mxu1 %v688_v43  ;;  %450 = vmatprep.subr.bf16.mxu0 %v689_v44 }
  0x2d   :  { %491 = vmatprep.subr.bf16.mxu1 %v691_v45 }
  0x2f   :  { %451 = vmatpush2.bf16.msra.mxu0 %v693_v49 }
  0x30   :  { %492 = vmatpush2.bf16.msra.mxu1 %v694_v50  ;;  %452 = vmatprep.subr.bf16.mxu0 %v695_v52 }
  0x31   :  { %493 = vmatprep.subr.bf16.mxu1 %v697_v53 }
  0x33   :  { %453 = vmatpush2.bf16.msra.mxu0 %v699_v54 }
  0x34   :  { %494 = vmatpush2.bf16.msra.mxu1 %v700_v55  ;;  %454 = vmatprep.subr.bf16.mxu0 %v701_v56 }
  0x35   :  { %495 = vmatprep.subr.bf16.mxu1 %v703_v57 }
  0x37   :  { %455 = vmatpush2.bf16.msra.mxu0 %v705_v58 }
  0x38   :  { %496 = vmatpush2.bf16.msra.mxu1 %v706_v59  ;;  %456 = vmatprep.subr.bf16.mxu0 %v707_v60 }
  0x39   :  { %497 = vmatprep.subr.bf16.mxu1 %v709_v61 }
  0x3b   :  { %457 = vmatpush2.bf16.msra.mxu0 %v711_v62 }
  0x3c   :  { %498 = vmatpush2.bf16.msra.mxu1 %v712_v63  ;;  %458 = vmatprep.subr.bf16.mxu0 %v713_v0 }
  0x3d   :  { %499 = vmatprep.subr.bf16.mxu1 %v715_v1 }
  0x3f   :  { %459 = vmatpush2.bf16.msra.mxu0 %v717_v2 }
  0x40   :  { %500 = vmatpush2.bf16.msra.mxu1 %v718_v3 }
  0x42   :  { %461 = vmatmul.mubr.bf16.vlgmr.msra.gmra.mxu0 %v553_v4 }
  0x43   :  { %502 = vmatmul.mubr.bf16.vlgmr.msra.gmra.mxu1 %v555_v5 }
 0x102   :  { %v462_v13 = vpop.f32.mrf.mxu0 }
 0x103   :  { %v503_v14 = vpop.f32.mrf.mxu1 }
 0x104   :  { %v504_v15 = vadd.f32 %v503_v14, %v462_v13  ;;  %v464_v18 = vpop.f32.mrf.mxu0 }
 0x105   :  { %v505_v19 = vpop.f32.mrf.mxu1 }
 0x106   :  { %v531_v20 = vadd.f32 %v524_v12, %v504_v15  ;;  %v506_v21 = vadd.f32 %v505_v19, %v464_v18  ;;  %v466_v23 = vpop.f32.mrf.mxu0 }
 0x107   :  { %v507_v24 = vpop.f32.mrf.mxu1 }
 0x108   :  { %v536_v25 = vadd.f32 %v534_v16, %v531_v20  ;;  %v532_v26 = vadd.f32 %v528_v17, %v506_v21  ;;  %v467_v27 = vpop.f32.mrf.mxu0 }
 0x109   :  { %v508_v28 = vpop.f32.mrf.mxu1 }
 0x10a   :  { %v537_v29 = vadd.f32 %v535_v22, %v532_v26  ;;  %v538_v30 = vmax.f32 %v536_v25, 0.0 }
 0x10c   :  { %v539_v31 = vmax.f32 %v537_v29, 0.0 }
 0x10e   :  { %v622_v32 = vpack.c.bf16 %v539_v31, %v538_v30 }
 0x110   :  { %548 = vst [vmem:[%s965_s5] sm:$0xff] %v622_v32 }

// kernel: rfunet_forward.57
= control target key start
LH: loop header
LB: loop body
LE: loop exit
PB: predicated region body
PF: predicated region fallthrough
CT: control target
= control target key end

     0   :  { %s376_s1 = inlined_call_operand.vmem [shape: bf16[256,128], index: 1, kind: input, shape index: {}]   ;;  %s377_s2 = inlined_call_operand.vmem [shape: f32[1,128], index: 2, kind: input, shape index: {}]   ;;  %s378_s0 = inlined_call_operand.vmem [shape: bf16[8,256], index: 0, kind: input, shape index: {}]   ;;  %s379_s4 = inlined_call_operand.vmem [shape: bf16[8,128], index: 4, kind: input, shape index: {}]   ;;  %s380_s3 = inlined_call_operand.vmem [shape: f32[1,128], index: 3, kind: input, shape index: {}]   ;;  %s381_s5 = inlined_call_operand.vmem [shape: bf16[8,128], index: 5, kind: output, shape index: {}]  }
   0x1   :  { %v268_v0 = vld [vmem:[%s376_s1 + $0x78] sm:$0xff]   ;;  %v270_v2 = vld [vmem:[%s376_s1 + $0x70] sm:$0xff]   ;;  %v272_v4 = vld [vmem:[%s376_s1 + $0x68] sm:$0xff]  }
   0x2   :  { %v269_v1 = vld [vmem:[%s376_s1 + $0x38] sm:$0xff]   ;;  %246 = vmatprep.subr.bf16.mxu0 %v268_v0  ;;  %v271_v3 = vld [vmem:[%s376_s1 + $0x30] sm:$0xff]   ;;  %v273_v5 = vld [vmem:[%s376_s1 + $0x28] sm:$0xff]  }
   0x3   :  { %247 = vmatpush3.bf16.msra.mxu0 %v269_v1  ;;  %v274_v6 = vld [vmem:[%s376_s1 + $0x60] sm:$0xff]   ;;  %v276_v8 = vld [vmem:[%s376_s1 + $0x58] sm:$0xff]   ;;  %v278_v10 = vld [vmem:[%s376_s1 + $0x50] sm:$0xff]  }
   0x4   :  { %248 = vmatprep.subr.bf16.mxu0 %v270_v2  ;;  %v275_v7 = vld [vmem:[%s376_s1 + $0x20] sm:$0xff]   ;;  %v277_v9 = vld [vmem:[%s376_s1 + $0x18] sm:$0xff]   ;;  %v279_v13 = vld [vmem:[%s376_s1 + $0x10] sm:$0xff]  }
   0x5   :  { %v27_v11 = vld [vmem:[%s378_s0] sm:$0xff]  ;;  %v280_v14 = vld [vmem:[%s376_s1 + $0x48] sm:$0xff]  }
   0x6   :  { %v228_v12 = vcombine.high %v27_v11, %v27_v11  ;;  %v281_v15 = vld [vmem:[%s376_s1 + $0x8] sm:$0xff]   ;;  %v282_v16 = vld [vmem:[%s376_s1 + $0x40] sm:$0xff]   ;;  %v227_v18 = vcombine.low %v27_v11, %v27_v11 }
   0x7   :  { %249 = vmatpush3.bf16.msra.mxu0 %v271_v3  ;;  %v283_v17 = vld [vmem:[%s376_s1] sm:$0xff]  }
   0x8   :  { %250 = vmatprep.subr.bf16.mxu0 %v272_v4  ;;  %195 = vmatprep.mubr.bf16.mxu0 %v228_v12  ;;  %v217_v20 = vld [vmem:[%s379_s4] sm:$0xf] }
   0x9   :  { %v245_v22 = vld [vmem:[%s380_s3] ss:$0 sm:$0xff]  ;;  %v218_v24 = vunpack.c.l.bf16 %v217_v20 }
   0xb   :  { %251 = vmatpush3.bf16.msra.mxu0 %v273_v5 }
   0xc   :  { %252 = vmatprep.subr.bf16.mxu0 %v274_v6 }
   0xf   :  { %253 = vmatpush3.bf16.msra.mxu0 %v275_v7 }
  0x10   :  { %254 = vmatprep.subr.bf16.mxu0 %v276_v8 }
  0x13   :  { %255 = vmatpush3.bf16.msra.mxu0 %v277_v9 }
  0x14   :  { %256 = vmatprep.subr.bf16.mxu0 %v278_v10 }
  0x17   :  { %257 = vmatpush3.bf16.msra.mxu0 %v279_v13 }
  0x18   :  { %258 = vmatprep.subr.bf16.mxu0 %v280_v14 }
  0x1b   :  { %259 = vmatpush3.bf16.msra.mxu0 %v281_v15 }
  0x1c   :  { %260 = vmatprep.subr.bf16.mxu0 %v282_v16 }
  0x1f   :  { %261 = vmatpush3.bf16.msra.mxu0 %v283_v17 }
  0x22   :  { %196 = vmatmul.mubr.bf16.vlgmr.msra.gmra.mxu0 %v227_v18 }
  0xe2   :  { %v262_v19 = vpop.f32.mrf.mxu0 }
  0xe4   :  { %v263_v21 = vpop.f32.mrf.mxu0 }
  0xe5   :  { %v264_v23 = vadd.f32 %v263_v21, %v262_v19 }
  0xe6   :  { %v265_v25 = vpop.f32.mrf.mxu0 }
  0xe7   :  { %v216_v26 = vadd.f32 %v264_v23, %v245_v22 }
  0xe8   :  { %v266_v27 = vpop.f32.mrf.mxu0 }
  0xe9   :  { %v219_v28 = vadd.f32 %v218_v24, %v216_v26 }
  0xeb   :  { %v220_v29 = vmax.f32 %v219_v28, 0.0 }
  0xed   :  { %v221_v30 = vpack.c.bf16 %v220_v29, %v220_v29 }
  0xef   :  { %222 = vst [vmem:[%s381_s5] sm:$0xf] %v221_v30 }

// kernel: rfunet_forward.58
= control target key start
LH: loop header
LB: loop body
LE: loop exit
PB: predicated region body
PF: predicated region fallthrough
CT: control target
= control target key end

     0   :  { %vm25_vm0 = vcmask 523264   ;;  %v300_v1 = vmov 0.0   ;;  %vm222_vm1 = vcmask 519168   ;;  %s390_s1 = inlined_call_operand.vmem [shape: bf16[128,64], index: 1, kind: input, shape index: {}]   ;;  %s391_s2 = inlined_call_operand.vmem [shape: f32[1,64], index: 2, kind: input, shape index: {}]   ;;  %s392_s0 = inlined_call_operand.vmem [shape: bf16[32,128], index: 0, kind: input, shape index: {}]   ;;  %s393_s4 = inlined_call_operand.vmem [shape: bf16[32,64], index: 4, kind: input, shape index: {}]   ;;  %s394_s3 = inlined_call_operand.vmem [shape: f32[1,64], index: 3, kind: input, shape index: {}]   ;;  %s395_s5 = inlined_call_operand.vmem [shape: bf16[32,64], index: 5, kind: output, shape index: {}]  }
   0x1   :  { %v290_v0 = vld [vmem:[%s390_s1 + $0x38] sm:$0xff]   ;;  %28 = vst.msk [vmem:[#allocation2 + $0x10] sm:$0xff] %vm25_vm0, %v300_v1  ;;  %26 = vst.msk [vmem:[#allocation2] sm:$0xff] %vm25_vm0, %v300_v1  ;;  %v291_v2 = vld [vmem:[%s390_s1 + $0x30] sm:$0xff]  }
   0x2   :  { %27 = vst.msk [vmem:[#allocation2 + $0x8] sm:$0xff] %vm25_vm0, %v300_v1  ;;  %29 = vst.msk [vmem:[#allocation2 + $0x18] sm:$0xff] %vm25_vm0, %v300_v1  ;;  %269 = vmatprep.subr.bf16.mxu0 %v290_v0  ;;  %v292_v3 = vld [vmem:[%s390_s1 + $0x28] sm:$0xff]   ;;  %v293_v4 = vld [vmem:[%s390_s1 + $0x20] sm:$0xff]  }
   0x3   :  { %270 = vmatpush3.bf16.msra.mxu0 %v290_v0  ;;  %v298_v5 = vld [vmem:[%s392_s0] sm:$0xff]   ;;  %v294_v6 = vld [vmem:[%s390_s1 + $0x18] sm:$0xff]   ;;  %v295_v7 = vld [vmem:[%s390_s1 + $0x10] sm:$0xff]  }
   0x4   :  { %271 = vmatprep.subr.bf16.mxu0 %v291_v2  ;;  %285 = vmatprep.mubr.bf16.mxu0 %v298_v5  ;;  %v296_v8 = vld [vmem:[%s390_s1 + $0x8] sm:$0xff]   ;;  %v297_v9 = vld [vmem:[%s390_s1] sm:$0xff]  }
   0x5   :  { %v299_v10 = vld [vmem:[%s392_s0 + $0x8] sm:$0xff]   ;;  %v241_v24 = vld [vmem:[%s394_s3] ss:$0 sm:$0xff] }
   0x6   :  { %v258_v21 = vld [vmem:[%s393_s4 + $0x8] sm:$0xff]   ;;  %v251_v25 = vld [vmem:[%s393_s4] sm:$0xff]  }
   0x7   :  { %272 = vmatpush3.bf16.msra.mxu0 %v291_v2  ;;  %v256_v26 = vunpack.c.l.bf16 %v258_v21  ;;  %v252_v29 = vunpack.c.l.bf16 %v251_v25  ;;  %v257_v33 = vunpack.c.h.bf16 %v258_v21  ;;  %v253_v38 = vunpack.c.h.bf16 %v251_v25 }
   0x8   :  { %273 = vmatprep.subr.bf16.mxu0 %v292_v3  ;;  %v32_v11 = vld [vmem:[#allocation2 + $0x10] sm:$0xff]  ;;  %v30_v13 = vld [vmem:[#allocation2] sm:$0xff] }
   0x9   :  { %v33_v16 = vld [vmem:[#allocation2 + $0x18] sm:$0xff]  ;;  %v31_v19 = vld [vmem:[#allocation2 + $0x8] sm:$0xff] }
   0xb   :  { %274 = vmatpush3.bf16.msra.mxu0 %v292_v3 }
   0xc   :  { %275 = vmatprep.subr.bf16.mxu0 %v293_v4 }
   0xf   :  { %276 = vmatpush3.bf16.msra.mxu0 %v293_v4 }
  0x10   :  { %277 = vmatprep.subr.bf16.mxu0 %v294_v6 }
  0x13   :  { %278 = vmatpush3.bf16.msra.mxu0 %v294_v6 }
  0x14   :  { %279 = vmatprep.subr.bf16.mxu0 %v295_v7 }
  0x17   :  { %280 = vmatpush3.bf16.msra.mxu0 %v295_v7 }
  0x18   :  { %281 = vmatprep.subr.bf16.mxu0 %v296_v8 }
  0x1b   :  { %282 = vmatpush3.bf16.msra.mxu0 %v296_v8 }
  0x1c   :  { %283 = vmatprep.subr.bf16.mxu0 %v297_v9 }
  0x1f   :  { %284 = vmatpush3.bf16.msra.mxu0 %v297_v9 }
  0x22   :  { %286 = vmatmul.mubr.bf16.vlgmr.msra.gmra.mxu0 %v299_v10 }
  0xe2   :  { %v287_v12 = vpop.f32.mrf.mxu0 }
  0xe3   :  { %v165_v14 = vadd.f32 %v287_v12, %v32_v11 }
  0xe4   :  { %v148_v15 = vpop.f32.mrf.mxu0 }
  0xe5   :  { %170 = vst.msk [vmem:[#allocation2 + $0x10] sm:$0xff] %vm25_vm0, %v165_v14  ;;  %v163_v17 = vadd.f32 %v148_v15, %v30_v13 }
  0xe6   :  { %v288_v18 = vpop.f32.mrf.mxu0 }
  0xe7   :  { %168 = vst.msk [vmem:[#allocation2] sm:$0xff] %vm25_vm0, %v163_v17  ;;  %v166_v20 = vadd.f32 %v288_v18, %v33_v16 }
  0xe8   :  { %v151_v22 = vpop.f32.mrf.mxu0 }
  0xe9   :  { %171 = vst.msk [vmem:[#allocation2 + $0x18] sm:$0xff] %vm25_vm0, %v166_v20  ;;  %v164_v23 = vadd.f32 %v151_v22, %v31_v19 }
  0xeb   :  { %169 = vst.msk [vmem:[#allocation2 + $0x8] sm:$0xff] %vm25_vm0, %v164_v23 }
  0xec   :  { %v177_v27 = vld [vmem:[#allocation2 + $0x10] sm:$0xff] }
  0xed   :  { %v188_v28 = vadd.f32 %v241_v24, %v177_v27 }
  0xee   :  { %v175_v30 = vld [vmem:[#allocation2] sm:$0xff] }
  0xef   :  { %v200_v31 = vadd.f32 %v256_v26, %v188_v28  ;;  %v186_v32 = vadd.f32 %v241_v24, %v175_v30 }
  0xf0   :  { %v178_v34 = vld [vmem:[#allocation2 + $0x18] sm:$0xff] }
  0xf1   :  { %v204_v35 = vmax.f32 %v200_v31, 0.0  ;;  %v198_v36 = vadd.f32 %v252_v29, %v186_v32  ;;  %v189_v37 = vadd.f32 %v241_v24, %v178_v34 }
  0xf2   :  { %v176_v39 = vld [vmem:[#allocation2 + $0x8] sm:$0xff] }
  0xf3   :  { %v248_v40 = vpack.c.bf16 %v204_v35, %v204_v35  ;;  %v202_v41 = vmax.f32 %v198_v36, 0.0  ;;  %v201_v42 = vadd.f32 %v257_v33, %v189_v37  ;;  %v187_v43 = vadd.f32 %v241_v24, %v176_v39 }
  0xf5   :  { %225 = vst.msk [vmem:[%s395_s5 + $0x8] sm:$0xf] %vm222_vm1, %v248_v40  ;;  %v246_v44 = vpack.c.bf16 %v202_v41, %v202_v41  ;;  %v205_v45 = vmax.f32 %v201_v42, 0.0  ;;  %v199_v46 = vadd.f32 %v253_v38, %v187_v43 }
  0xf7   :  { %223 = vst.msk [vmem:[%s395_s5] sm:$0xf] %vm222_vm1, %v246_v44  ;;  %v249_v47 = vpack.c.bf16 %v205_v45, %v205_v45  ;;  %v203_v48 = vmax.f32 %v199_v46, 0.0 }
  0xf9   :  { %226 = vst.msk [vmem:[%s395_s5 + $0xc] sm:$0xf] %vm222_vm1, %v249_v47  ;;  %v247_v49 = vpack.c.bf16 %v203_v48, %v203_v48 }
  0xfb   :  { %224 = vst.msk [vmem:[%s395_s5 + $0x4] sm:$0xf] %vm222_vm1, %v247_v49 }

// kernel: rfunet_forward.59
= control target key start
LH: loop header
LB: loop body
LE: loop exit
PB: predicated region body
PF: predicated region fallthrough
CT: control target
= control target key end

     0   :  { %vm22_vm0 = vcmask 171008   ;;  %v202_v1 = vmov 0.0   ;;  %vm77_vm1 = vcmask 523264   ;;  %s273_s1 = inlined_call_operand.vmem [shape: bf16[64,21], index: 1, kind: input, shape index: {}]   ;;  %s274_s2 = inlined_call_operand.vmem [shape: f32[1,21], index: 2, kind: input, shape index: {}]   ;;  %s275_s0 = inlined_call_operand.vmem [shape: bf16[32,64], index: 0, kind: input, shape index: {}]   ;;  %s276_s3 = inlined_call_operand.vmem [shape: f32[1,21], index: 3, kind: input, shape index: {}]   ;;  %s277_s4 = inlined_call_operand.vmem [shape: f32[32,21], index: 4, kind: output, shape index: {}]  }
   0x1   :  { %v196_v0 = vld [vmem:[%s273_s1 + $0x18] sm:$0xff]   ;;  %25 = vst.msk [vmem:[#allocation2 + $0x10] sm:$0xff] %vm22_vm0, %v202_v1  ;;  %23 = vst.msk [vmem:[#allocation2] sm:$0xff] %vm22_vm0, %v202_v1  ;;  %v197_v2 = vld [vmem:[%s273_s1 + $0x10] sm:$0xff]  }
   0x2   :  { %24 = vst.msk [vmem:[#allocation2 + $0x8] sm:$0xff] %vm22_vm0, %v202_v1  ;;  %26 = vst.msk [vmem:[#allocation2 + $0x18] sm:$0xff] %vm22_vm0, %v202_v1  ;;  %183 = vmatprep.subr.bf16.mxu0 %v196_v0  ;;  %v198_v3 = vld [vmem:[%s273_s1 + $0x8] sm:$0xff]   ;;  %v200_v4 = vld [vmem:[%s275_s0] sm:$0xff]  }
   0x3   :  { %184 = vmatpush3.bf16.msra.mxu0 %v196_v0  ;;  %191 = vmatprep.mubr.msk.bf16.mxu0 %vm77_vm1, %v200_v4  ;;  %v199_v5 = vld [vmem:[%s273_s1] sm:$0xff]   ;;  %v201_v6 = vld [vmem:[%s275_s0 + $0x8] sm:$0xff]  }
   0x4   :  { %185 = vmatprep.subr.bf16.mxu0 %v197_v2  ;;  %v176_v19 = vld [vmem:[%s276_s3] ss:$0 sm:$0xff] }
   0x7   :  { %186 = vmatpush3.bf16.msra.mxu0 %v197_v2 }
   0x8   :  { %187 = vmatprep.subr.bf16.mxu0 %v198_v3  ;;  %v29_v7 = vld [vmem:[#allocation2 + $0x10] sm:$0xff]  ;;  %v27_v9 = vld [vmem:[#allocation2] sm:$0xff] }
   0x9   :  { %v30_v12 = vld [vmem:[#allocation2 + $0x18] sm:$0xff]  ;;  %v28_v15 = vld [vmem:[#allocation2 + $0x8] sm:$0xff] }
   0xb   :  { %188 = vmatpush3.bf16.msra.mxu0 %v198_v3 }
   0xc   :  { %189 = vmatprep.subr.bf16.mxu0 %v199_v5 }
   0xf   :  { %190 = vmatpush3.bf16.msra.mxu0 %v199_v5 }
  0x12   :  { %192 = vmatmul.mubr.msk.bf16.vlgmr.msra.gmra.mxu0 %vm77_vm1, %v201_v6 }
  0xd2   :  { %v193_v8 = vpop.f32.mrf.mxu0 }
  0xd3   :  { %v135_v10 = vadd.f32 %v193_v8, %v29_v7 }
  0xd4   :  { %v118_v11 = vpop.f32.mrf.mxu0 }
  0xd5   :  { %140 = vst.msk [vmem:[#allocation2 + $0x10] sm:$0xff] %vm22_vm0, %v135_v10  ;;  %v133_v13 = vadd.f32 %v118_v11, %v27_v9 }
  0xd6   :  { %v194_v14 = vpop.f32.mrf.mxu0 }
  0xd7   :  { %138 = vst.msk [vmem:[#allocation2] sm:$0xff] %vm22_vm0, %v133_v13  ;;  %v136_v16 = vadd.f32 %v194_v14, %v30_v12 }
  0xd8   :  { %v121_v17 = vpop.f32.mrf.mxu0 }
  0xd9   :  { %141 = vst.msk [vmem:[#allocation2 + $0x18] sm:$0xff] %vm22_vm0, %v136_v16  ;;  %v134_v18 = vadd.f32 %v121_v17, %v28_v15 }
  0xdb   :  { %139 = vst.msk [vmem:[#allocation2 + $0x8] sm:$0xff] %vm22_vm0, %v134_v18 }
  0xdc   :  { %v147_v20 = vld [vmem:[#allocation2 + $0x10] sm:$0xff] }
  0xdd   :  { %v158_v21 = vadd.f32 %v176_v19, %v147_v20 }
  0xde   :  { %v145_v22 = vld [vmem:[#allocation2] sm:$0xff] }
  0xdf   :  { %162 = vst.msk [vmem:[%s277_s4 + $0x10] sm:$0xff] %vm22_vm0, %v158_v21  ;;  %v156_v23 = vadd.f32 %v176_v19, %v145_v22 }
  0xe0   :  { %v148_v24 = vld [vmem:[#allocation2 + $0x18] sm:$0xff] }
  0xe1   :  { %160 = vst.msk [vmem:[%s277_s4] sm:$0xff] %vm22_vm0, %v156_v23  ;;  %v159_v25 = vadd.f32 %v176_v19, %v148_v24 }
  0xe2   :  { %v146_v26 = vld [vmem:[#allocation2 + $0x8] sm:$0xff] }
  0xe3   :  { %163 = vst.msk [vmem:[%s277_s4 + $0x18] sm:$0xff] %vm22_vm0, %v159_v25  ;;  %v157_v27 = vadd.f32 %v176_v19, %v146_v26 }
  0xe5   :  { %161 = vst.msk [vmem:[%s277_s4 + $0x8] sm:$0xff] %vm22_vm0, %v157_v27 }

</bundles_post_ra>
